<compile_context>
chip_gen: v5e
topology: v5e:2x2
jax: 0.10.0
libtpu: 0.0.40
codegen_flags: <defaults>
</compile_context>

<pallas_src>
import jax
import jax.numpy as jnp
import numpy as np
from jax.experimental import pallas as pl
from jax.experimental.pallas import tpu as pltpu

D_MODEL = 64
NHEAD = 8
HEAD_DIM = D_MODEL // NHEAD
FF_DIM = 2048          # nn.TransformerEncoderLayer default dim_feedforward
NUM_LAYERS = 2
LN_EPS = 1e-5
HIDDEN = 32            # head MLP hidden width
HEAD_OUT = 8           # fused head output: [bp24(2) | bp3(2) | risk(1) | pad(3)]


# ----------------------------- fused Pallas kernel -----------------------------
def fused_kernel(seq_ref, static_ref, seq_w_ref, seq_b_ref,
                 qkv_w_ref, qkv_b_ref, wo_ref, small_ref,
                 w1_ref, b1_ref, w2_ref,
                 ha_pool_ref, ha_stat_ref, ha_b_ref, hb_w_ref, hb_b_ref,
                 out_ref):
    TB, S, F = seq_ref.shape
    D = D_MODEL

    def ln(x, w, b):
        # one-pass layernorm: var = E[x^2] - E[x]^2
        mu = jnp.mean(x, axis=-1, keepdims=True)
        var = jnp.mean(x * x, axis=-1, keepdims=True) - mu * mu
        return (x - mu) * jax.lax.rsqrt(var + LN_EPS) * w + b

    # ---- input projection: (TB*S, F) @ (F, D) ----
    x = jnp.dot(seq_ref[...].reshape(TB * S, F), seq_w_ref[...],
                preferred_element_type=jnp.float32) + seq_b_ref[...]

    # ---- transformer encoder, statically unrolled over NUM_LAYERS ----
    for l in range(NUM_LAYERS):
        small = small_ref[l]            # (8, D): rows = bo, b2, ln1w, ln1b, ln2w, ln2b, 0, 0
        wo = wo_ref[l]                  # (D, D)

        # fused QKV projection; the 1/sqrt(head_dim) scale is pre-folded into Q cols.
        qkv = jnp.dot(x, qkv_w_ref[l], preferred_element_type=jnp.float32) + qkv_b_ref[l]
        q = qkv[:, 0 * D:1 * D].reshape(TB, S, D)
        k = qkv[:, 1 * D:2 * D].reshape(TB, S, D)
        v = qkv[:, 2 * D:3 * D].reshape(TB, S, D)

        # per-head score matmuls (MXU), ONE shared softmax chain over all heads.
        scores = [jnp.einsum('bqd,bkd->bqk',
                             q[:, :, h * HEAD_DIM:(h + 1) * HEAD_DIM],
                             k[:, :, h * HEAD_DIM:(h + 1) * HEAD_DIM],
                             preferred_element_type=jnp.float32)
                  for h in range(NHEAD)]
        s_all = jnp.concatenate(scores, axis=0)          # (NHEAD*TB, S, S)
        s_all = s_all - jnp.max(s_all, axis=-1, keepdims=True)
        p_all = jnp.exp(s_all)
        p_all = p_all * pl.reciprocal(jnp.sum(p_all, axis=-1, keepdims=True), approx=True)

        # P@V per head; the head-concat is folded into the O projection as a sum of
        # row-block matmuls: attn_proj = sum_h o_h @ Wo[h*hd:(h+1)*hd, :]
        proj = None
        for h in range(NHEAD):
            p_h = p_all[h * TB:(h + 1) * TB]
            o_h = jnp.einsum('bqk,bkd->bqd', p_h,
                             v[:, :, h * HEAD_DIM:(h + 1) * HEAD_DIM],
                             preferred_element_type=jnp.float32)
            c = jnp.dot(o_h.reshape(TB * S, HEAD_DIM),
                        wo[h * HEAD_DIM:(h + 1) * HEAD_DIM, :],
                        preferred_element_type=jnp.float32)
            proj = c if proj is None else proj + c
        attn = proj + small[0:1, :]                      # + bo

        # post-norm encoder layer (norm_first=False), ReLU FFN
        h1 = ln(x + attn, small[2:3, :], small[3:4, :])
        ff = jnp.maximum(jnp.dot(h1, w1_ref[l], preferred_element_type=jnp.float32)
                         + b1_ref[l], 0.0)
        ff = jnp.dot(ff, w2_ref[l], preferred_element_type=jnp.float32) + small[1:2, :]
        x = ln(h1 + ff, small[4:5, :], small[5:6, :])

    # ---- mean-pool over sequence + fused 3-way heads ----
    pooled = jnp.mean(x.reshape(TB, S, D), axis=1)       # (TB, D)
    # [pooled, static] concat replaced by splitting the weight rows
    hid = jnp.maximum(
        jnp.dot(pooled, ha_pool_ref[...], preferred_element_type=jnp.float32)
        + jnp.dot(static_ref[...], ha_stat_ref[...], preferred_element_type=jnp.float32)
        + ha_b_ref[...], 0.0)                             # (TB, 3*HIDDEN)
    z = jnp.dot(hid, hb_w_ref[...], preferred_element_type=jnp.float32) + hb_b_ref[...]
    col = jax.lax.broadcasted_iota(jnp.int32, z.shape, 1)
    out_ref[...] = jnp.where(col == 4, jax.nn.sigmoid(z), z)   # sigmoid only on risk col


def multitask_bp_forward(seq_input, static_input, packed, *, batch_tile=None):
    B, S, F = seq_input.shape
    Fs = static_input.shape[1]
    if batch_tile is None:
        # Largest tile that is v7x-VMEM-safe at these shapes; for large B pass a
        # smaller multiple-of-8 tile to shard work across v7x's two TensorCores.
        batch_tile = B
    assert B % batch_tile == 0
    TB = batch_tile
    grid = (B // TB,)

    def const_spec(shape):
        nd = len(shape)
        return pl.BlockSpec(shape, lambda i: (0,) * nd)

    in_specs = [
        pl.BlockSpec((TB, S, F), lambda i: (i, 0, 0)),
        pl.BlockSpec((TB, Fs), lambda i: (i, 0)),
        const_spec(packed['seq_w'].shape), const_spec(packed['seq_b'].shape),
        const_spec(packed['qkv_w'].shape), const_spec(packed['qkv_b'].shape),
        const_spec(packed['wo'].shape), const_spec(packed['small'].shape),
        const_spec(packed['w1'].shape), const_spec(packed['b1'].shape),
        const_spec(packed['w2'].shape),
        const_spec(packed['ha_pool'].shape), const_spec(packed['ha_stat'].shape),
        const_spec(packed['ha_b'].shape), const_spec(packed['hb_w'].shape),
        const_spec(packed['hb_b'].shape),
    ]

    out = pl.pallas_call(
        fused_kernel,
        out_shape=jax.ShapeDtypeStruct((B, HEAD_OUT), jnp.float32),
        grid=grid,
        in_specs=in_specs,
        out_specs=pl.BlockSpec((TB, HEAD_OUT), lambda i: (i, 0)),
        compiler_params=pltpu.CompilerParams(dimension_semantics=("parallel",)),
    )(seq_input, static_input,
      packed['seq_w'], packed['seq_b'],
      packed['qkv_w'], packed['qkv_b'], packed['wo'], packed['small'],
      packed['w1'], packed['b1'], packed['w2'],
      packed['ha_pool'], packed['ha_stat'], packed['ha_b'],
      packed['hb_w'], packed['hb_b'])

    return out[:, 0:2], out[:, 2:4], out[:, 4:5]


# ----------------------------- param packing -----------------------------
def pack_params(params):
    """One-time host-side repack of natural (PyTorch-like) params for the fused kernel."""
    scale = 1.0 / (HEAD_DIM ** 0.5)
    qkv_w, qkv_b, wo, small, w1, b1, w2 = [], [], [], [], [], [], []
    for lp in params['layers']:
        qkv_w.append(jnp.concatenate([lp['wq'] * scale, lp['wk'], lp['wv']], axis=1))
        qkv_b.append(jnp.concatenate([lp['bq'] * scale, lp['bk'], lp['bv']], axis=1))
        wo.append(lp['wo'])
        small.append(jnp.concatenate(
            [lp['bo'], lp['b2'], lp['ln1w'], lp['ln1b'], lp['ln2w'], lp['ln2b'],
             jnp.zeros((2, D_MODEL), jnp.float32)], axis=0))     # (8, D)
        w1.append(lp['w1']); b1.append(lp['b1']); w2.append(lp['w2'])

    hp = params['heads']
    ha_w = jnp.concatenate([hp['w24a'], hp['w3a'], hp['wra']], axis=1)   # (fusion, 96)
    ha_b = jnp.concatenate([hp['b24a'], hp['b3a'], hp['bra']], axis=1)   # (1, 96)
    hb_w = jnp.zeros((3 * HIDDEN, HEAD_OUT), jnp.float32)
    hb_w = hb_w.at[0:HIDDEN, 0:2].set(hp['w24b'])
    hb_w = hb_w.at[HIDDEN:2 * HIDDEN, 2:4].set(hp['w3b'])
    hb_w = hb_w.at[2 * HIDDEN:, 4:5].set(hp['wrb'])
    hb_b = jnp.zeros((1, HEAD_OUT), jnp.float32)
    hb_b = hb_b.at[:, 0:2].set(hp['b24b'])
    hb_b = hb_b.at[:, 2:4].set(hp['b3b'])
    hb_b = hb_b.at[:, 4:5].set(hp['brb'])

    return {
        'seq_w': params['seq_proj_w'], 'seq_b': params['seq_proj_b'],
        'qkv_w': jnp.stack(qkv_w), 'qkv_b': jnp.stack(qkv_b),
        'wo': jnp.stack(wo), 'small': jnp.stack(small),
        'w1': jnp.stack(w1), 'b1': jnp.stack(b1), 'w2': jnp.stack(w2),
        'ha_pool': ha_w[:D_MODEL], 'ha_stat': ha_w[D_MODEL:],
        'ha_b': ha_b, 'hb_w': hb_w, 'hb_b': hb_b,
    }


# ----------------------------- pure-JAX (XLA) reference -----------------------------
def _linear(x, w, b):
    return jnp.dot(x, w, preferred_element_type=jnp.float32) + b


def _layer_norm(x, w, b):
    mu = jnp.mean(x, axis=-1, keepdims=True)
    var = jnp.mean((x - mu) ** 2, axis=-1, keepdims=True)
    return (x - mu) * jax.lax.rsqrt(var + LN_EPS) * w + b


def _seq_proj_math(x, w, b):
    B, S, F = x.shape
    return _linear(x.reshape(B * S, F), w, b).reshape(B, S, w.shape[1])


def _encoder_layer_math(x, wq, wk, wv, bq, bk, bv, wo, bo,
                        ln1w, ln1b, w1, b1, w2, b2, ln2w, ln2b):
    B, S, D = x.shape
    x2 = x.reshape(B * S, D)
    q = _linear(x2, wq, bq).reshape(B, S, D)
    k = _linear(x2, wk, bk).reshape(B, S, D)
    v = _linear(x2, wv, bv).reshape(B, S, D)
    scale = 1.0 / (HEAD_DIM ** 0.5)
    head_outs = []
    for h in range(NHEAD):
        lo, hi = h * HEAD_DIM, (h + 1) * HEAD_DIM
        qh, kh, vh = q[:, :, lo:hi], k[:, :, lo:hi], v[:, :, lo:hi]
        s = jnp.einsum('bqd,bkd->bqk', qh, kh, preferred_element_type=jnp.float32) * scale
        s = s - jnp.max(s, axis=-1, keepdims=True)
        p = jnp.exp(s)
        p = p / jnp.sum(p, axis=-1, keepdims=True)
        head_outs.append(jnp.einsum('bqk,bkd->bqd', p, vh, preferred_element_type=jnp.float32))
    attn = _linear(jnp.concatenate(head_outs, axis=-1).reshape(B * S, D), wo, bo)
    h1 = _layer_norm(x2 + attn, ln1w, ln1b)
    f = jnp.maximum(_linear(h1, w1, b1), 0.0)
    f = _linear(f, w2, b2)
    return _layer_norm(h1 + f, ln2w, ln2b).reshape(B, S, D)


def _heads_math(enc, static, w24a, b24a, w24b, b24b,
                w3a, b3a, w3b, b3b, wra, bra, wrb, brb):
    pooled = jnp.mean(enc, axis=1)
    fusion = jnp.concatenate([pooled, static], axis=1)

    def mlp(wa, ba, wb, bb):
        return _linear(jnp.maximum(_linear(fusion, wa, ba), 0.0), wb, bb)

    return (mlp(w24a, b24a, w24b, b24b), mlp(w3a, b3a, w3b, b3b),
            jax.nn.sigmoid(mlp(wra, bra, wrb, brb)))


def jax_reference(seq_input, static_input, params):
    x = _seq_proj_math(seq_input, params['seq_proj_w'], params['seq_proj_b'])
    for lp in params['layers']:
        x = _encoder_layer_math(x, **lp)
    return _heads_math(x, static_input, **params['heads'])


# ----------------------------- params -----------------------------
def init_params(key, seq_dim, static_dim):
    keys = iter(jax.random.split(key, 128))

    def rnd(shape, scale=0.05):
        return (scale * jax.random.normal(next(keys), shape)).astype(jnp.float32)

    def zeros(shape):
        return jnp.zeros(shape, jnp.float32)

    def ones(shape):
        return jnp.ones(shape, jnp.float32)

    params = {
        'seq_proj_w': rnd((seq_dim, D_MODEL)),
        'seq_proj_b': rnd((1, D_MODEL)),
        'layers': [],
    }
    for _ in range(NUM_LAYERS):
        params['layers'].append({
            'wq': rnd((D_MODEL, D_MODEL)), 'wk': rnd((D_MODEL, D_MODEL)),
            'wv': rnd((D_MODEL, D_MODEL)),
            'bq': rnd((1, D_MODEL)), 'bk': rnd((1, D_MODEL)), 'bv': rnd((1, D_MODEL)),
            'wo': rnd((D_MODEL, D_MODEL)), 'bo': rnd((1, D_MODEL)),
            'ln1w': ones((1, D_MODEL)), 'ln1b': zeros((1, D_MODEL)),
            'w1': rnd((D_MODEL, FF_DIM)), 'b1': rnd((1, FF_DIM)),
            'w2': rnd((FF_DIM, D_MODEL)), 'b2': rnd((1, D_MODEL)),
            'ln2w': ones((1, D_MODEL)), 'ln2b': zeros((1, D_MODEL)),
        })
    fusion_dim = D_MODEL + static_dim
    params['heads'] = {
        'w24a': rnd((fusion_dim, HIDDEN)), 'b24a': rnd((1, HIDDEN)),
        'w24b': rnd((HIDDEN, 2)), 'b24b': rnd((1, 2)),
        'w3a': rnd((fusion_dim, HIDDEN)), 'b3a': rnd((1, HIDDEN)),
        'w3b': rnd((HIDDEN, 2)), 'b3b': rnd((1, 2)),
        'wra': rnd((fusion_dim, HIDDEN)), 'bra': rnd((1, HIDDEN)),
        'wrb': rnd((HIDDEN, 1)), 'brb': rnd((1, 1)),
    }
    return params


if __name__ == "__main__":
    B, S = 2, 8
    SEQ_DIM = 16      # seq_input_dim  (= len(feature_cols))
    STATIC_DIM = 16   # static_input_dim (= len(feature_cols))

    key = jax.random.PRNGKey(0)
    kp, kx, ks = jax.random.split(key, 3)
    params = init_params(kp, SEQ_DIM, STATIC_DIM)
    packed = pack_params(params)           # one-time repack for the fused kernel
    seq_input = jax.random.normal(kx, (B, S, SEQ_DIM), dtype=jnp.float32)
    static_input = jax.random.normal(ks, (B, STATIC_DIM), dtype=jnp.float32)

    bp24, bp3, risk = multitask_bp_forward(seq_input, static_input, packed)
    jax.block_until_ready((bp24, bp3, risk))

    assert bp24.shape == (B, 2) and bp3.shape == (B, 2) and risk.shape == (B, 1)

    r24, r3, rr = jax_reference(seq_input, static_input, params)
    np.testing.assert_allclose(np.asarray(bp24), np.asarray(r24), rtol=2e-3, atol=2e-3)
    np.testing.assert_allclose(np.asarray(bp3), np.asarray(r3), rtol=2e-3, atol=2e-3)
    np.testing.assert_allclose(np.asarray(risk), np.asarray(rr), rtol=2e-3, atol=2e-3)

    print("KERNEL_OK")
</pallas_src>

<mosaic_0001>
module attributes {stable_mosaic.version = 11 : i64} {
  func.func @fused_kernel(%arg0: i32, %arg1: memref<2x8x16xf32, #tpu.memory_space<vmem>>, %arg2: memref<2x16xf32, #tpu.memory_space<vmem>>, %arg3: memref<16x64xf32, #tpu.memory_space<vmem>>, %arg4: memref<1x64xf32, #tpu.memory_space<vmem>>, %arg5: memref<2x64x192xf32, #tpu.memory_space<vmem>>, %arg6: memref<2x1x192xf32, #tpu.memory_space<vmem>>, %arg7: memref<2x64x64xf32, #tpu.memory_space<vmem>>, %arg8: memref<2x8x64xf32, #tpu.memory_space<vmem>>, %arg9: memref<2x64x2048xf32, #tpu.memory_space<vmem>>, %arg10: memref<2x1x2048xf32, #tpu.memory_space<vmem>>, %arg11: memref<2x2048x64xf32, #tpu.memory_space<vmem>>, %arg12: memref<64x96xf32, #tpu.memory_space<vmem>>, %arg13: memref<16x96xf32, #tpu.memory_space<vmem>>, %arg14: memref<1x96xf32, #tpu.memory_space<vmem>>, %arg15: memref<96x8xf32, #tpu.memory_space<vmem>>, %arg16: memref<1x8xf32, #tpu.memory_space<vmem>>, %arg17: memref<2x8xf32, #tpu.memory_space<vmem>>) attributes {dimension_semantics = [#tpu.dimension_semantics<parallel>], iteration_bounds = array<i64: 1>, scalar_prefetch = 0 : i64, scratch_operands = 0 : i64, tpu.core_type = #tpu.core_type<tc>, window_params = [{transform_indices = @transform_0, window_bounds = array<i64: 2, 8, 16>}, {transform_indices = @transform_1, window_bounds = array<i64: 2, 16>}, {pipeline_mode = #tpu.pipeline_mode<synchronous>, transform_indices = @transform_2, window_bounds = array<i64: 16, 64>}, {pipeline_mode = #tpu.pipeline_mode<synchronous>, transform_indices = @transform_3, window_bounds = array<i64: 1, 64>}, {pipeline_mode = #tpu.pipeline_mode<synchronous>, transform_indices = @transform_4, window_bounds = array<i64: 2, 64, 192>}, {pipeline_mode = #tpu.pipeline_mode<synchronous>, transform_indices = @transform_5, window_bounds = array<i64: 2, 1, 192>}, {pipeline_mode = #tpu.pipeline_mode<synchronous>, transform_indices = @transform_6, window_bounds = array<i64: 2, 64, 64>}, {pipeline_mode = #tpu.pipeline_mode<synchronous>, transform_indices = @transform_7, window_bounds = array<i64: 2, 8, 64>}, {pipeline_mode = #tpu.pipeline_mode<synchronous>, transform_indices = @transform_8, window_bounds = array<i64: 2, 64, 2048>}, {pipeline_mode = #tpu.pipeline_mode<synchronous>, transform_indices = @transform_9, window_bounds = array<i64: 2, 1, 2048>}, {pipeline_mode = #tpu.pipeline_mode<synchronous>, transform_indices = @transform_10, window_bounds = array<i64: 2, 2048, 64>}, {pipeline_mode = #tpu.pipeline_mode<synchronous>, transform_indices = @transform_11, window_bounds = array<i64: 64, 96>}, {pipeline_mode = #tpu.pipeline_mode<synchronous>, transform_indices = @transform_12, window_bounds = array<i64: 16, 96>}, {pipeline_mode = #tpu.pipeline_mode<synchronous>, transform_indices = @transform_13, window_bounds = array<i64: 1, 96>}, {pipeline_mode = #tpu.pipeline_mode<synchronous>, transform_indices = @transform_14, window_bounds = array<i64: 96, 8>}, {pipeline_mode = #tpu.pipeline_mode<synchronous>, transform_indices = @transform_15, window_bounds = array<i64: 1, 8>}, {transform_indices = @transform_16, window_bounds = array<i64: 2, 8>}]} {
    %c0 = arith.constant 0 : index
    %c0_0 = arith.constant 0 : index
    %c0_1 = arith.constant 0 : index
    %0 = vector.load %arg1[%c0, %c0_0, %c0_1] : memref<2x8x16xf32, #tpu.memory_space<vmem>>, vector<2x8x16xf32>
    %1 = vector.shape_cast %0 : vector<2x8x16xf32> to vector<16x16xf32>
    %c0_2 = arith.constant 0 : index
    %c0_3 = arith.constant 0 : index
    %2 = vector.load %arg3[%c0_2, %c0_3] : memref<16x64xf32, #tpu.memory_space<vmem>>, vector<16x64xf32>
    %cst = arith.constant dense<0.000000e+00> : vector<16x64xf32>
    %3 = tpu.matmul %1, %2, %cst {dimension_numbers = #tpu.dot_dimension_numbers<[1], [0], [0], [1], [0, 0, 1, 1], [], []>} : vector<16x16xf32>, vector<16x64xf32>, vector<16x64xf32> -> vector<16x64xf32>
    %c0_4 = arith.constant 0 : index
    %c0_5 = arith.constant 0 : index
    %4 = vector.load %arg4[%c0_4, %c0_5] : memref<1x64xf32, #tpu.memory_space<vmem>>, vector<1x64xf32>
    %5 = vector.broadcast %4 : vector<1x64xf32> to vector<16x64xf32>
    %6 = arith.addf %3, %5 : vector<16x64xf32>
    %c0_6 = arith.constant 0 : index
    %c0_7 = arith.constant 0 : index
    %c0_8 = arith.constant 0 : index
    %7 = vector.load %arg8[%c0_6, %c0_7, %c0_8] : memref<2x8x64xf32, #tpu.memory_space<vmem>>, vector<1x8x64xf32>
    %8 = vector.shape_cast %7 : vector<1x8x64xf32> to vector<8x64xf32>
    %c0_9 = arith.constant 0 : index
    %c0_10 = arith.constant 0 : index
    %c0_11 = arith.constant 0 : index
    %9 = vector.load %arg7[%c0_9, %c0_10, %c0_11] : memref<2x64x64xf32, #tpu.memory_space<vmem>>, vector<1x64x64xf32>
    %10 = vector.shape_cast %9 : vector<1x64x64xf32> to vector<64x64xf32>
    %c0_12 = arith.constant 0 : index
    %c0_13 = arith.constant 0 : index
    %c0_14 = arith.constant 0 : index
    %11 = vector.load %arg5[%c0_12, %c0_13, %c0_14] : memref<2x64x192xf32, #tpu.memory_space<vmem>>, vector<1x64x192xf32>
    %12 = vector.shape_cast %11 : vector<1x64x192xf32> to vector<64x192xf32>
    %cst_15 = arith.constant dense<0.000000e+00> : vector<16x192xf32>
    %13 = tpu.matmul %6, %12, %cst_15 {dimension_numbers = #tpu.dot_dimension_numbers<[1], [0], [0], [1], [0, 0, 1, 1], [], []>} : vector<16x64xf32>, vector<64x192xf32>, vector<16x192xf32> -> vector<16x192xf32>
    %c0_16 = arith.constant 0 : index
    %c0_17 = arith.constant 0 : index
    %c0_18 = arith.constant 0 : index
    %14 = vector.load %arg6[%c0_16, %c0_17, %c0_18] : memref<2x1x192xf32, #tpu.memory_space<vmem>>, vector<1x1x192xf32>
    %15 = vector.shape_cast %14 : vector<1x1x192xf32> to vector<1x192xf32>
    %16 = vector.broadcast %15 : vector<1x192xf32> to vector<16x192xf32>
    %17 = arith.addf %13, %16 : vector<16x192xf32>
    %18 = vector.extract_strided_slice %17 {offsets = [0, 0], sizes = [16, 64], strides = [1, 1]} : vector<16x192xf32> to vector<16x64xf32>
    %19 = vector.shape_cast %18 : vector<16x64xf32> to vector<2x8x64xf32>
    %20 = vector.extract_strided_slice %17 {offsets = [0, 64], sizes = [16, 64], strides = [1, 1]} : vector<16x192xf32> to vector<16x64xf32>
    %21 = vector.shape_cast %20 : vector<16x64xf32> to vector<2x8x64xf32>
    %22 = vector.extract_strided_slice %17 {offsets = [0, 128], sizes = [16, 64], strides = [1, 1]} : vector<16x192xf32> to vector<16x64xf32>
    %23 = vector.shape_cast %22 : vector<16x64xf32> to vector<2x8x64xf32>
    %24 = vector.extract_strided_slice %19 {offsets = [0, 0, 0], sizes = [2, 8, 8], strides = [1, 1, 1]} : vector<2x8x64xf32> to vector<2x8x8xf32>
    %25 = vector.extract_strided_slice %21 {offsets = [0, 0, 0], sizes = [2, 8, 8], strides = [1, 1, 1]} : vector<2x8x64xf32> to vector<2x8x8xf32>
    "tpu.trace_start"() <{level = 10 : i32, message = "bqd,bkd->bqk"}> : () -> ()
    %cst_19 = arith.constant dense<0.000000e+00> : vector<2x8x8xf32>
    %26 = tpu.matmul %24, %25, %cst_19 {dimension_numbers = #tpu.dot_dimension_numbers<[2], [2], [1], [1], [0, 0, 0, 1, 1, 1], [0], [0]>} : vector<2x8x8xf32>, vector<2x8x8xf32>, vector<2x8x8xf32> -> vector<2x8x8xf32>
    "tpu.trace_stop"() : () -> ()
    %27 = vector.extract_strided_slice %19 {offsets = [0, 0, 8], sizes = [2, 8, 8], strides = [1, 1, 1]} : vector<2x8x64xf32> to vector<2x8x8xf32>
    %28 = vector.extract_strided_slice %21 {offsets = [0, 0, 8], sizes = [2, 8, 8], strides = [1, 1, 1]} : vector<2x8x64xf32> to vector<2x8x8xf32>
    "tpu.trace_start"() <{level = 10 : i32, message = "bqd,bkd->bqk"}> : () -> ()
    %cst_20 = arith.constant dense<0.000000e+00> : vector<2x8x8xf32>
    %29 = tpu.matmul %27, %28, %cst_20 {dimension_numbers = #tpu.dot_dimension_numbers<[2], [2], [1], [1], [0, 0, 0, 1, 1, 1], [0], [0]>} : vector<2x8x8xf32>, vector<2x8x8xf32>, vector<2x8x8xf32> -> vector<2x8x8xf32>
    "tpu.trace_stop"() : () -> ()
    %30 = vector.extract_strided_slice %19 {offsets = [0, 0, 16], sizes = [2, 8, 8], strides = [1, 1, 1]} : vector<2x8x64xf32> to vector<2x8x8xf32>
    %31 = vector.extract_strided_slice %21 {offsets = [0, 0, 16], sizes = [2, 8, 8], strides = [1, 1, 1]} : vector<2x8x64xf32> to vector<2x8x8xf32>
    "tpu.trace_start"() <{level = 10 : i32, message = "bqd,bkd->bqk"}> : () -> ()
    %cst_21 = arith.constant dense<0.000000e+00> : vector<2x8x8xf32>
    %32 = tpu.matmul %30, %31, %cst_21 {dimension_numbers = #tpu.dot_dimension_numbers<[2], [2], [1], [1], [0, 0, 0, 1, 1, 1], [0], [0]>} : vector<2x8x8xf32>, vector<2x8x8xf32>, vector<2x8x8xf32> -> vector<2x8x8xf32>
    "tpu.trace_stop"() : () -> ()
    %33 = vector.extract_strided_slice %19 {offsets = [0, 0, 24], sizes = [2, 8, 8], strides = [1, 1, 1]} : vector<2x8x64xf32> to vector<2x8x8xf32>
    %34 = vector.extract_strided_slice %21 {offsets = [0, 0, 24], sizes = [2, 8, 8], strides = [1, 1, 1]} : vector<2x8x64xf32> to vector<2x8x8xf32>
    "tpu.trace_start"() <{level = 10 : i32, message = "bqd,bkd->bqk"}> : () -> ()
    %cst_22 = arith.constant dense<0.000000e+00> : vector<2x8x8xf32>
    %35 = tpu.matmul %33, %34, %cst_22 {dimension_numbers = #tpu.dot_dimension_numbers<[2], [2], [1], [1], [0, 0, 0, 1, 1, 1], [0], [0]>} : vector<2x8x8xf32>, vector<2x8x8xf32>, vector<2x8x8xf32> -> vector<2x8x8xf32>
    "tpu.trace_stop"() : () -> ()
    %36 = vector.extract_strided_slice %19 {offsets = [0, 0, 32], sizes = [2, 8, 8], strides = [1, 1, 1]} : vector<2x8x64xf32> to vector<2x8x8xf32>
    %37 = vector.extract_strided_slice %21 {offsets = [0, 0, 32], sizes = [2, 8, 8], strides = [1, 1, 1]} : vector<2x8x64xf32> to vector<2x8x8xf32>
    "tpu.trace_start"() <{level = 10 : i32, message = "bqd,bkd->bqk"}> : () -> ()
    %cst_23 = arith.constant dense<0.000000e+00> : vector<2x8x8xf32>
    %38 = tpu.matmul %36, %37, %cst_23 {dimension_numbers = #tpu.dot_dimension_numbers<[2], [2], [1], [1], [0, 0, 0, 1, 1, 1], [0], [0]>} : vector<2x8x8xf32>, vector<2x8x8xf32>, vector<2x8x8xf32> -> vector<2x8x8xf32>
    "tpu.trace_stop"() : () -> ()
    %39 = vector.extract_strided_slice %19 {offsets = [0, 0, 40], sizes = [2, 8, 8], strides = [1, 1, 1]} : vector<2x8x64xf32> to vector<2x8x8xf32>
    %40 = vector.extract_strided_slice %21 {offsets = [0, 0, 40], sizes = [2, 8, 8], strides = [1, 1, 1]} : vector<2x8x64xf32> to vector<2x8x8xf32>
    "tpu.trace_start"() <{level = 10 : i32, message = "bqd,bkd->bqk"}> : () -> ()
    %cst_24 = arith.constant dense<0.000000e+00> : vector<2x8x8xf32>
    %41 = tpu.matmul %39, %40, %cst_24 {dimension_numbers = #tpu.dot_dimension_numbers<[2], [2], [1], [1], [0, 0, 0, 1, 1, 1], [0], [0]>} : vector<2x8x8xf32>, vector<2x8x8xf32>, vector<2x8x8xf32> -> vector<2x8x8xf32>
    "tpu.trace_stop"() : () -> ()
    %42 = vector.extract_strided_slice %19 {offsets = [0, 0, 48], sizes = [2, 8, 8], strides = [1, 1, 1]} : vector<2x8x64xf32> to vector<2x8x8xf32>
    %43 = vector.extract_strided_slice %21 {offsets = [0, 0, 48], sizes = [2, 8, 8], strides = [1, 1, 1]} : vector<2x8x64xf32> to vector<2x8x8xf32>
    "tpu.trace_start"() <{level = 10 : i32, message = "bqd,bkd->bqk"}> : () -> ()
    %cst_25 = arith.constant dense<0.000000e+00> : vector<2x8x8xf32>
    %44 = tpu.matmul %42, %43, %cst_25 {dimension_numbers = #tpu.dot_dimension_numbers<[2], [2], [1], [1], [0, 0, 0, 1, 1, 1], [0], [0]>} : vector<2x8x8xf32>, vector<2x8x8xf32>, vector<2x8x8xf32> -> vector<2x8x8xf32>
    "tpu.trace_stop"() : () -> ()
    %45 = vector.extract_strided_slice %19 {offsets = [0, 0, 56], sizes = [2, 8, 8], strides = [1, 1, 1]} : vector<2x8x64xf32> to vector<2x8x8xf32>
    %46 = vector.extract_strided_slice %21 {offsets = [0, 0, 56], sizes = [2, 8, 8], strides = [1, 1, 1]} : vector<2x8x64xf32> to vector<2x8x8xf32>
    "tpu.trace_start"() <{level = 10 : i32, message = "bqd,bkd->bqk"}> : () -> ()
    %cst_26 = arith.constant dense<0.000000e+00> : vector<2x8x8xf32>
    %47 = tpu.matmul %45, %46, %cst_26 {dimension_numbers = #tpu.dot_dimension_numbers<[2], [2], [1], [1], [0, 0, 0, 1, 1, 1], [0], [0]>} : vector<2x8x8xf32>, vector<2x8x8xf32>, vector<2x8x8xf32> -> vector<2x8x8xf32>
    "tpu.trace_stop"() : () -> ()
    %48 = tpu.concatenate %26, %29, %32, %35, %38, %41, %44, %47 in 0 : vector<2x8x8xf32>, vector<2x8x8xf32>, vector<2x8x8xf32>, vector<2x8x8xf32>, vector<2x8x8xf32>, vector<2x8x8xf32>, vector<2x8x8xf32>, vector<2x8x8xf32> -> vector<16x8x8xf32>
    %cst_27 = arith.constant dense<0xFF800000> : vector<16x8xf32>
    %49 = vector.multi_reduction <maximumf>, %48, %cst_27 [2] : vector<16x8x8xf32> to vector<16x8xf32>
    %50 = vector.shape_cast %49 : vector<16x8xf32> to vector<16x8x1xf32>
    %51 = vector.broadcast %50 : vector<16x8x1xf32> to vector<16x8x8xf32>
    %52 = arith.subf %48, %51 : vector<16x8x8xf32>
    %53 = math.exp %52 : vector<16x8x8xf32>
    %cst_28 = arith.constant dense<0.000000e+00> : vector<16x8xf32>
    %54 = vector.multi_reduction <add>, %53, %cst_28 [2] : vector<16x8x8xf32> to vector<16x8xf32>
    %55 = vector.shape_cast %54 : vector<16x8xf32> to vector<16x8x1xf32>
    %56 = tpu.reciprocal %55 {approx = true} : vector<16x8x1xf32> -> vector<16x8x1xf32>
    %57 = vector.broadcast %56 : vector<16x8x1xf32> to vector<16x8x8xf32>
    %58 = arith.mulf %53, %57 : vector<16x8x8xf32>
    %59 = vector.extract_strided_slice %58 {offsets = [0, 0, 0], sizes = [2, 8, 8], strides = [1, 1, 1]} : vector<16x8x8xf32> to vector<2x8x8xf32>
    %60 = vector.extract_strided_slice %23 {offsets = [0, 0, 0], sizes = [2, 8, 8], strides = [1, 1, 1]} : vector<2x8x64xf32> to vector<2x8x8xf32>
    "tpu.trace_start"() <{level = 10 : i32, message = "bqk,bkd->bqd"}> : () -> ()
    %cst_29 = arith.constant dense<0.000000e+00> : vector<2x8x8xf32>
    %61 = tpu.matmul %59, %60, %cst_29 {dimension_numbers = #tpu.dot_dimension_numbers<[2], [1], [1], [2], [0, 0, 0, 1, 1, 2], [0], [0]>} : vector<2x8x8xf32>, vector<2x8x8xf32>, vector<2x8x8xf32> -> vector<2x8x8xf32>
    "tpu.trace_stop"() : () -> ()
    %62 = vector.shape_cast %61 : vector<2x8x8xf32> to vector<16x8xf32>
    %63 = vector.extract_strided_slice %10 {offsets = [0, 0], sizes = [8, 64], strides = [1, 1]} : vector<64x64xf32> to vector<8x64xf32>
    %cst_30 = arith.constant dense<0.000000e+00> : vector<16x64xf32>
    %64 = tpu.matmul %62, %63, %cst_30 {dimension_numbers = #tpu.dot_dimension_numbers<[1], [0], [0], [1], [0, 0, 1, 1], [], []>} : vector<16x8xf32>, vector<8x64xf32>, vector<16x64xf32> -> vector<16x64xf32>
    %65 = vector.extract_strided_slice %58 {offsets = [2, 0, 0], sizes = [2, 8, 8], strides = [1, 1, 1]} : vector<16x8x8xf32> to vector<2x8x8xf32>
    %66 = vector.extract_strided_slice %23 {offsets = [0, 0, 8], sizes = [2, 8, 8], strides = [1, 1, 1]} : vector<2x8x64xf32> to vector<2x8x8xf32>
    "tpu.trace_start"() <{level = 10 : i32, message = "bqk,bkd->bqd"}> : () -> ()
    %cst_31 = arith.constant dense<0.000000e+00> : vector<2x8x8xf32>
    %67 = tpu.matmul %65, %66, %cst_31 {dimension_numbers = #tpu.dot_dimension_numbers<[2], [1], [1], [2], [0, 0, 0, 1, 1, 2], [0], [0]>} : vector<2x8x8xf32>, vector<2x8x8xf32>, vector<2x8x8xf32> -> vector<2x8x8xf32>
    "tpu.trace_stop"() : () -> ()
    %68 = vector.shape_cast %67 : vector<2x8x8xf32> to vector<16x8xf32>
    %69 = vector.extract_strided_slice %10 {offsets = [8, 0], sizes = [8, 64], strides = [1, 1]} : vector<64x64xf32> to vector<8x64xf32>
    %cst_32 = arith.constant dense<0.000000e+00> : vector<16x64xf32>
    %70 = tpu.matmul %68, %69, %cst_32 {dimension_numbers = #tpu.dot_dimension_numbers<[1], [0], [0], [1], [0, 0, 1, 1], [], []>} : vector<16x8xf32>, vector<8x64xf32>, vector<16x64xf32> -> vector<16x64xf32>
    %71 = arith.addf %64, %70 : vector<16x64xf32>
    %72 = vector.extract_strided_slice %58 {offsets = [4, 0, 0], sizes = [2, 8, 8], strides = [1, 1, 1]} : vector<16x8x8xf32> to vector<2x8x8xf32>
    %73 = vector.extract_strided_slice %23 {offsets = [0, 0, 16], sizes = [2, 8, 8], strides = [1, 1, 1]} : vector<2x8x64xf32> to vector<2x8x8xf32>
    "tpu.trace_start"() <{level = 10 : i32, message = "bqk,bkd->bqd"}> : () -> ()
    %cst_33 = arith.constant dense<0.000000e+00> : vector<2x8x8xf32>
    %74 = tpu.matmul %72, %73, %cst_33 {dimension_numbers = #tpu.dot_dimension_numbers<[2], [1], [1], [2], [0, 0, 0, 1, 1, 2], [0], [0]>} : vector<2x8x8xf32>, vector<2x8x8xf32>, vector<2x8x8xf32> -> vector<2x8x8xf32>
    "tpu.trace_stop"() : () -> ()
    %75 = vector.shape_cast %74 : vector<2x8x8xf32> to vector<16x8xf32>
    %76 = vector.extract_strided_slice %10 {offsets = [16, 0], sizes = [8, 64], strides = [1, 1]} : vector<64x64xf32> to vector<8x64xf32>
    %cst_34 = arith.constant dense<0.000000e+00> : vector<16x64xf32>
    %77 = tpu.matmul %75, %76, %cst_34 {dimension_numbers = #tpu.dot_dimension_numbers<[1], [0], [0], [1], [0, 0, 1, 1], [], []>} : vector<16x8xf32>, vector<8x64xf32>, vector<16x64xf32> -> vector<16x64xf32>
    %78 = arith.addf %71, %77 : vector<16x64xf32>
    %79 = vector.extract_strided_slice %58 {offsets = [6, 0, 0], sizes = [2, 8, 8], strides = [1, 1, 1]} : vector<16x8x8xf32> to vector<2x8x8xf32>
    %80 = vector.extract_strided_slice %23 {offsets = [0, 0, 24], sizes = [2, 8, 8], strides = [1, 1, 1]} : vector<2x8x64xf32> to vector<2x8x8xf32>
    "tpu.trace_start"() <{level = 10 : i32, message = "bqk,bkd->bqd"}> : () -> ()
    %cst_35 = arith.constant dense<0.000000e+00> : vector<2x8x8xf32>
    %81 = tpu.matmul %79, %80, %cst_35 {dimension_numbers = #tpu.dot_dimension_numbers<[2], [1], [1], [2], [0, 0, 0, 1, 1, 2], [0], [0]>} : vector<2x8x8xf32>, vector<2x8x8xf32>, vector<2x8x8xf32> -> vector<2x8x8xf32>
    "tpu.trace_stop"() : () -> ()
    %82 = vector.shape_cast %81 : vector<2x8x8xf32> to vector<16x8xf32>
    %83 = vector.extract_strided_slice %10 {offsets = [24, 0], sizes = [8, 64], strides = [1, 1]} : vector<64x64xf32> to vector<8x64xf32>
    %cst_36 = arith.constant dense<0.000000e+00> : vector<16x64xf32>
    %84 = tpu.matmul %82, %83, %cst_36 {dimension_numbers = #tpu.dot_dimension_numbers<[1], [0], [0], [1], [0, 0, 1, 1], [], []>} : vector<16x8xf32>, vector<8x64xf32>, vector<16x64xf32> -> vector<16x64xf32>
    %85 = arith.addf %78, %84 : vector<16x64xf32>
    %86 = vector.extract_strided_slice %58 {offsets = [8, 0, 0], sizes = [2, 8, 8], strides = [1, 1, 1]} : vector<16x8x8xf32> to vector<2x8x8xf32>
    %87 = vector.extract_strided_slice %23 {offsets = [0, 0, 32], sizes = [2, 8, 8], strides = [1, 1, 1]} : vector<2x8x64xf32> to vector<2x8x8xf32>
    "tpu.trace_start"() <{level = 10 : i32, message = "bqk,bkd->bqd"}> : () -> ()
    %cst_37 = arith.constant dense<0.000000e+00> : vector<2x8x8xf32>
    %88 = tpu.matmul %86, %87, %cst_37 {dimension_numbers = #tpu.dot_dimension_numbers<[2], [1], [1], [2], [0, 0, 0, 1, 1, 2], [0], [0]>} : vector<2x8x8xf32>, vector<2x8x8xf32>, vector<2x8x8xf32> -> vector<2x8x8xf32>
    "tpu.trace_stop"() : () -> ()
    %89 = vector.shape_cast %88 : vector<2x8x8xf32> to vector<16x8xf32>
    %90 = vector.extract_strided_slice %10 {offsets = [32, 0], sizes = [8, 64], strides = [1, 1]} : vector<64x64xf32> to vector<8x64xf32>
    %cst_38 = arith.constant dense<0.000000e+00> : vector<16x64xf32>
    %91 = tpu.matmul %89, %90, %cst_38 {dimension_numbers = #tpu.dot_dimension_numbers<[1], [0], [0], [1], [0, 0, 1, 1], [], []>} : vector<16x8xf32>, vector<8x64xf32>, vector<16x64xf32> -> vector<16x64xf32>
    %92 = arith.addf %85, %91 : vector<16x64xf32>
    %93 = vector.extract_strided_slice %58 {offsets = [10, 0, 0], sizes = [2, 8, 8], strides = [1, 1, 1]} : vector<16x8x8xf32> to vector<2x8x8xf32>
    %94 = vector.extract_strided_slice %23 {offsets = [0, 0, 40], sizes = [2, 8, 8], strides = [1, 1, 1]} : vector<2x8x64xf32> to vector<2x8x8xf32>
    "tpu.trace_start"() <{level = 10 : i32, message = "bqk,bkd->bqd"}> : () -> ()
    %cst_39 = arith.constant dense<0.000000e+00> : vector<2x8x8xf32>
    %95 = tpu.matmul %93, %94, %cst_39 {dimension_numbers = #tpu.dot_dimension_numbers<[2], [1], [1], [2], [0, 0, 0, 1, 1, 2], [0], [0]>} : vector<2x8x8xf32>, vector<2x8x8xf32>, vector<2x8x8xf32> -> vector<2x8x8xf32>
    "tpu.trace_stop"() : () -> ()
    %96 = vector.shape_cast %95 : vector<2x8x8xf32> to vector<16x8xf32>
    %97 = vector.extract_strided_slice %10 {offsets = [40, 0], sizes = [8, 64], strides = [1, 1]} : vector<64x64xf32> to vector<8x64xf32>
    %cst_40 = arith.constant dense<0.000000e+00> : vector<16x64xf32>
    %98 = tpu.matmul %96, %97, %cst_40 {dimension_numbers = #tpu.dot_dimension_numbers<[1], [0], [0], [1], [0, 0, 1, 1], [], []>} : vector<16x8xf32>, vector<8x64xf32>, vector<16x64xf32> -> vector<16x64xf32>
    %99 = arith.addf %92, %98 : vector<16x64xf32>
    %100 = vector.extract_strided_slice %58 {offsets = [12, 0, 0], sizes = [2, 8, 8], strides = [1, 1, 1]} : vector<16x8x8xf32> to vector<2x8x8xf32>
    %101 = vector.extract_strided_slice %23 {offsets = [0, 0, 48], sizes = [2, 8, 8], strides = [1, 1, 1]} : vector<2x8x64xf32> to vector<2x8x8xf32>
    "tpu.trace_start"() <{level = 10 : i32, message = "bqk,bkd->bqd"}> : () -> ()
    %cst_41 = arith.constant dense<0.000000e+00> : vector<2x8x8xf32>
    %102 = tpu.matmul %100, %101, %cst_41 {dimension_numbers = #tpu.dot_dimension_numbers<[2], [1], [1], [2], [0, 0, 0, 1, 1, 2], [0], [0]>} : vector<2x8x8xf32>, vector<2x8x8xf32>, vector<2x8x8xf32> -> vector<2x8x8xf32>
    "tpu.trace_stop"() : () -> ()
    %103 = vector.shape_cast %102 : vector<2x8x8xf32> to vector<16x8xf32>
    %104 = vector.extract_strided_slice %10 {offsets = [48, 0], sizes = [8, 64], strides = [1, 1]} : vector<64x64xf32> to vector<8x64xf32>
    %cst_42 = arith.constant dense<0.000000e+00> : vector<16x64xf32>
    %105 = tpu.matmul %103, %104, %cst_42 {dimension_numbers = #tpu.dot_dimension_numbers<[1], [0], [0], [1], [0, 0, 1, 1], [], []>} : vector<16x8xf32>, vector<8x64xf32>, vector<16x64xf32> -> vector<16x64xf32>
    %106 = arith.addf %99, %105 : vector<16x64xf32>
    %107 = vector.extract_strided_slice %58 {offsets = [14, 0, 0], sizes = [2, 8, 8], strides = [1, 1, 1]} : vector<16x8x8xf32> to vector<2x8x8xf32>
    %108 = vector.extract_strided_slice %23 {offsets = [0, 0, 56], sizes = [2, 8, 8], strides = [1, 1, 1]} : vector<2x8x64xf32> to vector<2x8x8xf32>
    "tpu.trace_start"() <{level = 10 : i32, message = "bqk,bkd->bqd"}> : () -> ()
    %cst_43 = arith.constant dense<0.000000e+00> : vector<2x8x8xf32>
    %109 = tpu.matmul %107, %108, %cst_43 {dimension_numbers = #tpu.dot_dimension_numbers<[2], [1], [1], [2], [0, 0, 0, 1, 1, 2], [0], [0]>} : vector<2x8x8xf32>, vector<2x8x8xf32>, vector<2x8x8xf32> -> vector<2x8x8xf32>
    "tpu.trace_stop"() : () -> ()
    %110 = vector.shape_cast %109 : vector<2x8x8xf32> to vector<16x8xf32>
    %111 = vector.extract_strided_slice %10 {offsets = [56, 0], sizes = [8, 64], strides = [1, 1]} : vector<64x64xf32> to vector<8x64xf32>
    %cst_44 = arith.constant dense<0.000000e+00> : vector<16x64xf32>
    %112 = tpu.matmul %110, %111, %cst_44 {dimension_numbers = #tpu.dot_dimension_numbers<[1], [0], [0], [1], [0, 0, 1, 1], [], []>} : vector<16x8xf32>, vector<8x64xf32>, vector<16x64xf32> -> vector<16x64xf32>
    %113 = arith.addf %106, %112 : vector<16x64xf32>
    %114 = vector.extract_strided_slice %8 {offsets = [0, 0], sizes = [1, 64], strides = [1, 1]} : vector<8x64xf32> to vector<1x64xf32>
    %115 = vector.broadcast %114 : vector<1x64xf32> to vector<16x64xf32>
    %116 = arith.addf %113, %115 : vector<16x64xf32>
    %117 = arith.addf %6, %116 : vector<16x64xf32>
    %118 = vector.extract_strided_slice %8 {offsets = [2, 0], sizes = [1, 64], strides = [1, 1]} : vector<8x64xf32> to vector<1x64xf32>
    %119 = vector.extract_strided_slice %8 {offsets = [3, 0], sizes = [1, 64], strides = [1, 1]} : vector<8x64xf32> to vector<1x64xf32>
    %cst_45 = arith.constant dense<0.000000e+00> : vector<16xf32>
    %120 = vector.multi_reduction <add>, %117, %cst_45 [1] : vector<16x64xf32> to vector<16xf32>
    %121 = vector.shape_cast %120 : vector<16xf32> to vector<16x1xf32>
    %cst_46 = arith.constant 6.400000e+01 : f32
    %122 = vector.broadcast %cst_46 : f32 to vector<16x1xf32>
    %123 = arith.divf %121, %122 : vector<16x1xf32>
    %124 = arith.mulf %117, %117 : vector<16x64xf32>
    %cst_47 = arith.constant dense<0.000000e+00> : vector<16xf32>
    %125 = vector.multi_reduction <add>, %124, %cst_47 [1] : vector<16x64xf32> to vector<16xf32>
    %126 = vector.shape_cast %125 : vector<16xf32> to vector<16x1xf32>
    %cst_48 = arith.constant 6.400000e+01 : f32
    %127 = vector.broadcast %cst_48 : f32 to vector<16x1xf32>
    %128 = arith.divf %126, %127 : vector<16x1xf32>
    %129 = arith.mulf %123, %123 : vector<16x1xf32>
    %130 = arith.subf %128, %129 : vector<16x1xf32>
    %131 = vector.broadcast %123 : vector<16x1xf32> to vector<16x64xf32>
    %132 = arith.subf %117, %131 : vector<16x64xf32>
    %cst_49 = arith.constant 9.99999974E-6 : f32
    %133 = vector.broadcast %cst_49 : f32 to vector<16x1xf32>
    %134 = arith.addf %130, %133 : vector<16x1xf32>
    %135 = math.rsqrt %134 : vector<16x1xf32>
    %136 = vector.broadcast %135 : vector<16x1xf32> to vector<16x64xf32>
    %137 = arith.mulf %132, %136 : vector<16x64xf32>
    %138 = vector.broadcast %118 : vector<1x64xf32> to vector<16x64xf32>
    %139 = arith.mulf %137, %138 : vector<16x64xf32>
    %140 = vector.broadcast %119 : vector<1x64xf32> to vector<16x64xf32>
    %141 = arith.addf %139, %140 : vector<16x64xf32>
    %c0_50 = arith.constant 0 : index
    %c0_51 = arith.constant 0 : index
    %c0_52 = arith.constant 0 : index
    %142 = vector.load %arg9[%c0_50, %c0_51, %c0_52] : memref<2x64x2048xf32, #tpu.memory_space<vmem>>, vector<1x64x2048xf32>
    %143 = vector.shape_cast %142 : vector<1x64x2048xf32> to vector<64x2048xf32>
    %cst_53 = arith.constant dense<0.000000e+00> : vector<16x2048xf32>
    %144 = tpu.matmul %141, %143, %cst_53 {dimension_numbers = #tpu.dot_dimension_numbers<[1], [0], [0], [1], [0, 0, 1, 1], [], []>} : vector<16x64xf32>, vector<64x2048xf32>, vector<16x2048xf32> -> vector<16x2048xf32>
    %c0_54 = arith.constant 0 : index
    %c0_55 = arith.constant 0 : index
    %c0_56 = arith.constant 0 : index
    %145 = vector.load %arg10[%c0_54, %c0_55, %c0_56] : memref<2x1x2048xf32, #tpu.memory_space<vmem>>, vector<1x1x2048xf32>
    %146 = vector.shape_cast %145 : vector<1x1x2048xf32> to vector<1x2048xf32>
    %147 = vector.broadcast %146 : vector<1x2048xf32> to vector<16x2048xf32>
    %148 = arith.addf %144, %147 : vector<16x2048xf32>
    %cst_57 = arith.constant 0.000000e+00 : f32
    %149 = vector.broadcast %cst_57 : f32 to vector<16x2048xf32>
    %150 = arith.maximumf %148, %149 : vector<16x2048xf32>
    %c0_58 = arith.constant 0 : index
    %c0_59 = arith.constant 0 : index
    %c0_60 = arith.constant 0 : index
    %151 = vector.load %arg11[%c0_58, %c0_59, %c0_60] : memref<2x2048x64xf32, #tpu.memory_space<vmem>>, vector<1x2048x64xf32>
    %152 = vector.shape_cast %151 : vector<1x2048x64xf32> to vector<2048x64xf32>
    %cst_61 = arith.constant dense<0.000000e+00> : vector<16x64xf32>
    %153 = tpu.matmul %150, %152, %cst_61 {dimension_numbers = #tpu.dot_dimension_numbers<[1], [0], [0], [1], [0, 0, 1, 1], [], []>} : vector<16x2048xf32>, vector<2048x64xf32>, vector<16x64xf32> -> vector<16x64xf32>
    %154 = vector.extract_strided_slice %8 {offsets = [1, 0], sizes = [1, 64], strides = [1, 1]} : vector<8x64xf32> to vector<1x64xf32>
    %155 = vector.broadcast %154 : vector<1x64xf32> to vector<16x64xf32>
    %156 = arith.addf %153, %155 : vector<16x64xf32>
    %157 = arith.addf %141, %156 : vector<16x64xf32>
    %158 = vector.extract_strided_slice %8 {offsets = [4, 0], sizes = [1, 64], strides = [1, 1]} : vector<8x64xf32> to vector<1x64xf32>
    %159 = vector.extract_strided_slice %8 {offsets = [5, 0], sizes = [1, 64], strides = [1, 1]} : vector<8x64xf32> to vector<1x64xf32>
    %cst_62 = arith.constant dense<0.000000e+00> : vector<16xf32>
    %160 = vector.multi_reduction <add>, %157, %cst_62 [1] : vector<16x64xf32> to vector<16xf32>
    %161 = vector.shape_cast %160 : vector<16xf32> to vector<16x1xf32>
    %cst_63 = arith.constant 6.400000e+01 : f32
    %162 = vector.broadcast %cst_63 : f32 to vector<16x1xf32>
    %163 = arith.divf %161, %162 : vector<16x1xf32>
    %164 = arith.mulf %157, %157 : vector<16x64xf32>
    %cst_64 = arith.constant dense<0.000000e+00> : vector<16xf32>
    %165 = vector.multi_reduction <add>, %164, %cst_64 [1] : vector<16x64xf32> to vector<16xf32>
    %166 = vector.shape_cast %165 : vector<16xf32> to vector<16x1xf32>
    %cst_65 = arith.constant 6.400000e+01 : f32
    %167 = vector.broadcast %cst_65 : f32 to vector<16x1xf32>
    %168 = arith.divf %166, %167 : vector<16x1xf32>
    %169 = arith.mulf %163, %163 : vector<16x1xf32>
    %170 = arith.subf %168, %169 : vector<16x1xf32>
    %171 = vector.broadcast %163 : vector<16x1xf32> to vector<16x64xf32>
    %172 = arith.subf %157, %171 : vector<16x64xf32>
    %cst_66 = arith.constant 9.99999974E-6 : f32
    %173 = vector.broadcast %cst_66 : f32 to vector<16x1xf32>
    %174 = arith.addf %170, %173 : vector<16x1xf32>
    %175 = math.rsqrt %174 : vector<16x1xf32>
    %176 = vector.broadcast %175 : vector<16x1xf32> to vector<16x64xf32>
    %177 = arith.mulf %172, %176 : vector<16x64xf32>
    %178 = vector.broadcast %158 : vector<1x64xf32> to vector<16x64xf32>
    %179 = arith.mulf %177, %178 : vector<16x64xf32>
    %180 = vector.broadcast %159 : vector<1x64xf32> to vector<16x64xf32>
    %181 = arith.addf %179, %180 : vector<16x64xf32>
    %c1 = arith.constant 1 : index
    %c0_67 = arith.constant 0 : index
    %c0_68 = arith.constant 0 : index
    %182 = vector.load %arg8[%c1, %c0_67, %c0_68] : memref<2x8x64xf32, #tpu.memory_space<vmem>>, vector<1x8x64xf32>
    %183 = vector.shape_cast %182 : vector<1x8x64xf32> to vector<8x64xf32>
    %c1_69 = arith.constant 1 : index
    %c0_70 = arith.constant 0 : index
    %c0_71 = arith.constant 0 : index
    %184 = vector.load %arg7[%c1_69, %c0_70, %c0_71] : memref<2x64x64xf32, #tpu.memory_space<vmem>>, vector<1x64x64xf32>
    %185 = vector.shape_cast %184 : vector<1x64x64xf32> to vector<64x64xf32>
    %c1_72 = arith.constant 1 : index
    %c0_73 = arith.constant 0 : index
    %c0_74 = arith.constant 0 : index
    %186 = vector.load %arg5[%c1_72, %c0_73, %c0_74] : memref<2x64x192xf32, #tpu.memory_space<vmem>>, vector<1x64x192xf32>
    %187 = vector.shape_cast %186 : vector<1x64x192xf32> to vector<64x192xf32>
    %cst_75 = arith.constant dense<0.000000e+00> : vector<16x192xf32>
    %188 = tpu.matmul %181, %187, %cst_75 {dimension_numbers = #tpu.dot_dimension_numbers<[1], [0], [0], [1], [0, 0, 1, 1], [], []>} : vector<16x64xf32>, vector<64x192xf32>, vector<16x192xf32> -> vector<16x192xf32>
    %c1_76 = arith.constant 1 : index
    %c0_77 = arith.constant 0 : index
    %c0_78 = arith.constant 0 : index
    %189 = vector.load %arg6[%c1_76, %c0_77, %c0_78] : memref<2x1x192xf32, #tpu.memory_space<vmem>>, vector<1x1x192xf32>
    %190 = vector.shape_cast %189 : vector<1x1x192xf32> to vector<1x192xf32>
    %191 = vector.broadcast %190 : vector<1x192xf32> to vector<16x192xf32>
    %192 = arith.addf %188, %191 : vector<16x192xf32>
    %193 = vector.extract_strided_slice %192 {offsets = [0, 0], sizes = [16, 64], strides = [1, 1]} : vector<16x192xf32> to vector<16x64xf32>
    %194 = vector.shape_cast %193 : vector<16x64xf32> to vector<2x8x64xf32>
    %195 = vector.extract_strided_slice %192 {offsets = [0, 64], sizes = [16, 64], strides = [1, 1]} : vector<16x192xf32> to vector<16x64xf32>
    %196 = vector.shape_cast %195 : vector<16x64xf32> to vector<2x8x64xf32>
    %197 = vector.extract_strided_slice %192 {offsets = [0, 128], sizes = [16, 64], strides = [1, 1]} : vector<16x192xf32> to vector<16x64xf32>
    %198 = vector.shape_cast %197 : vector<16x64xf32> to vector<2x8x64xf32>
    %199 = vector.extract_strided_slice %194 {offsets = [0, 0, 0], sizes = [2, 8, 8], strides = [1, 1, 1]} : vector<2x8x64xf32> to vector<2x8x8xf32>
    %200 = vector.extract_strided_slice %196 {offsets = [0, 0, 0], sizes = [2, 8, 8], strides = [1, 1, 1]} : vector<2x8x64xf32> to vector<2x8x8xf32>
    "tpu.trace_start"() <{level = 10 : i32, message = "bqd,bkd->bqk"}> : () -> ()
    %cst_79 = arith.constant dense<0.000000e+00> : vector<2x8x8xf32>
    %201 = tpu.matmul %199, %200, %cst_79 {dimension_numbers = #tpu.dot_dimension_numbers<[2], [2], [1], [1], [0, 0, 0, 1, 1, 1], [0], [0]>} : vector<2x8x8xf32>, vector<2x8x8xf32>, vector<2x8x8xf32> -> vector<2x8x8xf32>
    "tpu.trace_stop"() : () -> ()
    %202 = vector.extract_strided_slice %194 {offsets = [0, 0, 8], sizes = [2, 8, 8], strides = [1, 1, 1]} : vector<2x8x64xf32> to vector<2x8x8xf32>
    %203 = vector.extract_strided_slice %196 {offsets = [0, 0, 8], sizes = [2, 8, 8], strides = [1, 1, 1]} : vector<2x8x64xf32> to vector<2x8x8xf32>
    "tpu.trace_start"() <{level = 10 : i32, message = "bqd,bkd->bqk"}> : () -> ()
    %cst_80 = arith.constant dense<0.000000e+00> : vector<2x8x8xf32>
    %204 = tpu.matmul %202, %203, %cst_80 {dimension_numbers = #tpu.dot_dimension_numbers<[2], [2], [1], [1], [0, 0, 0, 1, 1, 1], [0], [0]>} : vector<2x8x8xf32>, vector<2x8x8xf32>, vector<2x8x8xf32> -> vector<2x8x8xf32>
    "tpu.trace_stop"() : () -> ()
    %205 = vector.extract_strided_slice %194 {offsets = [0, 0, 16], sizes = [2, 8, 8], strides = [1, 1, 1]} : vector<2x8x64xf32> to vector<2x8x8xf32>
    %206 = vector.extract_strided_slice %196 {offsets = [0, 0, 16], sizes = [2, 8, 8], strides = [1, 1, 1]} : vector<2x8x64xf32> to vector<2x8x8xf32>
    "tpu.trace_start"() <{level = 10 : i32, message = "bqd,bkd->bqk"}> : () -> ()
    %cst_81 = arith.constant dense<0.000000e+00> : vector<2x8x8xf32>
    %207 = tpu.matmul %205, %206, %cst_81 {dimension_numbers = #tpu.dot_dimension_numbers<[2], [2], [1], [1], [0, 0, 0, 1, 1, 1], [0], [0]>} : vector<2x8x8xf32>, vector<2x8x8xf32>, vector<2x8x8xf32> -> vector<2x8x8xf32>
    "tpu.trace_stop"() : () -> ()
    %208 = vector.extract_strided_slice %194 {offsets = [0, 0, 24], sizes = [2, 8, 8], strides = [1, 1, 1]} : vector<2x8x64xf32> to vector<2x8x8xf32>
    %209 = vector.extract_strided_slice %196 {offsets = [0, 0, 24], sizes = [2, 8, 8], strides = [1, 1, 1]} : vector<2x8x64xf32> to vector<2x8x8xf32>
    "tpu.trace_start"() <{level = 10 : i32, message = "bqd,bkd->bqk"}> : () -> ()
    %cst_82 = arith.constant dense<0.000000e+00> : vector<2x8x8xf32>
    %210 = tpu.matmul %208, %209, %cst_82 {dimension_numbers = #tpu.dot_dimension_numbers<[2], [2], [1], [1], [0, 0, 0, 1, 1, 1], [0], [0]>} : vector<2x8x8xf32>, vector<2x8x8xf32>, vector<2x8x8xf32> -> vector<2x8x8xf32>
    "tpu.trace_stop"() : () -> ()
    %211 = vector.extract_strided_slice %194 {offsets = [0, 0, 32], sizes = [2, 8, 8], strides = [1, 1, 1]} : vector<2x8x64xf32> to vector<2x8x8xf32>
    %212 = vector.extract_strided_slice %196 {offsets = [0, 0, 32], sizes = [2, 8, 8], strides = [1, 1, 1]} : vector<2x8x64xf32> to vector<2x8x8xf32>
    "tpu.trace_start"() <{level = 10 : i32, message = "bqd,bkd->bqk"}> : () -> ()
    %cst_83 = arith.constant dense<0.000000e+00> : vector<2x8x8xf32>
    %213 = tpu.matmul %211, %212, %cst_83 {dimension_numbers = #tpu.dot_dimension_numbers<[2], [2], [1], [1], [0, 0, 0, 1, 1, 1], [0], [0]>} : vector<2x8x8xf32>, vector<2x8x8xf32>, vector<2x8x8xf32> -> vector<2x8x8xf32>
    "tpu.trace_stop"() : () -> ()
    %214 = vector.extract_strided_slice %194 {offsets = [0, 0, 40], sizes = [2, 8, 8], strides = [1, 1, 1]} : vector<2x8x64xf32> to vector<2x8x8xf32>
    %215 = vector.extract_strided_slice %196 {offsets = [0, 0, 40], sizes = [2, 8, 8], strides = [1, 1, 1]} : vector<2x8x64xf32> to vector<2x8x8xf32>
    "tpu.trace_start"() <{level = 10 : i32, message = "bqd,bkd->bqk"}> : () -> ()
    %cst_84 = arith.constant dense<0.000000e+00> : vector<2x8x8xf32>
    %216 = tpu.matmul %214, %215, %cst_84 {dimension_numbers = #tpu.dot_dimension_numbers<[2], [2], [1], [1], [0, 0, 0, 1, 1, 1], [0], [0]>} : vector<2x8x8xf32>, vector<2x8x8xf32>, vector<2x8x8xf32> -> vector<2x8x8xf32>
    "tpu.trace_stop"() : () -> ()
    %217 = vector.extract_strided_slice %194 {offsets = [0, 0, 48], sizes = [2, 8, 8], strides = [1, 1, 1]} : vector<2x8x64xf32> to vector<2x8x8xf32>
    %218 = vector.extract_strided_slice %196 {offsets = [0, 0, 48], sizes = [2, 8, 8], strides = [1, 1, 1]} : vector<2x8x64xf32> to vector<2x8x8xf32>
    "tpu.trace_start"() <{level = 10 : i32, message = "bqd,bkd->bqk"}> : () -> ()
    %cst_85 = arith.constant dense<0.000000e+00> : vector<2x8x8xf32>
    %219 = tpu.matmul %217, %218, %cst_85 {dimension_numbers = #tpu.dot_dimension_numbers<[2], [2], [1], [1], [0, 0, 0, 1, 1, 1], [0], [0]>} : vector<2x8x8xf32>, vector<2x8x8xf32>, vector<2x8x8xf32> -> vector<2x8x8xf32>
    "tpu.trace_stop"() : () -> ()
    %220 = vector.extract_strided_slice %194 {offsets = [0, 0, 56], sizes = [2, 8, 8], strides = [1, 1, 1]} : vector<2x8x64xf32> to vector<2x8x8xf32>
    %221 = vector.extract_strided_slice %196 {offsets = [0, 0, 56], sizes = [2, 8, 8], strides = [1, 1, 1]} : vector<2x8x64xf32> to vector<2x8x8xf32>
    "tpu.trace_start"() <{level = 10 : i32, message = "bqd,bkd->bqk"}> : () -> ()
    %cst_86 = arith.constant dense<0.000000e+00> : vector<2x8x8xf32>
    %222 = tpu.matmul %220, %221, %cst_86 {dimension_numbers = #tpu.dot_dimension_numbers<[2], [2], [1], [1], [0, 0, 0, 1, 1, 1], [0], [0]>} : vector<2x8x8xf32>, vector<2x8x8xf32>, vector<2x8x8xf32> -> vector<2x8x8xf32>
    "tpu.trace_stop"() : () -> ()
    %223 = tpu.concatenate %201, %204, %207, %210, %213, %216, %219, %222 in 0 : vector<2x8x8xf32>, vector<2x8x8xf32>, vector<2x8x8xf32>, vector<2x8x8xf32>, vector<2x8x8xf32>, vector<2x8x8xf32>, vector<2x8x8xf32>, vector<2x8x8xf32> -> vector<16x8x8xf32>
    %cst_87 = arith.constant dense<0xFF800000> : vector<16x8xf32>
    %224 = vector.multi_reduction <maximumf>, %223, %cst_87 [2] : vector<16x8x8xf32> to vector<16x8xf32>
    %225 = vector.shape_cast %224 : vector<16x8xf32> to vector<16x8x1xf32>
    %226 = vector.broadcast %225 : vector<16x8x1xf32> to vector<16x8x8xf32>
    %227 = arith.subf %223, %226 : vector<16x8x8xf32>
    %228 = math.exp %227 : vector<16x8x8xf32>
    %cst_88 = arith.constant dense<0.000000e+00> : vector<16x8xf32>
    %229 = vector.multi_reduction <add>, %228, %cst_88 [2] : vector<16x8x8xf32> to vector<16x8xf32>
    %230 = vector.shape_cast %229 : vector<16x8xf32> to vector<16x8x1xf32>
    %231 = tpu.reciprocal %230 {approx = true} : vector<16x8x1xf32> -> vector<16x8x1xf32>
    %232 = vector.broadcast %231 : vector<16x8x1xf32> to vector<16x8x8xf32>
    %233 = arith.mulf %228, %232 : vector<16x8x8xf32>
    %234 = vector.extract_strided_slice %233 {offsets = [0, 0, 0], sizes = [2, 8, 8], strides = [1, 1, 1]} : vector<16x8x8xf32> to vector<2x8x8xf32>
    %235 = vector.extract_strided_slice %198 {offsets = [0, 0, 0], sizes = [2, 8, 8], strides = [1, 1, 1]} : vector<2x8x64xf32> to vector<2x8x8xf32>
    "tpu.trace_start"() <{level = 10 : i32, message = "bqk,bkd->bqd"}> : () -> ()
    %cst_89 = arith.constant dense<0.000000e+00> : vector<2x8x8xf32>
    %236 = tpu.matmul %234, %235, %cst_89 {dimension_numbers = #tpu.dot_dimension_numbers<[2], [1], [1], [2], [0, 0, 0, 1, 1, 2], [0], [0]>} : vector<2x8x8xf32>, vector<2x8x8xf32>, vector<2x8x8xf32> -> vector<2x8x8xf32>
    "tpu.trace_stop"() : () -> ()
    %237 = vector.shape_cast %236 : vector<2x8x8xf32> to vector<16x8xf32>
    %238 = vector.extract_strided_slice %185 {offsets = [0, 0], sizes = [8, 64], strides = [1, 1]} : vector<64x64xf32> to vector<8x64xf32>
    %cst_90 = arith.constant dense<0.000000e+00> : vector<16x64xf32>
    %239 = tpu.matmul %237, %238, %cst_90 {dimension_numbers = #tpu.dot_dimension_numbers<[1], [0], [0], [1], [0, 0, 1, 1], [], []>} : vector<16x8xf32>, vector<8x64xf32>, vector<16x64xf32> -> vector<16x64xf32>
    %240 = vector.extract_strided_slice %233 {offsets = [2, 0, 0], sizes = [2, 8, 8], strides = [1, 1, 1]} : vector<16x8x8xf32> to vector<2x8x8xf32>
    %241 = vector.extract_strided_slice %198 {offsets = [0, 0, 8], sizes = [2, 8, 8], strides = [1, 1, 1]} : vector<2x8x64xf32> to vector<2x8x8xf32>
    "tpu.trace_start"() <{level = 10 : i32, message = "bqk,bkd->bqd"}> : () -> ()
    %cst_91 = arith.constant dense<0.000000e+00> : vector<2x8x8xf32>
    %242 = tpu.matmul %240, %241, %cst_91 {dimension_numbers = #tpu.dot_dimension_numbers<[2], [1], [1], [2], [0, 0, 0, 1, 1, 2], [0], [0]>} : vector<2x8x8xf32>, vector<2x8x8xf32>, vector<2x8x8xf32> -> vector<2x8x8xf32>
    "tpu.trace_stop"() : () -> ()
    %243 = vector.shape_cast %242 : vector<2x8x8xf32> to vector<16x8xf32>
    %244 = vector.extract_strided_slice %185 {offsets = [8, 0], sizes = [8, 64], strides = [1, 1]} : vector<64x64xf32> to vector<8x64xf32>
    %cst_92 = arith.constant dense<0.000000e+00> : vector<16x64xf32>
    %245 = tpu.matmul %243, %244, %cst_92 {dimension_numbers = #tpu.dot_dimension_numbers<[1], [0], [0], [1], [0, 0, 1, 1], [], []>} : vector<16x8xf32>, vector<8x64xf32>, vector<16x64xf32> -> vector<16x64xf32>
    %246 = arith.addf %239, %245 : vector<16x64xf32>
    %247 = vector.extract_strided_slice %233 {offsets = [4, 0, 0], sizes = [2, 8, 8], strides = [1, 1, 1]} : vector<16x8x8xf32> to vector<2x8x8xf32>
    %248 = vector.extract_strided_slice %198 {offsets = [0, 0, 16], sizes = [2, 8, 8], strides = [1, 1, 1]} : vector<2x8x64xf32> to vector<2x8x8xf32>
    "tpu.trace_start"() <{level = 10 : i32, message = "bqk,bkd->bqd"}> : () -> ()
    %cst_93 = arith.constant dense<0.000000e+00> : vector<2x8x8xf32>
    %249 = tpu.matmul %247, %248, %cst_93 {dimension_numbers = #tpu.dot_dimension_numbers<[2], [1], [1], [2], [0, 0, 0, 1, 1, 2], [0], [0]>} : vector<2x8x8xf32>, vector<2x8x8xf32>, vector<2x8x8xf32> -> vector<2x8x8xf32>
    "tpu.trace_stop"() : () -> ()
    %250 = vector.shape_cast %249 : vector<2x8x8xf32> to vector<16x8xf32>
    %251 = vector.extract_strided_slice %185 {offsets = [16, 0], sizes = [8, 64], strides = [1, 1]} : vector<64x64xf32> to vector<8x64xf32>
    %cst_94 = arith.constant dense<0.000000e+00> : vector<16x64xf32>
    %252 = tpu.matmul %250, %251, %cst_94 {dimension_numbers = #tpu.dot_dimension_numbers<[1], [0], [0], [1], [0, 0, 1, 1], [], []>} : vector<16x8xf32>, vector<8x64xf32>, vector<16x64xf32> -> vector<16x64xf32>
    %253 = arith.addf %246, %252 : vector<16x64xf32>
    %254 = vector.extract_strided_slice %233 {offsets = [6, 0, 0], sizes = [2, 8, 8], strides = [1, 1, 1]} : vector<16x8x8xf32> to vector<2x8x8xf32>
    %255 = vector.extract_strided_slice %198 {offsets = [0, 0, 24], sizes = [2, 8, 8], strides = [1, 1, 1]} : vector<2x8x64xf32> to vector<2x8x8xf32>
    "tpu.trace_start"() <{level = 10 : i32, message = "bqk,bkd->bqd"}> : () -> ()
    %cst_95 = arith.constant dense<0.000000e+00> : vector<2x8x8xf32>
    %256 = tpu.matmul %254, %255, %cst_95 {dimension_numbers = #tpu.dot_dimension_numbers<[2], [1], [1], [2], [0, 0, 0, 1, 1, 2], [0], [0]>} : vector<2x8x8xf32>, vector<2x8x8xf32>, vector<2x8x8xf32> -> vector<2x8x8xf32>
    "tpu.trace_stop"() : () -> ()
    %257 = vector.shape_cast %256 : vector<2x8x8xf32> to vector<16x8xf32>
    %258 = vector.extract_strided_slice %185 {offsets = [24, 0], sizes = [8, 64], strides = [1, 1]} : vector<64x64xf32> to vector<8x64xf32>
    %cst_96 = arith.constant dense<0.000000e+00> : vector<16x64xf32>
    %259 = tpu.matmul %257, %258, %cst_96 {dimension_numbers = #tpu.dot_dimension_numbers<[1], [0], [0], [1], [0, 0, 1, 1], [], []>} : vector<16x8xf32>, vector<8x64xf32>, vector<16x64xf32> -> vector<16x64xf32>
    %260 = arith.addf %253, %259 : vector<16x64xf32>
    %261 = vector.extract_strided_slice %233 {offsets = [8, 0, 0], sizes = [2, 8, 8], strides = [1, 1, 1]} : vector<16x8x8xf32> to vector<2x8x8xf32>
    %262 = vector.extract_strided_slice %198 {offsets = [0, 0, 32], sizes = [2, 8, 8], strides = [1, 1, 1]} : vector<2x8x64xf32> to vector<2x8x8xf32>
    "tpu.trace_start"() <{level = 10 : i32, message = "bqk,bkd->bqd"}> : () -> ()
    %cst_97 = arith.constant dense<0.000000e+00> : vector<2x8x8xf32>
    %263 = tpu.matmul %261, %262, %cst_97 {dimension_numbers = #tpu.dot_dimension_numbers<[2], [1], [1], [2], [0, 0, 0, 1, 1, 2], [0], [0]>} : vector<2x8x8xf32>, vector<2x8x8xf32>, vector<2x8x8xf32> -> vector<2x8x8xf32>
    "tpu.trace_stop"() : () -> ()
    %264 = vector.shape_cast %263 : vector<2x8x8xf32> to vector<16x8xf32>
    %265 = vector.extract_strided_slice %185 {offsets = [32, 0], sizes = [8, 64], strides = [1, 1]} : vector<64x64xf32> to vector<8x64xf32>
    %cst_98 = arith.constant dense<0.000000e+00> : vector<16x64xf32>
    %266 = tpu.matmul %264, %265, %cst_98 {dimension_numbers = #tpu.dot_dimension_numbers<[1], [0], [0], [1], [0, 0, 1, 1], [], []>} : vector<16x8xf32>, vector<8x64xf32>, vector<16x64xf32> -> vector<16x64xf32>
    %267 = arith.addf %260, %266 : vector<16x64xf32>
    %268 = vector.extract_strided_slice %233 {offsets = [10, 0, 0], sizes = [2, 8, 8], strides = [1, 1, 1]} : vector<16x8x8xf32> to vector<2x8x8xf32>
    %269 = vector.extract_strided_slice %198 {offsets = [0, 0, 40], sizes = [2, 8, 8], strides = [1, 1, 1]} : vector<2x8x64xf32> to vector<2x8x8xf32>
    "tpu.trace_start"() <{level = 10 : i32, message = "bqk,bkd->bqd"}> : () -> ()
    %cst_99 = arith.constant dense<0.000000e+00> : vector<2x8x8xf32>
    %270 = tpu.matmul %268, %269, %cst_99 {dimension_numbers = #tpu.dot_dimension_numbers<[2], [1], [1], [2], [0, 0, 0, 1, 1, 2], [0], [0]>} : vector<2x8x8xf32>, vector<2x8x8xf32>, vector<2x8x8xf32> -> vector<2x8x8xf32>
    "tpu.trace_stop"() : () -> ()
    %271 = vector.shape_cast %270 : vector<2x8x8xf32> to vector<16x8xf32>
    %272 = vector.extract_strided_slice %185 {offsets = [40, 0], sizes = [8, 64], strides = [1, 1]} : vector<64x64xf32> to vector<8x64xf32>
    %cst_100 = arith.constant dense<0.000000e+00> : vector<16x64xf32>
    %273 = tpu.matmul %271, %272, %cst_100 {dimension_numbers = #tpu.dot_dimension_numbers<[1], [0], [0], [1], [0, 0, 1, 1], [], []>} : vector<16x8xf32>, vector<8x64xf32>, vector<16x64xf32> -> vector<16x64xf32>
    %274 = arith.addf %267, %273 : vector<16x64xf32>
    %275 = vector.extract_strided_slice %233 {offsets = [12, 0, 0], sizes = [2, 8, 8], strides = [1, 1, 1]} : vector<16x8x8xf32> to vector<2x8x8xf32>
    %276 = vector.extract_strided_slice %198 {offsets = [0, 0, 48], sizes = [2, 8, 8], strides = [1, 1, 1]} : vector<2x8x64xf32> to vector<2x8x8xf32>
    "tpu.trace_start"() <{level = 10 : i32, message = "bqk,bkd->bqd"}> : () -> ()
    %cst_101 = arith.constant dense<0.000000e+00> : vector<2x8x8xf32>
    %277 = tpu.matmul %275, %276, %cst_101 {dimension_numbers = #tpu.dot_dimension_numbers<[2], [1], [1], [2], [0, 0, 0, 1, 1, 2], [0], [0]>} : vector<2x8x8xf32>, vector<2x8x8xf32>, vector<2x8x8xf32> -> vector<2x8x8xf32>
    "tpu.trace_stop"() : () -> ()
    %278 = vector.shape_cast %277 : vector<2x8x8xf32> to vector<16x8xf32>
    %279 = vector.extract_strided_slice %185 {offsets = [48, 0], sizes = [8, 64], strides = [1, 1]} : vector<64x64xf32> to vector<8x64xf32>
    %cst_102 = arith.constant dense<0.000000e+00> : vector<16x64xf32>
    %280 = tpu.matmul %278, %279, %cst_102 {dimension_numbers = #tpu.dot_dimension_numbers<[1], [0], [0], [1], [0, 0, 1, 1], [], []>} : vector<16x8xf32>, vector<8x64xf32>, vector<16x64xf32> -> vector<16x64xf32>
    %281 = arith.addf %274, %280 : vector<16x64xf32>
    %282 = vector.extract_strided_slice %233 {offsets = [14, 0, 0], sizes = [2, 8, 8], strides = [1, 1, 1]} : vector<16x8x8xf32> to vector<2x8x8xf32>
    %283 = vector.extract_strided_slice %198 {offsets = [0, 0, 56], sizes = [2, 8, 8], strides = [1, 1, 1]} : vector<2x8x64xf32> to vector<2x8x8xf32>
    "tpu.trace_start"() <{level = 10 : i32, message = "bqk,bkd->bqd"}> : () -> ()
    %cst_103 = arith.constant dense<0.000000e+00> : vector<2x8x8xf32>
    %284 = tpu.matmul %282, %283, %cst_103 {dimension_numbers = #tpu.dot_dimension_numbers<[2], [1], [1], [2], [0, 0, 0, 1, 1, 2], [0], [0]>} : vector<2x8x8xf32>, vector<2x8x8xf32>, vector<2x8x8xf32> -> vector<2x8x8xf32>
    "tpu.trace_stop"() : () -> ()
    %285 = vector.shape_cast %284 : vector<2x8x8xf32> to vector<16x8xf32>
    %286 = vector.extract_strided_slice %185 {offsets = [56, 0], sizes = [8, 64], strides = [1, 1]} : vector<64x64xf32> to vector<8x64xf32>
    %cst_104 = arith.constant dense<0.000000e+00> : vector<16x64xf32>
    %287 = tpu.matmul %285, %286, %cst_104 {dimension_numbers = #tpu.dot_dimension_numbers<[1], [0], [0], [1], [0, 0, 1, 1], [], []>} : vector<16x8xf32>, vector<8x64xf32>, vector<16x64xf32> -> vector<16x64xf32>
    %288 = arith.addf %281, %287 : vector<16x64xf32>
    %289 = vector.extract_strided_slice %183 {offsets = [0, 0], sizes = [1, 64], strides = [1, 1]} : vector<8x64xf32> to vector<1x64xf32>
    %290 = vector.broadcast %289 : vector<1x64xf32> to vector<16x64xf32>
    %291 = arith.addf %288, %290 : vector<16x64xf32>
    %292 = arith.addf %181, %291 : vector<16x64xf32>
    %293 = vector.extract_strided_slice %183 {offsets = [2, 0], sizes = [1, 64], strides = [1, 1]} : vector<8x64xf32> to vector<1x64xf32>
    %294 = vector.extract_strided_slice %183 {offsets = [3, 0], sizes = [1, 64], strides = [1, 1]} : vector<8x64xf32> to vector<1x64xf32>
    %cst_105 = arith.constant dense<0.000000e+00> : vector<16xf32>
    %295 = vector.multi_reduction <add>, %292, %cst_105 [1] : vector<16x64xf32> to vector<16xf32>
    %296 = vector.shape_cast %295 : vector<16xf32> to vector<16x1xf32>
    %cst_106 = arith.constant 6.400000e+01 : f32
    %297 = vector.broadcast %cst_106 : f32 to vector<16x1xf32>
    %298 = arith.divf %296, %297 : vector<16x1xf32>
    %299 = arith.mulf %292, %292 : vector<16x64xf32>
    %cst_107 = arith.constant dense<0.000000e+00> : vector<16xf32>
    %300 = vector.multi_reduction <add>, %299, %cst_107 [1] : vector<16x64xf32> to vector<16xf32>
    %301 = vector.shape_cast %300 : vector<16xf32> to vector<16x1xf32>
    %cst_108 = arith.constant 6.400000e+01 : f32
    %302 = vector.broadcast %cst_108 : f32 to vector<16x1xf32>
    %303 = arith.divf %301, %302 : vector<16x1xf32>
    %304 = arith.mulf %298, %298 : vector<16x1xf32>
    %305 = arith.subf %303, %304 : vector<16x1xf32>
    %306 = vector.broadcast %298 : vector<16x1xf32> to vector<16x64xf32>
    %307 = arith.subf %292, %306 : vector<16x64xf32>
    %cst_109 = arith.constant 9.99999974E-6 : f32
    %308 = vector.broadcast %cst_109 : f32 to vector<16x1xf32>
    %309 = arith.addf %305, %308 : vector<16x1xf32>
    %310 = math.rsqrt %309 : vector<16x1xf32>
    %311 = vector.broadcast %310 : vector<16x1xf32> to vector<16x64xf32>
    %312 = arith.mulf %307, %311 : vector<16x64xf32>
    %313 = vector.broadcast %293 : vector<1x64xf32> to vector<16x64xf32>
    %314 = arith.mulf %312, %313 : vector<16x64xf32>
    %315 = vector.broadcast %294 : vector<1x64xf32> to vector<16x64xf32>
    %316 = arith.addf %314, %315 : vector<16x64xf32>
    %c1_110 = arith.constant 1 : index
    %c0_111 = arith.constant 0 : index
    %c0_112 = arith.constant 0 : index
    %317 = vector.load %arg9[%c1_110, %c0_111, %c0_112] : memref<2x64x2048xf32, #tpu.memory_space<vmem>>, vector<1x64x2048xf32>
    %318 = vector.shape_cast %317 : vector<1x64x2048xf32> to vector<64x2048xf32>
    %cst_113 = arith.constant dense<0.000000e+00> : vector<16x2048xf32>
    %319 = tpu.matmul %316, %318, %cst_113 {dimension_numbers = #tpu.dot_dimension_numbers<[1], [0], [0], [1], [0, 0, 1, 1], [], []>} : vector<16x64xf32>, vector<64x2048xf32>, vector<16x2048xf32> -> vector<16x2048xf32>
    %c1_114 = arith.constant 1 : index
    %c0_115 = arith.constant 0 : index
    %c0_116 = arith.constant 0 : index
    %320 = vector.load %arg10[%c1_114, %c0_115, %c0_116] : memref<2x1x2048xf32, #tpu.memory_space<vmem>>, vector<1x1x2048xf32>
    %321 = vector.shape_cast %320 : vector<1x1x2048xf32> to vector<1x2048xf32>
    %322 = vector.broadcast %321 : vector<1x2048xf32> to vector<16x2048xf32>
    %323 = arith.addf %319, %322 : vector<16x2048xf32>
    %cst_117 = arith.constant 0.000000e+00 : f32
    %324 = vector.broadcast %cst_117 : f32 to vector<16x2048xf32>
    %325 = arith.maximumf %323, %324 : vector<16x2048xf32>
    %c1_118 = arith.constant 1 : index
    %c0_119 = arith.constant 0 : index
    %c0_120 = arith.constant 0 : index
    %326 = vector.load %arg11[%c1_118, %c0_119, %c0_120] : memref<2x2048x64xf32, #tpu.memory_space<vmem>>, vector<1x2048x64xf32>
    %327 = vector.shape_cast %326 : vector<1x2048x64xf32> to vector<2048x64xf32>
    %cst_121 = arith.constant dense<0.000000e+00> : vector<16x64xf32>
    %328 = tpu.matmul %325, %327, %cst_121 {dimension_numbers = #tpu.dot_dimension_numbers<[1], [0], [0], [1], [0, 0, 1, 1], [], []>} : vector<16x2048xf32>, vector<2048x64xf32>, vector<16x64xf32> -> vector<16x64xf32>
    %329 = vector.extract_strided_slice %183 {offsets = [1, 0], sizes = [1, 64], strides = [1, 1]} : vector<8x64xf32> to vector<1x64xf32>
    %330 = vector.broadcast %329 : vector<1x64xf32> to vector<16x64xf32>
    %331 = arith.addf %328, %330 : vector<16x64xf32>
    %332 = arith.addf %316, %331 : vector<16x64xf32>
    %333 = vector.extract_strided_slice %183 {offsets = [4, 0], sizes = [1, 64], strides = [1, 1]} : vector<8x64xf32> to vector<1x64xf32>
    %334 = vector.extract_strided_slice %183 {offsets = [5, 0], sizes = [1, 64], strides = [1, 1]} : vector<8x64xf32> to vector<1x64xf32>
    %cst_122 = arith.constant dense<0.000000e+00> : vector<16xf32>
    %335 = vector.multi_reduction <add>, %332, %cst_122 [1] : vector<16x64xf32> to vector<16xf32>
    %336 = vector.shape_cast %335 : vector<16xf32> to vector<16x1xf32>
    %cst_123 = arith.constant 6.400000e+01 : f32
    %337 = vector.broadcast %cst_123 : f32 to vector<16x1xf32>
    %338 = arith.divf %336, %337 : vector<16x1xf32>
    %339 = arith.mulf %332, %332 : vector<16x64xf32>
    %cst_124 = arith.constant dense<0.000000e+00> : vector<16xf32>
    %340 = vector.multi_reduction <add>, %339, %cst_124 [1] : vector<16x64xf32> to vector<16xf32>
    %341 = vector.shape_cast %340 : vector<16xf32> to vector<16x1xf32>
    %cst_125 = arith.constant 6.400000e+01 : f32
    %342 = vector.broadcast %cst_125 : f32 to vector<16x1xf32>
    %343 = arith.divf %341, %342 : vector<16x1xf32>
    %344 = arith.mulf %338, %338 : vector<16x1xf32>
    %345 = arith.subf %343, %344 : vector<16x1xf32>
    %346 = vector.broadcast %338 : vector<16x1xf32> to vector<16x64xf32>
    %347 = arith.subf %332, %346 : vector<16x64xf32>
    %cst_126 = arith.constant 9.99999974E-6 : f32
    %348 = vector.broadcast %cst_126 : f32 to vector<16x1xf32>
    %349 = arith.addf %345, %348 : vector<16x1xf32>
    %350 = math.rsqrt %349 : vector<16x1xf32>
    %351 = vector.broadcast %350 : vector<16x1xf32> to vector<16x64xf32>
    %352 = arith.mulf %347, %351 : vector<16x64xf32>
    %353 = vector.broadcast %333 : vector<1x64xf32> to vector<16x64xf32>
    %354 = arith.mulf %352, %353 : vector<16x64xf32>
    %355 = vector.broadcast %334 : vector<1x64xf32> to vector<16x64xf32>
    %356 = arith.addf %354, %355 : vector<16x64xf32>
    %357 = vector.shape_cast %356 : vector<16x64xf32> to vector<2x8x64xf32>
    %cst_127 = arith.constant dense<0.000000e+00> : vector<2x64xf32>
    %358 = vector.multi_reduction <add>, %357, %cst_127 [1] : vector<2x8x64xf32> to vector<2x64xf32>
    %cst_128 = arith.constant 8.000000e+00 : f32
    %359 = vector.broadcast %cst_128 : f32 to vector<2x64xf32>
    %360 = arith.divf %358, %359 : vector<2x64xf32>
    %c0_129 = arith.constant 0 : index
    %c0_130 = arith.constant 0 : index
    %361 = vector.load %arg12[%c0_129, %c0_130] : memref<64x96xf32, #tpu.memory_space<vmem>>, vector<64x96xf32>
    %cst_131 = arith.constant dense<0.000000e+00> : vector<2x96xf32>
    %362 = tpu.matmul %360, %361, %cst_131 {dimension_numbers = #tpu.dot_dimension_numbers<[1], [0], [0], [1], [0, 0, 1, 1], [], []>} : vector<2x64xf32>, vector<64x96xf32>, vector<2x96xf32> -> vector<2x96xf32>
    %c0_132 = arith.constant 0 : index
    %c0_133 = arith.constant 0 : index
    %363 = vector.load %arg2[%c0_132, %c0_133] : memref<2x16xf32, #tpu.memory_space<vmem>>, vector<2x16xf32>
    %c0_134 = arith.constant 0 : index
    %c0_135 = arith.constant 0 : index
    %364 = vector.load %arg13[%c0_134, %c0_135] : memref<16x96xf32, #tpu.memory_space<vmem>>, vector<16x96xf32>
    %cst_136 = arith.constant dense<0.000000e+00> : vector<2x96xf32>
    %365 = tpu.matmul %363, %364, %cst_136 {dimension_numbers = #tpu.dot_dimension_numbers<[1], [0], [0], [1], [0, 0, 1, 1], [], []>} : vector<2x16xf32>, vector<16x96xf32>, vector<2x96xf32> -> vector<2x96xf32>
    %366 = arith.addf %362, %365 : vector<2x96xf32>
    %c0_137 = arith.constant 0 : index
    %c0_138 = arith.constant 0 : index
    %367 = vector.load %arg14[%c0_137, %c0_138] : memref<1x96xf32, #tpu.memory_space<vmem>>, vector<1x96xf32>
    %368 = vector.broadcast %367 : vector<1x96xf32> to vector<2x96xf32>
    %369 = arith.addf %366, %368 : vector<2x96xf32>
    %cst_139 = arith.constant 0.000000e+00 : f32
    %370 = vector.broadcast %cst_139 : f32 to vector<2x96xf32>
    %371 = arith.maximumf %369, %370 : vector<2x96xf32>
    %c0_140 = arith.constant 0 : index
    %c0_141 = arith.constant 0 : index
    %372 = vector.load %arg15[%c0_140, %c0_141] : memref<96x8xf32, #tpu.memory_space<vmem>>, vector<96x8xf32>
    %cst_142 = arith.constant dense<0.000000e+00> : vector<2x8xf32>
    %373 = tpu.matmul %371, %372, %cst_142 {dimension_numbers = #tpu.dot_dimension_numbers<[1], [0], [0], [1], [0, 0, 1, 1], [], []>} : vector<2x96xf32>, vector<96x8xf32>, vector<2x8xf32> -> vector<2x8xf32>
    %c0_143 = arith.constant 0 : index
    %c0_144 = arith.constant 0 : index
    %374 = vector.load %arg16[%c0_143, %c0_144] : memref<1x8xf32, #tpu.memory_space<vmem>>, vector<1x8xf32>
    %375 = vector.broadcast %374 : vector<1x8xf32> to vector<2x8xf32>
    %376 = arith.addf %373, %375 : vector<2x8xf32>
    %377 = tpu.iota {dimensions = array<i32: 1>} : vector<2x8xi32>
    %c4_i32 = arith.constant 4 : i32
    %378 = vector.broadcast %c4_i32 : i32 to vector<2x8xi32>
    %379 = arith.cmpi eq, %377, %378 : vector<2x8xi32>
    %380 = arith.negf %376 : vector<2x8xf32>
    %381 = math.exp %380 : vector<2x8xf32>
    %cst_145 = arith.constant 1.000000e+00 : f32
    %382 = vector.broadcast %cst_145 : f32 to vector<2x8xf32>
    %383 = arith.addf %382, %381 : vector<2x8xf32>
    %384 = arith.divf %382, %383 : vector<2x8xf32>
    %385 = arith.select %379, %384, %376 : vector<2x8xi1>, vector<2x8xf32>
    %c0_146 = arith.constant 0 : index
    %c0_147 = arith.constant 0 : index
    %386 = vector.load %arg17[%c0_146, %c0_147] : memref<2x8xf32, #tpu.memory_space<vmem>>, vector<2x8xf32>
    tpu.vector_store %arg17[%c0_146, %c0_147], %385 {strides = array<i32>} : memref<2x8xf32, #tpu.memory_space<vmem>>, vector<2x8xf32>,
    return
  }
  func.func @transform_0(%arg0: i32) -> (i32, i32, i32) {
    %c0_i32 = arith.constant 0 : i32
    %c0_i32_0 = arith.constant 0 : i32
    %c0_i32_1 = arith.constant 0 : i32
    return %arg0, %c0_i32, %c0_i32_0 : i32, i32, i32
  }
  func.func @transform_1(%arg0: i32) -> (i32, i32) {
    %c0_i32 = arith.constant 0 : i32
    %c0_i32_0 = arith.constant 0 : i32
    return %arg0, %c0_i32 : i32, i32
  }
  func.func @transform_2(%arg0: i32) -> (i32, i32) {
    %c0_i32 = arith.constant 0 : i32
    %c0_i32_0 = arith.constant 0 : i32
    %c0_i32_1 = arith.constant 0 : i32
    return %c0_i32, %c0_i32_0 : i32, i32
  }
  func.func @transform_3(%arg0: i32) -> (i32, i32) {
    %c0_i32 = arith.constant 0 : i32
    %c0_i32_0 = arith.constant 0 : i32
    %c0_i32_1 = arith.constant 0 : i32
    return %c0_i32, %c0_i32_0 : i32, i32
  }
  func.func @transform_4(%arg0: i32) -> (i32, i32, i32) {
    %c0_i32 = arith.constant 0 : i32
    %c0_i32_0 = arith.constant 0 : i32
    %c0_i32_1 = arith.constant 0 : i32
    %c0_i32_2 = arith.constant 0 : i32
    return %c0_i32, %c0_i32_0, %c0_i32_1 : i32, i32, i32
  }
  func.func @transform_5(%arg0: i32) -> (i32, i32, i32) {
    %c0_i32 = arith.constant 0 : i32
    %c0_i32_0 = arith.constant 0 : i32
    %c0_i32_1 = arith.constant 0 : i32
    %c0_i32_2 = arith.constant 0 : i32
    return %c0_i32, %c0_i32_0, %c0_i32_1 : i32, i32, i32
  }
  func.func @transform_6(%arg0: i32) -> (i32, i32, i32) {
    %c0_i32 = arith.constant 0 : i32
    %c0_i32_0 = arith.constant 0 : i32
    %c0_i32_1 = arith.constant 0 : i32
    %c0_i32_2 = arith.constant 0 : i32
    return %c0_i32, %c0_i32_0, %c0_i32_1 : i32, i32, i32
  }
  func.func @transform_7(%arg0: i32) -> (i32, i32, i32) {
    %c0_i32 = arith.constant 0 : i32
    %c0_i32_0 = arith.constant 0 : i32
    %c0_i32_1 = arith.constant 0 : i32
    %c0_i32_2 = arith.constant 0 : i32
    return %c0_i32, %c0_i32_0, %c0_i32_1 : i32, i32, i32
  }
  func.func @transform_8(%arg0: i32) -> (i32, i32, i32) {
    %c0_i32 = arith.constant 0 : i32
    %c0_i32_0 = arith.constant 0 : i32
    %c0_i32_1 = arith.constant 0 : i32
    %c0_i32_2 = arith.constant 0 : i32
    return %c0_i32, %c0_i32_0, %c0_i32_1 : i32, i32, i32
  }
  func.func @transform_9(%arg0: i32) -> (i32, i32, i32) {
    %c0_i32 = arith.constant 0 : i32
    %c0_i32_0 = arith.constant 0 : i32
    %c0_i32_1 = arith.constant 0 : i32
    %c0_i32_2 = arith.constant 0 : i32
    return %c0_i32, %c0_i32_0, %c0_i32_1 : i32, i32, i32
  }
  func.func @transform_10(%arg0: i32) -> (i32, i32, i32) {
    %c0_i32 = arith.constant 0 : i32
    %c0_i32_0 = arith.constant 0 : i32
    %c0_i32_1 = arith.constant 0 : i32
    %c0_i32_2 = arith.constant 0 : i32
    return %c0_i32, %c0_i32_0, %c0_i32_1 : i32, i32, i32
  }
  func.func @transform_11(%arg0: i32) -> (i32, i32) {
    %c0_i32 = arith.constant 0 : i32
    %c0_i32_0 = arith.constant 0 : i32
    %c0_i32_1 = arith.constant 0 : i32
    return %c0_i32, %c0_i32_0 : i32, i32
  }
  func.func @transform_12(%arg0: i32) -> (i32, i32) {
    %c0_i32 = arith.constant 0 : i32
    %c0_i32_0 = arith.constant 0 : i32
    %c0_i32_1 = arith.constant 0 : i32
    return %c0_i32, %c0_i32_0 : i32, i32
  }
  func.func @transform_13(%arg0: i32) -> (i32, i32) {
    %c0_i32 = arith.constant 0 : i32
    %c0_i32_0 = arith.constant 0 : i32
    %c0_i32_1 = arith.constant 0 : i32
    return %c0_i32, %c0_i32_0 : i32, i32
  }
  func.func @transform_14(%arg0: i32) -> (i32, i32) {
    %c0_i32 = arith.constant 0 : i32
    %c0_i32_0 = arith.constant 0 : i32
    %c0_i32_1 = arith.constant 0 : i32
    return %c0_i32, %c0_i32_0 : i32, i32
  }
  func.func @transform_15(%arg0: i32) -> (i32, i32) {
    %c0_i32 = arith.constant 0 : i32
    %c0_i32_0 = arith.constant 0 : i32
    %c0_i32_1 = arith.constant 0 : i32
    return %c0_i32, %c0_i32_0 : i32, i32
  }
  func.func @transform_16(%arg0: i32) -> (i32, i32) {
    %c0_i32 = arith.constant 0 : i32
    %c0_i32_0 = arith.constant 0 : i32
    return %arg0, %c0_i32 : i32, i32
  }
}

</mosaic_0001>

<bundles_post_ra>
// kernel: tpu_custom_call.1
= control target key start
LH: loop header
LB: loop body
LE: loop exit
PB: predicated region body
PF: predicated region fallthrough
CT: control target
= control target key end

     0   :  { %s10136_s0 = inlined_call_operand.vmem [shape: f32[2,8,16], index: 0, kind: input, shape index: {}]   ;;  %s10137_s1 = inlined_call_operand.vmem [shape: f32[2,16], index: 1, kind: input, shape index: {}]   ;;  %s10138_s2 = inlined_call_operand.vmem [shape: f32[16,64], index: 2, kind: input, shape index: {}]   ;;  %s10139_s3 = inlined_call_operand.vmem [shape: f32[1,64], index: 3, kind: input, shape index: {}]   ;;  %s10140_s4 = inlined_call_operand.vmem [shape: f32[2,64,192], index: 4, kind: input, shape index: {}]   ;;  %s10141_s5 = inlined_call_operand.vmem [shape: f32[2,1,192], index: 5, kind: input, shape index: {}]   ;;  %s10142_s6 = inlined_call_operand.vmem [shape: f32[2,64,64], index: 6, kind: input, shape index: {}]   ;;  %s10143_s7 = inlined_call_operand.vmem [shape: f32[2,8,64], index: 7, kind: input, shape index: {}]   ;;  %s10144_s8 = inlined_call_operand.vmem [shape: f32[2,64,2048], index: 8, kind: input, shape index: {}]   ;;  %s10145_s9 = inlined_call_operand.vmem [shape: f32[2,1,2048], index: 9, kind: input, shape index: {}]   ;;  %s10146_s10 = inlined_call_operand.vmem [shape: f32[2,2048,64], index: 10, kind: input, shape index: {}]   ;;  %s10147_s11 = inlined_call_operand.vmem [shape: f32[64,96], index: 11, kind: input, shape index: {}]   ;;  %s10148_s12 = inlined_call_operand.vmem [shape: f32[16,96], index: 12, kind: input, shape index: {}]   ;;  %s10149_s13 = inlined_call_operand.vmem [shape: f32[1,96], index: 13, kind: input, shape index: {}]   ;;  %s10150_s14 = inlined_call_operand.vmem [shape: f32[96,8], index: 14, kind: input, shape index: {}]   ;;  %s10151_s15 = inlined_call_operand.vmem [shape: f32[1,8], index: 15, kind: input, shape index: {}]   ;;  %s10152_s16 = inlined_call_operand.hbm [shape: f32[2,8], index: 16, kind: output, shape index: {}]  }
   0x1   :  { %10170 = sst [smem:[#allocation5_spill]] %s10136_s0 }
   0x2   :  { %v57_v0 = vld [vmem:[%s10138_s2 + $0x8] sm:$0xff]  ;;  %v56_v1 = vld [vmem:[%s10138_s2] sm:$0xff]  ;;  %s10171_s27 = sld [smem:[#allocation5_spill]]  ;;  %vm62_vm0 = vcmask 130048   ;;  %v115_v3 = vld [vmem:[%s10140_s4 + $0x70] sm:$0xff] }
   0x3   :  { %83 = vmatpush.msra.mxu0 %v57_v0  ;;  %v116_v4 = vld [vmem:[%s10140_s4 + $0x78] sm:$0xff]  ;;  %138 = vmatpush.msra.mxu1 %v115_v3  ;;  %v113_v5 = vld [vmem:[%s10140_s4 + $0x60] sm:$0xff]  ;;  %v114_v6 = vld [vmem:[%s10140_s4 + $0x68] sm:$0xff] }
   0x4   :  { %161 = vmatpush.msra.mxu2 %v116_v4  ;;  %v111_v7 = vld [vmem:[%s10140_s4 + $0x50] sm:$0xff]  ;;  %v112_v8 = vld [vmem:[%s10140_s4 + $0x58] sm:$0xff]  ;;  %v109_v9 = vld [vmem:[%s10140_s4 + $0x40] sm:$0xff] }
   0x5   :  { %84 = vmatpush.msra.mxu0 %v56_v1  ;;  %139 = vmatpush.msra.mxu1 %v113_v5  ;;  %v110_v10 = vld [vmem:[%s10140_s4 + $0x48] sm:$0xff] }
   0x6   :  { %162 = vmatpush.msra.mxu2 %v114_v6 }
   0x7   :  { %140 = vmatpush.msra.mxu1 %v111_v7 }
   0x8   :  { %v54_v2 = vld [vmem:[%s10171_s27] sm:$0xff] }
   0x9   :  { %5620 = vmatmul.msk.f32.vlgmr.msra.gmra.mxu0 %vm62_vm0, %v54_v2 }
   0xa   :  { %21 = vsyncpa [#allocation3], 0  ;;  %163 = vmatpush.msra.mxu2 %v112_v8  ;;  %v107_v11 = vld [vmem:[%s10140_s4 + $0x30] sm:$0xff]  ;;  %141 = vmatpush.msra.mxu1 %v109_v9  ;;  %v108_v12 = vld [vmem:[%s10140_s4 + $0x38] sm:$0xff]  ;;  %vm123_vm1 = vcmask 523264   ;;  %s6489_s2 = smov 56  }
   0xb   :  { %v55_v13 = vld [vmem:[%s10171_s27 + $0x8] sm:$0xff]  ;;  %v105_v14 = vld [vmem:[%s10140_s4 + $0x20] sm:$0xff]  ;;  %v103_v16 = vld [vmem:[%s10140_s4 + $0x10] sm:$0xff]  ;;  %s6490_s19 = smov 64   ;;  %s6491_s20 = smov 120   ;;  %vm179_vm2 = vcmask 64512  }
   0xc   :  { %164 = vmatpush.msra.mxu2 %v110_v10  ;;  %142 = vmatpush.msra.mxu1 %v107_v11  ;;  %v106_v15 = vld [vmem:[%s10140_s4 + $0x28] sm:$0xff]  ;;  %v104_v17 = vld [vmem:[%s10140_s4 + $0x18] sm:$0xff]  ;;  %v101_v18 = vld [vmem:[%s10140_s4] sm:$0xff]  ;;  %s6492_s21 = smov 40   ;;  %s6493_s22 = smov 48  }
   0xd   :  { %v102_v19 = vld [vmem:[%s10140_s4 + $0x8] sm:$0xff]  ;;  %v6306_v20 = vld [vmem:[%s10139_s3] ss:$0 sm:$0xff]  ;;  %s6494_s23 = smov 112   ;;  %s10168_s24 = smov 104  }
   0xe   :  { %165 = vmatpush.msra.mxu2 %v108_v12  ;;  %143 = vmatpush.msra.mxu1 %v105_v14  ;;  %v6672_v25 = vld [vmem:[%s10141_s5] sm:$0x3]  ;;  %s10166_s27 = smov 32   ;;  %s10162_s25 = smov 24  }
   0xf   :  { %v119_v26 = vperm.slane %v6672_v25, 0  ;;  %s6498_s26 = smov 96   ;;  %s10156_s28 = smov 88   ;;  %v120_v50 = vperm.slane %v6672_v25, 1 }
  0x10   :  { %166 = vmatpush.msra.mxu2 %v106_v15  ;;  %144 = vmatpush.msra.mxu1 %v103_v16  ;;  %s10158_s29 = smov 80   ;;  %s10164_s30 = smov 16  }
  0x11   :  { %5621 = vmatmul.msk.f32.gmra.mxu0 %vm62_vm0, %v55_v13  ;;  %s10154_s0 = smov 8   ;;  %s10160_s17 = smov 72  }
  0x12   :  { %167 = vmatpush.msra.mxu2 %v104_v17  ;;  %145 = vmatpush.msra.mxu1 %v101_v18  ;;  %s10177_s3 = smov 72  }
  0x14   :  { %168 = vmatpush.msra.mxu2 %v102_v19 }
  0x86   :  { %v86_v21 = vpop.f32.mrf.mxu0 }
  0x87   :  { %v6657_v22 = vadd.f32 %v6306_v20, %v86_v21 }
  0x89   :  { %5622 = vmatmul.msk.f32.vlgmr.msra.gmra.mxu1 %vm123_vm1, %v6657_v22  ;;  %5624 = vmatmul.msk.f32.vlgmr.msra.gmra.mxu2 %vm123_vm1, %v6657_v22 }
  0x8e   :  { %v89_v23 = vpop.f32.mrf.mxu0 }
  0x8f   :  { %v6663_v24 = vadd.f32 %v6306_v20, %v89_v23 }
  0x91   :  { %5623 = vmatmul.msk.f32.gmra.mxu1 %vm123_vm1, %v6663_v24  ;;  %5625 = vmatmul.msk.f32.gmra.mxu2 %vm123_vm1, %v6663_v24 }
 0x106   :  { %v147_v27 = vpop.f32.mrf.mxu1 }
 0x107   :  { %v148_v28 = vadd.f32 %v147_v27, %v119_v26 }
 0x109   :  { %233 = vrot.lane.b32.xlu2 %v148_v28, %s6489_s2  ;;  %177 = vrot.lane.b32.xlu0 %v148_v28, %s6490_s19 }
 0x10c   :  { %v170_v51 = vpop.f32.mrf.mxu2 }
 0x10d   :  { %v6726_v53 = vadd.f32 %v170_v51, %v120_v50 }
 0x10e   :  { %v150_v29 = vpop.f32.mrf.mxu1 }
 0x10f   :  { %v151_v30 = vadd.f32 %v150_v29, %v119_v26 }
 0x111   :  { %261 = vrot.lane.b32.xlu1 %v151_v30, %s6489_s2  ;;  %231 = vrot.lane.b32.xlu2 %v148_v28, %s6491_s20 }
 0x112   :  { %205 = vrot.lane.b32.xlu0 %v151_v30, %s6490_s19 }
 0x114   :  { %v173_v57 = vpop.f32.mrf.mxu2 }
 0x115   :  { %v6735_v60 = vadd.f32 %v173_v57, %v120_v50 }
 0x117   :  { %v6261_v57 = vpack.i.bf16 %v6726_v53, %v6735_v60 }
 0x119   :  { %259 = vrot.lane.b32.xlu1 %v151_v30, %s6491_s20  ;;  %345 = vrot.lane.b32.xlu2 %v148_v28, %s6492_s21 }
 0x11a   :  { %317 = vrot.lane.b32.xlu0 %v151_v30, %s6493_s22 }
 0x121   :  { %289 = vrot.lane.b32.xlu1 %v148_v28, %s6493_s22  ;;  %287 = vrot.lane.b32.xlu2 %v148_v28, %s6494_s23 }
 0x122   :  { %343 = vrot.lane.b32.xlu0 %v148_v28, %s10168_s24 }
 0x129   :  { %401 = vrot.lane.b32.xlu1 %v148_v28, %s10166_s27  ;;  %457 = vrot.lane.b32.xlu2 %v148_v28, %s10162_s25 }
 0x12a   :  { %399 = vrot.lane.b32.xlu0 %v148_v28, %s6498_s26 }
 0x131   :  { %455 = vrot.lane.b32.xlu1 %v148_v28, %s10156_s28  ;;  %511 = vrot.lane.b32.xlu2 %v148_v28, %s10158_s29 }
 0x132   :  { %373 = vrot.lane.b32.xlu0 %v151_v30, %s6492_s21 }
 0x139   :  { %315 = vrot.lane.b32.xlu1 %v151_v30, %s6494_s23  ;;  %371 = vrot.lane.b32.xlu2 %v151_v30, %s10168_s24 }
 0x13a   :  { %513 = vrot.lane.b32.xlu0 %v148_v28, %s10164_s30 }
 0x141   :  { %569 = vrot.lane.b32.xlu1 %v148_v28, %s10154_s0  ;;  %485 = vrot.lane.b32.xlu2 %v151_v30, %s10162_s25 }
 0x142   :  { %427 = vrot.lane.b32.xlu0 %v151_v30, %s6498_s26 }
 0x149   :  { %429 = vrot.lane.b32.xlu1 %v151_v30, %s10166_s27  ;;  %539 = vrot.lane.b32.xlu2 %v151_v30, %s10158_s29  ;;  %s10174_s27 = smov 16  }
 0x14a   :  { %541 = vrot.lane.b32.xlu0 %v151_v30, %s10164_s30 }
 0x151   :  { %483 = vrot.lane.b32.xlu1 %v151_v30, %s10156_s28 }
 0x152   :  { %567 = vrot.lane.b32.xlu0 %v148_v28, %s10160_s17 }
 0x159   :  { %597 = vrot.lane.b32.xlu1 %v151_v30, %s10154_s0  ;;  %s10176_s0 = smov 88  }
 0x15a   :  { %595 = vrot.lane.b32.xlu0 %v151_v30, %s10160_s17 }
 0x163   :  { %v234_v31 = vpop.permute.xlu2 %233 }
 0x164   :  { %5630 = vmatpush.xpose.msk.msrb.mxu0 %vm179_vm2, %v234_v31 }
 0x16b   :  { %v232_v32 = vpop.permute.xlu2 %231 }
 0x16c   :  { %5631 = vmatmul.msk.f32.vlgmr.msrb.gmra.mxu0 %vm179_vm2, %v232_v32 }
 0x173   :  { %v346_v33 = vpop.permute.xlu2 %345 }
 0x174   :  { %5638 = vmatpush.xpose.msk.msrb.mxu2 %vm179_vm2, %v346_v33 }
 0x17b   :  { %v288_v34 = vpop.permute.xlu2 %287  ;;  %v178_v35 = vpop.permute.xlu0 %177 }
 0x17c   :  { %5626 = vmatpush.xpose.msk.msra.mxu3 %vm179_vm2, %v178_v35 }
 0x17f   :  { %5627 = vmatmul.msk.f32.vlgmr.msra.gmra.mxu3 %vm179_vm2, %v148_v28 }
 0x183   :  { %v262_v36 = vpop.permute.xlu1 %261  ;;  %v458_v37 = vpop.permute.xlu2 %457 }
 0x184   :  { %v206_v38 = vpop.permute.xlu0 %205  ;;  %5646 = vmatpush.xpose.msk.msrb.mxu1 %vm179_vm2, %v458_v37 }
 0x185   :  { %5628 = vmatpush.xpose.msk.msrb.mxu3 %vm179_vm2, %v206_v38 }
 0x188   :  { %5629 = vmatmul.msk.f32.vlgmr.msrb.gmra.mxu3 %vm179_vm2, %v151_v30 }
 0x189   :  { %5632 = vmatpush.xpose.msk.msra.mxu3 %vm179_vm2, %v262_v36 }
 0x18b   :  { %v260_v39 = vpop.permute.xlu1 %259  ;;  %v512_v41 = vpop.permute.xlu2 %511 }
 0x18c   :  { %v318_v40 = vpop.permute.xlu0 %317 }
 0x18d   :  { %5636 = vmatpush.xpose.msk.msrb.mxu3 %vm179_vm2, %v318_v40 }
 0x190   :  { %5633 = vmatmul.msk.f32.vlgmr.msra.gmra.mxu3 %vm179_vm2, %v260_v39 }
 0x193   :  { %v290_v42 = vpop.permute.xlu1 %289  ;;  %v372_v44 = vpop.permute.xlu2 %371 }
 0x194   :  { %v344_v43 = vpop.permute.xlu0 %343  ;;  %5634 = vmatpush.xpose.msk.msra.mxu0 %vm179_vm2, %v290_v42 }
 0x195   :  { %5639 = vmatmul.msk.f32.vlgmr.msrb.gmra.mxu2 %vm179_vm2, %v344_v43 }
 0x197   :  { %5635 = vmatmul.msk.f32.vlgmr.msra.gmra.mxu0 %vm179_vm2, %v288_v34 }
 0x19b   :  { %v402_v45 = vpop.permute.xlu1 %401  ;;  %v486_v49 = vpop.permute.xlu2 %485 }
 0x19c   :  { %v400_v46 = vpop.permute.xlu0 %399  ;;  %5642 = vmatpush.xpose.msk.msrb.mxu0 %vm179_vm2, %v402_v45 }
 0x19f   :  { %5643 = vmatmul.msk.f32.vlgmr.msrb.gmra.mxu0 %vm179_vm2, %v400_v46 }
 0x1a3   :  { %v456_v47 = vpop.permute.xlu1 %455  ;;  %v540_v63 = vpop.permute.xlu2 %539 }
 0x1a4   :  { %v374_v48 = vpop.permute.xlu0 %373  ;;  %5647 = vmatmul.msk.f32.vlgmr.msrb.gmra.mxu1 %vm179_vm2, %v456_v47 }
 0x1a5   :  { %5640 = vmatpush.xpose.msk.msra.mxu2 %vm179_vm2, %v374_v48  ;;  %v6801_v48 = vpack.i.bf16 %v6735_v60, %v6726_v53 }
 0x1a8   :  { %5641 = vmatmul.msk.f32.vlgmr.msra.gmra.mxu2 %vm179_vm2, %v372_v44 }
 0x1a9   :  { %5648 = vmatpush.xpose.msk.msrb.mxu2 %vm179_vm2, %v486_v49 }
 0x1ab   :  { %v316_v52 = vpop.permute.xlu1 %315 }
 0x1ac   :  { %v514_v54 = vpop.permute.xlu0 %513  ;;  %5637 = vmatmul.msk.f32.vlgmr.msrb.gmra.mxu3 %vm179_vm2, %v316_v52 }
 0x1ad   :  { %5650 = vmatpush.xpose.msk.msra.mxu0 %vm179_vm2, %v514_v54 }
 0x1b0   :  { %5651 = vmatmul.msk.f32.vlgmr.msra.gmra.mxu0 %vm179_vm2, %v512_v41 }
 0x1b1   :  { %817 = vmatpush.msrb.mxu0 %v6726_v53 }
 0x1b3   :  { %v570_v55 = vpop.permute.xlu1 %569 }
 0x1b4   :  { %v428_v56 = vpop.permute.xlu0 %427  ;;  %5654 = vmatpush.xpose.msk.msra.mxu1 %vm179_vm2, %v570_v55 }
 0x1bb   :  { %v430_v58 = vpop.permute.xlu1 %429 }
 0x1bc   :  { %v542_v59 = vpop.permute.xlu0 %541  ;;  %5644 = vmatpush.xpose.msk.msra.mxu3 %vm179_vm2, %v430_v58 }
 0x1bf   :  { %5645 = vmatmul.msk.f32.vlgmr.msra.gmra.mxu3 %vm179_vm2, %v428_v56 }
 0x1c0   :  { %5652 = vmatpush.xpose.msk.msrb.mxu3 %vm179_vm2, %v542_v59 }
 0x1c3   :  { %v484_v61 = vpop.permute.xlu1 %483 }
 0x1c4   :  { %840 = vmatpush.msra.mxu3 %v6735_v60  ;;  %v568_v62 = vpop.permute.xlu0 %567  ;;  %5649 = vmatmul.msk.f32.vlgmr.msrb.gmra.mxu2 %vm179_vm2, %v484_v61 }
 0x1c5   :  { %5655 = vmatmul.msk.f32.vlgmr.msra.gmra.mxu1 %vm179_vm2, %v568_v62 }
 0x1c7   :  { %5653 = vmatmul.msk.f32.vlgmr.msrb.gmra.mxu3 %vm179_vm2, %v540_v63 }
 0x1cb   :  { %v598_v0 = vpop.permute.xlu1 %597 }
 0x1cc   :  { %5656 = vmatpush.xpose.msk.msra.mxu2 %vm179_vm2, %v598_v0  ;;  %v596_v1 = vpop.permute.xlu0 %595 }
 0x1cf   :  { %5657 = vmatmul.msk.f32.vlgmr.msra.gmra.mxu2 %vm179_vm2, %v596_v1 }
 0x1e9   :  { %v256_v2 = vpop.f32.mrf.mxu0 }
 0x1ea   :  { %v629_v3 = vsel %vm179_vm2, %v256_v2, -inf }
 0x1eb   :  { %630 = vmax.xlane.f32.xlu2 %v629_v3 }
 0x202   :  { %v201_v4 = vpop.f32.mrf.mxu3 }
 0x203   :  { %v623_v8 = vsel %vm179_vm2, %v201_v4, -inf }
 0x20b   :  { %v6745_v5 = vpop.f32.mrf.mxu3 }
 0x20c   :  { %v626_v27 = vsel %vm179_vm2, %v6745_v5, -inf }
 0x213   :  { %v284_v6 = vpop.f32.mrf.mxu3 }
 0x214   :  { %v632_v7 = vsel %vm179_vm2, %v284_v6, -inf  ;;  %v6749_v9 = vpop.f32.mrf.mxu0 }
 0x215   :  { %633 = vmax.xlane.f32.xlu1 %v632_v7  ;;  %v635_v49 = vsel %vm179_vm2, %v6749_v9, -inf }
 0x218   :  { %v368_v28 = vpop.f32.mrf.mxu2 }
 0x219   :  { %v641_v29 = vsel %vm179_vm2, %v368_v28, -inf }
 0x21c   :  { %v6755_v12 = vpop.f32.mrf.mxu0 }
 0x21d   :  { %624 = vmax.xlane.f32.xlu1 %v623_v8  ;;  %v647_v13 = vsel %vm179_vm2, %v6755_v12, -inf }
 0x221   :  { %v6759_v14 = vpop.f32.mrf.mxu1 }
 0x222   :  { %v653_v15 = vsel %vm179_vm2, %v6759_v14, -inf }
 0x22b   :  { %v6778_v30 = vpop.f32.mrf.mxu2 }
 0x22c   :  { %v644_v31 = vsel %vm179_vm2, %v6778_v30, -inf }
 0x22d   :  { %v6763_v16 = vpop.f32.mrf.mxu0 }
 0x22e   :  { %v659_v17 = vsel %vm179_vm2, %v6763_v16, -inf }
 0x22f   :  { %v6751_v10 = vpop.f32.mrf.mxu3 }
 0x230   :  { %v638_v11 = vsel %vm179_vm2, %v6751_v10, -inf }
 0x231   :  { %639 = vmax.xlane.f32.xlu1 %v638_v11 }
 0x239   :  { %648 = vmax.xlane.f32.xlu1 %v647_v13 }
 0x241   :  { %654 = vmax.xlane.f32.xlu1 %v653_v15 }
 0x242   :  { %v6767_v18 = vpop.f32.mrf.mxu1  ;;  %v6782_v32 = vpop.f32.mrf.mxu3 }
 0x243   :  { %v665_v19 = vsel %vm179_vm2, %v6767_v18, -inf  ;;  %v650_v35 = vsel %vm179_vm2, %v6782_v32, -inf }
 0x247   :  { %v6786_v37 = vpop.f32.mrf.mxu2 }
 0x248   :  { %v656_v40 = vsel %vm179_vm2, %v6786_v37, -inf }
 0x249   :  { %660 = vmax.xlane.f32.xlu1 %v659_v17 }
 0x24a   :  { %v6791_v44 = vpop.f32.mrf.mxu3 }
 0x24b   :  { %v662_v45 = vsel %vm179_vm2, %v6791_v44, -inf }
 0x251   :  { %666 = vmax.xlane.f32.xlu1 %v665_v19 }
 0x252   :  { %v6818_v3 = vpop.f32.mrf.mxu2 }
 0x25e   :  { %v631_v20 = vpop.xlane.xlu2 %630 }
 0x25f   :  { %v673_v21 = vsub.f32 %v256_v2, %v631_v20 }
 0x261   :  { %v691_v23 = vmul.f32 1.442695, %v673_v21 }
 0x263   :  { %6309 = vpow2.f32 %v691_v23 }
 0x269   :  { %v6771_v25 = vpop.eup %6309 }
 0x26a   :  { %v725_v26 = vsel %vm179_vm2, %v6771_v25, 0.0 }
 0x26b   :  { %726 = vadd.xlane.f32.xlu0 %v725_v26 }
 0x273   :  { %627 = vmax.xlane.f32.xlu0 %v626_v27 }
 0x27b   :  { %642 = vmax.xlane.f32.xlu0 %v641_v29 }
 0x283   :  { %645 = vmax.xlane.f32.xlu0 %v644_v31 }
 0x288   :  { %v634_v33 = vpop.xlane.xlu1 %633 }
 0x289   :  { %v674_v34 = vsub.f32 %v284_v6, %v634_v33 }
 0x28b   :  { %v693_v36 = vmul.f32 1.442695, %v674_v34  ;;  %651 = vmax.xlane.f32.xlu0 %v650_v35 }
 0x28d   :  { %6311 = vpow2.f32 %v693_v36 }
 0x290   :  { %v625_v38 = vpop.xlane.xlu1 %624 }
 0x291   :  { %v671_v39 = vsub.f32 %v201_v4, %v625_v38 }
 0x293   :  { %v6312_v41 = vpop.eup %6311  ;;  %v687_v42 = vmul.f32 1.442695, %v671_v39  ;;  %657 = vmax.xlane.f32.xlu0 %v656_v40 }
 0x294   :  { %v728_v43 = vsel %vm179_vm2, %v6312_v41, 0.0 }
 0x295   :  { %6313 = vpow2.f32 %v687_v42  ;;  %729 = vadd.xlane.f32.xlu2 %v728_v43 }
 0x29b   :  { %v6795_v46 = vpop.eup %6313  ;;  %663 = vmax.xlane.f32.xlu0 %v662_v45 }
 0x29c   :  { %v719_v47 = vsel %vm179_vm2, %v6795_v46, 0.0 }
 0x29d   :  { %720 = vadd.xlane.f32.xlu1 %v719_v47 }
 0x2a4   :  { %v6807_v51 = vpop.xlane.xlu1 %639 }
 0x2a5   :  { %v676_v43 = vsub.f32 %v6751_v10, %v6807_v51 }
 0x2a7   :  { %v697_v45 = vmul.f32 1.442695, %v676_v43 }
 0x2ac   :  { %v649_v56 = vpop.xlane.xlu1 %648 }
 0x2ad   :  { %6257 = vrot.lane.b32.xlu2 %v6801_v48, %s6491_s20  ;;  %v679_v62 = vsub.f32 %v6755_v12, %v649_v56 }
 0x2af   :  { %v703_v2 = vmul.f32 1.442695, %v679_v62 }
 0x2b4   :  { %v655_v1 = vpop.xlane.xlu1 %654 }
 0x2b5   :  { %v681_v12 = vsub.f32 %v6759_v14, %v655_v1 }
 0x2b7   :  { %v707_v17 = vmul.f32 1.442695, %v681_v12  ;;  %v94_v12 = vld [vmem:[%s10142_s6 + $0x8] sm:$0xff] }
 0x2b8   :  { %920 = vmatpush.msra.mxu0 %v94_v12 }
 0x2bc   :  { %v6826_v7 = vpop.xlane.xlu1 %660 }
 0x2c4   :  { %v667_v13 = vpop.xlane.xlu1 %666 }
 0x2c5   :  { %v685_v36 = vsub.f32 %v6767_v18, %v667_v13 }
 0x2c7   :  { %v715_v38 = vmul.f32 1.442695, %v685_v36 }
 0x2d6   :  { %636 = vmax.xlane.f32.xlu2 %v635_v49 }
 0x2de   :  { %v727_v50 = vpop.xlane.xlu0 %726 }
 0x2e6   :  { %v628_v52 = vpop.xlane.xlu0 %627 }
 0x2e7   :  { %v672_v54 = vsub.f32 %v6745_v5, %v628_v52  ;;  %v668_v5 = vsel %vm179_vm2, %v6818_v3, -inf }
 0x2e9   :  { %v689_v55 = vmul.f32 1.442695, %v672_v54 }
 0x2eb   :  { %6315 = vpow2.f32 %v689_v55 }
 0x2ee   :  { %6262 = vrot.lane.b32.xlu2 %v6261_v57, %s6494_s23  ;;  %v643_v58 = vpop.xlane.xlu0 %642 }
 0x2ef   :  { %v677_v59 = vsub.f32 %v368_v28, %v643_v58 }
 0x2f1   :  { %v6813_v61 = vpop.eup %6315  ;;  %v699_v63 = vmul.f32 1.442695, %v677_v59 }
 0x2f2   :  { %v722_v0 = vsel %vm179_vm2, %v6813_v61, 0.0 }
 0x2f3   :  { %6317 = vpow2.f32 %v699_v63  ;;  %723 = vadd.xlane.f32.xlu0 %v722_v0 }
 0x2f4   :  { %6319 = vpow2.f32 %v703_v2 }
 0x2f5   :  { %6321 = vrcp.f32 %v727_v50 }
 0x2f9   :  { %v6820_v4 = vpop.eup %6317 }
 0x2fa   :  { %v737_v6 = vsel %vm179_vm2, %v6820_v4, 0.0  ;;  %v6828_v8 = vpop.eup %6319 }
 0x2fb   :  { %669 = vmax.xlane.f32.xlu0 %v668_v5  ;;  %738 = vadd.xlane.f32.xlu1 %v737_v6  ;;  %v743_v11 = vsel %vm179_vm2, %v6828_v8, 0.0  ;;  %v6322_v19 = vpop.eup %6321 }
 0x2fc   :  { %v785_v28 = vmul.f32 %v6322_v19, %v6771_v25  ;;  %v646_v25 = vpop.xlane.xlu0 %645 }
 0x2fd   :  { %v678_v54 = vsub.f32 %v6778_v30, %v646_v25 }
 0x2ff   :  { %v701_v57 = vmul.f32 1.442695, %v678_v54 }
 0x303   :  { %744 = vadd.xlane.f32.xlu0 %v743_v11 }
 0x304   :  { %v652_v35 = vpop.xlane.xlu0 %651 }
 0x308   :  { %v730_v15 = vpop.xlane.xlu2 %729 }
 0x309   :  { %6323 = vrcp.f32 %v730_v15 }
 0x30a   :  { %6325 = vpow2.f32 %v707_v17 }
 0x30c   :  { %v658_v39 = vpop.xlane.xlu0 %657 }
 0x30d   :  { %v682_v40 = vsub.f32 %v6786_v37, %v658_v39  ;;  %v680_v37 = vsub.f32 %v6782_v32, %v652_v35 }
 0x30f   :  { %v6324_v20 = vpop.eup %6323  ;;  %v705_v49 = vmul.f32 1.442695, %v680_v37 }
 0x310   :  { %v6258_v21 = vpop.permute.xlu2 %6257  ;;  %v721_v23 = vpop.xlane.xlu1 %720  ;;  %v786_v29 = vmul.f32 %v6324_v20, %v6312_v41  ;;  %v709_v41 = vmul.f32 1.442695, %v682_v40 }
 0x311   :  { %v6260_v26 = vunpack.i.h.bf16 %v6258_v21  ;;  %v6259_v27 = vunpack.i.l.bf16 %v6258_v21  ;;  %6327 = vrcp.f32 %v721_v23  ;;  %v6834_v31 = vpop.eup %6325  ;;  %v93_v21 = vld [vmem:[%s10142_s6] sm:$0xff] }
 0x312   :  { %v749_v14 = vsel %vm179_vm2, %v6834_v31, 0.0  ;;  %6329 = vpow2.f32 %v715_v38  ;;  %949 = vmatpush.msrb.mxu3 %v93_v21  ;;  %v96_v21 = vld [vmem:[%s10142_s6 + $0x18] sm:$0xff] }
 0x313   :  { %867 = vmatpush.msrb.mxu1 %v6259_v27  ;;  %894 = vmatpush.msrb.mxu2 %v6260_v26  ;;  %6331 = vpow2.f32 %v709_v41 }
 0x314   :  { %5660 = vmatmul.msk.f32.vlgmr.msrb.gmra.mxu1 %vm179_vm2, %v785_v28  ;;  %5661 = vmatmul.msk.f32.vlgmr.msrb.gmra.mxu2 %vm179_vm2, %v786_v29  ;;  %6333 = vpow2.f32 %v697_v45  ;;  %v664_v52 = vpop.xlane.xlu0 %663  ;;  %v683_v29 = vsub.f32 %v6763_v16, %v6826_v7 }
 0x315   :  { %6267 = vrot.lane.b32.xlu1 %v6801_v48, %s10168_s24  ;;  %6335 = vpow2.f32 %v705_v49  ;;  %v684_v56 = vsub.f32 %v6791_v44, %v664_v52  ;;  %s10173_s24 = smov 32  }
 0x317   :  { %v6328_v33 = vpop.eup %6327  ;;  %750 = vadd.xlane.f32.xlu2 %v749_v14  ;;  %v713_v58 = vmul.f32 1.442695, %v684_v56  ;;  %v711_v14 = vmul.f32 1.442695, %v683_v29 }
 0x318   :  { %v783_v34 = vmul.f32 %v6328_v33, %v6795_v46  ;;  %v6850_v42 = vpop.eup %6329 }
 0x319   :  { %v761_v18 = vsel %vm179_vm2, %v6850_v42, 0.0  ;;  %v6856_v46 = vpop.eup %6331 }
 0x31a   :  { %5658 = vmatmul.msk.f32.vlgmr.msrb.gmra.mxu0 %vm179_vm2, %v783_v34  ;;  %v752_v47 = vsel %vm179_vm2, %v6856_v46, 0.0  ;;  %v6862_v51 = vpop.eup %6333 }
 0x31b   :  { %v734_v32 = vsel %vm179_vm2, %v6862_v51, 0.0  ;;  %v6868_v0 = vpop.eup %6335 }
 0x31c   :  { %v746_v44 = vsel %vm179_vm2, %v6868_v0, 0.0 }
 0x32f   :  { %6277 = vrot.lane.b32.xlu2 %v6801_v48, %s10156_s28 }
 0x337   :  { %1289 = vrot.lane.b32.xlu2 %v6726_v53, %s10158_s29 }
 0x33f   :  { %762 = vadd.xlane.f32.xlu1 %v761_v18 }
 0x347   :  { %753 = vadd.xlane.f32.xlu1 %v752_v47 }
 0x349   :  { %v637_v50 = vpop.xlane.xlu2 %636 }
 0x34a   :  { %v675_v10 = vsub.f32 %v6749_v9, %v637_v50 }
 0x34c   :  { %v695_v55 = vmul.f32 1.442695, %v675_v10 }
 0x34e   :  { %6337 = vpow2.f32 %v695_v55 }
 0x34f   :  { %735 = vadd.xlane.f32.xlu1 %v734_v32  ;;  %6339 = vpow2.f32 %v701_v57 }
 0x350   :  { %6341 = vpow2.f32 %v713_v58 }
 0x351   :  { %v6263_v59 = vpop.permute.xlu2 %6262 }
 0x352   :  { %v6265_v62 = vunpack.i.h.bf16 %v6263_v59  ;;  %v6264_v63 = vunpack.i.l.bf16 %v6263_v59 }
 0x354   :  { %v6870_v9 = vpop.eup %6337  ;;  %978 = vmatpush.msra.mxu1 %v6265_v62  ;;  %1004 = vmatpush.msra.mxu2 %v6264_v63 }
 0x355   :  { %v731_v30 = vsel %vm179_vm2, %v6870_v9, 0.0  ;;  %v6876_v1 = vpop.eup %6339 }
 0x356   :  { %732 = vadd.xlane.f32.xlu0 %v731_v30  ;;  %v6878_v2 = vpop.eup %6341  ;;  %v740_v5 = vsel %vm179_vm2, %v6876_v1, 0.0 }
 0x357   :  { %747 = vadd.xlane.f32.xlu1 %v746_v44  ;;  %v758_v6 = vsel %vm179_vm2, %v6878_v2, 0.0 }
 0x35e   :  { %741 = vadd.xlane.f32.xlu0 %v740_v5 }
 0x35f   :  { %759 = vadd.xlane.f32.xlu1 %v758_v6 }
 0x366   :  { %v724_v11 = vpop.xlane.xlu0 %723 }
 0x367   :  { %6343 = vrcp.f32 %v724_v11 }
 0x36d   :  { %v6344_v13 = vpop.eup %6343 }
 0x36e   :  { %v784_v15 = vmul.f32 %v6344_v13, %v6813_v61  ;;  %v670_v17 = vpop.xlane.xlu0 %669 }
 0x36f   :  { %v686_v19 = vsub.f32 %v6818_v3, %v670_v17  ;;  %v739_v3 = vpop.xlane.xlu1 %738 }
 0x370   :  { %5659 = vmatmul.msk.f32.vlgmr.msra.gmra.mxu3 %vm179_vm2, %v784_v15 }
 0x371   :  { %v717_v20 = vmul.f32 1.442695, %v686_v19  ;;  %1113 = vmatpush.msra.mxu3 %v96_v21  ;;  %v1634_v21 = vld [vmem:[%s10144_s8 + $0x388] sm:$0xff] }
 0x372   :  { %6272 = vrot.lane.b32.xlu0 %v6801_v48, %s6498_s26 }
 0x373   :  { %6345 = vpow2.f32 %v717_v20  ;;  %v95_v20 = vld [vmem:[%s10142_s6 + $0x10] sm:$0xff] }
 0x374   :  { %6347 = vpow2.f32 %v711_v14  ;;  %1030 = vmatpush.msrb.mxu1 %v95_v20 }
 0x376   :  { %v745_v7 = vpop.xlane.xlu0 %744 }
 0x378   :  { %1315 = vrot.lane.b32.xlu1 %v6735_v60, %s10158_s29 }
 0x379   :  { %v6897_v23 = vpop.eup %6345 }
 0x37a   :  { %1372 = vrot.lane.b32.xlu0 %v6726_v53, %s10160_s17  ;;  %v764_v61 = vsel %vm179_vm2, %v6897_v23, 0.0  ;;  %v6908_v34 = vpop.eup %6347 }
 0x37b   :  { %765 = vadd.xlane.f32.xlu2 %v764_v61  ;;  %v755_v25 = vsel %vm179_vm2, %v6908_v34, 0.0 }
 0x387   :  { %v6268_v48 = vpop.permute.xlu1 %6267 }
 0x388   :  { %v6270_v26 = vunpack.i.h.bf16 %v6268_v48  ;;  %v6269_v27 = vunpack.i.l.bf16 %v6268_v48  ;;  %v98_v48 = vld [vmem:[%s10142_s6 + $0x28] sm:$0xff] }
 0x38a   :  { %1061 = vmatpush.msrb.mxu2 %v6269_v27  ;;  %1087 = vmatpush.msrb.mxu0 %v6270_v26 }
 0x391   :  { %v869_v28 = vpop.f32.mrf.mxu1 }
 0x392   :  { %5662 = vmatmul.msk.f32.vlgmr.msra.gmra.mxu0 %vm179_vm2, %v869_v28 }
 0x397   :  { %v819_v33 = vpop.f32.mrf.mxu0  ;;  %v896_v53 = vpop.f32.mrf.mxu2 }
 0x398   :  { %5664 = vmatmul.msk.f32.vlgmr.msrb.gmra.mxu3 %vm179_vm2, %v819_v33 }
 0x399   :  { %1279 = vmatpush.msrb.mxu3 %v98_v48  ;;  %v1619_v48 = vld [vmem:[%s10144_s8 + $0x310] sm:$0xff] }
 0x39a   :  { %5663 = vmatmul.msk.f32.gmra.mxu0 %vm179_vm2, %v896_v53 }
 0x3a4   :  { %756 = vadd.xlane.f32.xlu0 %v755_v25  ;;  %v100_v25 = vld [vmem:[%s10142_s6 + $0x38] sm:$0xff] }
 0x3b2   :  { %v6912_v35 = vpop.xlane.xlu1 %762 }
 0x3b8   :  { %1398 = vrot.lane.b32.xlu0 %v6735_v60, %s10160_s17  ;;  %v751_v60 = vpop.xlane.xlu2 %750 }
 0x3ba   :  { %v754_v16 = vpop.xlane.xlu1 %753 }
 0x3c0   :  { %v6278_v52 = vpop.permute.xlu2 %6277 }
 0x3c1   :  { %v6280_v58 = vunpack.i.h.bf16 %v6278_v52  ;;  %v6279_v59 = vunpack.i.l.bf16 %v6278_v52 }
 0x3c2   :  { %v736_v36 = vpop.xlane.xlu1 %735 }
 0x3c3   :  { %6349 = vrcp.f32 %v736_v36 }
 0x3c4   :  { %6351 = vrcp.f32 %v739_v3 }
 0x3c8   :  { %v1290_v62 = vpop.permute.xlu2 %1289 }
 0x3c9   :  { %v6350_v38 = vpop.eup %6349  ;;  %v733_v39 = vpop.xlane.xlu0 %732 }
 0x3ca   :  { %v788_v40 = vmul.f32 %v6350_v38, %v6862_v51  ;;  %6353 = vrcp.f32 %v733_v39  ;;  %v6352_v41 = vpop.eup %6351  ;;  %v748_v49 = vpop.xlane.xlu1 %747 }
 0x3cb   :  { %v789_v37 = vmul.f32 %v6352_v41, %v6820_v4 }
 0x3cc   :  { %5667 = vmatmul.msk.f32.vlgmr.msra.gmra.mxu2 %vm179_vm2, %v788_v40 }
 0x3d0   :  { %v6354_v43 = vpop.eup %6353 }
 0x3d1   :  { %v787_v18 = vmul.f32 %v6354_v43, %v6870_v9  ;;  %v742_v45 = vpop.xlane.xlu0 %741 }
 0x3d2   :  { %6355 = vrcp.f32 %v742_v45  ;;  %v760_v51 = vpop.xlane.xlu1 %759 }
 0x3d3   :  { %5666 = vmatmul.msk.f32.vlgmr.msra.gmra.mxu1 %vm179_vm2, %v787_v18  ;;  %6357 = vrcp.f32 %v745_v7 }
 0x3d4   :  { %5670 = vmatmul.msk.f32.vlgmr.msrb.gmra.mxu2 %vm179_vm2, %v789_v37  ;;  %6359 = vrcp.f32 %v748_v49 }
 0x3d5   :  { %6361 = vrcp.f32 %v751_v60 }
 0x3d6   :  { %6363 = vrcp.f32 %v754_v16 }
 0x3d7   :  { %6365 = vrcp.f32 %v760_v51 }
 0x3d8   :  { %v6356_v47 = vpop.eup %6355 }
 0x3d9   :  { %v790_v50 = vmul.f32 %v6356_v47, %v6876_v1  ;;  %v6358_v10 = vpop.eup %6357 }
 0x3da   :  { %v6360_v54 = vpop.eup %6359  ;;  %v791_v32 = vmul.f32 %v6358_v10, %v6828_v8 }
 0x3db   :  { %5671 = vmatmul.msk.f32.vlgmr.msrb.gmra.mxu0 %vm179_vm2, %v790_v50  ;;  %v792_v57 = vmul.f32 %v6360_v54, %v6868_v0  ;;  %v6362_v63 = vpop.eup %6361  ;;  %v6975_v54 = vld [vmem:[%s10143_s7] sm:$0xff] }
 0x3dc   :  { %v6364_v30 = vpop.eup %6363  ;;  %v793_v8 = vmul.f32 %v6362_v63, %v6834_v31 }
 0x3dd   :  { %v794_v0 = vmul.f32 %v6364_v30, %v6856_v46  ;;  %v6366_v1 = vpop.eup %6365 }
 0x3de   :  { %v796_v6 = vmul.f32 %v6366_v1, %v6878_v2 }
 0x3e4   :  { %v6273_v4 = vpop.permute.xlu0 %6272 }
 0x3e5   :  { %v6275_v55 = vunpack.i.h.bf16 %v6273_v4  ;;  %v6274_v56 = vunpack.i.l.bf16 %v6273_v4 }
 0x3e7   :  { %1144 = vmatpush.msra.mxu2 %v6274_v56  ;;  %1170 = vmatpush.msra.mxu0 %v6275_v55 }
 0x3e8   :  { %5674 = vmatmul.msk.f32.vlgmr.msra.gmra.mxu2 %vm179_vm2, %v791_v32  ;;  %5675 = vmatmul.msk.f32.vlgmr.msra.gmra.mxu0 %vm179_vm2, %v792_v57  ;;  %v1455_v57 = vperm.slane %v6975_v54, 0 }
 0x3e9   :  { %1227 = vmatpush.msrb.mxu2 %v6279_v59  ;;  %1253 = vmatpush.msrb.mxu0 %v6280_v58 }
 0x3ea   :  { %v1316_v9 = vpop.permute.xlu1 %1315 }
 0x3eb   :  { %1310 = vmatpush.msra.mxu2 %v1290_v62  ;;  %1336 = vmatpush.msra.mxu0 %v1316_v9 }
 0x3ec   :  { %v1373_v44 = vpop.permute.xlu0 %1372 }
 0x3ee   :  { %v766_v31 = vpop.xlane.xlu2 %765 }
 0x3f0   :  { %5678 = vmatmul.msk.f32.vlgmr.msrb.gmra.mxu2 %vm179_vm2, %v793_v8  ;;  %5679 = vmatmul.msk.f32.vlgmr.msrb.gmra.mxu0 %vm179_vm2, %v794_v0 }
 0x3f1   :  { %1393 = vmatpush.msrb.mxu2 %v1373_v44 }
 0x3f3   :  { %v842_v5 = vpop.f32.mrf.mxu3 }
 0x3f4   :  { %5665 = vmatmul.msk.f32.gmra.mxu3 %vm179_vm2, %v842_v5 }
 0x3f8   :  { %5683 = vmatmul.msk.f32.vlgmr.msra.gmra.mxu0 %vm179_vm2, %v796_v6 }
 0x417   :  { %v757_v11 = vpop.xlane.xlu0 %756 }
 0x418   :  { %6367 = vrcp.f32 %v757_v11 }
 0x419   :  { %6369 = vrcp.f32 %v6912_v35 }
 0x41a   :  { %6371 = vrcp.f32 %v766_v31 }
 0x41b   :  { %v951_v38 = vpop.f32.mrf.mxu3 }
 0x41e   :  { %v6368_v12 = vpop.eup %6367 }
 0x41f   :  { %v795_v46 = vmul.f32 %v6368_v12, %v6908_v34  ;;  %v6370_v13 = vpop.eup %6369  ;;  %v99_v34 = vld [vmem:[%s10142_s6 + $0x30] sm:$0xff] }
 0x420   :  { %v6372_v15 = vpop.eup %6371  ;;  %v797_v17 = vmul.f32 %v6370_v13, %v6850_v42  ;;  %v97_v42 = vld [vmem:[%s10142_s6 + $0x20] sm:$0xff] }
 0x421   :  { %5682 = vmatmul.msk.f32.vlgmr.msra.gmra.mxu2 %vm179_vm2, %v795_v46  ;;  %v798_v2 = vmul.f32 %v6372_v15, %v6897_v23  ;;  %1196 = vmatpush.msra.mxu1 %v97_v42  ;;  %v922_v23 = vpop.f32.mrf.mxu0  ;;  %v1635_v42 = vld [vmem:[%s10144_s8 + $0x390] sm:$0xff] }
 0x422   :  { %v952_v47 = vadd.f32 %v951_v38, %v922_v23  ;;  %1722 = vmatpush.msra.mxu2 %v1634_v21  ;;  %v1636_v23 = vld [vmem:[%s10144_s8 + $0x398] sm:$0xff]  ;;  %v1571_v38 = vld [vmem:[%s10144_s8 + $0x190] sm:$0xff] }
 0x429   :  { %5686 = vmatmul.msk.f32.vlgmr.msrb.gmra.mxu2 %vm179_vm2, %v797_v17  ;;  %v925_v26 = vpop.f32.mrf.mxu0  ;;  %v6504_v17 = vmov 64.0  }
 0x42a   :  { %v1399_v19 = vpop.permute.xlu0 %1398  ;;  %6373 = vrcp.f32 %v6504_v17  ;;  %v1590_v17 = vld [vmem:[%s10144_s8 + $0x228] sm:$0xff] }
 0x42b   :  { %1419 = vmatpush.msrb.mxu0 %v1399_v19 }
 0x42c   :  { %5687 = vmatmul.msk.f32.vlgmr.msrb.gmra.mxu0 %vm179_vm2, %v798_v2 }
 0x42d   :  { %1745 = vmatpush.msra.mxu0 %v1635_v42  ;;  %v1573_v42 = vld [vmem:[%s10144_s8 + $0x1a0] sm:$0xff] }
 0x42f   :  { %1746 = vmatpush.msra.mxu0 %v1619_v48 }
 0x430   :  { %v6374_v2 = vpop.eup %6373 }
 0x431   :  { %v1467_v19 = vmul.f32 64.0, %v6374_v2  ;;  %vm1471_vm3 = vweird.f32 %v6374_v2 }
 0x433   :  { %v1468_v20 = vsub.f32 1.0, %v1467_v19  ;;  %v1592_v19 = vld [vmem:[%s10144_s8 + $0x238] sm:$0xff] }
 0x44f   :  { %v1006_v61 = vpop.f32.mrf.mxu2 }
 0x450   :  { %v980_v3 = vpop.f32.mrf.mxu1 }
 0x451   :  { %5668 = vmatmul.msk.f32.vlgmr.msrb.gmra.mxu1 %vm179_vm2, %v980_v3  ;;  %v1618_v3 = vld [vmem:[%s10144_s8 + $0x308] sm:$0xff] }
 0x452   :  { %1362 = vmatpush.msrb.mxu1 %v99_v34  ;;  %1723 = vmatpush.msra.mxu2 %v1618_v3  ;;  %v1586_v34 = vld [vmem:[%s10144_s8 + $0x208] sm:$0xff] }
 0x457   :  { %v1063_v27 = vpop.f32.mrf.mxu2 }
 0x458   :  { %5672 = vmatmul.msk.f32.vlgmr.msra.gmra.mxu3 %vm179_vm2, %v1063_v27  ;;  %v1089_v28 = vpop.f32.mrf.mxu0  ;;  %v1469_v27 = vmul.f32 %v6374_v2, %v1468_v20 }
 0x459   :  { %5669 = vmatmul.msk.f32.gmra.mxu1 %vm179_vm2, %v1006_v61  ;;  %1445 = vmatpush.msra.mxu3 %v100_v25  ;;  %v1617_v61 = vld [vmem:[%s10144_s8 + $0x300] sm:$0xff]  ;;  %v1587_v25 = vld [vmem:[%s10144_s8 + $0x210] sm:$0xff] }
 0x460   :  { %5673 = vmatmul.msk.f32.gmra.mxu3 %vm179_vm2, %v1089_v28  ;;  %v1601_v28 = vld [vmem:[%s10144_s8 + $0x280] sm:$0xff] }
 0x465   :  { %v1172_v14 = vpop.f32.mrf.mxu0 }
 0x46b   :  { %v1146_v29 = vpop.f32.mrf.mxu2 }
 0x46c   :  { %5676 = vmatmul.msk.f32.vlgmr.msra.gmra.mxu1 %vm179_vm2, %v1146_v29  ;;  %v1602_v29 = vld [vmem:[%s10144_s8 + $0x288] sm:$0xff] }
 0x46d   :  { %v1255_v53 = vpop.f32.mrf.mxu0  ;;  %1724 = vmatpush.msra.mxu2 %v1602_v29  ;;  %v1558_v29 = vld [vmem:[%s10144_s8 + $0x128] sm:$0xff] }
 0x46f   :  { %1725 = vmatpush.msra.mxu2 %v1586_v34  ;;  %v1541_v34 = vld [vmem:[%s10144_s8 + $0xa0] sm:$0xff] }
 0x473   :  { %v1229_v33 = vpop.f32.mrf.mxu2 }
 0x474   :  { %5677 = vmatmul.msk.f32.gmra.mxu1 %vm179_vm2, %v1172_v14  ;;  %5680 = vmatmul.msk.f32.vlgmr.msrb.gmra.mxu3 %vm179_vm2, %v1229_v33  ;;  %v1603_v14 = vld [vmem:[%s10144_s8 + $0x290] sm:$0xff]  ;;  %v1604_v33 = vld [vmem:[%s10144_s8 + $0x298] sm:$0xff] }
 0x475   :  { %v1338_v16 = vpop.f32.mrf.mxu0  ;;  %1768 = vmatpush.msrb.mxu3 %v1636_v23  ;;  %1747 = vmatpush.msra.mxu0 %v1603_v14  ;;  %v1574_v23 = vld [vmem:[%s10144_s8 + $0x1a8] sm:$0xff]  ;;  %v1559_v14 = vld [vmem:[%s10144_s8 + $0x130] sm:$0xff] }
 0x477   :  { %v954_v39 = vpop.f32.mrf.mxu3  ;;  %1748 = vmatpush.msra.mxu0 %v1587_v25  ;;  %v1542_v25 = vld [vmem:[%s10144_s8 + $0xa8] sm:$0xff] }
 0x478   :  { %v955_v4 = vadd.f32 %v954_v39, %v925_v26  ;;  %v1620_v26 = vld [vmem:[%s10144_s8 + $0x318] sm:$0xff] }
 0x479   :  { %1769 = vmatpush.msrb.mxu3 %v1620_v26  ;;  %v1572_v39 = vld [vmem:[%s10144_s8 + $0x198] sm:$0xff]  ;;  %1749 = vmatpush.msra.mxu0 %v1571_v38  ;;  %v1526_v38 = vld [vmem:[%s10144_s8 + $0x28] sm:$0xff] }
 0x47a   :  { %v1576_v26 = vld [vmem:[%s10144_s8 + $0x1b8] sm:$0xff] }
 0x47b   :  { %1770 = vmatpush.msrb.mxu3 %v1604_v33  ;;  %v1560_v33 = vld [vmem:[%s10144_s8 + $0x138] sm:$0xff] }
 0x47c   :  { %5681 = vmatmul.msk.f32.gmra.mxu3 %vm179_vm2, %v1255_v53  ;;  %v1585_v53 = vld [vmem:[%s10144_s8 + $0x200] sm:$0xff] }
 0x4a4   :  { %v1312_v35 = vpop.f32.mrf.mxu2 }
 0x4a5   :  { %5684 = vmatmul.msk.f32.vlgmr.msrb.gmra.mxu1 %vm179_vm2, %v1312_v35  ;;  %v1588_v35 = vld [vmem:[%s10144_s8 + $0x218] sm:$0xff] }
 0x4a6   :  { %1771 = vmatpush.msrb.mxu3 %v1588_v35  ;;  %v1543_v35 = vld [vmem:[%s10144_s8 + $0xb0] sm:$0xff] }
 0x4a8   :  { %1772 = vmatpush.msrb.mxu3 %v1572_v39 }
 0x4a9   :  { %v1421_v36 = vpop.f32.mrf.mxu0 }
 0x4ac   :  { %v1395_v7 = vpop.f32.mrf.mxu2 }
 0x4ad   :  { %5685 = vmatmul.msk.f32.gmra.mxu1 %vm179_vm2, %v1338_v16  ;;  %5688 = vmatmul.msk.f32.vlgmr.msra.gmra.mxu3 %vm179_vm2, %v1395_v7  ;;  %v1470_v16 = vadd.f32 %v6374_v2, %v1469_v27  ;;  %v1569_v7 = vld [vmem:[%s10144_s8 + $0x180] sm:$0xff] }
 0x4ae   :  { %v1557_v27 = vld [vmem:[%s10144_s8 + $0x120] sm:$0xff] }
 0x4b5   :  { %5689 = vmatmul.msk.f32.gmra.mxu3 %vm179_vm2, %v1421_v36  ;;  %v1570_v36 = vld [vmem:[%s10144_s8 + $0x188] sm:$0xff] }
 0x4b6   :  { %1726 = vmatpush.msra.mxu2 %v1570_v36  ;;  %v1525_v36 = vld [vmem:[%s10144_s8 + $0x20] sm:$0xff] }
 0x4ce   :  { %v1032_v40 = vpop.f32.mrf.mxu1 }
 0x4cf   :  { %v1038_v49 = vadd.f32 %v1032_v40, %v952_v47  ;;  %v1553_v40 = vld [vmem:[%s10144_s8 + $0x100] sm:$0xff]  ;;  %v1539_v47 = vld [vmem:[%s10144_s8 + $0x90] sm:$0xff] }
 0x4d6   :  { %v1035_v43 = vpop.f32.mrf.mxu1 }
 0x4d7   :  { %v1039_v56 = vadd.f32 %v1035_v43, %v955_v4  ;;  %v1555_v43 = vld [vmem:[%s10144_s8 + $0x110] sm:$0xff] }
 0x4d8   :  { %1750 = vmatpush.msra.mxu0 %v1555_v43 }
 0x4da   :  { %1751 = vmatpush.msra.mxu0 %v1539_v47 }
 0x4db   :  { %v1115_v41 = vpop.f32.mrf.mxu3 }
 0x4dc   :  { %v1121_v52 = vadd.f32 %v1115_v41, %v1038_v49  ;;  %v1554_v41 = vld [vmem:[%s10144_s8 + $0x108] sm:$0xff]  ;;  %v1540_v49 = vld [vmem:[%s10144_s8 + $0x98] sm:$0xff] }
 0x4dd   :  { %1727 = vmatpush.msra.mxu2 %v1554_v41  ;;  %v1528_v41 = vld [vmem:[%s10144_s8 + $0x38] sm:$0xff] }
 0x4e3   :  { %v1118_v18 = vpop.f32.mrf.mxu3 }
 0x4e4   :  { %v1122_v59 = vadd.f32 %v1118_v18, %v1039_v56  ;;  %v1556_v18 = vld [vmem:[%s10144_s8 + $0x118] sm:$0xff] }
 0x4e5   :  { %1773 = vmatpush.msrb.mxu3 %v1556_v18 }
 0x4e7   :  { %1774 = vmatpush.msrb.mxu3 %v1540_v49  ;;  %v1518_v49 = vperm.slane %v6975_v54, 3 }
 0x4e9   :  { %v1198_v45 = vpop.f32.mrf.mxu1 }
 0x4ea   :  { %v1204_v51 = vadd.f32 %v1198_v45, %v1121_v52  ;;  %v7066_v45 = vsel %vm1471_vm3, %v6374_v2, %v1470_v16  ;;  %v1521_v52 = vld [vmem:[%s10144_s8] sm:$0xff]  ;;  %v1591_v2 = vld [vmem:[%s10144_s8 + $0x230] sm:$0xff] }
 0x4f1   :  { %v1201_v60 = vpop.f32.mrf.mxu1 }
 0x4f2   :  { %v1205_v63 = vadd.f32 %v1201_v60, %v1122_v59  ;;  %v1538_v60 = vld [vmem:[%s10144_s8 + $0x88] sm:$0xff] }
 0x4f3   :  { %1728 = vmatpush.msra.mxu2 %v1538_v60  ;;  %v1515_v60 = vperm.slane %v6975_v54, 2  ;;  %v1547_v54 = vld [vmem:[%s10144_s8 + $0xd0] sm:$0xff] }
 0x4f7   :  { %v1281_v37 = vpop.f32.mrf.mxu3 }
 0x4f8   :  { %v1287_v55 = vadd.f32 %v1281_v37, %v1204_v51  ;;  %v1537_v37 = vld [vmem:[%s10144_s8 + $0x80] sm:$0xff]  ;;  %v1523_v51 = vld [vmem:[%s10144_s8 + $0x10] sm:$0xff] }
 0x4f9   :  { %1752 = vmatpush.msra.mxu0 %v1523_v51 }
 0x4ff   :  { %v1284_v50 = vpop.f32.mrf.mxu3 }
 0x500   :  { %v1288_v8 = vadd.f32 %v1284_v50, %v1205_v63  ;;  %v1637_v63 = vld [vmem:[%s10144_s8 + $0x3a0] sm:$0xff] }
 0x522   :  { %v1364_v10 = vpop.f32.mrf.mxu1 }
 0x523   :  { %v1370_v32 = vadd.f32 %v1364_v10, %v1287_v55  ;;  %v1522_v10 = vld [vmem:[%s10144_s8 + $0x8] sm:$0xff]  ;;  %v1524_v55 = vld [vmem:[%s10144_s8 + $0x18] sm:$0xff] }
 0x524   :  { %1729 = vmatpush.msra.mxu2 %v1522_v10  ;;  %1775 = vmatpush.msrb.mxu3 %v1524_v55 }
 0x52a   :  { %v1367_v30 = vpop.f32.mrf.mxu1 }
 0x52b   :  { %v1371_v44 = vadd.f32 %v1367_v30, %v1288_v8  ;;  %v1639_v30 = vld [vmem:[%s10144_s8 + $0x3b0] sm:$0xff]  ;;  %v1640_v8 = vld [vmem:[%s10144_s8 + $0x3b8] sm:$0xff] }
 0x52c   :  { %1837 = vmatpush.msrb.mxu0 %v1639_v30  ;;  %1860 = vmatpush.msra.mxu3 %v1640_v8  ;;  %v1609_v8 = vld [vmem:[%s10144_s8 + $0x2c0] sm:$0xff] }
 0x530   :  { %v1447_v58 = vpop.f32.mrf.mxu3 }
 0x531   :  { %v1453_v62 = vadd.f32 %v1447_v58, %v1370_v32 }
 0x533   :  { %v1456_v9 = vadd.f32 %v1455_v57, %v1453_v62 }
 0x535   :  { %v6979_v0 = vadd.f32 %v1456_v9, %v6657_v22  ;;  %v1638_v9 = vld [vmem:[%s10144_s8 + $0x3a8] sm:$0xff] }
 0x536   :  { %1814 = vmatpush.msrb.mxu2 %v1638_v9  ;;  %v1628_v9 = vld [vmem:[%s10144_s8 + $0x358] sm:$0xff] }
 0x537   :  { %v1460_v1 = vsel %vm123_vm1, %v6979_v0, 0.0  ;;  %v1475_v5 = vmul.f32 %v6979_v0, %v6979_v0 }
 0x538   :  { %v1450_v6 = vpop.f32.mrf.mxu3  ;;  %1461 = vadd.xlane.f32.xlu0 %v1460_v1  ;;  %v1622_v1 = vld [vmem:[%s10144_s8 + $0x328] sm:$0xff] }
 0x539   :  { %v1454_v11 = vadd.f32 %v1450_v6, %v1371_v44  ;;  %v1477_v12 = vsel %vm123_vm1, %v1475_v5, 0.0  ;;  %v1621_v44 = vld [vmem:[%s10144_s8 + $0x320] sm:$0xff]  ;;  %v1623_v5 = vld [vmem:[%s10144_s8 + $0x330] sm:$0xff]  ;;  %1815 = vmatpush.msrb.mxu2 %v1622_v1  ;;  %v1624_v6 = vld [vmem:[%s10144_s8 + $0x338] sm:$0xff] }
 0x53a   :  { %1478 = vadd.xlane.f32.xlu1 %v1477_v12  ;;  %1838 = vmatpush.msrb.mxu0 %v1623_v5  ;;  %v1606_v12 = vld [vmem:[%s10144_s8 + $0x2a8] sm:$0xff]  ;;  %v1611_v1 = vld [vmem:[%s10144_s8 + $0x2d0] sm:$0xff]  ;;  %v1612_v5 = vld [vmem:[%s10144_s8 + $0x2d8] sm:$0xff] }
 0x53b   :  { %v1457_v31 = vadd.f32 %v1455_v57, %v1454_v11  ;;  %1861 = vmatpush.msra.mxu3 %v1624_v6  ;;  %v1605_v11 = vld [vmem:[%s10144_s8 + $0x2a0] sm:$0xff]  ;;  %1816 = vmatpush.msrb.mxu2 %v1606_v12  ;;  %v1594_v12 = vld [vmem:[%s10144_s8 + $0x248] sm:$0xff] }
 0x53d   :  { %v6987_v46 = vadd.f32 %v1457_v31, %v6663_v24  ;;  %v1633_v24 = vld [vmem:[%s10144_s8 + $0x380] sm:$0xff]  ;;  %v1607_v31 = vld [vmem:[%s10144_s8 + $0x2b0] sm:$0xff]  ;;  %1817 = vmatpush.msrb.mxu2 %v1590_v17 }
 0x53e   :  { %1699 = vmatpush.msra.mxu1 %v1633_v24  ;;  %1839 = vmatpush.msrb.mxu0 %v1607_v31 }
 0x53f   :  { %v1463_v22 = vsel %vm123_vm1, %v6987_v46, 0.0  ;;  %v1476_v13 = vmul.f32 %v6987_v46, %v6987_v46  ;;  %1818 = vmatpush.msrb.mxu2 %v1574_v23  ;;  %v1563_v23 = vld [vmem:[%s10144_s8 + $0x150] sm:$0xff] }
 0x540   :  { %1464 = vadd.xlane.f32.xlu2 %v1463_v22  ;;  %1700 = vmatpush.msra.mxu1 %v1617_v61  ;;  %v1575_v61 = vld [vmem:[%s10144_s8 + $0x1b0] sm:$0xff] }
 0x541   :  { %v1480_v15 = vsel %vm123_vm1, %v1476_v13, 0.0  ;;  %v1608_v13 = vld [vmem:[%s10144_s8 + $0x2b8] sm:$0xff]  ;;  %1840 = vmatpush.msrb.mxu0 %v1591_v2  ;;  %1819 = vmatpush.msrb.mxu2 %v1558_v29  ;;  %v1577_v2 = vld [vmem:[%s10144_s8 + $0x1c0] sm:$0xff]  ;;  %v1530_v29 = vld [vmem:[%s10144_s8 + $0x48] sm:$0xff] }
 0x542   :  { %1701 = vmatpush.msra.mxu1 %v1601_v28  ;;  %1862 = vmatpush.msra.mxu3 %v1608_v13  ;;  %v1595_v13 = vld [vmem:[%s10144_s8 + $0x250] sm:$0xff] }
 0x543   :  { %1841 = vmatpush.msrb.mxu0 %v1575_v61  ;;  %1820 = vmatpush.msrb.mxu2 %v1542_v25  ;;  %v1564_v61 = vld [vmem:[%s10144_s8 + $0x158] sm:$0xff]  ;;  %v1647_v25 = vld [vmem:[%s10144_s8 + $0x3f0] sm:$0xff] }
 0x544   :  { %1702 = vmatpush.msra.mxu1 %v1585_v53  ;;  %1863 = vmatpush.msra.mxu3 %v1592_v19  ;;  %v1579_v19 = vld [vmem:[%s10144_s8 + $0x1d0] sm:$0xff] }
 0x545   :  { %1842 = vmatpush.msrb.mxu0 %v1559_v14  ;;  %1821 = vmatpush.msrb.mxu2 %v1526_v38  ;;  %v1531_v14 = vld [vmem:[%s10144_s8 + $0x50] sm:$0xff]  ;;  %v1632_v38 = vld [vmem:[%s10144_s8 + $0x378] sm:$0xff] }
 0x546   :  { %1703 = vmatpush.msra.mxu1 %v1569_v7  ;;  %1864 = vmatpush.msra.mxu3 %v1576_v26  ;;  %v1544_v7 = vld [vmem:[%s10144_s8 + $0xb8] sm:$0xff]  ;;  %v1546_v26 = vld [vmem:[%s10144_s8 + $0xc8] sm:$0xff] }
 0x547   :  { %1843 = vmatpush.msrb.mxu0 %v1543_v35  ;;  %v1648_v35 = vld [vmem:[%s10144_s8 + $0x3f8] sm:$0xff] }
 0x548   :  { %1481 = vadd.xlane.f32.xlu2 %v1480_v15  ;;  %1704 = vmatpush.msra.mxu1 %v1553_v40  ;;  %v1589_v15 = vld [vmem:[%s10144_s8 + $0x220] sm:$0xff]  ;;  %v1527_v40 = vld [vmem:[%s10144_s8 + $0x30] sm:$0xff] }
 0x549   :  { %1865 = vmatpush.msra.mxu3 %v1560_v33  ;;  %1844 = vmatpush.msrb.mxu0 %v1527_v40  ;;  %v1532_v33 = vld [vmem:[%s10144_s8 + $0x58] sm:$0xff]  ;;  %v1614_v40 = vld [vmem:[%s10144_s8 + $0x2e8] sm:$0xff] }
 0x54a   :  { %1705 = vmatpush.msra.mxu1 %v1537_v37 }
 0x54b   :  { %1866 = vmatpush.msra.mxu3 %v1544_v7  ;;  %v1630_v7 = vld [vmem:[%s10144_s8 + $0x368] sm:$0xff] }
 0x54c   :  { %1706 = vmatpush.msra.mxu1 %v1521_v52 }
 0x54d   :  { %1867 = vmatpush.msra.mxu3 %v1528_v41  ;;  %v1615_v41 = vld [vmem:[%s10144_s8 + $0x2f0] sm:$0xff] }
 0x54e   :  { %1791 = vmatpush.msrb.mxu1 %v1637_v63  ;;  %v1627_v63 = vld [vmem:[%s10144_s8 + $0x350] sm:$0xff] }
 0x550   :  { %1792 = vmatpush.msrb.mxu1 %v1621_v44  ;;  %v1610_v44 = vld [vmem:[%s10144_s8 + $0x2c8] sm:$0xff] }
 0x552   :  { %1793 = vmatpush.msrb.mxu1 %v1605_v11  ;;  %v1593_v11 = vld [vmem:[%s10144_s8 + $0x240] sm:$0xff] }
 0x554   :  { %1794 = vmatpush.msrb.mxu1 %v1589_v15  ;;  %v1596_v15 = vld [vmem:[%s10144_s8 + $0x258] sm:$0xff] }
 0x556   :  { %1795 = vmatpush.msrb.mxu1 %v1573_v42 }
 0x558   :  { %1796 = vmatpush.msrb.mxu1 %v1557_v27  ;;  %v1548_v27 = vld [vmem:[%s10144_s8 + $0xd8] sm:$0xff] }
 0x55a   :  { %1797 = vmatpush.msrb.mxu1 %v1541_v34  ;;  %v1646_v34 = vld [vmem:[%s10144_s8 + $0x3e8] sm:$0xff] }
 0x55c   :  { %1798 = vmatpush.msrb.mxu1 %v1525_v36  ;;  %v1631_v36 = vld [vmem:[%s10144_s8 + $0x370] sm:$0xff] }
 0x5ab   :  { %v1462_v50 = vpop.xlane.xlu0 %1461 }
 0x5ac   :  { %v7090_v4 = vmul.f32 %v7066_v45, %v1462_v50 }
 0x5ad   :  { %v1479_v56 = vpop.xlane.xlu1 %1478 }
 0x5ae   :  { %v1485_v32 = vmul.f32 %v7090_v4, %v7090_v4  ;;  %v1483_v57 = vmul.f32 %v1479_v56, %v7066_v45  ;;  %v1489_v37 = vsub.f32 %v6979_v0, %v7090_v4  ;;  %v1642_v0 = vld [vmem:[%s10144_s8 + $0x3c8] sm:$0xff]  ;;  %v1643_v4 = vld [vmem:[%s10144_s8 + $0x3d0] sm:$0xff] }
 0x5b0   :  { %v1487_v58 = vsub.f32 %v1483_v57, %v1485_v32  ;;  %v1641_v32 = vld [vmem:[%s10144_s8 + $0x3c0] sm:$0xff]  ;;  %v1644_v57 = vld [vmem:[%s10144_s8 + $0x3d8] sm:$0xff] }
 0x5b2   :  { %v7098_v59 = vadd.f32 1e-05, %v1487_v58 }
 0x5b3   :  { %v1465_v62 = vpop.xlane.xlu2 %1464 }
 0x5b4   :  { %6375 = vrsqrt.f32 %v7098_v59  ;;  %v7135_v22 = vmul.f32 %v7066_v45, %v1465_v62  ;;  %vm1499_vm5 = vweird.f32 %v7098_v59  ;;  %v1626_v62 = vld [vmem:[%s10144_s8 + $0x348] sm:$0xff] }
 0x5b6   :  { %v1486_v3 = vmul.f32 %v7135_v22, %v7135_v22  ;;  %v1490_v31 = vsub.f32 %v6987_v46, %v7135_v22  ;;  %v1578_v46 = vld [vmem:[%s10144_s8 + $0x1c8] sm:$0xff] }
 0x5ba   :  { %v6376_v20 = vpop.eup %6375 }
 0x5bb   :  { %v1494_v24 = vmul.f32 %v6376_v20, %v7098_v59  ;;  %v1482_v21 = vpop.xlane.xlu2 %1481  ;;  %vm1500_vm4 = vweird.f32 %v6376_v20  ;;  %v1625_v59 = vld [vmem:[%s10144_s8 + $0x340] sm:$0xff] }
 0x5bc   :  { %v1484_v48 = vmul.f32 %v1482_v21, %v7066_v45  ;;  %vm1501_vm6 = vmor %vm1499_vm5, %vm1500_vm4  ;;  %v1562_v21 = vld [vmem:[%s10144_s8 + $0x148] sm:$0xff] }
 0x5bd   :  { %v1495_v28 = vmul.f32 %v6376_v20, %v1494_v24  ;;  %v1561_v24 = vld [vmem:[%s10144_s8 + $0x140] sm:$0xff] }
 0x5be   :  { %v1488_v53 = vsub.f32 %v1484_v48, %v1486_v3  ;;  %v1545_v48 = vld [vmem:[%s10144_s8 + $0xc0] sm:$0xff] }
 0x5bf   :  { %v1496_v16 = vmul.f32 0.5, %v1495_v28  ;;  %v1529_v28 = vld [vmem:[%s10144_s8 + $0x40] sm:$0xff] }
 0x5c0   :  { %v1492_v39 = vadd.f32 1e-05, %v1488_v53  ;;  %v1645_v53 = vld [vmem:[%s10144_s8 + $0x3e0] sm:$0xff] }
 0x5c1   :  { %v1497_v43 = vsub.f32 1.5, %v1496_v16  ;;  %v1629_v16 = vld [vmem:[%s10144_s8 + $0x360] sm:$0xff] }
 0x5c2   :  { %6377 = vrsqrt.f32 %v1492_v39  ;;  %vm1509_vm8 = vweird.f32 %v1492_v39 }
 0x5c3   :  { %v1498_v18 = vmul.f32 %v6376_v20, %v1497_v43  ;;  %v1616_v43 = vld [vmem:[%s10144_s8 + $0x2f8] sm:$0xff] }
 0x5c5   :  { %v1502_v47 = vsel %vm1501_vm6, %v6376_v20, %v1498_v18  ;;  %v1580_v20 = vld [vmem:[%s10144_s8 + $0x1d8] sm:$0xff]  ;;  %v1597_v18 = vld [vmem:[%s10144_s8 + $0x260] sm:$0xff] }
 0x5c6   :  { %v1513_v50 = vmul.f32 %v1502_v47, %v1489_v37  ;;  %v1598_v37 = vld [vmem:[%s10144_s8 + $0x268] sm:$0xff]  ;;  %v1600_v47 = vld [vmem:[%s10144_s8 + $0x278] sm:$0xff] }
 0x5c8   :  { %v6378_v52 = vpop.eup %6377  ;;  %v1516_v10 = vmul.f32 %v1515_v60, %v1513_v50  ;;  %v1582_v50 = vld [vmem:[%s10144_s8 + $0x1e8] sm:$0xff] }
 0x5c9   :  { %v1504_v51 = vmul.f32 %v6378_v52, %v1492_v39  ;;  %vm1510_vm7 = vweird.f32 %v6378_v52  ;;  %v1613_v39 = vld [vmem:[%s10144_s8 + $0x2e0] sm:$0xff] }
 0x5ca   :  { %v7211_v55 = vadd.f32 %v1518_v49, %v1516_v10  ;;  %vm1511_vm9 = vmor %vm1509_vm8, %vm1510_vm7  ;;  %v1584_v10 = vld [vmem:[%s10144_s8 + $0x1f8] sm:$0xff] }
 0x5cb   :  { %v1505_v56 = vmul.f32 %v6378_v52, %v1504_v51  ;;  %v1565_v51 = vld [vmem:[%s10144_s8 + $0x160] sm:$0xff] }
 0x5cc   :  { %5690 = vmatmul.msk.f32.vlgmr.msra.gmra.mxu1 %vm123_vm1, %v7211_v55  ;;  %5692 = vmatmul.msk.f32.vlgmr.msra.gmra.mxu2 %vm123_vm1, %v7211_v55 }
 0x5cd   :  { %v1506_v58 = vmul.f32 0.5, %v1505_v56  ;;  %5694 = vmatmul.msk.f32.vlgmr.msra.gmra.mxu0 %vm123_vm1, %v7211_v55  ;;  %5696 = vmatmul.msk.f32.vlgmr.msrb.gmra.mxu3 %vm123_vm1, %v7211_v55  ;;  %v1566_v56 = vld [vmem:[%s10144_s8 + $0x168] sm:$0xff] }
 0x5ce   :  { %1883 = vmatpush.msra.mxu1 %v1641_v32  ;;  %1906 = vmatpush.msra.mxu2 %v1642_v0  ;;  %v1567_v32 = vld [vmem:[%s10144_s8 + $0x170] sm:$0xff]  ;;  %v1568_v0 = vld [vmem:[%s10144_s8 + $0x178] sm:$0xff] }
 0x5cf   :  { %v1507_v30 = vsub.f32 1.5, %v1506_v58  ;;  %1929 = vmatpush.msra.mxu0 %v1643_v4  ;;  %1952 = vmatpush.msrb.mxu3 %v1644_v57  ;;  %v1549_v4 = vld [vmem:[%s10144_s8 + $0xe0] sm:$0xff]  ;;  %v1550_v57 = vld [vmem:[%s10144_s8 + $0xe8] sm:$0xff]  ;;  %v1551_v58 = vld [vmem:[%s10144_s8 + $0xf0] sm:$0xff] }
 0x5d0   :  { %1884 = vmatpush.msra.mxu1 %v1625_v59  ;;  %1907 = vmatpush.msra.mxu2 %v1626_v62  ;;  %v1552_v59 = vld [vmem:[%s10144_s8 + $0xf8] sm:$0xff]  ;;  %v1533_v62 = vld [vmem:[%s10144_s8 + $0x60] sm:$0xff] }
 0x5d1   :  { %v1508_v6 = vmul.f32 %v6378_v52, %v1507_v30  ;;  %1930 = vmatpush.msra.mxu0 %v1627_v63  ;;  %1953 = vmatpush.msrb.mxu3 %v1628_v9  ;;  %v1534_v63 = vld [vmem:[%s10144_s8 + $0x68] sm:$0xff]  ;;  %v1535_v9 = vld [vmem:[%s10144_s8 + $0x70] sm:$0xff]  ;;  %v1536_v30 = vld [vmem:[%s10144_s8 + $0x78] sm:$0xff] }
 0x5d2   :  { %1885 = vmatpush.msra.mxu1 %v1609_v8  ;;  %1908 = vmatpush.msra.mxu2 %v1610_v44  ;;  %v2106_v8 = vld [vmem:[%s10146_s10 + $0x78] sm:$0xff] }
 0x5d3   :  { %v1512_v17 = vsel %vm1511_vm9, %v6378_v52, %v1508_v6  ;;  %1931 = vmatpush.msra.mxu0 %v1611_v1  ;;  %1954 = vmatpush.msrb.mxu3 %v1612_v5  ;;  %v1583_v52 = vld [vmem:[%s10144_s8 + $0x1f0] sm:$0xff]  ;;  %v2138_v44 = vld [vmem:[%s10146_s10 + $0x178] sm:$0xff] }
 0x5d4   :  { %v1514_v22 = vmul.f32 %v1512_v17, %v1490_v31  ;;  %1886 = vmatpush.msra.mxu1 %v1593_v11  ;;  %1909 = vmatpush.msra.mxu2 %v1594_v12  ;;  %v2122_v1 = vld [vmem:[%s10146_s10 + $0xf8] sm:$0xff]  ;;  %v2105_v6 = vld [vmem:[%s10146_s10 + $0x70] sm:$0xff]  ;;  %v2120_v17 = vld [vmem:[%s10146_s10 + $0xe8] sm:$0xff] }
 0x5d5   :  { %1932 = vmatpush.msra.mxu0 %v1595_v13  ;;  %1955 = vmatpush.msrb.mxu3 %v1596_v15  ;;  %v2154_v5 = vld [vmem:[%s10146_s10 + $0x1f8] sm:$0xff]  ;;  %v2137_v11 = vld [vmem:[%s10146_s10 + $0x170] sm:$0xff]  ;;  %v2104_v13 = vld [vmem:[%s10146_s10 + $0x68] sm:$0xff] }
 0x5d6   :  { %v1517_v42 = vmul.f32 %v1515_v60, %v1514_v22  ;;  %1887 = vmatpush.msra.mxu1 %v1577_v2  ;;  %1910 = vmatpush.msra.mxu2 %v1578_v46  ;;  %v1599_v60 = vld [vmem:[%s10144_s8 + $0x270] sm:$0xff]  ;;  %v2136_v15 = vld [vmem:[%s10146_s10 + $0x168] sm:$0xff]  ;;  %v2103_v46 = vld [vmem:[%s10146_s10 + $0x60] sm:$0xff] }
 0x5d7   :  { %1933 = vmatpush.msra.mxu0 %v1579_v19  ;;  %1956 = vmatpush.msrb.mxu3 %v1580_v20  ;;  %v2121_v12 = vld [vmem:[%s10146_s10 + $0xf0] sm:$0xff]  ;;  %v2152_v2 = vld [vmem:[%s10146_s10 + $0x1e8] sm:$0xff]  ;;  %v2135_v22 = vld [vmem:[%s10146_s10 + $0x160] sm:$0xff] }
 0x5d8   :  { %v7298_v3 = vadd.f32 %v1518_v49, %v1517_v42  ;;  %1888 = vmatpush.msra.mxu1 %v1561_v24  ;;  %1911 = vmatpush.msra.mxu2 %v1562_v21  ;;  %v1581_v49 = vld [vmem:[%s10144_s8 + $0x1e0] sm:$0xff]  ;;  %v2153_v31 = vld [vmem:[%s10146_s10 + $0x1f0] sm:$0xff]  ;;  %v2102_v24 = vld [vmem:[%s10146_s10 + $0x58] sm:$0xff] }
 0x5d9   :  { %1934 = vmatpush.msra.mxu0 %v1563_v23  ;;  %1957 = vmatpush.msrb.mxu3 %v1564_v61  ;;  %v2119_v19 = vld [vmem:[%s10146_s10 + $0xe0] sm:$0xff]  ;;  %v2134_v21 = vld [vmem:[%s10146_s10 + $0x158] sm:$0xff]  ;;  %v2101_v61 = vld [vmem:[%s10146_s10 + $0x50] sm:$0xff] }
 0x5da   :  { %5691 = vmatmul.msk.f32.gmra.mxu1 %vm123_vm1, %v7298_v3  ;;  %5693 = vmatmul.msk.f32.gmra.mxu2 %vm123_vm1, %v7298_v3  ;;  %v2151_v20 = vld [vmem:[%s10146_s10 + $0x1e0] sm:$0xff]  ;;  %v2118_v42 = vld [vmem:[%s10146_s10 + $0xd8] sm:$0xff] }
 0x5db   :  { %5695 = vmatmul.msk.f32.gmra.mxu0 %vm123_vm1, %v7298_v3  ;;  %5697 = vmatmul.msk.f32.gmra.mxu3 %vm123_vm1, %v7298_v3  ;;  %v2150_v23 = vld [vmem:[%s10146_s10 + $0x1d8] sm:$0xff] }
 0x5dc   :  { %1889 = vmatpush.msra.mxu1 %v1545_v48  ;;  %1912 = vmatpush.msra.mxu2 %v1546_v26  ;;  %v2133_v48 = vld [vmem:[%s10146_s10 + $0x150] sm:$0xff] }
 0x5dd   :  { %1935 = vmatpush.msra.mxu0 %v1547_v54  ;;  %1958 = vmatpush.msrb.mxu3 %v1548_v27  ;;  %v2117_v26 = vld [vmem:[%s10146_s10 + $0xd0] sm:$0xff]  ;;  %v2100_v27 = vld [vmem:[%s10146_s10 + $0x48] sm:$0xff] }
 0x5de   :  { %1890 = vmatpush.msra.mxu1 %v1529_v28  ;;  %1913 = vmatpush.msra.mxu2 %v1530_v29  ;;  %v2149_v54 = vld [vmem:[%s10146_s10 + $0x1d0] sm:$0xff]  ;;  %v2132_v28 = vld [vmem:[%s10146_s10 + $0x148] sm:$0xff] }
 0x5df   :  { %1936 = vmatpush.msra.mxu0 %v1531_v14  ;;  %1959 = vmatpush.msrb.mxu3 %v1532_v33  ;;  %v2116_v29 = vld [vmem:[%s10146_s10 + $0xc8] sm:$0xff]  ;;  %v2099_v33 = vld [vmem:[%s10146_s10 + $0x40] sm:$0xff] }
 0x5e0   :  { %v2148_v14 = vld [vmem:[%s10146_s10 + $0x1c8] sm:$0xff] }
 0x5e2   :  { %5698 = vmatmul.msk.f32.vlgmr.msrb.gmra.mxu1 %vm123_vm1, %v7211_v55  ;;  %5700 = vmatmul.msk.f32.vlgmr.msrb.gmra.mxu2 %vm123_vm1, %v7211_v55 }
 0x5e3   :  { %5702 = vmatmul.msk.f32.vlgmr.msrb.gmra.mxu0 %vm123_vm1, %v7211_v55  ;;  %5704 = vmatmul.msk.f32.vlgmr.msra.gmra.mxu3 %vm123_vm1, %v7211_v55 }
 0x5e4   :  { %1975 = vmatpush.msrb.mxu1 %v1645_v53  ;;  %1998 = vmatpush.msrb.mxu2 %v1646_v34  ;;  %v2131_v53 = vld [vmem:[%s10146_s10 + $0x140] sm:$0xff] }
 0x5e5   :  { %2021 = vmatpush.msrb.mxu0 %v1647_v25  ;;  %2044 = vmatpush.msra.mxu3 %v1648_v35  ;;  %v2115_v34 = vld [vmem:[%s10146_s10 + $0xc0] sm:$0xff]  ;;  %v2098_v35 = vld [vmem:[%s10146_s10 + $0x38] sm:$0xff] }
 0x5e6   :  { %1976 = vmatpush.msrb.mxu1 %v1629_v16  ;;  %1999 = vmatpush.msrb.mxu2 %v1630_v7  ;;  %v2147_v25 = vld [vmem:[%s10146_s10 + $0x1c0] sm:$0xff]  ;;  %v2130_v16 = vld [vmem:[%s10146_s10 + $0x138] sm:$0xff] }
 0x5e7   :  { %2022 = vmatpush.msrb.mxu0 %v1631_v36  ;;  %2045 = vmatpush.msra.mxu3 %v1632_v38  ;;  %v2114_v7 = vld [vmem:[%s10146_s10 + $0xb8] sm:$0xff]  ;;  %v2097_v38 = vld [vmem:[%s10146_s10 + $0x30] sm:$0xff] }
 0x5e8   :  { %1977 = vmatpush.msrb.mxu1 %v1613_v39  ;;  %2000 = vmatpush.msrb.mxu2 %v1614_v40  ;;  %v2146_v36 = vld [vmem:[%s10146_s10 + $0x1b8] sm:$0xff]  ;;  %v2129_v39 = vld [vmem:[%s10146_s10 + $0x130] sm:$0xff] }
 0x5e9   :  { %2023 = vmatpush.msrb.mxu0 %v1615_v41  ;;  %2046 = vmatpush.msra.mxu3 %v1616_v43  ;;  %v2113_v40 = vld [vmem:[%s10146_s10 + $0xb0] sm:$0xff]  ;;  %v2096_v43 = vld [vmem:[%s10146_s10 + $0x28] sm:$0xff] }
 0x5ea   :  { %5699 = vmatmul.msk.f32.gmra.mxu1 %vm123_vm1, %v7298_v3  ;;  %5701 = vmatmul.msk.f32.gmra.mxu2 %vm123_vm1, %v7298_v3  ;;  %v2145_v41 = vld [vmem:[%s10146_s10 + $0x1b0] sm:$0xff] }
 0x5eb   :  { %5703 = vmatmul.msk.f32.gmra.mxu0 %vm123_vm1, %v7298_v3  ;;  %5705 = vmatmul.msk.f32.gmra.mxu3 %vm123_vm1, %v7298_v3 }
 0x5ec   :  { %1978 = vmatpush.msrb.mxu1 %v1597_v18  ;;  %2001 = vmatpush.msrb.mxu2 %v1598_v37  ;;  %v2128_v18 = vld [vmem:[%s10146_s10 + $0x128] sm:$0xff] }
 0x5ed   :  { %2024 = vmatpush.msrb.mxu0 %v1599_v60  ;;  %2047 = vmatpush.msra.mxu3 %v1600_v47  ;;  %v2112_v37 = vld [vmem:[%s10146_s10 + $0xa8] sm:$0xff]  ;;  %v2095_v47 = vld [vmem:[%s10146_s10 + $0x20] sm:$0xff] }
 0x5ee   :  { %1979 = vmatpush.msrb.mxu1 %v1581_v49  ;;  %2002 = vmatpush.msrb.mxu2 %v1582_v50  ;;  %v2144_v60 = vld [vmem:[%s10146_s10 + $0x1a8] sm:$0xff]  ;;  %v2127_v49 = vld [vmem:[%s10146_s10 + $0x120] sm:$0xff] }
 0x5ef   :  { %2025 = vmatpush.msrb.mxu0 %v1583_v52  ;;  %2048 = vmatpush.msra.mxu3 %v1584_v10  ;;  %v2111_v50 = vld [vmem:[%s10146_s10 + $0xa0] sm:$0xff]  ;;  %v2094_v10 = vld [vmem:[%s10146_s10 + $0x18] sm:$0xff] }
 0x5f0   :  { %1980 = vmatpush.msrb.mxu1 %v1565_v51  ;;  %2003 = vmatpush.msrb.mxu2 %v1566_v56  ;;  %v2143_v52 = vld [vmem:[%s10146_s10 + $0x1a0] sm:$0xff]  ;;  %v2126_v51 = vld [vmem:[%s10146_s10 + $0x118] sm:$0xff] }
 0x5f1   :  { %2026 = vmatpush.msrb.mxu0 %v1567_v32  ;;  %2049 = vmatpush.msra.mxu3 %v1568_v0  ;;  %v2110_v56 = vld [vmem:[%s10146_s10 + $0x98] sm:$0xff]  ;;  %v2093_v0 = vld [vmem:[%s10146_s10 + $0x10] sm:$0xff] }
 0x5f2   :  { %5706 = vmatmul.msk.f32.vlgmr.msra.gmra.mxu1 %vm123_vm1, %v7211_v55  ;;  %5708 = vmatmul.msk.f32.vlgmr.msra.gmra.mxu2 %vm123_vm1, %v7211_v55  ;;  %v2142_v32 = vld [vmem:[%s10146_s10 + $0x198] sm:$0xff] }
 0x5f3   :  { %5710 = vmatmul.msk.f32.vlgmr.msra.gmra.mxu0 %vm123_vm1, %v7211_v55  ;;  %5712 = vmatmul.msk.f32.vlgmr.msrb.gmra.mxu3 %vm123_vm1, %v7211_v55 }
 0x5f4   :  { %1981 = vmatpush.msrb.mxu1 %v1549_v4  ;;  %2004 = vmatpush.msrb.mxu2 %v1550_v57  ;;  %v2125_v4 = vld [vmem:[%s10146_s10 + $0x110] sm:$0xff] }
 0x5f5   :  { %2027 = vmatpush.msrb.mxu0 %v1551_v58  ;;  %2050 = vmatpush.msra.mxu3 %v1552_v59  ;;  %v2109_v57 = vld [vmem:[%s10146_s10 + $0x90] sm:$0xff]  ;;  %v2092_v59 = vld [vmem:[%s10146_s10 + $0x8] sm:$0xff] }
 0x5f6   :  { %1982 = vmatpush.msrb.mxu1 %v1533_v62  ;;  %2005 = vmatpush.msrb.mxu2 %v1534_v63  ;;  %v2141_v58 = vld [vmem:[%s10146_s10 + $0x190] sm:$0xff]  ;;  %v2124_v62 = vld [vmem:[%s10146_s10 + $0x108] sm:$0xff] }
 0x5f7   :  { %2028 = vmatpush.msrb.mxu0 %v1535_v9  ;;  %2051 = vmatpush.msra.mxu3 %v1536_v30  ;;  %v2108_v63 = vld [vmem:[%s10146_s10 + $0x88] sm:$0xff]  ;;  %v2091_v30 = vld [vmem:[%s10146_s10] sm:$0xff] }
 0x5f8   :  { %2348 = vmatpush.msra.mxu1 %v2106_v8  ;;  %2371 = vmatpush.msra.mxu2 %v2122_v1  ;;  %v2140_v9 = vld [vmem:[%s10146_s10 + $0x188] sm:$0xff]  ;;  %v2123_v8 = vld [vmem:[%s10146_s10 + $0x100] sm:$0xff]  ;;  %v2202_v1 = vld [vmem:[%s10146_s10 + $0x378] sm:$0xff] }
 0x5f9   :  { %2394 = vmatpush.msra.mxu0 %v2138_v44  ;;  %2417 = vmatpush.msrb.mxu3 %v2154_v5  ;;  %v2170_v44 = vld [vmem:[%s10146_s10 + $0x278] sm:$0xff]  ;;  %v2107_v5 = vld [vmem:[%s10146_s10 + $0x80] sm:$0xff] }
 0x5fa   :  { %5707 = vmatmul.msk.f32.gmra.mxu1 %vm123_vm1, %v7298_v3  ;;  %5709 = vmatmul.msk.f32.gmra.mxu2 %vm123_vm1, %v7298_v3 }
 0x5fb   :  { %5711 = vmatmul.msk.f32.gmra.mxu0 %vm123_vm1, %v7298_v3  ;;  %5713 = vmatmul.msk.f32.gmra.mxu3 %vm123_vm1, %v7298_v3 }
 0x5fc   :  { %2349 = vmatpush.msra.mxu1 %v2105_v6  ;;  %2395 = vmatpush.msra.mxu0 %v2137_v11  ;;  %v2139_v6 = vld [vmem:[%s10146_s10 + $0x180] sm:$0xff]  ;;  %v2169_v11 = vld [vmem:[%s10146_s10 + $0x270] sm:$0xff] }
 0x5fd   :  { %2372 = vmatpush.msra.mxu2 %v2121_v12  ;;  %2418 = vmatpush.msrb.mxu3 %v2153_v31  ;;  %v2201_v12 = vld [vmem:[%s10146_s10 + $0x370] sm:$0xff]  ;;  %v2186_v31 = vld [vmem:[%s10146_s10 + $0x2f8] sm:$0xff] }
 0x5fe   :  { %2350 = vmatpush.msra.mxu1 %v2104_v13  ;;  %2396 = vmatpush.msra.mxu0 %v2136_v15  ;;  %v2218_v13 = vld [vmem:[%s10146_s10 + $0x3f8] sm:$0xff]  ;;  %v2168_v15 = vld [vmem:[%s10146_s10 + $0x268] sm:$0xff] }
 0x5ff   :  { %2373 = vmatpush.msra.mxu2 %v2120_v17  ;;  %2419 = vmatpush.msrb.mxu3 %v2152_v2  ;;  %v2200_v17 = vld [vmem:[%s10146_s10 + $0x368] sm:$0xff]  ;;  %v2185_v2 = vld [vmem:[%s10146_s10 + $0x2f0] sm:$0xff] }
 0x600   :  { %2351 = vmatpush.msra.mxu1 %v2103_v46  ;;  %2397 = vmatpush.msra.mxu0 %v2135_v22  ;;  %v2217_v46 = vld [vmem:[%s10146_s10 + $0x3f0] sm:$0xff]  ;;  %v2167_v22 = vld [vmem:[%s10146_s10 + $0x260] sm:$0xff] }
 0x601   :  { %2374 = vmatpush.msra.mxu2 %v2119_v19  ;;  %2420 = vmatpush.msrb.mxu3 %v2151_v20  ;;  %v2199_v19 = vld [vmem:[%s10146_s10 + $0x360] sm:$0xff]  ;;  %v2184_v20 = vld [vmem:[%s10146_s10 + $0x2e8] sm:$0xff] }
 0x602   :  { %5714 = vmatmul.msk.f32.vlgmr.msrb.gmra.mxu1 %vm123_vm1, %v7211_v55  ;;  %5716 = vmatmul.msk.f32.vlgmr.msrb.gmra.mxu2 %vm123_vm1, %v7211_v55 }
 0x603   :  { %5718 = vmatmul.msk.f32.vlgmr.msrb.gmra.mxu0 %vm123_vm1, %v7211_v55  ;;  %5720 = vmatmul.msk.f32.vlgmr.msra.gmra.mxu3 %vm123_vm1, %v7211_v55 }
 0x604   :  { %2352 = vmatpush.msra.mxu1 %v2102_v24  ;;  %2398 = vmatpush.msra.mxu0 %v2134_v21  ;;  %v2216_v24 = vld [vmem:[%s10146_s10 + $0x3e8] sm:$0xff]  ;;  %v2166_v21 = vld [vmem:[%s10146_s10 + $0x258] sm:$0xff] }
 0x605   :  { %2375 = vmatpush.msra.mxu2 %v2118_v42  ;;  %2421 = vmatpush.msrb.mxu3 %v2150_v23  ;;  %v2198_v42 = vld [vmem:[%s10146_s10 + $0x358] sm:$0xff]  ;;  %v2183_v23 = vld [vmem:[%s10146_s10 + $0x2e0] sm:$0xff] }
 0x606   :  { %2353 = vmatpush.msra.mxu1 %v2101_v61  ;;  %2399 = vmatpush.msra.mxu0 %v2133_v48  ;;  %v2215_v61 = vld [vmem:[%s10146_s10 + $0x3e0] sm:$0xff]  ;;  %v2165_v48 = vld [vmem:[%s10146_s10 + $0x250] sm:$0xff] }
 0x607   :  { %2376 = vmatpush.msra.mxu2 %v2117_v26  ;;  %2422 = vmatpush.msrb.mxu3 %v2149_v54  ;;  %v2197_v26 = vld [vmem:[%s10146_s10 + $0x350] sm:$0xff]  ;;  %v2182_v54 = vld [vmem:[%s10146_s10 + $0x2d8] sm:$0xff] }
 0x608   :  { %2354 = vmatpush.msra.mxu1 %v2100_v27  ;;  %2400 = vmatpush.msra.mxu0 %v2132_v28  ;;  %v2214_v27 = vld [vmem:[%s10146_s10 + $0x3d8] sm:$0xff]  ;;  %v2164_v28 = vld [vmem:[%s10146_s10 + $0x248] sm:$0xff] }
 0x609   :  { %2377 = vmatpush.msra.mxu2 %v2116_v29  ;;  %2423 = vmatpush.msrb.mxu3 %v2148_v14  ;;  %v2196_v29 = vld [vmem:[%s10146_s10 + $0x348] sm:$0xff]  ;;  %v2181_v14 = vld [vmem:[%s10146_s10 + $0x2d0] sm:$0xff] }
 0x60a   :  { %5715 = vmatmul.msk.f32.gmra.mxu1 %vm123_vm1, %v7298_v3  ;;  %5717 = vmatmul.msk.f32.gmra.mxu2 %vm123_vm1, %v7298_v3 }
 0x60b   :  { %5719 = vmatmul.msk.f32.gmra.mxu0 %vm123_vm1, %v7298_v3  ;;  %5721 = vmatmul.msk.f32.gmra.mxu3 %vm123_vm1, %v7298_v3 }
 0x60c   :  { %2355 = vmatpush.msra.mxu1 %v2099_v33  ;;  %2401 = vmatpush.msra.mxu0 %v2131_v53  ;;  %v2213_v33 = vld [vmem:[%s10146_s10 + $0x3d0] sm:$0xff]  ;;  %v2163_v53 = vld [vmem:[%s10146_s10 + $0x240] sm:$0xff] }
 0x60d   :  { %2378 = vmatpush.msra.mxu2 %v2115_v34  ;;  %2424 = vmatpush.msrb.mxu3 %v2147_v25  ;;  %v2195_v34 = vld [vmem:[%s10146_s10 + $0x340] sm:$0xff]  ;;  %v2180_v25 = vld [vmem:[%s10146_s10 + $0x2c8] sm:$0xff] }
 0x60e   :  { %2356 = vmatpush.msra.mxu1 %v2098_v35  ;;  %2402 = vmatpush.msra.mxu0 %v2130_v16  ;;  %v2212_v35 = vld [vmem:[%s10146_s10 + $0x3c8] sm:$0xff]  ;;  %v2162_v16 = vld [vmem:[%s10146_s10 + $0x238] sm:$0xff] }
 0x60f   :  { %2379 = vmatpush.msra.mxu2 %v2114_v7  ;;  %2425 = vmatpush.msrb.mxu3 %v2146_v36  ;;  %v2194_v7 = vld [vmem:[%s10146_s10 + $0x338] sm:$0xff]  ;;  %v2179_v36 = vld [vmem:[%s10146_s10 + $0x2c0] sm:$0xff] }
 0x610   :  { %2357 = vmatpush.msra.mxu1 %v2097_v38  ;;  %2403 = vmatpush.msra.mxu0 %v2129_v39  ;;  %v2211_v38 = vld [vmem:[%s10146_s10 + $0x3c0] sm:$0xff]  ;;  %v2161_v39 = vld [vmem:[%s10146_s10 + $0x230] sm:$0xff] }
 0x611   :  { %2380 = vmatpush.msra.mxu2 %v2113_v40  ;;  %2426 = vmatpush.msrb.mxu3 %v2145_v41  ;;  %v2193_v40 = vld [vmem:[%s10146_s10 + $0x330] sm:$0xff]  ;;  %v2178_v41 = vld [vmem:[%s10146_s10 + $0x2b8] sm:$0xff] }
 0x612   :  { %2358 = vmatpush.msra.mxu1 %v2096_v43  ;;  %2404 = vmatpush.msra.mxu0 %v2128_v18  ;;  %v2210_v43 = vld [vmem:[%s10146_s10 + $0x3b8] sm:$0xff]  ;;  %v2160_v18 = vld [vmem:[%s10146_s10 + $0x228] sm:$0xff] }
 0x613   :  { %2381 = vmatpush.msra.mxu2 %v2112_v37  ;;  %2427 = vmatpush.msrb.mxu3 %v2144_v60  ;;  %v2192_v37 = vld [vmem:[%s10146_s10 + $0x328] sm:$0xff]  ;;  %v2177_v60 = vld [vmem:[%s10146_s10 + $0x2b0] sm:$0xff] }
 0x614   :  { %2359 = vmatpush.msra.mxu1 %v2095_v47  ;;  %2405 = vmatpush.msra.mxu0 %v2127_v49  ;;  %v2209_v47 = vld [vmem:[%s10146_s10 + $0x3b0] sm:$0xff]  ;;  %v2159_v49 = vld [vmem:[%s10146_s10 + $0x220] sm:$0xff] }
 0x615   :  { %2382 = vmatpush.msra.mxu2 %v2111_v50  ;;  %2428 = vmatpush.msrb.mxu3 %v2143_v52  ;;  %v2191_v50 = vld [vmem:[%s10146_s10 + $0x320] sm:$0xff]  ;;  %v2176_v52 = vld [vmem:[%s10146_s10 + $0x2a8] sm:$0xff] }
 0x616   :  { %2360 = vmatpush.msra.mxu1 %v2094_v10  ;;  %2406 = vmatpush.msra.mxu0 %v2126_v51  ;;  %v2208_v10 = vld [vmem:[%s10146_s10 + $0x3a8] sm:$0xff]  ;;  %v2158_v51 = vld [vmem:[%s10146_s10 + $0x218] sm:$0xff] }
 0x617   :  { %2383 = vmatpush.msra.mxu2 %v2110_v56  ;;  %2429 = vmatpush.msrb.mxu3 %v2142_v32  ;;  %v2190_v56 = vld [vmem:[%s10146_s10 + $0x318] sm:$0xff]  ;;  %v2175_v32 = vld [vmem:[%s10146_s10 + $0x2a0] sm:$0xff] }
 0x618   :  { %2361 = vmatpush.msra.mxu1 %v2093_v0  ;;  %2407 = vmatpush.msra.mxu0 %v2125_v4  ;;  %v2207_v0 = vld [vmem:[%s10146_s10 + $0x3a0] sm:$0xff]  ;;  %v2157_v4 = vld [vmem:[%s10146_s10 + $0x210] sm:$0xff] }
 0x619   :  { %2384 = vmatpush.msra.mxu2 %v2109_v57  ;;  %2430 = vmatpush.msrb.mxu3 %v2141_v58  ;;  %v2189_v57 = vld [vmem:[%s10146_s10 + $0x310] sm:$0xff]  ;;  %v2174_v58 = vld [vmem:[%s10146_s10 + $0x298] sm:$0xff] }
 0x61a   :  { %2362 = vmatpush.msra.mxu1 %v2092_v59  ;;  %2408 = vmatpush.msra.mxu0 %v2124_v62  ;;  %v2206_v59 = vld [vmem:[%s10146_s10 + $0x398] sm:$0xff]  ;;  %v2156_v62 = vld [vmem:[%s10146_s10 + $0x208] sm:$0xff] }
 0x61b   :  { %2385 = vmatpush.msra.mxu2 %v2108_v63  ;;  %2431 = vmatpush.msrb.mxu3 %v2140_v9  ;;  %v2188_v63 = vld [vmem:[%s10146_s10 + $0x308] sm:$0xff]  ;;  %v2173_v9 = vld [vmem:[%s10146_s10 + $0x290] sm:$0xff] }
 0x61c   :  { %2363 = vmatpush.msra.mxu1 %v2091_v30  ;;  %2409 = vmatpush.msra.mxu0 %v2123_v8  ;;  %v2205_v30 = vld [vmem:[%s10146_s10 + $0x390] sm:$0xff]  ;;  %v2155_v8 = vld [vmem:[%s10146_s10 + $0x200] sm:$0xff] }
 0x61d   :  { %2386 = vmatpush.msra.mxu2 %v2107_v5  ;;  %2432 = vmatpush.msrb.mxu3 %v2139_v6  ;;  %v2204_v5 = vld [vmem:[%s10146_s10 + $0x388] sm:$0xff]  ;;  %v2171_v6 = vld [vmem:[%s10146_s10 + $0x280] sm:$0xff] }
 0x61e   :  { %2440 = vmatpush.msrb.mxu1 %v2170_v44  ;;  %2486 = vmatpush.msrb.mxu0 %v2202_v1  ;;  %v2187_v44 = vld [vmem:[%s10146_s10 + $0x300] sm:$0xff]  ;;  %v2172_v1 = vld [vmem:[%s10146_s10 + $0x288] sm:$0xff] }
 0x61f   :  { %2463 = vmatpush.msrb.mxu2 %v2186_v31  ;;  %2509 = vmatpush.msra.mxu3 %v2218_v13 }
 0x620   :  { %2441 = vmatpush.msrb.mxu1 %v2169_v11  ;;  %2487 = vmatpush.msrb.mxu0 %v2201_v12  ;;  %v2203_v11 = vld [vmem:[%s10146_s10 + $0x380] sm:$0xff] }
 0x621   :  { %2464 = vmatpush.msrb.mxu2 %v2185_v2  ;;  %2510 = vmatpush.msra.mxu3 %v2217_v46  ;;  %v7863_v12 = vld [vmem:[%s10145_s9] sm:$0xff] }
 0x622   :  { %2442 = vmatpush.msrb.mxu1 %v2168_v15  ;;  %2488 = vmatpush.msrb.mxu0 %v2200_v17  ;;  %v1653_v31 = vperm.slane %v7863_v12, 0  ;;  %v1655_v13 = vperm.slane %v7863_v12, 2 }
 0x623   :  { %2465 = vmatpush.msrb.mxu2 %v2184_v20  ;;  %2511 = vmatpush.msra.mxu3 %v2216_v24  ;;  %v1654_v20 = vperm.slane %v7863_v12, 1 }
 0x624   :  { %2443 = vmatpush.msrb.mxu1 %v2167_v22  ;;  %2489 = vmatpush.msrb.mxu0 %v2199_v19  ;;  %v2234_v19 = vld [vmem:[%s10146_s10 + $0x478] sm:$0xff] }
 0x625   :  { %2466 = vmatpush.msrb.mxu2 %v2183_v23  ;;  %2512 = vmatpush.msra.mxu3 %v2215_v61  ;;  %v2233_v23 = vld [vmem:[%s10146_s10 + $0x470] sm:$0xff] }
 0x626   :  { %2444 = vmatpush.msrb.mxu1 %v2166_v21  ;;  %2490 = vmatpush.msrb.mxu0 %v2198_v42  ;;  %v2266_v21 = vld [vmem:[%s10146_s10 + $0x578] sm:$0xff]  ;;  %v1656_v42 = vperm.slane %v7863_v12, 3 }
 0x627   :  { %2467 = vmatpush.msrb.mxu2 %v2182_v54  ;;  %2513 = vmatpush.msra.mxu3 %v2214_v27  ;;  %v2232_v27 = vld [vmem:[%s10146_s10 + $0x468] sm:$0xff] }
 0x628   :  { %2445 = vmatpush.msrb.mxu1 %v2165_v48  ;;  %2491 = vmatpush.msrb.mxu0 %v2197_v26  ;;  %v2265_v48 = vld [vmem:[%s10146_s10 + $0x570] sm:$0xff] }
 0x629   :  { %2468 = vmatpush.msrb.mxu2 %v2181_v14  ;;  %2514 = vmatpush.msra.mxu3 %v2213_v33  ;;  %v2231_v33 = vld [vmem:[%s10146_s10 + $0x460] sm:$0xff] }
 0x62a   :  { %2446 = vmatpush.msrb.mxu1 %v2164_v28  ;;  %2492 = vmatpush.msrb.mxu0 %v2196_v29  ;;  %v2264_v29 = vld [vmem:[%s10146_s10 + $0x568] sm:$0xff] }
 0x62b   :  { %2469 = vmatpush.msrb.mxu2 %v2180_v25  ;;  %2515 = vmatpush.msra.mxu3 %v2212_v35  ;;  %v2263_v25 = vld [vmem:[%s10146_s10 + $0x560] sm:$0xff]  ;;  %v2282_v35 = vld [vmem:[%s10146_s10 + $0x5f8] sm:$0xff] }
 0x62c   :  { %2447 = vmatpush.msrb.mxu1 %v2163_v53  ;;  %2493 = vmatpush.msrb.mxu0 %v2195_v34  ;;  %v2250_v34 = vld [vmem:[%s10146_s10 + $0x4f8] sm:$0xff] }
 0x62d   :  { %2470 = vmatpush.msrb.mxu2 %v2179_v36  ;;  %2516 = vmatpush.msra.mxu3 %v2211_v38  ;;  %v2262_v36 = vld [vmem:[%s10146_s10 + $0x558] sm:$0xff]  ;;  %v2281_v38 = vld [vmem:[%s10146_s10 + $0x5f0] sm:$0xff] }
 0x62e   :  { %2448 = vmatpush.msrb.mxu1 %v2162_v16  ;;  %2494 = vmatpush.msrb.mxu0 %v2194_v7  ;;  %v2230_v16 = vld [vmem:[%s10146_s10 + $0x458] sm:$0xff]  ;;  %v2249_v7 = vld [vmem:[%s10146_s10 + $0x4f0] sm:$0xff] }
 0x62f   :  { %2471 = vmatpush.msrb.mxu2 %v2178_v41  ;;  %2517 = vmatpush.msra.mxu3 %v2210_v43  ;;  %v2248_v41 = vld [vmem:[%s10146_s10 + $0x4e8] sm:$0xff]  ;;  %v2261_v43 = vld [vmem:[%s10146_s10 + $0x550] sm:$0xff] }
 0x630   :  { %2449 = vmatpush.msrb.mxu1 %v2161_v39  ;;  %2495 = vmatpush.msrb.mxu0 %v2193_v40  ;;  %v2229_v39 = vld [vmem:[%s10146_s10 + $0x450] sm:$0xff] }
 0x631   :  { %2472 = vmatpush.msrb.mxu2 %v2177_v60  ;;  %2518 = vmatpush.msra.mxu3 %v2209_v47  ;;  %v2280_v60 = vld [vmem:[%s10146_s10 + $0x5e8] sm:$0xff] }
 0x632   :  { %2450 = vmatpush.msrb.mxu1 %v2160_v18  ;;  %2496 = vmatpush.msrb.mxu0 %v2192_v37  ;;  %v2228_v47 = vld [vmem:[%s10146_s10 + $0x448] sm:$0xff] }
 0x633   :  { %2473 = vmatpush.msrb.mxu2 %v2176_v52  ;;  %2519 = vmatpush.msra.mxu3 %v2208_v10  ;;  %v2260_v52 = vld [vmem:[%s10146_s10 + $0x548] sm:$0xff]  ;;  %v2279_v10 = vld [vmem:[%s10146_s10 + $0x5e0] sm:$0xff] }
 0x634   :  { %2451 = vmatpush.msrb.mxu1 %v2159_v49  ;;  %2497 = vmatpush.msrb.mxu0 %v2191_v50  ;;  %v2247_v50 = vld [vmem:[%s10146_s10 + $0x4e0] sm:$0xff] }
 0x635   :  { %2474 = vmatpush.msrb.mxu2 %v2175_v32  ;;  %2520 = vmatpush.msra.mxu3 %v2207_v0  ;;  %v2227_v32 = vld [vmem:[%s10146_s10 + $0x440] sm:$0xff]  ;;  %v2246_v0 = vld [vmem:[%s10146_s10 + $0x4d8] sm:$0xff] }
 0x636   :  { %2452 = vmatpush.msrb.mxu1 %v2158_v51  ;;  %2498 = vmatpush.msrb.mxu0 %v2190_v56 }
 0x637   :  { %2475 = vmatpush.msrb.mxu2 %v2174_v58  ;;  %2521 = vmatpush.msra.mxu3 %v2206_v59  ;;  %v2278_v58 = vld [vmem:[%s10146_s10 + $0x5d8] sm:$0xff] }
 0x638   :  { %2453 = vmatpush.msrb.mxu1 %v2157_v4  ;;  %2499 = vmatpush.msrb.mxu0 %v2189_v57  ;;  %v2259_v4 = vld [vmem:[%s10146_s10 + $0x540] sm:$0xff]  ;;  %v1657_v57 = vperm.slane %v7863_v12, 4 }
 0x639   :  { %2476 = vmatpush.msrb.mxu2 %v2173_v9  ;;  %2522 = vmatpush.msra.mxu3 %v2205_v30 }
 0x63a   :  { %2454 = vmatpush.msrb.mxu1 %v2156_v62  ;;  %2500 = vmatpush.msrb.mxu0 %v2188_v63  ;;  %v2226_v62 = vld [vmem:[%s10146_s10 + $0x438] sm:$0xff]  ;;  %v1659_v63 = vperm.slane %v7863_v12, 6 }
 0x63b   :  { %2477 = vmatpush.msrb.mxu2 %v2172_v1  ;;  %2523 = vmatpush.msra.mxu3 %v2204_v5  ;;  %v2277_v5 = vld [vmem:[%s10146_s10 + $0x5d0] sm:$0xff] }
 0x63c   :  { %2455 = vmatpush.msrb.mxu1 %v2155_v8  ;;  %2501 = vmatpush.msrb.mxu0 %v2187_v44  ;;  %v2245_v8 = vld [vmem:[%s10146_s10 + $0x4d0] sm:$0xff]  ;;  %v2258_v44 = vld [vmem:[%s10146_s10 + $0x538] sm:$0xff] }
 0x63d   :  { %2478 = vmatpush.msrb.mxu2 %v2171_v6  ;;  %2524 = vmatpush.msra.mxu3 %v2203_v11  ;;  %v2225_v11 = vld [vmem:[%s10146_s10 + $0x430] sm:$0xff] }
 0x649   :  { %v1708_v15 = vpop.f32.mrf.mxu1 }
 0x64a   :  { %v1709_v17 = vadd.f32 %v1708_v15, %v1653_v31  ;;  %v1754_v2 = vpop.f32.mrf.mxu0  ;;  %v2244_v15 = vld [vmem:[%s10146_s10 + $0x4c8] sm:$0xff] }
 0x64b   :  { %v1755_v46 = vadd.f32 %v1754_v2, %v1655_v13 }
 0x64c   :  { %v2059_v22 = vmax.f32 %v1709_v17, 0.0  ;;  %v2257_v17 = vld [vmem:[%s10146_s10 + $0x530] sm:$0xff] }
 0x64d   :  { %v2061_v24 = vmax.f32 %v1755_v46, 0.0 }
 0x64e   :  { %2364 = vmatmul.f32.vlgmr.msra.gmra.mxu1 %v2059_v22 }
 0x64f   :  { %2410 = vmatmul.f32.vlgmr.msra.gmra.mxu0 %v2061_v24  ;;  %2532 = vmatpush.msra.mxu1 %v2234_v19  ;;  %v1731_v61 = vpop.f32.mrf.mxu2  ;;  %v2276_v19 = vld [vmem:[%s10146_s10 + $0x5c8] sm:$0xff]  ;;  %v1658_v24 = vperm.slane %v7863_v12, 5 }
 0x650   :  { %2578 = vmatpush.msra.mxu0 %v2266_v21  ;;  %v1732_v26 = vadd.f32 %v1731_v61, %v1654_v20  ;;  %v1777_v54 = vpop.f32.mrf.mxu3  ;;  %v1660_v61 = vperm.slane %v7863_v12, 7  ;;  %v2297_v12 = vld [vmem:[%s10146_s10 + $0x670] sm:$0xff] }
 0x651   :  { %v1778_v28 = vadd.f32 %v1777_v54, %v1656_v42  ;;  %2533 = vmatpush.msra.mxu1 %v2233_v23  ;;  %v2256_v23 = vld [vmem:[%s10146_s10 + $0x528] sm:$0xff]  ;;  %v2223_v54 = vld [vmem:[%s10146_s10 + $0x420] sm:$0xff] }
 0x652   :  { %v2060_v14 = vmax.f32 %v1732_v26, 0.0  ;;  %2579 = vmatpush.msra.mxu0 %v2265_v48  ;;  %v2275_v26 = vld [vmem:[%s10146_s10 + $0x5c0] sm:$0xff] }
 0x653   :  { %v2062_v53 = vmax.f32 %v1778_v28, 0.0  ;;  %2534 = vmatpush.msra.mxu1 %v2232_v27  ;;  %v2242_v28 = vld [vmem:[%s10146_s10 + $0x4b8] sm:$0xff] }
 0x654   :  { %2580 = vmatpush.msra.mxu0 %v2264_v29  ;;  %2387 = vmatmul.f32.vlgmr.msra.gmra.mxu2 %v2060_v14  ;;  %v2255_v29 = vld [vmem:[%s10146_s10 + $0x520] sm:$0xff] }
 0x655   :  { %2433 = vmatmul.f32.vlgmr.msrb.gmra.mxu3 %v2062_v53  ;;  %2535 = vmatpush.msra.mxu1 %v2231_v33  ;;  %v2274_v53 = vld [vmem:[%s10146_s10 + $0x5b8] sm:$0xff] }
 0x656   :  { %2555 = vmatpush.msra.mxu2 %v2250_v34  ;;  %2581 = vmatpush.msra.mxu0 %v2263_v25  ;;  %v2222_v25 = vld [vmem:[%s10146_s10 + $0x418] sm:$0xff] }
 0x657   :  { %2601 = vmatpush.msrb.mxu3 %v2282_v35  ;;  %2536 = vmatpush.msra.mxu1 %v2230_v16  ;;  %v1711_v40 = vpop.f32.mrf.mxu1  ;;  %v2241_v16 = vld [vmem:[%s10146_s10 + $0x4b0] sm:$0xff] }
 0x658   :  { %2556 = vmatpush.msra.mxu2 %v2249_v7  ;;  %2582 = vmatpush.msra.mxu0 %v2262_v36  ;;  %v1712_v18 = vadd.f32 %v1711_v40, %v1653_v31  ;;  %v1757_v37 = vpop.f32.mrf.mxu0  ;;  %v2254_v7 = vld [vmem:[%s10146_s10 + $0x518] sm:$0xff]  ;;  %v2221_v40 = vld [vmem:[%s10146_s10 + $0x410] sm:$0xff] }
 0x659   :  { %2602 = vmatpush.msrb.mxu3 %v2281_v38  ;;  %v1758_v49 = vadd.f32 %v1757_v37, %v1655_v13  ;;  %2537 = vmatpush.msra.mxu1 %v2229_v39  ;;  %v2273_v38 = vld [vmem:[%s10146_s10 + $0x5b0] sm:$0xff] }
 0x65a   :  { %2557 = vmatpush.msra.mxu2 %v2248_v41  ;;  %2583 = vmatpush.msra.mxu0 %v2261_v43  ;;  %v2075_v51 = vmax.f32 %v1712_v18, 0.0  ;;  %v2240_v18 = vld [vmem:[%s10146_s10 + $0x4a8] sm:$0xff]  ;;  %v2253_v37 = vld [vmem:[%s10146_s10 + $0x510] sm:$0xff] }
 0x65b   :  { %2603 = vmatpush.msrb.mxu3 %v2280_v60  ;;  %2538 = vmatpush.msra.mxu1 %v2228_v47  ;;  %v2077_v56 = vmax.f32 %v1758_v49, 0.0  ;;  %v2272_v47 = vld [vmem:[%s10146_s10 + $0x5a8] sm:$0xff] }
 0x65c   :  { %2558 = vmatpush.msra.mxu2 %v2247_v50  ;;  %2584 = vmatpush.msra.mxu0 %v2260_v52  ;;  %v2220_v49 = vld [vmem:[%s10146_s10 + $0x408] sm:$0xff]  ;;  %v2239_v50 = vld [vmem:[%s10146_s10 + $0x4a0] sm:$0xff] }
 0x65d   :  { %2604 = vmatpush.msrb.mxu3 %v2279_v10  ;;  %2367 = vmatmul.f32.gmra.mxu1 %v2075_v51  ;;  %v1734_v59 = vpop.f32.mrf.mxu2  ;;  %v2252_v52 = vld [vmem:[%s10146_s10 + $0x508] sm:$0xff] }
 0x65e   :  { %2413 = vmatmul.f32.gmra.mxu0 %v2077_v56  ;;  %2539 = vmatpush.msra.mxu1 %v2227_v32  ;;  %v1735_v9 = vadd.f32 %v1734_v59, %v1654_v20  ;;  %v1780_v30 = vpop.f32.mrf.mxu3  ;;  %v2224_v20 = vld [vmem:[%s10146_s10 + $0x428] sm:$0xff]  ;;  %v2271_v56 = vld [vmem:[%s10146_s10 + $0x5a0] sm:$0xff] }
 0x65f   :  { %2559 = vmatpush.msra.mxu2 %v2246_v0  ;;  %2585 = vmatpush.msra.mxu0 %v2259_v4  ;;  %v1781_v1 = vadd.f32 %v1780_v30, %v1656_v42  ;;  %v1800_v6 = vpop.f32.mrf.mxu1  ;;  %v2243_v42 = vld [vmem:[%s10146_s10 + $0x4c0] sm:$0xff]  ;;  %v8058_v0 = vld [vmem:[%s10145_s9 + $0x8] sm:$0xff] }
 0x660   :  { %2605 = vmatpush.msrb.mxu3 %v2278_v58  ;;  %2540 = vmatpush.msra.mxu1 %v2226_v62  ;;  %v1801_v31 = vadd.f32 %v1800_v6, %v1657_v57  ;;  %v1846_v13 = vpop.f32.mrf.mxu0  ;;  %v2076_v2 = vmax.f32 %v1735_v9, 0.0  ;;  %v2219_v4 = vld [vmem:[%s10146_s10 + $0x400] sm:$0xff]  ;;  %v2238_v58 = vld [vmem:[%s10146_s10 + $0x498] sm:$0xff]  ;;  %v1661_v30 = vperm.slane %v8058_v0, 0  ;;  %v1663_v6 = vperm.slane %v8058_v0, 2 }
 0x661   :  { %v2078_v46 = vmax.f32 %v1781_v1, 0.0  ;;  %2560 = vmatpush.msra.mxu2 %v2245_v8  ;;  %2586 = vmatpush.msra.mxu0 %v2258_v44  ;;  %v1847_v22 = vadd.f32 %v1846_v13, %v1659_v63  ;;  %v2251_v59 = vld [vmem:[%s10146_s10 + $0x500] sm:$0xff]  ;;  %v2270_v62 = vld [vmem:[%s10146_s10 + $0x598] sm:$0xff]  ;;  %v2237_v1 = vld [vmem:[%s10146_s10 + $0x490] sm:$0xff] }
 0x662   :  { %2606 = vmatpush.msrb.mxu3 %v2277_v5  ;;  %2541 = vmatpush.msra.mxu1 %v2225_v11  ;;  %v2063_v21 = vmax.f32 %v1801_v31, 0.0  ;;  %v2298_v9 = vld [vmem:[%s10146_s10 + $0x678] sm:$0xff]  ;;  %v2269_v11 = vld [vmem:[%s10146_s10 + $0x590] sm:$0xff] }
 0x663   :  { %2561 = vmatpush.msra.mxu2 %v2244_v15  ;;  %2587 = vmatpush.msra.mxu0 %v2257_v17  ;;  %v2065_v48 = vmax.f32 %v1847_v22, 0.0  ;;  %v2330_v44 = vld [vmem:[%s10146_s10 + $0x778] sm:$0xff]  ;;  %v2329_v13 = vld [vmem:[%s10146_s10 + $0x770] sm:$0xff]  ;;  %v2236_v15 = vld [vmem:[%s10146_s10 + $0x488] sm:$0xff] }
 0x664   :  { %2607 = vmatpush.msrb.mxu3 %v2276_v19  ;;  %2390 = vmatmul.f32.gmra.mxu2 %v2076_v2  ;;  %v2296_v22 = vld [vmem:[%s10146_s10 + $0x668] sm:$0xff] }
 0x665   :  { %2436 = vmatmul.f32.gmra.mxu3 %v2078_v46  ;;  %2542 = vmatpush.msra.mxu1 %v2224_v20  ;;  %v1823_v27 = vpop.f32.mrf.mxu2  ;;  %v2268_v46 = vld [vmem:[%s10146_s10 + $0x588] sm:$0xff] }
 0x666   :  { %2562 = vmatpush.msra.mxu2 %v2243_v42  ;;  %2588 = vmatpush.msra.mxu0 %v2256_v23  ;;  %v1824_v14 = vadd.f32 %v1823_v27, %v1658_v24  ;;  %v1869_v33 = vpop.f32.mrf.mxu3  ;;  %v2267_v42 = vld [vmem:[%s10146_s10 + $0x580] sm:$0xff] }
 0x667   :  { %2608 = vmatpush.msrb.mxu3 %v2275_v26  ;;  %2456 = vmatmul.f32.vlgmr.msrb.gmra.mxu1 %v2063_v21  ;;  %v1870_v34 = vadd.f32 %v1869_v33, %v1660_v61  ;;  %v1803_v35 = vpop.f32.mrf.mxu1  ;;  %v2235_v21 = vld [vmem:[%s10146_s10 + $0x480] sm:$0xff]  ;;  %v2314_v26 = vld [vmem:[%s10146_s10 + $0x6f8] sm:$0xff] }
 0x668   :  { %2502 = vmatmul.f32.vlgmr.msrb.gmra.mxu0 %v2065_v48  ;;  %2543 = vmatpush.msra.mxu1 %v2223_v54  ;;  %v1849_v36 = vpop.f32.mrf.mxu0  ;;  %v1804_v39 = vadd.f32 %v1803_v35, %v1657_v57  ;;  %v2064_v41 = vmax.f32 %v1824_v14, 0.0  ;;  %v2295_v23 = vld [vmem:[%s10146_s10 + $0x660] sm:$0xff]  ;;  %v2346_v14 = vld [vmem:[%s10146_s10 + $0x7f8] sm:$0xff] }
 0x669   :  { %2563 = vmatpush.msra.mxu2 %v2242_v28  ;;  %2589 = vmatpush.msra.mxu0 %v2255_v29  ;;  %v1850_v43 = vadd.f32 %v1849_v36, %v1659_v63  ;;  %v2066_v60 = vmax.f32 %v1870_v34, 0.0  ;;  %v2327_v54 = vld [vmem:[%s10146_s10 + $0x760] sm:$0xff]  ;;  %v1664_v28 = vperm.slane %v8058_v0, 3  ;;  %v2326_v35 = vld [vmem:[%s10146_s10 + $0x758] sm:$0xff]  ;;  %v2345_v36 = vld [vmem:[%s10146_s10 + $0x7f0] sm:$0xff] }
 0x66a   :  { %2609 = vmatpush.msrb.mxu3 %v2274_v53  ;;  %2544 = vmatpush.msra.mxu1 %v2222_v25  ;;  %v2079_v10 = vmax.f32 %v1804_v39, 0.0  ;;  %v2294_v53 = vld [vmem:[%s10146_s10 + $0x658] sm:$0xff]  ;;  %v2313_v25 = vld [vmem:[%s10146_s10 + $0x6f0] sm:$0xff] }
 0x66b   :  { %2564 = vmatpush.msra.mxu2 %v2241_v16  ;;  %2590 = vmatpush.msra.mxu0 %v2254_v7  ;;  %v2081_v51 = vmax.f32 %v1850_v43, 0.0  ;;  %v2293_v39 = vld [vmem:[%s10146_s10 + $0x650] sm:$0xff] }
 0x66c   :  { %2610 = vmatpush.msrb.mxu3 %v2273_v38  ;;  %2545 = vmatpush.msra.mxu1 %v2221_v40  ;;  %v2312_v40 = vld [vmem:[%s10146_s10 + $0x6e8] sm:$0xff] }
 0x66d   :  { %2565 = vmatpush.msra.mxu2 %v2240_v18  ;;  %2591 = vmatpush.msra.mxu0 %v2253_v37  ;;  %v1826_v32 = vpop.f32.mrf.mxu2  ;;  %v2344_v18 = vld [vmem:[%s10146_s10 + $0x7e8] sm:$0xff] }
 0x66e   :  { %2611 = vmatpush.msrb.mxu3 %v2272_v47  ;;  %2479 = vmatmul.f32.vlgmr.msrb.gmra.mxu2 %v2064_v41  ;;  %v1872_v57 = vpop.f32.mrf.mxu3  ;;  %v1827_v63 = vadd.f32 %v1826_v32, %v1658_v24  ;;  %v2328_v24 = vld [vmem:[%s10146_s10 + $0x768] sm:$0xff]  ;;  %v2325_v41 = vld [vmem:[%s10146_s10 + $0x750] sm:$0xff]  ;;  %v2310_v32 = vld [vmem:[%s10146_s10 + $0x6d8] sm:$0xff] }
 0x66f   :  { %2525 = vmatmul.f32.vlgmr.msra.gmra.mxu3 %v2066_v60  ;;  %2546 = vmatpush.msra.mxu1 %v2220_v49  ;;  %v1873_v8 = vadd.f32 %v1872_v57, %v1660_v61  ;;  %v1892_v5 = vpop.f32.mrf.mxu1  ;;  %v1662_v61 = vperm.slane %v8058_v0, 1  ;;  %v2292_v37 = vld [vmem:[%s10146_s10 + $0x648] sm:$0xff]  ;;  %v2311_v49 = vld [vmem:[%s10146_s10 + $0x6e0] sm:$0xff] }
 0x670   :  { %2566 = vmatpush.msra.mxu2 %v2239_v50  ;;  %2592 = vmatpush.msra.mxu0 %v2252_v52  ;;  %v1938_v31 = vpop.f32.mrf.mxu0  ;;  %v2080_v17 = vmax.f32 %v1827_v63, 0.0  ;;  %v1893_v2 = vadd.f32 %v1892_v5, %v1661_v30  ;;  %v2324_v50 = vld [vmem:[%s10146_s10 + $0x748] sm:$0xff]  ;;  %v2290_v63 = vld [vmem:[%s10146_s10 + $0x638] sm:$0xff]  ;;  %v2289_v5 = vld [vmem:[%s10146_s10 + $0x630] sm:$0xff] }
 0x671   :  { %2612 = vmatpush.msrb.mxu3 %v2271_v56  ;;  %2459 = vmatmul.f32.gmra.mxu1 %v2079_v10  ;;  %v2082_v19 = vmax.f32 %v1873_v8, 0.0  ;;  %v1939_v20 = vadd.f32 %v1938_v31, %v1663_v6  ;;  %v2343_v10 = vld [vmem:[%s10146_s10 + $0x7e0] sm:$0xff]  ;;  %v2322_v8 = vld [vmem:[%s10146_s10 + $0x738] sm:$0xff]  ;;  %v2340_v31 = vld [vmem:[%s10146_s10 + $0x7c8] sm:$0xff] }
 0x672   :  { %2505 = vmatmul.f32.gmra.mxu0 %v2081_v51  ;;  %2547 = vmatpush.msra.mxu1 %v2219_v4  ;;  %v2067_v48 = vmax.f32 %v1893_v2, 0.0  ;;  %v2291_v51 = vld [vmem:[%s10146_s10 + $0x640] sm:$0xff] }
 0x673   :  { %2567 = vmatpush.msra.mxu2 %v2238_v58  ;;  %2593 = vmatpush.msra.mxu0 %v2251_v59  ;;  %v2069_v29 = vmax.f32 %v1939_v20, 0.0  ;;  %v2323_v4 = vld [vmem:[%s10146_s10 + $0x740] sm:$0xff]  ;;  %v2342_v59 = vld [vmem:[%s10146_s10 + $0x7d8] sm:$0xff] }
 0x674   :  { %2613 = vmatpush.msrb.mxu3 %v2270_v62  ;;  %2624 = vmatpush.msrb.mxu1 %v2298_v9  ;;  %v2319_v20 = vld [vmem:[%s10146_s10 + $0x720] sm:$0xff] }
 0x675   :  { %2670 = vmatpush.msrb.mxu0 %v2330_v44  ;;  %2568 = vmatpush.msra.mxu2 %v2237_v1  ;;  %v1915_v27 = vpop.f32.mrf.mxu2  ;;  %v2341_v1 = vld [vmem:[%s10146_s10 + $0x7d0] sm:$0xff] }
 0x676   :  { %2614 = vmatpush.msrb.mxu3 %v2269_v11  ;;  %2625 = vmatpush.msrb.mxu1 %v2297_v12  ;;  %v1961_v33 = vpop.f32.mrf.mxu3  ;;  %v1916_v34 = vadd.f32 %v1915_v27, %v1662_v61  ;;  %v2321_v11 = vld [vmem:[%s10146_s10 + $0x730] sm:$0xff]  ;;  %v2288_v12 = vld [vmem:[%s10146_s10 + $0x628] sm:$0xff] }
 0x677   :  { %2671 = vmatpush.msrb.mxu0 %v2329_v13  ;;  %2569 = vmatpush.msra.mxu2 %v2236_v15  ;;  %v1895_v16 = vpop.f32.mrf.mxu1  ;;  %v1962_v7 = vadd.f32 %v1961_v33, %v1664_v28  ;;  %v2307_v15 = vld [vmem:[%s10146_s10 + $0x6c0] sm:$0xff]  ;;  %v2337_v27 = vld [vmem:[%s10146_s10 + $0x7b0] sm:$0xff]  ;;  %v2336_v33 = vld [vmem:[%s10146_s10 + $0x7a8] sm:$0xff] }
 0x678   :  { %2615 = vmatpush.msrb.mxu3 %v2268_v46  ;;  %2626 = vmatpush.msrb.mxu1 %v2296_v22  ;;  %v1941_v38 = vpop.f32.mrf.mxu0  ;;  %v1896_v43 = vadd.f32 %v1895_v16, %v1661_v30  ;;  %v2068_v60 = vmax.f32 %v1916_v34, 0.0  ;;  %v2309_v30 = vld [vmem:[%s10146_s10 + $0x6d0] sm:$0xff]  ;;  %v2339_v46 = vld [vmem:[%s10146_s10 + $0x7c0] sm:$0xff] }
 0x679   :  { %2672 = vmatpush.msrb.mxu0 %v2328_v24  ;;  %2482 = vmatmul.f32.gmra.mxu2 %v2080_v17  ;;  %v1942_v47 = vadd.f32 %v1941_v38, %v1663_v6  ;;  %v2070_v52 = vmax.f32 %v1962_v7, 0.0  ;;  %v2308_v6 = vld [vmem:[%s10146_s10 + $0x6c8] sm:$0xff]  ;;  %v2287_v22 = vld [vmem:[%s10146_s10 + $0x620] sm:$0xff] }
 0x67a   :  { %2528 = vmatmul.f32.gmra.mxu3 %v2082_v19  ;;  %2570 = vmatpush.msra.mxu2 %v2235_v21  ;;  %v2083_v56 = vmax.f32 %v1896_v43, 0.0  ;;  %v2320_v17 = vld [vmem:[%s10146_s10 + $0x728] sm:$0xff]  ;;  %v2306_v19 = vld [vmem:[%s10146_s10 + $0x6b8] sm:$0xff]  ;;  %v2283_v38 = vld [vmem:[%s10146_s10 + $0x600] sm:$0xff] }
 0x67b   :  { %2616 = vmatpush.msrb.mxu3 %v2267_v42  ;;  %2627 = vmatpush.msrb.mxu1 %v2295_v23  ;;  %v2085_v58 = vmax.f32 %v1942_v47, 0.0  ;;  %v2338_v21 = vld [vmem:[%s10146_s10 + $0x7b8] sm:$0xff]  ;;  %v1665_v23 = vperm.slane %v8058_v0, 4  ;;  %v2315_v43 = vld [vmem:[%s10146_s10 + $0x700] sm:$0xff]  ;;  %v2301_v47 = vld [vmem:[%s10146_s10 + $0x690] sm:$0xff] }
 0x67c   :  { %2647 = vmatpush.msrb.mxu2 %v2314_v26  ;;  %2673 = vmatpush.msrb.mxu0 %v2327_v54  ;;  %v2286_v42 = vld [vmem:[%s10146_s10 + $0x618] sm:$0xff]  ;;  %v1667_v54 = vperm.slane %v8058_v0, 6 }
 0x67d   :  { %2693 = vmatpush.msra.mxu3 %v2346_v14  ;;  %2548 = vmatmul.f32.vlgmr.msra.gmra.mxu1 %v2067_v48  ;;  %v1918_v57 = vpop.f32.mrf.mxu2  ;;  %v2305_v48 = vld [vmem:[%s10146_s10 + $0x6b0] sm:$0xff]  ;;  %v2318_v26 = vld [vmem:[%s10146_s10 + $0x718] sm:$0xff] }
 0x67e   :  { %2594 = vmatmul.f32.vlgmr.msra.gmra.mxu0 %v2069_v29  ;;  %2628 = vmatpush.msrb.mxu1 %v2294_v53  ;;  %v1964_v62 = vpop.f32.mrf.mxu3  ;;  %v1919_v9 = vadd.f32 %v1918_v57, %v1662_v61  ;;  %v2304_v29 = vld [vmem:[%s10146_s10 + $0x6a8] sm:$0xff]  ;;  %v2317_v14 = vld [vmem:[%s10146_s10 + $0x710] sm:$0xff]  ;;  %v2299_v57 = vld [vmem:[%s10146_s10 + $0x680] sm:$0xff] }
 0x67f   :  { %2648 = vmatpush.msrb.mxu2 %v2313_v25  ;;  %2674 = vmatpush.msrb.mxu0 %v2326_v35  ;;  %v1965_v44 = vadd.f32 %v1964_v62, %v1664_v28  ;;  %v1984_v24 = vpop.f32.mrf.mxu1  ;;  %v2285_v28 = vld [vmem:[%s10146_s10 + $0x610] sm:$0xff]  ;;  %v2284_v53 = vld [vmem:[%s10146_s10 + $0x608] sm:$0xff]  ;;  %v2303_v25 = vld [vmem:[%s10146_s10 + $0x6a0] sm:$0xff] }
 0x680   :  { %2694 = vmatpush.msra.mxu3 %v2345_v36  ;;  %2629 = vmatpush.msrb.mxu1 %v2293_v39  ;;  %v2084_v13 = vmax.f32 %v1919_v9, 0.0  ;;  %v2030_v61 = vpop.f32.mrf.mxu0  ;;  %v1985_v34 = vadd.f32 %v1984_v24, %v1665_v23  ;;  %v2316_v35 = vld [vmem:[%s10146_s10 + $0x708] sm:$0xff]  ;;  %v2335_v36 = vld [vmem:[%s10146_s10 + $0x7a0] sm:$0xff]  ;;  %v1666_v39 = vperm.slane %v8058_v0, 5 }
 0x681   :  { %2649 = vmatpush.msrb.mxu2 %v2312_v40  ;;  %2675 = vmatpush.msrb.mxu0 %v2325_v41  ;;  %v2086_v2 = vmax.f32 %v1965_v44, 0.0  ;;  %v2031_v16 = vadd.f32 %v2030_v61, %v1667_v54  ;;  %v2302_v41 = vld [vmem:[%s10146_s10 + $0x698] sm:$0xff] }
 0x682   :  { %2695 = vmatpush.msra.mxu3 %v2344_v18  ;;  %2630 = vmatpush.msrb.mxu1 %v2292_v37  ;;  %v1668_v18 = vperm.slane %v8058_v0, 7  ;;  %v2334_v37 = vld [vmem:[%s10146_s10 + $0x798] sm:$0xff]  ;;  %v2333_v0 = vld [vmem:[%s10146_s10 + $0x790] sm:$0xff] }
 0x683   :  { %2650 = vmatpush.msrb.mxu2 %v2311_v49  ;;  %2676 = vmatpush.msrb.mxu0 %v2324_v50  ;;  %v2073_v49 = vmax.f32 %v2031_v16, 0.0 }
 0x684   :  { %2696 = vmatpush.msra.mxu3 %v2343_v10  ;;  %2571 = vmatmul.f32.vlgmr.msra.gmra.mxu2 %v2068_v60  ;;  %v2071_v60 = vmax.f32 %v1985_v34, 0.0 }
 0x685   :  { %2617 = vmatmul.f32.vlgmr.msrb.gmra.mxu3 %v2070_v52  ;;  %2631 = vmatpush.msrb.mxu1 %v2291_v51  ;;  %v2007_v7 = vpop.f32.mrf.mxu2  ;;  %v2300_v51 = vld [vmem:[%s10146_s10 + $0x688] sm:$0xff] }
 0x686   :  { %2651 = vmatpush.msrb.mxu2 %v2310_v32  ;;  %2677 = vmatpush.msrb.mxu0 %v2323_v4  ;;  %v2053_v40 = vpop.f32.mrf.mxu3  ;;  %v2008_v52 = vadd.f32 %v2007_v7, %v1666_v39  ;;  %v2332_v32 = vld [vmem:[%s10146_s10 + $0x788] sm:$0xff] }
 0x687   :  { %2697 = vmatpush.msra.mxu3 %v2342_v59  ;;  %2551 = vmatmul.f32.gmra.mxu1 %v2083_v56  ;;  %v1987_v50 = vpop.f32.mrf.mxu1  ;;  %v2054_v56 = vadd.f32 %v2053_v40, %v1668_v18  ;;  %v2331_v59 = vld [vmem:[%s10146_s10 + $0x780] sm:$0xff] }
 0x688   :  { %2597 = vmatmul.f32.gmra.mxu0 %v2085_v58  ;;  %2632 = vmatpush.msrb.mxu1 %v2290_v63  ;;  %v2033_v10 = vpop.f32.mrf.mxu0  ;;  %v1988_v4 = vadd.f32 %v1987_v50, %v1665_v23  ;;  %v2072_v62 = vmax.f32 %v2008_v52, 0.0 }
 0x689   :  { %2652 = vmatpush.msrb.mxu2 %v2309_v30  ;;  %2678 = vmatpush.msrb.mxu0 %v2322_v8  ;;  %v2034_v58 = vadd.f32 %v2033_v10, %v1667_v54  ;;  %v2074_v63 = vmax.f32 %v2054_v56, 0.0 }
 0x68a   :  { %2698 = vmatpush.msra.mxu3 %v2341_v1  ;;  %2633 = vmatpush.msrb.mxu1 %v2289_v5  ;;  %v2087_v30 = vmax.f32 %v1988_v4, 0.0 }
 0x68b   :  { %2653 = vmatpush.msrb.mxu2 %v2308_v6  ;;  %2679 = vmatpush.msrb.mxu0 %v2321_v11  ;;  %v2089_v44 = vmax.f32 %v2034_v58, 0.0 }
 0x68c   :  { %2699 = vmatpush.msra.mxu3 %v2340_v31  ;;  %2634 = vmatpush.msrb.mxu1 %v2288_v12 }
 0x68d   :  { %2654 = vmatpush.msrb.mxu2 %v2307_v15  ;;  %2680 = vmatpush.msrb.mxu0 %v2320_v17  ;;  %v2010_v9 = vpop.f32.mrf.mxu2 }
 0x68e   :  { %2700 = vmatpush.msra.mxu3 %v2339_v46  ;;  %2574 = vmatmul.f32.gmra.mxu2 %v2084_v13  ;;  %v2056_v8 = vpop.f32.mrf.mxu3  ;;  %v2011_v1 = vadd.f32 %v2010_v9, %v1666_v39 }
 0x68f   :  { %2620 = vmatmul.f32.gmra.mxu3 %v2086_v2  ;;  %2635 = vmatpush.msrb.mxu1 %v2287_v22  ;;  %v2057_v5 = vadd.f32 %v2056_v8, %v1668_v18 }
 0x690   :  { %2655 = vmatpush.msrb.mxu2 %v2306_v19  ;;  %2681 = vmatpush.msrb.mxu0 %v2319_v20  ;;  %v2088_v6 = vmax.f32 %v2011_v1, 0.0  ;;  %v8313_v20 = vld [vmem:[%s10143_s7] sm:$0xff] }
 0x691   :  { %2701 = vmatpush.msra.mxu3 %v2338_v21  ;;  %2636 = vmatpush.msrb.mxu1 %v2286_v42  ;;  %v2090_v11 = vmax.f32 %v2057_v5, 0.0  ;;  %v2347_v24 = vperm.slane %v8313_v20, 1 }
 0x692   :  { %2656 = vmatpush.msrb.mxu2 %v2305_v48  ;;  %2682 = vmatpush.msrb.mxu0 %v2318_v26 }
 0x693   :  { %2702 = vmatpush.msra.mxu3 %v2337_v27  ;;  %2637 = vmatpush.msrb.mxu1 %v2285_v28 }
 0x694   :  { %2657 = vmatpush.msrb.mxu2 %v2304_v29  ;;  %2683 = vmatpush.msrb.mxu0 %v2317_v14 }
 0x695   :  { %2703 = vmatpush.msra.mxu3 %v2336_v33  ;;  %2638 = vmatpush.msrb.mxu1 %v2284_v53 }
 0x696   :  { %2658 = vmatpush.msrb.mxu2 %v2303_v25  ;;  %2684 = vmatpush.msrb.mxu0 %v2316_v35 }
 0x697   :  { %2704 = vmatpush.msra.mxu3 %v2335_v36  ;;  %2639 = vmatpush.msrb.mxu1 %v2283_v38 }
 0x698   :  { %2659 = vmatpush.msrb.mxu2 %v2302_v41  ;;  %2685 = vmatpush.msrb.mxu0 %v2315_v43 }
 0x699   :  { %2705 = vmatpush.msra.mxu3 %v2334_v37  ;;  %2640 = vmatmul.f32.vlgmr.msrb.gmra.mxu1 %v2071_v60 }
 0x69a   :  { %2686 = vmatmul.f32.vlgmr.msrb.gmra.mxu0 %v2073_v49  ;;  %2660 = vmatpush.msrb.mxu2 %v2301_v47 }
 0x69b   :  { %2706 = vmatpush.msra.mxu3 %v2333_v0 }
 0x69c   :  { %2661 = vmatpush.msrb.mxu2 %v2300_v51 }
 0x69d   :  { %2707 = vmatpush.msra.mxu3 %v2332_v32 }
 0x69e   :  { %2662 = vmatpush.msrb.mxu2 %v2299_v57 }
 0x69f   :  { %2708 = vmatpush.msra.mxu3 %v2331_v59  ;;  %2663 = vmatmul.f32.vlgmr.msrb.gmra.mxu2 %v2072_v62 }
 0x6a0   :  { %2709 = vmatmul.f32.vlgmr.msra.gmra.mxu3 %v2074_v63 }
 0x6a1   :  { %2643 = vmatmul.f32.gmra.mxu1 %v2087_v30 }
 0x6a2   :  { %2689 = vmatmul.f32.gmra.mxu0 %v2089_v44 }
 0x6a7   :  { %2666 = vmatmul.f32.gmra.mxu2 %v2088_v6 }
 0x6a8   :  { %2712 = vmatmul.f32.gmra.mxu3 %v2090_v11 }
 0x6cb   :  { %v2365_v31 = vpop.f32.mrf.mxu1 }
 0x6cc   :  { %v2411_v12 = vpop.f32.mrf.mxu0  ;;  %v2366_v21 = vadd.f32 %v2365_v31, %v2347_v24 }
 0x6d7   :  { %v2388_v13 = vpop.f32.mrf.mxu2 }
 0x6d8   :  { %v2434_v15 = vpop.f32.mrf.mxu3  ;;  %v2389_v61 = vadd.f32 %v2388_v13, %v2366_v21 }
 0x6da   :  { %v2368_v17 = vpop.f32.mrf.mxu1  ;;  %v2412_v54 = vadd.f32 %v2411_v12, %v2389_v61  ;;  %v5743_v61 = vld [vmem:[%s10140_s4 + $0xe0] sm:$0xff] }
 0x6db   :  { %v2414_v2 = vpop.f32.mrf.mxu0  ;;  %v2369_v27 = vadd.f32 %v2368_v17, %v2347_v24 }
 0x6dc   :  { %v2435_v29 = vadd.f32 %v2434_v15, %v2412_v54  ;;  %v5742_v54 = vld [vmem:[%s10140_s4 + $0xd8] sm:$0xff] }
 0x6e4   :  { %v2457_v19 = vpop.f32.mrf.mxu1 }
 0x6e5   :  { %v2503_v42 = vpop.f32.mrf.mxu0  ;;  %v2458_v53 = vadd.f32 %v2457_v19, %v2435_v29 }
 0x6e7   :  { %v2391_v46 = vpop.f32.mrf.mxu2 }
 0x6e8   :  { %v2437_v22 = vpop.f32.mrf.mxu3  ;;  %v2392_v28 = vadd.f32 %v2391_v46, %v2369_v27  ;;  %v5739_v27 = vld [vmem:[%s10140_s4 + $0xc0] sm:$0xff] }
 0x6ea   :  { %v2415_v34 = vadd.f32 %v2414_v2, %v2392_v28  ;;  %v5740_v28 = vld [vmem:[%s10140_s4 + $0xc8] sm:$0xff] }
 0x6ec   :  { %v2438_v7 = vadd.f32 %v2437_v22, %v2415_v34  ;;  %v5736_v34 = vld [vmem:[%s10140_s4 + $0xa8] sm:$0xff] }
 0x6ee   :  { %v2460_v26 = vpop.f32.mrf.mxu1 }
 0x6ef   :  { %v2506_v14 = vpop.f32.mrf.mxu0  ;;  %v2461_v38 = vadd.f32 %v2460_v26, %v2438_v7  ;;  %v5741_v26 = vld [vmem:[%s10140_s4 + $0xd0] sm:$0xff]  ;;  %v5731_v7 = vld [vmem:[%s10140_s4 + $0x80] sm:$0xff] }
 0x6f1   :  { %v2480_v23 = vpop.f32.mrf.mxu2 }
 0x6f2   :  { %v2526_v48 = vpop.f32.mrf.mxu3  ;;  %v2481_v35 = vadd.f32 %v2480_v23, %v2458_v53  ;;  %v5745_v23 = vld [vmem:[%s10140_s4 + $0xf0] sm:$0xff]  ;;  %v5735_v53 = vld [vmem:[%s10140_s4 + $0xa0] sm:$0xff] }
 0x6f3   :  { %2821 = vmatpush.msra.mxu1 %v5745_v23 }
 0x6f4   :  { %v2504_v36 = vadd.f32 %v2503_v42, %v2481_v35  ;;  %v5734_v35 = vld [vmem:[%s10140_s4 + $0x98] sm:$0xff] }
 0x6f5   :  { %2822 = vmatpush.msra.mxu1 %v5743_v61 }
 0x6f6   :  { %v2527_v41 = vadd.f32 %v2526_v48, %v2504_v36  ;;  %v5744_v48 = vld [vmem:[%s10140_s4 + $0xe8] sm:$0xff] }
 0x6f7   :  { %2823 = vmatpush.msra.mxu1 %v5741_v26  ;;  %v5732_v36 = vld [vmem:[%s10140_s4 + $0x88] sm:$0xff] }
 0x6f9   :  { %2824 = vmatpush.msra.mxu1 %v5739_v27 }
 0x6fa   :  { %v2549_v16 = vpop.f32.mrf.mxu1 }
 0x6fb   :  { %v2595_v39 = vpop.f32.mrf.mxu0  ;;  %v2550_v60 = vadd.f32 %v2549_v16, %v2527_v41 }
 0x6fc   :  { %v2483_v33 = vpop.f32.mrf.mxu2 }
 0x6fd   :  { %v2529_v25 = vpop.f32.mrf.mxu3  ;;  %v2484_v43 = vadd.f32 %v2483_v33, %v2461_v38  ;;  %v5738_v33 = vld [vmem:[%s10140_s4 + $0xb8] sm:$0xff] }
 0x6ff   :  { %v2507_v47 = vadd.f32 %v2506_v14, %v2484_v43  ;;  %v5737_v14 = vld [vmem:[%s10140_s4 + $0xb0] sm:$0xff] }
 0x700   :  { %2825 = vmatpush.msra.mxu1 %v5737_v14 }
 0x701   :  { %v2530_v50 = vadd.f32 %v2529_v25, %v2507_v47  ;;  %v5733_v25 = vld [vmem:[%s10140_s4 + $0x90] sm:$0xff] }
 0x702   :  { %2826 = vmatpush.msra.mxu1 %v5735_v53 }
 0x704   :  { %v2552_v37 = vpop.f32.mrf.mxu1  ;;  %2827 = vmatpush.msra.mxu1 %v5733_v25 }
 0x705   :  { %v2598_v0 = vpop.f32.mrf.mxu0  ;;  %v2553_v32 = vadd.f32 %v2552_v37, %v2530_v50 }
 0x706   :  { %2828 = vmatpush.msra.mxu1 %v5731_v7 }
 0x707   :  { %v2572_v40 = vpop.f32.mrf.mxu2 }
 0x708   :  { %v2618_v18 = vpop.f32.mrf.mxu3  ;;  %v2573_v49 = vadd.f32 %v2572_v40, %v2550_v60 }
 0x70a   :  { %v2596_v10 = vadd.f32 %v2595_v39, %v2573_v49 }
 0x70c   :  { %v2619_v4 = vadd.f32 %v2618_v18, %v2596_v10 }
 0x711   :  { %v2575_v52 = vpop.f32.mrf.mxu2 }
 0x712   :  { %v2621_v51 = vpop.f32.mrf.mxu3  ;;  %v2576_v57 = vadd.f32 %v2575_v52, %v2553_v32 }
 0x714   :  { %v2599_v63 = vadd.f32 %v2598_v0, %v2576_v57 }
 0x716   :  { %v2641_v56 = vpop.f32.mrf.mxu1  ;;  %v2622_v1 = vadd.f32 %v2621_v51, %v2599_v63 }
 0x717   :  { %v2642_v58 = vadd.f32 %v2641_v56, %v2619_v4  ;;  %v2687_v59 = vpop.f32.mrf.mxu0 }
 0x71e   :  { %v2644_v44 = vpop.f32.mrf.mxu1 }
 0x71f   :  { %v2645_v6 = vadd.f32 %v2644_v44, %v2622_v1  ;;  %v2690_v15 = vpop.f32.mrf.mxu0  ;;  %v2769_v1 = vperm.slane %v8313_v20, 5 }
 0x722   :  { %v2664_v62 = vpop.f32.mrf.mxu2 }
 0x723   :  { %v2665_v9 = vadd.f32 %v2664_v62, %v2642_v58  ;;  %v2710_v30 = vpop.f32.mrf.mxu3 }
 0x725   :  { %v2688_v8 = vadd.f32 %v2687_v59, %v2665_v9 }
 0x727   :  { %v2711_v5 = vadd.f32 %v2710_v30, %v2688_v8  ;;  %v2766_v30 = vperm.slane %v8313_v20, 4  ;;  %v8403_v20 = vld [vmem:[%s10141_s5 + $0x2] sm:$0x3]  ;;  %s10172_s5 = smov 104  }
 0x728   :  { %v2804_v25 = vperm.slane %v8403_v20, 1 }
 0x729   :  { %v8317_v11 = vadd.f32 %v2711_v5, %v7211_v55 }
 0x72a   :  { %v2667_v31 = vpop.f32.mrf.mxu2 }
 0x72b   :  { %v2668_v12 = vadd.f32 %v2667_v31, %v2645_v6  ;;  %v2718_v13 = vsel %vm123_vm1, %v8317_v11, 0.0  ;;  %v2713_v2 = vpop.f32.mrf.mxu3  ;;  %v2726_v22 = vmul.f32 %v8317_v11, %v8317_v11 }
 0x72c   :  { %2719 = vadd.xlane.f32.xlu2 %v2718_v13 }
 0x72d   :  { %v2691_v17 = vadd.f32 %v2690_v15, %v2668_v12  ;;  %v2728_v24 = vsel %vm123_vm1, %v2726_v22, 0.0 }
 0x72f   :  { %v2714_v46 = vadd.f32 %v2713_v2, %v2691_v17  ;;  %v2803_v2 = vperm.slane %v8403_v20, 0 }
 0x731   :  { %v8324_v19 = vadd.f32 %v2714_v46, %v7298_v3  ;;  %v5746_v3 = vld [vmem:[%s10140_s4 + $0xf8] sm:$0xff] }
 0x732   :  { %2844 = vmatpush.msra.mxu2 %v5746_v3 }
 0x733   :  { %v2721_v55 = vsel %vm123_vm1, %v8324_v19, 0.0  ;;  %v2727_v21 = vmul.f32 %v8324_v19, %v8324_v19 }
 0x734   :  { %2729 = vadd.xlane.f32.xlu2 %v2728_v24  ;;  %2722 = vadd.xlane.f32.xlu0 %v2721_v55 }
 0x735   :  { %v2731_v42 = vsel %vm123_vm1, %v2727_v21, 0.0  ;;  %2845 = vmatpush.msra.mxu2 %v5744_v48 }
 0x736   :  { %2732 = vadd.xlane.f32.xlu1 %v2731_v42 }
 0x737   :  { %2846 = vmatpush.msra.mxu2 %v5742_v54 }
 0x739   :  { %2847 = vmatpush.msra.mxu2 %v5740_v28 }
 0x73b   :  { %2848 = vmatpush.msra.mxu2 %v5738_v33 }
 0x73d   :  { %2849 = vmatpush.msra.mxu2 %v5736_v34 }
 0x73f   :  { %2850 = vmatpush.msra.mxu2 %v5734_v35 }
 0x741   :  { %2851 = vmatpush.msra.mxu2 %v5732_v36 }
 0x79f   :  { %v2720_v29 = vpop.xlane.xlu2 %2719 }
 0x7a0   :  { %v2724_v16 = vmul.f32 %v2720_v29, %v7066_v45 }
 0x7a2   :  { %v2736_v40 = vmul.f32 %v2724_v16, %v2724_v16  ;;  %v2740_v9 = vsub.f32 %v8317_v11, %v2724_v16 }
 0x7a7   :  { %v2730_v38 = vpop.xlane.xlu2 %2729  ;;  %v2723_v39 = vpop.xlane.xlu0 %2722 }
 0x7a8   :  { %v2734_v41 = vmul.f32 %v2730_v38, %v7066_v45  ;;  %v2725_v43 = vmul.f32 %v2723_v39, %v7066_v45 }
 0x7a9   :  { %v2733_v18 = vpop.xlane.xlu1 %2732 }
 0x7aa   :  { %v2738_v37 = vsub.f32 %v2734_v41, %v2736_v40  ;;  %v2737_v60 = vmul.f32 %v2725_v43, %v2725_v43  ;;  %v2735_v47 = vmul.f32 %v2733_v18, %v7066_v45  ;;  %v2741_v12 = vsub.f32 %v8324_v19, %v2725_v43 }
 0x7ac   :  { %v2742_v49 = vadd.f32 1e-05, %v2738_v37  ;;  %v2739_v50 = vsub.f32 %v2735_v47, %v2737_v60 }
 0x7ae   :  { %6379 = vrsqrt.f32 %v2742_v49  ;;  %v2743_v0 = vadd.f32 1e-05, %v2739_v50  ;;  %vm2750_vm11 = vweird.f32 %v2742_v49 }
 0x7b0   :  { %6381 = vrsqrt.f32 %v2743_v0  ;;  %vm2760_vm14 = vweird.f32 %v2743_v0 }
 0x7b4   :  { %v6380_v52 = vpop.eup %6379 }
 0x7b5   :  { %v2745_v10 = vmul.f32 %v6380_v52, %v2742_v49  ;;  %vm2751_vm10 = vweird.f32 %v6380_v52 }
 0x7b6   :  { %v6382_v51 = vpop.eup %6381  ;;  %vm2752_vm13 = vmor %vm2750_vm11, %vm2751_vm10 }
 0x7b7   :  { %v2746_v56 = vmul.f32 %v6380_v52, %v2745_v10  ;;  %v2755_v32 = vmul.f32 %v6382_v51, %v2743_v0  ;;  %vm2761_vm12 = vweird.f32 %v6382_v51 }
 0x7b8   :  { %vm2762_vm15 = vmor %vm2760_vm14, %vm2761_vm12  ;;  %vm5509_vm14 = vcmask 1041409  }
 0x7b9   :  { %v2747_v4 = vmul.f32 0.5, %v2746_v56  ;;  %v2756_v57 = vmul.f32 %v6382_v51, %v2755_v32 }
 0x7bb   :  { %v2748_v58 = vsub.f32 1.5, %v2747_v4  ;;  %v2757_v59 = vmul.f32 0.5, %v2756_v57 }
 0x7bd   :  { %v2749_v62 = vmul.f32 %v6380_v52, %v2748_v58  ;;  %v2758_v63 = vsub.f32 1.5, %v2757_v59 }
 0x7bf   :  { %v2753_v8 = vsel %vm2752_vm13, %v6380_v52, %v2749_v62  ;;  %v2759_v44 = vmul.f32 %v6382_v51, %v2758_v63 }
 0x7c0   :  { %v2764_v5 = vmul.f32 %v2753_v8, %v2740_v9 }
 0x7c1   :  { %v2763_v6 = vsel %vm2762_vm15, %v6382_v51, %v2759_v44 }
 0x7c2   :  { %v2767_v31 = vmul.f32 %v2766_v30, %v2764_v5  ;;  %v2765_v15 = vmul.f32 %v2763_v6, %v2741_v12 }
 0x7c4   :  { %v8388_v13 = vadd.f32 %v2769_v1, %v2767_v31  ;;  %v2768_v11 = vmul.f32 %v2766_v30, %v2765_v15 }
 0x7c6   :  { %5748 = vmatmul.msk.f32.vlgmr.msra.gmra.mxu1 %vm123_vm1, %v8388_v13  ;;  %5750 = vmatmul.msk.f32.vlgmr.msra.gmra.mxu2 %vm123_vm1, %v8388_v13  ;;  %v8394_v17 = vadd.f32 %v2769_v1, %v2768_v11 }
 0x7ce   :  { %5749 = vmatmul.msk.f32.gmra.mxu1 %vm123_vm1, %v8394_v17  ;;  %5751 = vmatmul.msk.f32.gmra.mxu2 %vm123_vm1, %v8394_v17 }
 0x843   :  { %v2830_v46 = vpop.f32.mrf.mxu1 }
 0x844   :  { %v2831_v22 = vadd.f32 %v2830_v46, %v2803_v2 }
 0x846   :  { %2860 = vrot.lane.b32.xlu0 %v2831_v22, %s6490_s19 }
 0x849   :  { %v2853_v35 = vpop.f32.mrf.mxu2 }
 0x84a   :  { %v8453_v36 = vadd.f32 %v2853_v35, %v2804_v25 }
 0x84b   :  { %v2833_v19 = vpop.f32.mrf.mxu1 }
 0x84c   :  { %v2834_v24 = vadd.f32 %v2833_v19, %v2803_v2 }
 0x84e   :  { %2941 = vrot.lane.b32.xlu0 %v2834_v24, %s6491_s20  ;;  %2943 = vrot.lane.b32.xlu1 %v2834_v24, %s6489_s2 }
 0x84f   :  { %2887 = vrot.lane.b32.xlu2 %v2834_v24, %s6490_s19  ;;  %s10175_s19 = smov 24  }
 0x851   :  { %v2856_v49 = vpop.f32.mrf.mxu2 }
 0x852   :  { %v8469_v50 = vadd.f32 %v2856_v49, %v2804_v25 }
 0x854   :  { %v8484_v63 = vpack.i.bf16 %v8469_v50, %v8453_v36 }
 0x856   :  { %3027 = vrot.lane.b32.xlu0 %v2831_v22, %s6492_s21  ;;  %2913 = vrot.lane.b32.xlu1 %v2831_v22, %s6491_s20 }
 0x857   :  { %2915 = vrot.lane.b32.xlu2 %v2831_v22, %s6489_s2  ;;  %s10178_s2 = smov 80  }
 0x85e   :  { %3081 = vrot.lane.b32.xlu0 %v2831_v22, %s6498_s26  ;;  %2971 = vrot.lane.b32.xlu1 %v2831_v22, %s6493_s22 }
 0x85f   :  { %2969 = vrot.lane.b32.xlu2 %v2831_v22, %s6494_s23 }
 0x866   :  { %2999 = vrot.lane.b32.xlu0 %v2834_v24, %s6493_s22  ;;  %3025 = vrot.lane.b32.xlu1 %v2831_v22, %s10172_s5  ;;  %s10179_s22 = smov 8  }
 0x867   :  { %3083 = vrot.lane.b32.xlu2 %v2831_v22, %s10173_s24 }
 0x86e   :  { %3195 = vrot.lane.b32.xlu0 %v2831_v22, %s10174_s27  ;;  %3139 = vrot.lane.b32.xlu1 %v2831_v22, %s10175_s19 }
 0x86f   :  { %3137 = vrot.lane.b32.xlu2 %v2831_v22, %s10176_s0 }
 0x876   :  { %3249 = vrot.lane.b32.xlu0 %v2831_v22, %s10177_s3  ;;  %3193 = vrot.lane.b32.xlu1 %v2831_v22, %s10178_s2 }
 0x877   :  { %2997 = vrot.lane.b32.xlu2 %v2834_v24, %s6494_s23 }
 0x87e   :  { %3055 = vrot.lane.b32.xlu0 %v2834_v24, %s6492_s21  ;;  %3053 = vrot.lane.b32.xlu1 %v2834_v24, %s10172_s5 }
 0x87f   :  { %3251 = vrot.lane.b32.xlu2 %v2831_v22, %s10179_s22 }
 0x886   :  { %3109 = vrot.lane.b32.xlu0 %v2834_v24, %s6498_s26  ;;  %3167 = vrot.lane.b32.xlu1 %v2834_v24, %s10175_s19 }
 0x887   :  { %3111 = vrot.lane.b32.xlu2 %v2834_v24, %s10173_s24 }
 0x88e   :  { %3223 = vrot.lane.b32.xlu0 %v2834_v24, %s10174_s27  ;;  %3221 = vrot.lane.b32.xlu1 %v2834_v24, %s10178_s2 }
 0x88f   :  { %3165 = vrot.lane.b32.xlu2 %v2834_v24, %s10176_s0 }
 0x896   :  { %3277 = vrot.lane.b32.xlu0 %v2834_v24, %s10177_s3 }
 0x897   :  { %3279 = vrot.lane.b32.xlu2 %v2834_v24, %s10179_s22 }
 0x8a9   :  { %v2888_v55 = vpop.permute.xlu2 %2887 }
 0x8aa   :  { %5754 = vmatpush.xpose.msk.msrb.mxu3 %vm179_vm2, %v2888_v55 }
 0x8ad   :  { %5755 = vmatmul.msk.f32.vlgmr.msrb.gmra.mxu3 %vm179_vm2, %v2834_v24 }
 0x8b1   :  { %v2916_v21 = vpop.permute.xlu2 %2915 }
 0x8b8   :  { %v2861_v42 = vpop.permute.xlu0 %2860 }
 0x8b9   :  { %v2970_v23 = vpop.permute.xlu2 %2969  ;;  %5752 = vmatpush.xpose.msk.msra.mxu0 %vm179_vm2, %v2861_v42 }
 0x8bc   :  { %5753 = vmatmul.msk.f32.vlgmr.msra.gmra.mxu0 %vm179_vm2, %v2831_v22 }
 0x8bd   :  { %5756 = vmatpush.xpose.msk.msrb.mxu0 %vm179_vm2, %v2916_v21 }
 0x8c0   :  { %v2944_v3 = vpop.permute.xlu1 %2943  ;;  %v2942_v61 = vpop.permute.xlu0 %2941 }
 0x8c1   :  { %v3084_v48 = vpop.permute.xlu2 %3083  ;;  %5758 = vmatpush.xpose.msk.msra.mxu3 %vm179_vm2, %v2944_v3 }
 0x8c4   :  { %5759 = vmatmul.msk.f32.vlgmr.msra.gmra.mxu3 %vm179_vm2, %v2942_v61 }
 0x8c8   :  { %v2914_v26 = vpop.permute.xlu1 %2913  ;;  %v3028_v54 = vpop.permute.xlu0 %3027 }
 0x8c9   :  { %v3138_v27 = vpop.permute.xlu2 %3137  ;;  %5757 = vmatmul.msk.f32.vlgmr.msrb.gmra.mxu0 %vm179_vm2, %v2914_v26 }
 0x8ca   :  { %5764 = vmatpush.xpose.msk.msra.mxu0 %vm179_vm2, %v3028_v54 }
 0x8d0   :  { %v2972_v28 = vpop.permute.xlu1 %2971  ;;  %v3082_v29 = vpop.permute.xlu0 %3081 }
 0x8d1   :  { %v2998_v14 = vpop.permute.xlu2 %2997  ;;  %5760 = vmatpush.xpose.msk.msrb.mxu1 %vm179_vm2, %v2972_v28 }
 0x8d4   :  { %5761 = vmatmul.msk.f32.vlgmr.msrb.gmra.mxu1 %vm179_vm2, %v2970_v23 }
 0x8d5   :  { %5768 = vmatpush.xpose.msk.msra.mxu1 %vm179_vm2, %v3084_v48 }
 0x8d8   :  { %v3026_v33 = vpop.permute.xlu1 %3025  ;;  %v3000_v53 = vpop.permute.xlu0 %2999 }
 0x8d9   :  { %v3252_v34 = vpop.permute.xlu2 %3251  ;;  %5762 = vmatpush.xpose.msk.msrb.mxu2 %vm179_vm2, %v3000_v53  ;;  %5765 = vmatmul.msk.f32.vlgmr.msra.gmra.mxu0 %vm179_vm2, %v3026_v33 }
 0x8dc   :  { %5763 = vmatmul.msk.f32.vlgmr.msrb.gmra.mxu2 %vm179_vm2, %v2998_v14  ;;  %5769 = vmatmul.msk.f32.vlgmr.msra.gmra.mxu1 %vm179_vm2, %v3082_v29 }
 0x8e0   :  { %v3140_v16 = vpop.permute.xlu1 %3139  ;;  %v3196_v7 = vpop.permute.xlu0 %3195 }
 0x8e1   :  { %v3112_v38 = vpop.permute.xlu2 %3111  ;;  %5772 = vmatpush.xpose.msk.msrb.mxu0 %vm179_vm2, %v3140_v16  ;;  %5776 = vmatpush.xpose.msk.msrb.mxu1 %vm179_vm2, %v3196_v7 }
 0x8e2   :  { %5770 = vmatpush.xpose.msk.msra.mxu2 %vm179_vm2, %v3112_v38 }
 0x8e4   :  { %5773 = vmatmul.msk.f32.vlgmr.msrb.gmra.mxu0 %vm179_vm2, %v3138_v27 }
 0x8e5   :  { %5780 = vmatpush.xpose.msk.msra.mxu0 %vm179_vm2, %v3252_v34  ;;  %3499 = vmatpush.msra.mxu1 %v8453_v36 }
 0x8e8   :  { %v3194_v39 = vpop.permute.xlu1 %3193  ;;  %v3250_v40 = vpop.permute.xlu0 %3249 }
 0x8e9   :  { %5777 = vmatmul.msk.f32.vlgmr.msrb.gmra.mxu1 %vm179_vm2, %v3194_v39  ;;  %v3166_v41 = vpop.permute.xlu2 %3165 }
 0x8ec   :  { %5781 = vmatmul.msk.f32.vlgmr.msra.gmra.mxu0 %vm179_vm2, %v3250_v40 }
 0x8f0   :  { %v3054_v43 = vpop.permute.xlu1 %3053  ;;  %v3056_v18 = vpop.permute.xlu0 %3055 }
 0x8f1   :  { %5766 = vmatpush.xpose.msk.msrb.mxu3 %vm179_vm2, %v3056_v18  ;;  %v3280_v47 = vpop.permute.xlu2 %3279 }
 0x8f4   :  { %5767 = vmatmul.msk.f32.vlgmr.msrb.gmra.mxu3 %vm179_vm2, %v3054_v43 }
 0x8f8   :  { %v3168_v37 = vpop.permute.xlu1 %3167  ;;  %v3110_v60 = vpop.permute.xlu0 %3109 }
 0x8f9   :  { %5771 = vmatmul.msk.f32.vlgmr.msra.gmra.mxu2 %vm179_vm2, %v3110_v60  ;;  %5774 = vmatpush.xpose.msk.msra.mxu3 %vm179_vm2, %v3168_v37 }
 0x8fc   :  { %5775 = vmatmul.msk.f32.vlgmr.msra.gmra.mxu3 %vm179_vm2, %v3166_v41 }
 0x8fd   :  { %5782 = vmatpush.xpose.msk.msrb.mxu3 %vm179_vm2, %v3280_v47 }
 0x900   :  { %v3224_v0 = vpop.permute.xlu0 %3223  ;;  %v3222_v52 = vpop.permute.xlu1 %3221 }
 0x901   :  { %5778 = vmatpush.xpose.msk.msrb.mxu2 %vm179_vm2, %v3224_v0 }
 0x904   :  { %5779 = vmatmul.msk.f32.vlgmr.msrb.gmra.mxu2 %vm179_vm2, %v3222_v52 }
 0x905   :  { %3522 = vmatpush.msra.mxu2 %v8469_v50 }
 0x908   :  { %v3278_v10 = vpop.permute.xlu0 %3277 }
 0x909   :  { %5783 = vmatmul.msk.f32.vlgmr.msrb.gmra.mxu3 %vm179_vm2, %v3278_v10 }
 0x930   :  { %v8475_v51 = vpop.f32.mrf.mxu3 }
 0x931   :  { %v3308_v56 = vsel %vm179_vm2, %v8475_v51, -inf }
 0x932   :  { %3309 = vmax.xlane.f32.xlu0 %v3308_v56 }
 0x939   :  { %v2883_v32 = vpop.f32.mrf.mxu0 }
 0x93a   :  { %v3305_v62 = vsel %vm179_vm2, %v2883_v32, -inf }
 0x946   :  { %v2938_v4 = vpop.f32.mrf.mxu0 }
 0x947   :  { %v2966_v57 = vpop.f32.mrf.mxu3  ;;  %v3311_v58 = vsel %vm179_vm2, %v2938_v4, -inf }
 0x948   :  { %3312 = vmax.xlane.f32.xlu1 %v3311_v58  ;;  %v3314_v59 = vsel %vm179_vm2, %v2966_v57, -inf }
 0x949   :  { %3315 = vmax.xlane.f32.xlu2 %v3314_v59 }
 0x950   :  { %3306 = vmax.xlane.f32.xlu1 %v3305_v62 }
 0x951   :  { %v8494_v19 = vpop.f32.mrf.mxu1 }
 0x952   :  { %v3317_v3 = vsel %vm179_vm2, %v8494_v19, -inf }
 0x956   :  { %v3050_v24 = vpop.f32.mrf.mxu0 }
 0x957   :  { %v3323_v21 = vsel %vm179_vm2, %v3050_v24, -inf }
 0x959   :  { %v8498_v23 = vpop.f32.mrf.mxu1 }
 0x95a   :  { %v3329_v61 = vsel %vm179_vm2, %v8498_v23, -inf }
 0x95f   :  { %v3022_v55 = vpop.f32.mrf.mxu2 }
 0x960   :  { %v3320_v42 = vsel %vm179_vm2, %v3022_v55, -inf }
 0x961   :  { %6282 = vrot.lane.b32.xlu2 %v8484_v63, %s6491_s20  ;;  %v8506_v26 = vpop.f32.mrf.mxu0 }
 0x962   :  { %v3335_v27 = vsel %vm179_vm2, %v8506_v26, -inf }
 0x966   :  { %v8514_v33 = vpop.f32.mrf.mxu1 }
 0x967   :  { %v3341_v35 = vsel %vm179_vm2, %v8514_v33, -inf }
 0x969   :  { %v8523_v39 = vpop.f32.mrf.mxu0 }
 0x96a   :  { %v3347_v41 = vsel %vm179_vm2, %v8523_v39, -inf }
 0x977   :  { %v8488_v9 = vpop.f32.mrf.mxu3 }
 0x978   :  { %v3326_v30 = vsel %vm179_vm2, %v8488_v9, -inf }
 0x97c   :  { %v8504_v48 = vpop.f32.mrf.mxu2 }
 0x97d   :  { %v3332_v54 = vsel %vm179_vm2, %v8504_v48, -inf }
 0x97f   :  { %v8512_v29 = vpop.f32.mrf.mxu3 }
 0x980   :  { %v3338_v25 = vsel %vm179_vm2, %v8512_v29, -inf }
 0x987   :  { %v8521_v38 = vpop.f32.mrf.mxu2 }
 0x988   :  { %v3344_v40 = vsel %vm179_vm2, %v8521_v38, -inf }
 0x98a   :  { %3327 = vmax.xlane.f32.xlu2 %v3326_v30 }
 0x98c   :  { %v8537_v47 = vpop.f32.mrf.mxu3 }
 0x98d   :  { %v3350_v49 = vsel %vm179_vm2, %v8537_v47, -inf }
 0x9a5   :  { %v3310_v28 = vpop.xlane.xlu0 %3309 }
 0x9a6   :  { %v3354_v53 = vsub.f32 %v8475_v51, %v3310_v28 }
 0x9a8   :  { %v3371_v16 = vmul.f32 1.442695, %v3354_v53 }
 0x9bb   :  { %v3313_v8 = vpop.xlane.xlu1 %3312 }
 0x9bc   :  { %v3355_v44 = vsub.f32 %v2938_v4, %v3313_v8  ;;  %v3316_v1 = vpop.xlane.xlu2 %3315 }
 0x9bd   :  { %v3356_v5 = vsub.f32 %v2966_v57, %v3316_v1 }
 0x9be   :  { %v3373_v6 = vmul.f32 1.442695, %v3355_v44 }
 0x9bf   :  { %v3375_v31 = vmul.f32 1.442695, %v3356_v5 }
 0x9c0   :  { %6383 = vpow2.f32 %v3373_v6 }
 0x9c1   :  { %6385 = vpow2.f32 %v3375_v31 }
 0x9c2   :  { %6387 = vpow2.f32 %v3371_v16 }
 0x9c3   :  { %v3307_v14 = vpop.xlane.xlu1 %3306 }
 0x9c4   :  { %v6283_v12 = vpop.permute.xlu2 %6282  ;;  %v3353_v34 = vsub.f32 %v2883_v32, %v3307_v14  ;;  %v6286_v14 = vpack.i.bf16 %v8453_v36, %v8469_v50 }
 0x9c5   :  { %v6285_v15 = vunpack.i.h.bf16 %v6283_v12  ;;  %v6284_v11 = vunpack.i.l.bf16 %v6283_v12 }
 0x9c6   :  { %v6384_v20 = vpop.eup %6383  ;;  %v3369_v7 = vmul.f32 1.442695, %v3353_v34 }
 0x9c7   :  { %v6386_v2 = vpop.eup %6385  ;;  %3549 = vmatpush.msrb.mxu0 %v6284_v11  ;;  %3576 = vmatpush.msra.mxu3 %v6285_v15  ;;  %v3407_v46 = vsel %vm179_vm2, %v6384_v20, 0.0 }
 0x9c8   :  { %3408 = vadd.xlane.f32.xlu0 %v3407_v46  ;;  %v3410_v22 = vsel %vm179_vm2, %v6386_v2, 0.0  ;;  %6389 = vpow2.f32 %v3369_v7  ;;  %v8529_v43 = vpop.eup %6387 }
 0x9c9   :  { %3411 = vadd.xlane.f32.xlu1 %v3410_v22  ;;  %v3404_v37 = vsel %vm179_vm2, %v8529_v43, 0.0 }
 0x9ce   :  { %v8531_v18 = vpop.eup %6389 }
 0x9cf   :  { %v3401_v60 = vsel %vm179_vm2, %v8531_v18, 0.0 }
 0x9d0   :  { %3324 = vmax.xlane.f32.xlu0 %v3323_v21 }
 0x9d1   :  { %3321 = vmax.xlane.f32.xlu1 %v3320_v42 }
 0x9d8   :  { %3318 = vmax.xlane.f32.xlu0 %v3317_v3 }
 0x9d9   :  { %3330 = vmax.xlane.f32.xlu1 %v3329_v61 }
 0x9e0   :  { %3333 = vmax.xlane.f32.xlu0 %v3332_v54 }
 0x9e1   :  { %3336 = vmax.xlane.f32.xlu1 %v3335_v27 }
 0x9e8   :  { %3339 = vmax.xlane.f32.xlu0 %v3338_v25 }
 0x9e9   :  { %3342 = vmax.xlane.f32.xlu1 %v3341_v35 }
 0x9f0   :  { %3345 = vmax.xlane.f32.xlu0 %v3344_v40 }
 0x9f1   :  { %3348 = vmax.xlane.f32.xlu1 %v3347_v41 }
 0x9f8   :  { %3405 = vadd.xlane.f32.xlu0 %v3404_v37 }
 0x9f9   :  { %3402 = vadd.xlane.f32.xlu1 %v3401_v60 }
 0xa00   :  { %3351 = vmax.xlane.f32.xlu0 %v3350_v49 }
 0xa3b   :  { %v3409_v0 = vpop.xlane.xlu0 %3408 }
 0xa3c   :  { %6391 = vrcp.f32 %v3409_v0  ;;  %v3412_v52 = vpop.xlane.xlu1 %3411 }
 0xa3d   :  { %6393 = vrcp.f32 %v3412_v52 }
 0xa42   :  { %v6392_v10 = vpop.eup %6391 }
 0xa43   :  { %v6394_v51 = vpop.eup %6393  ;;  %v3467_v56 = vmul.f32 %v6392_v10, %v6384_v20  ;;  %v3325_v32 = vpop.xlane.xlu0 %3324 }
 0xa44   :  { %v3468_v4 = vmul.f32 %v6394_v51, %v6386_v2  ;;  %v3359_v57 = vsub.f32 %v3050_v24, %v3325_v32  ;;  %v3322_v58 = vpop.xlane.xlu1 %3321  ;;  %v5724_v32 = vld [vmem:[%s10142_s6 + $0x48] sm:$0xff] }
 0xa45   :  { %v3358_v59 = vsub.f32 %v3022_v55, %v3322_v58  ;;  %5786 = vmatmul.msk.f32.vlgmr.msrb.gmra.mxu0 %vm179_vm2, %v3467_v56  ;;  %v3328_v56 = vpop.xlane.xlu2 %3327  ;;  %3602 = vmatpush.msrb.mxu1 %v5724_v32 }
 0xa46   :  { %v3381_v62 = vmul.f32 1.442695, %v3359_v57  ;;  %5787 = vmatmul.msk.f32.vlgmr.msra.gmra.mxu3 %vm179_vm2, %v3468_v4  ;;  %v3360_v57 = vsub.f32 %v8488_v9, %v3328_v56 }
 0xa47   :  { %v3379_v30 = vmul.f32 1.442695, %v3358_v59 }
 0xa48   :  { %6395 = vpow2.f32 %v3381_v62 }
 0xa49   :  { %6397 = vpow2.f32 %v3379_v30 }
 0xa4b   :  { %v3319_v8 = vpop.xlane.xlu0 %3318 }
 0xa4c   :  { %v3331_v44 = vpop.xlane.xlu1 %3330  ;;  %v3357_v31 = vsub.f32 %v8494_v19, %v3319_v8 }
 0xa4d   :  { %v3361_v1 = vsub.f32 %v8498_v23, %v3331_v44 }
 0xa4e   :  { %v8544_v5 = vpop.eup %6395  ;;  %v3377_v20 = vmul.f32 1.442695, %v3357_v31 }
 0xa4f   :  { %v8546_v6 = vpop.eup %6397  ;;  %v3385_v12 = vmul.f32 1.442695, %v3361_v1  ;;  %v3419_v15 = vsel %vm179_vm2, %v8544_v5, 0.0 }
 0xa50   :  { %3420 = vadd.xlane.f32.xlu2 %v3419_v15  ;;  %v3416_v11 = vsel %vm179_vm2, %v8546_v6, 0.0 }
 0xa51   :  { %6399 = vpow2.f32 %v3385_v12  ;;  %3417 = vadd.xlane.f32.xlu1 %v3416_v11 }
 0xa52   :  { %6401 = vpow2.f32 %v3377_v20 }
 0xa53   :  { %v3334_v2 = vpop.xlane.xlu0 %3333 }
 0xa54   :  { %v3337_v46 = vpop.xlane.xlu1 %3336  ;;  %v3362_v7 = vsub.f32 %v8504_v48, %v3334_v2 }
 0xa56   :  { %v3387_v40 = vmul.f32 1.442695, %v3362_v7 }
 0xa57   :  { %v8553_v22 = vpop.eup %6399 }
 0xa58   :  { %v3425_v24 = vsel %vm179_vm2, %v8553_v22, 0.0  ;;  %v8559_v21 = vpop.eup %6401 }
 0xa59   :  { %3426 = vadd.xlane.f32.xlu0 %v3425_v24  ;;  %v3413_v3 = vsel %vm179_vm2, %v8559_v21, 0.0 }
 0xa5b   :  { %v8557_v19 = vpop.xlane.xlu0 %3339 }
 0xa5c   :  { %v3343_v55 = vpop.xlane.xlu1 %3342  ;;  %v3364_v59 = vsub.f32 %v8512_v29, %v8557_v19 }
 0xa5d   :  { %v3365_v42 = vsub.f32 %v8514_v33, %v3343_v55 }
 0xa5e   :  { %v3391_v30 = vmul.f32 1.442695, %v3364_v59 }
 0xa5f   :  { %v3393_v23 = vmul.f32 1.442695, %v3365_v42 }
 0xa61   :  { %6403 = vpow2.f32 %v3393_v23  ;;  %3414 = vadd.xlane.f32.xlu0 %v3413_v3 }
 0xa63   :  { %v3346_v61 = vpop.xlane.xlu0 %3345 }
 0xa64   :  { %v3349_v54 = vpop.xlane.xlu1 %3348  ;;  %v3366_v41 = vsub.f32 %v8521_v38, %v3346_v61 }
 0xa65   :  { %v3367_v48 = vsub.f32 %v8523_v39, %v3349_v54 }
 0xa67   :  { %v8564_v27 = vpop.eup %6403 }
 0xa68   :  { %6292 = vrot.lane.b32.xlu2 %v8484_v63, %s10172_s5  ;;  %v3437_v28 = vsel %vm179_vm2, %v8564_v27, 0.0 }
 0xa69   :  { %3438 = vadd.xlane.f32.xlu0 %v3437_v28 }
 0xa6a   :  { %6287 = vrot.lane.b32.xlu1 %v6286_v14, %s6494_s23 }
 0xa6b   :  { %v3406_v33 = vpop.xlane.xlu0 %3405 }
 0xa6c   :  { %6405 = vrcp.f32 %v3406_v33  ;;  %v3403_v53 = vpop.xlane.xlu1 %3402 }
 0xa6d   :  { %6407 = vrcp.f32 %v3403_v53 }
 0xa6e   :  { %6409 = vpow2.f32 %v3387_v40 }
 0xa72   :  { %v6406_v34 = vpop.eup %6405  ;;  %6297 = vrot.lane.b32.xlu1 %v8484_v63, %s6498_s26 }
 0xa73   :  { %v6408_v25 = vpop.eup %6407  ;;  %v3466_v35 = vmul.f32 %v6406_v34, %v8529_v43  ;;  %v3395_v43 = vmul.f32 1.442695, %v3366_v41 }
 0xa74   :  { %v3465_v16 = vmul.f32 %v6408_v25, %v8531_v18  ;;  %v3352_v18 = vpop.xlane.xlu0 %3351  ;;  %v8587_v37 = vpop.eup %6409 }
 0xa75   :  { %5785 = vmatmul.msk.f32.vlgmr.msra.gmra.mxu2 %vm179_vm2, %v3466_v35  ;;  %6411 = vpow2.f32 %v3395_v43  ;;  %v3368_v60 = vsub.f32 %v8537_v47, %v3352_v18  ;;  %v3363_v47 = vsub.f32 %v8506_v26, %v3337_v46  ;;  %v3383_v26 = vmul.f32 1.442695, %v3360_v57  ;;  %v5723_v46 = vld [vmem:[%s10142_s6 + $0x40] sm:$0xff] }
 0xa76   :  { %5784 = vmatmul.msk.f32.vlgmr.msra.gmra.mxu1 %vm179_vm2, %v3465_v16  ;;  %3631 = vmatpush.msrb.mxu2 %v5723_v46 }
 0xa77   :  { %v3399_v49 = vmul.f32 1.442695, %v3368_v60  ;;  %v3389_v39 = vmul.f32 1.442695, %v3363_v47 }
 0xa79   :  { %6413 = vpow2.f32 %v3399_v49 }
 0xa7a   :  { %6302 = vrot.lane.b32.xlu1 %v8484_v63, %s10176_s0  ;;  %v3428_v63 = vsel %vm179_vm2, %v8587_v37, 0.0 }
 0xa7b   :  { %v8593_v0 = vpop.eup %6411 }
 0xa7c   :  { %v3440_v38 = vsel %vm179_vm2, %v8593_v0, 0.0 }
 0xa7d   :  { %3971 = vrot.lane.b32.xlu0 %v8453_v36, %s10178_s2 }
 0xa7f   :  { %v8597_v52 = vpop.eup %6413 }
 0xa80   :  { %v3446_v51 = vsel %vm179_vm2, %v8597_v52, 0.0 }
 0xa85   :  { %4054 = vrot.lane.b32.xlu0 %v8453_v36, %s10177_s3  ;;  %v3397_v36 = vmul.f32 1.442695, %v3367_v48 }
 0xa87   :  { %6415 = vpow2.f32 %v3397_v36 }
 0xa88   :  { %6417 = vpow2.f32 %v3389_v39 }
 0xa89   :  { %6419 = vpow2.f32 %v3383_v26 }
 0xa8a   :  { %6421 = vpow2.f32 %v3391_v30 }
 0xa8d   :  { %v8600_v10 = vpop.eup %6415 }
 0xa8e   :  { %v3443_v4 = vsel %vm179_vm2, %v8600_v10, 0.0  ;;  %v8610_v58 = vpop.eup %6417 }
 0xa8f   :  { %v3431_v62 = vsel %vm179_vm2, %v8610_v58, 0.0  ;;  %v8616_v8 = vpop.eup %6419 }
 0xa90   :  { %v3422_v44 = vsel %vm179_vm2, %v8616_v8, 0.0  ;;  %v8620_v9 = vpop.eup %6421 }
 0xa91   :  { %3429 = vadd.xlane.f32.xlu2 %v3428_v63  ;;  %v3434_v29 = vsel %vm179_vm2, %v8620_v9, 0.0 }
 0xa99   :  { %3441 = vadd.xlane.f32.xlu2 %v3440_v38 }
 0xaa1   :  { %3447 = vadd.xlane.f32.xlu2 %v3446_v51 }
 0xaa4   :  { %3444 = vadd.xlane.f32.xlu1 %v3443_v4 }
 0xaaf   :  { %3432 = vadd.xlane.f32.xlu0 %v3431_v62 }
 0xab7   :  { %3423 = vadd.xlane.f32.xlu0 %v3422_v44  ;;  %v5726_v44 = vld [vmem:[%s10142_s6 + $0x58] sm:$0xff] }
 0xab8   :  { %3795 = vmatpush.msra.mxu2 %v5726_v44  ;;  %v5929_v44 = vld [vmem:[%s10144_s8 + $0x788] sm:$0xff] }
 0xabd   :  { %4080 = vrot.lane.b32.xlu1 %v8469_v50, %s10177_s3 }
 0xabf   :  { %3435 = vadd.xlane.f32.xlu0 %v3434_v29 }
 0xac2   :  { %v3551_v1 = vpop.f32.mrf.mxu0 }
 0xac3   :  { %5788 = vmatmul.msk.f32.vlgmr.msrb.gmra.mxu1 %vm179_vm2, %v3551_v1  ;;  %v3421_v31 = vpop.xlane.xlu2 %3420  ;;  %v5727_v1 = vld [vmem:[%s10142_s6 + $0x60] sm:$0xff] }
 0xac4   :  { %v3418_v2 = vpop.xlane.xlu1 %3417 }
 0xac5   :  { %6423 = vrcp.f32 %v3418_v2  ;;  %v5730_v2 = vld [vmem:[%s10142_s6 + $0x78] sm:$0xff] }
 0xac9   :  { %v3578_v12 = vpop.f32.mrf.mxu3 }
 0xacb   :  { %5789 = vmatmul.msk.f32.gmra.mxu1 %vm179_vm2, %v3578_v12  ;;  %v6293_v15 = vpop.permute.xlu2 %6292  ;;  %v6424_v19 = vpop.eup %6423 }
 0xacc   :  { %v6295_v11 = vunpack.i.h.bf16 %v6293_v15  ;;  %v3427_v20 = vpop.xlane.xlu0 %3426  ;;  %v3470_v61 = vmul.f32 %v6424_v19, %v8546_v6  ;;  %v6294_v28 = vunpack.i.l.bf16 %v6293_v15 }
 0xace   :  { %3769 = vmatpush.msra.mxu1 %v6295_v11 }
 0xad3   :  { %3997 = vrot.lane.b32.xlu0 %v8469_v50, %s10178_s2 }
 0xad4   :  { %v3415_v24 = vpop.xlane.xlu0 %3414 }
 0xad5   :  { %6425 = vrcp.f32 %v3415_v24 }
 0xad6   :  { %6427 = vrcp.f32 %v3421_v31 }
 0xad7   :  { %6429 = vrcp.f32 %v3427_v20  ;;  %v5729_v20 = vld [vmem:[%s10142_s6 + $0x70] sm:$0xff] }
 0xadb   :  { %v6426_v55 = vpop.eup %6425 }
 0xadc   :  { %v6288_v42 = vpop.permute.xlu1 %6287  ;;  %v3469_v54 = vmul.f32 %v6426_v55, %v8559_v21  ;;  %v6428_v50 = vpop.eup %6427 }
 0xadd   :  { %v6290_v23 = vunpack.i.h.bf16 %v6288_v42  ;;  %v6289_v3 = vunpack.i.l.bf16 %v6288_v42  ;;  %v3471_v34 = vmul.f32 %v6428_v50, %v8544_v5  ;;  %v3439_v25 = vpop.xlane.xlu0 %3438  ;;  %v6430_v6 = vpop.eup %6429 }
 0xade   :  { %v3473_v16 = vmul.f32 %v6430_v6, %v8553_v22 }
 0xadf   :  { %3660 = vmatpush.msra.mxu0 %v6290_v23  ;;  %3686 = vmatpush.msrb.mxu3 %v6289_v3 }
 0xae0   :  { %5792 = vmatmul.msk.f32.vlgmr.msra.gmra.mxu0 %vm179_vm2, %v3469_v54  ;;  %5793 = vmatmul.msk.f32.vlgmr.msrb.gmra.mxu3 %vm179_vm2, %v3470_v61 }
 0xae1   :  { %3743 = vmatpush.msra.mxu3 %v6294_v28 }
 0xae4   :  { %v6298_v14 = vpop.permute.xlu1 %6297 }
 0xae5   :  { %v6300_v33 = vunpack.i.h.bf16 %v6298_v14  ;;  %v6299_v53 = vunpack.i.l.bf16 %v6298_v14 }
 0xae7   :  { %3826 = vmatpush.msrb.mxu3 %v6299_v53  ;;  %3852 = vmatpush.msrb.mxu1 %v6300_v33 }
 0xae8   :  { %5796 = vmatmul.msk.f32.vlgmr.msra.gmra.mxu3 %vm179_vm2, %v3471_v34 }
 0xaec   :  { %v6303_v21 = vpop.permute.xlu1 %6302 }
 0xaed   :  { %v6304_v35 = vunpack.i.l.bf16 %v6303_v21  ;;  %v6305_v51 = vunpack.i.h.bf16 %v6303_v21 }
 0xaef   :  { %3909 = vmatpush.msra.mxu3 %v6304_v35  ;;  %v3972_v7 = vpop.permute.xlu0 %3971 }
 0xaf0   :  { %5800 = vmatmul.msk.f32.vlgmr.msrb.gmra.mxu3 %vm179_vm2, %v3473_v16 }
 0xaf1   :  { %3992 = vmatpush.msrb.mxu3 %v3972_v7 }
 0xaf3   :  { %v3501_v40 = vpop.f32.mrf.mxu1 }
 0xaf4   :  { %5790 = vmatmul.msk.f32.vlgmr.msrb.gmra.mxu2 %vm179_vm2, %v3501_v40 }
 0xaf7   :  { %v4055_v5 = vpop.permute.xlu0 %4054 }
 0xaf8   :  { %v3524_v41 = vpop.f32.mrf.mxu2 }
 0xafc   :  { %5791 = vmatmul.msk.f32.gmra.mxu2 %vm179_vm2, %v3524_v41 }
 0xb04   :  { %v3430_v22 = vpop.xlane.xlu2 %3429 }
 0xb0c   :  { %v3442_v26 = vpop.xlane.xlu2 %3441 }
 0xb17   :  { %v3445_v48 = vpop.xlane.xlu1 %3444 }
 0xb22   :  { %v3433_v43 = vpop.xlane.xlu0 %3432 }
 0xb23   :  { %6431 = vrcp.f32 %v3433_v43 }
 0xb24   :  { %6433 = vrcp.f32 %v3439_v25 }
 0xb29   :  { %v6432_v18 = vpop.eup %6431 }
 0xb2a   :  { %v3475_v60 = vmul.f32 %v6432_v18, %v8610_v58  ;;  %v3424_v63 = vpop.xlane.xlu0 %3423  ;;  %v6434_v49 = vpop.eup %6433 }
 0xb2b   :  { %6435 = vrcp.f32 %v3424_v63  ;;  %v3477_v38 = vmul.f32 %v6434_v49, %v8564_v27  ;;  %v5725_v27 = vld [vmem:[%s10142_s6 + $0x50] sm:$0xff]  ;;  %v8692_v63 = vld [vmem:[%s10143_s7 + $0x8] sm:$0xff] }
 0xb2c   :  { %5804 = vmatmul.msk.f32.vlgmr.msra.gmra.mxu3 %vm179_vm2, %v3475_v60  ;;  %6437 = vrcp.f32 %v3430_v22  ;;  %3712 = vmatpush.msrb.mxu0 %v5725_v27  ;;  %v4137_v49 = vperm.slane %v8692_v63, 0 }
 0xb2d   :  { %4075 = vmatpush.msra.mxu3 %v4055_v5  ;;  %6439 = vrcp.f32 %v3445_v48 }
 0xb2e   :  { %3878 = vmatpush.msra.mxu0 %v5727_v1  ;;  %v5913_v1 = vld [vmem:[%s10144_s8 + $0x708] sm:$0xff] }
 0xb2f   :  { %v4081_v30 = vpop.permute.xlu1 %4080 }
 0xb31   :  { %v6436_v36 = vpop.eup %6435 }
 0xb32   :  { %v3472_v47 = vmul.f32 %v6436_v36, %v8616_v8  ;;  %v6438_v39 = vpop.eup %6437  ;;  %v3436_v56 = vpop.xlane.xlu0 %3435 }
 0xb33   :  { %v6440_v32 = vpop.eup %6439  ;;  %6441 = vrcp.f32 %v3436_v56  ;;  %v3474_v4 = vmul.f32 %v6438_v39, %v8587_v37  ;;  %v3448_v37 = vpop.xlane.xlu2 %3447 }
 0xb34   :  { %5797 = vmatmul.msk.f32.vlgmr.msra.gmra.mxu1 %vm179_vm2, %v3472_v47  ;;  %5808 = vmatmul.msk.f32.vlgmr.msrb.gmra.mxu3 %vm179_vm2, %v3477_v38  ;;  %v3479_v57 = vmul.f32 %v6440_v32, %v8600_v10  ;;  %6443 = vrcp.f32 %v3442_v26 }
 0xb35   :  { %3935 = vmatpush.msra.mxu1 %v6305_v51  ;;  %6445 = vrcp.f32 %v3448_v37  ;;  %4399 = vmatpush.msrb.mxu3 %v5929_v44  ;;  %v5869_v44 = vld [vmem:[%s10144_s8 + $0x5a8] sm:$0xff] }
 0xb37   :  { %4400 = vmatpush.msrb.mxu3 %v5913_v1  ;;  %v5871_v1 = vld [vmem:[%s10144_s8 + $0x5b8] sm:$0xff] }
 0xb39   :  { %v6442_v58 = vpop.eup %6441 }
 0xb3a   :  { %v3476_v59 = vmul.f32 %v6442_v58, %v8620_v9  ;;  %v6444_v10 = vpop.eup %6443 }
 0xb3b   :  { %v3478_v8 = vmul.f32 %v6444_v10, %v8593_v0  ;;  %v6446_v29 = vpop.eup %6445 }
 0xb3c   :  { %5801 = vmatmul.msk.f32.vlgmr.msrb.gmra.mxu1 %vm179_vm2, %v3474_v4  ;;  %5812 = vmatmul.msk.f32.vlgmr.msra.gmra.mxu3 %vm179_vm2, %v3479_v57  ;;  %v3480_v9 = vmul.f32 %v6446_v29, %v8597_v52  ;;  %v5728_v52 = vld [vmem:[%s10142_s6 + $0x68] sm:$0xff]  ;;  %v5931_v29 = vld [vmem:[%s10144_s8 + $0x798] sm:$0xff] }
 0xb3d   :  { %3961 = vmatpush.msrb.mxu2 %v5728_v52  ;;  %v5898_v52 = vld [vmem:[%s10144_s8 + $0x690] sm:$0xff] }
 0xb40   :  { %v3604_v11 = vpop.f32.mrf.mxu1 }
 0xb44   :  { %5805 = vmatmul.msk.f32.vlgmr.msra.gmra.mxu1 %vm179_vm2, %v3476_v59 }
 0xb45   :  { %v3998_v62 = vpop.permute.xlu0 %3997 }
 0xb46   :  { %4018 = vmatpush.msrb.mxu1 %v3998_v62 }
 0xb48   :  { %4101 = vmatpush.msra.mxu1 %v4081_v30  ;;  %v3607_v46 = vpop.f32.mrf.mxu1 }
 0xb4c   :  { %5809 = vmatmul.msk.f32.vlgmr.msrb.gmra.mxu1 %vm179_vm2, %v3478_v8  ;;  %v5928_v8 = vld [vmem:[%s10144_s8 + $0x780] sm:$0xff] }
 0xb54   :  { %5813 = vmatmul.msk.f32.vlgmr.msra.gmra.mxu1 %vm179_vm2, %v3480_v9  ;;  %v5912_v9 = vld [vmem:[%s10144_s8 + $0x700] sm:$0xff] }
 0xb5d   :  { %v3662_v31 = vpop.f32.mrf.mxu0 }
 0xb5e   :  { %5794 = vmatmul.msk.f32.vlgmr.msrb.gmra.mxu0 %vm179_vm2, %v3662_v31  ;;  %v5914_v31 = vld [vmem:[%s10144_s8 + $0x710] sm:$0xff] }
 0xb5f   :  { %4044 = vmatpush.msrb.mxu0 %v5729_v20  ;;  %v5880_v20 = vld [vmem:[%s10144_s8 + $0x600] sm:$0xff] }
 0xb63   :  { %v3688_v0 = vpop.f32.mrf.mxu3 }
 0xb66   :  { %5795 = vmatmul.msk.f32.gmra.mxu0 %vm179_vm2, %v3688_v0  ;;  %v5915_v0 = vld [vmem:[%s10144_s8 + $0x718] sm:$0xff] }
 0xb6b   :  { %v3745_v12 = vpop.f32.mrf.mxu3 }
 0xb6c   :  { %5798 = vmatmul.msk.f32.vlgmr.msra.gmra.mxu2 %vm179_vm2, %v3745_v12  ;;  %v5896_v12 = vld [vmem:[%s10144_s8 + $0x680] sm:$0xff] }
 0xb6d   :  { %4127 = vmatpush.msra.mxu2 %v5730_v2  ;;  %v5881_v2 = vld [vmem:[%s10144_s8 + $0x608] sm:$0xff] }
 0xb73   :  { %v3828_v15 = vpop.f32.mrf.mxu3 }
 0xb74   :  { %5802 = vmatmul.msk.f32.vlgmr.msra.gmra.mxu0 %vm179_vm2, %v3828_v15  ;;  %v5897_v15 = vld [vmem:[%s10144_s8 + $0x688] sm:$0xff] }
 0xb75   :  { %4376 = vmatpush.msra.mxu0 %v5928_v8  ;;  %4401 = vmatpush.msrb.mxu3 %v5897_v15  ;;  %v5868_v8 = vld [vmem:[%s10144_s8 + $0x5a0] sm:$0xff]  ;;  %v5854_v15 = vld [vmem:[%s10144_s8 + $0x530] sm:$0xff] }
 0xb77   :  { %v3633_v28 = vpop.f32.mrf.mxu2  ;;  %4377 = vmatpush.msra.mxu0 %v5912_v9  ;;  %4402 = vmatpush.msrb.mxu3 %v5881_v2  ;;  %v5837_v2 = vld [vmem:[%s10144_s8 + $0x4a8] sm:$0xff] }
 0xb78   :  { %v3634_v35 = vadd.f32 %v3633_v28, %v3604_v11  ;;  %v5899_v11 = vld [vmem:[%s10144_s8 + $0x698] sm:$0xff] }
 0xb79   :  { %4378 = vmatpush.msra.mxu0 %v5896_v12  ;;  %v5851_v28 = vld [vmem:[%s10144_s8 + $0x518] sm:$0xff]  ;;  %v5853_v12 = vld [vmem:[%s10144_s8 + $0x528] sm:$0xff] }
 0xb7b   :  { %4379 = vmatpush.msra.mxu0 %v5880_v20  ;;  %v5836_v20 = vld [vmem:[%s10144_s8 + $0x4a0] sm:$0xff] }
 0xb7f   :  { %v3636_v14 = vpop.f32.mrf.mxu2 }
 0xb80   :  { %v3637_v41 = vadd.f32 %v3636_v14, %v3607_v46  ;;  %v5882_v46 = vld [vmem:[%s10144_s8 + $0x610] sm:$0xff]  ;;  %v5833_v14 = vld [vmem:[%s10144_s8 + $0x488] sm:$0xff] }
 0xbaf   :  { %v3911_v19 = vpop.f32.mrf.mxu3 }
 0xbb1   :  { %v3771_v24 = vpop.f32.mrf.mxu1 }
 0xbb2   :  { %5799 = vmatmul.msk.f32.gmra.mxu2 %vm179_vm2, %v3771_v24  ;;  %v5883_v24 = vld [vmem:[%s10144_s8 + $0x618] sm:$0xff] }
 0xbb7   :  { %v3994_v42 = vpop.f32.mrf.mxu3 }
 0xbb9   :  { %v3854_v55 = vpop.f32.mrf.mxu1 }
 0xbba   :  { %5803 = vmatmul.msk.f32.gmra.mxu0 %vm179_vm2, %v3854_v55  ;;  %5806 = vmatmul.msk.f32.vlgmr.msrb.gmra.mxu2 %vm179_vm2, %v3911_v19  ;;  %v5864_v19 = vld [vmem:[%s10144_s8 + $0x580] sm:$0xff]  ;;  %v5865_v55 = vld [vmem:[%s10144_s8 + $0x588] sm:$0xff] }
 0xbbb   :  { %4445 = vmatpush.msrb.mxu2 %v5931_v29  ;;  %4380 = vmatpush.msra.mxu0 %v5864_v19  ;;  %v5839_v19 = vld [vmem:[%s10144_s8 + $0x4b8] sm:$0xff] }
 0xbbc   :  { %4403 = vmatpush.msrb.mxu3 %v5865_v55  ;;  %v5820_v55 = vld [vmem:[%s10144_s8 + $0x420] sm:$0xff] }
 0xbbd   :  { %4446 = vmatpush.msrb.mxu2 %v5915_v0 }
 0xbbf   :  { %v4077_v3 = vpop.f32.mrf.mxu3  ;;  %4447 = vmatpush.msrb.mxu2 %v5899_v11 }
 0xbc1   :  { %v3937_v23 = vpop.f32.mrf.mxu1  ;;  %4448 = vmatpush.msrb.mxu2 %v5883_v24 }
 0xbc2   :  { %5807 = vmatmul.msk.f32.gmra.mxu2 %vm179_vm2, %v3937_v23  ;;  %5810 = vmatmul.msk.f32.vlgmr.msrb.gmra.mxu0 %vm179_vm2, %v3994_v42  ;;  %v5866_v42 = vld [vmem:[%s10144_s8 + $0x590] sm:$0xff]  ;;  %v5867_v23 = vld [vmem:[%s10144_s8 + $0x598] sm:$0xff] }
 0xbc3   :  { %4449 = vmatpush.msrb.mxu2 %v5867_v23 }
 0xbc5   :  { %4450 = vmatpush.msrb.mxu2 %v5851_v28 }
 0xbc9   :  { %v4020_v61 = vpop.f32.mrf.mxu1 }
 0xbca   :  { %5811 = vmatmul.msk.f32.gmra.mxu0 %vm179_vm2, %v4020_v61  ;;  %5814 = vmatmul.msk.f32.vlgmr.msra.gmra.mxu2 %vm179_vm2, %v4077_v3  ;;  %v5848_v3 = vld [vmem:[%s10144_s8 + $0x500] sm:$0xff]  ;;  %v5849_v61 = vld [vmem:[%s10144_s8 + $0x508] sm:$0xff] }
 0xbcb   :  { %4381 = vmatpush.msra.mxu0 %v5848_v3  ;;  %4404 = vmatpush.msrb.mxu3 %v5849_v61  ;;  %v5822_v3 = vld [vmem:[%s10144_s8 + $0x430] sm:$0xff]  ;;  %v5823_v61 = vld [vmem:[%s10144_s8 + $0x438] sm:$0xff] }
 0xbcd   :  { %4405 = vmatpush.msrb.mxu3 %v5833_v14  ;;  %v4190_v14 = vperm.slane %v8692_v63, 2 }
 0xbd1   :  { %v4103_v54 = vpop.f32.mrf.mxu1 }
 0xbd2   :  { %5815 = vmatmul.msk.f32.gmra.mxu2 %vm179_vm2, %v4103_v54  ;;  %v5850_v54 = vld [vmem:[%s10144_s8 + $0x510] sm:$0xff] }
 0xbdb   :  { %v3714_v50 = vpop.f32.mrf.mxu0 }
 0xbdc   :  { %v3720_v16 = vadd.f32 %v3714_v50, %v3634_v35  ;;  %v5832_v50 = vld [vmem:[%s10144_s8 + $0x480] sm:$0xff] }
 0xbdd   :  { %4382 = vmatpush.msra.mxu0 %v5832_v50 }
 0xbe3   :  { %v3717_v33 = vpop.f32.mrf.mxu0 }
 0xbe4   :  { %v3721_v18 = vadd.f32 %v3717_v33, %v3637_v41  ;;  %v5834_v33 = vld [vmem:[%s10144_s8 + $0x490] sm:$0xff] }
 0xbef   :  { %v3797_v53 = vpop.f32.mrf.mxu2 }
 0xbf0   :  { %v3803_v7 = vadd.f32 %v3797_v53, %v3720_v16  ;;  %v5835_v53 = vld [vmem:[%s10144_s8 + $0x498] sm:$0xff] }
 0xbf1   :  { %v3880_v34 = vpop.f32.mrf.mxu0  ;;  %4451 = vmatpush.msrb.mxu2 %v5835_v53  ;;  %v5819_v16 = vld [vmem:[%s10144_s8 + $0x418] sm:$0xff]  ;;  %v4193_v53 = vperm.slane %v8692_v63, 3  ;;  %v5842_v63 = vld [vmem:[%s10144_s8 + $0x4d0] sm:$0xff] }
 0xbf2   :  { %v3886_v5 = vadd.f32 %v3880_v34, %v3803_v7 }
 0xbf3   :  { %4452 = vmatpush.msrb.mxu2 %v5819_v16 }
 0xc35   :  { %v3800_v25 = vpop.f32.mrf.mxu2 }
 0xc36   :  { %v3804_v22 = vadd.f32 %v3800_v25, %v3721_v18  ;;  %v5816_v25 = vld [vmem:[%s10144_s8 + $0x400] sm:$0xff] }
 0xc37   :  { %v3883_v6 = vpop.f32.mrf.mxu0  ;;  %4383 = vmatpush.msra.mxu0 %v5816_v25 }
 0xc38   :  { %v3887_v38 = vadd.f32 %v3883_v6, %v3804_v22  ;;  %v5817_v6 = vld [vmem:[%s10144_s8 + $0x408] sm:$0xff] }
 0xc39   :  { %4406 = vmatpush.msrb.mxu3 %v5817_v6  ;;  %v5933_v22 = vld [vmem:[%s10144_s8 + $0x7a8] sm:$0xff] }
 0xc3b   :  { %4491 = vmatpush.msra.mxu3 %v5933_v22  ;;  %v5923_v22 = vld [vmem:[%s10144_s8 + $0x758] sm:$0xff] }
 0xc3d   :  { %v3963_v21 = vpop.f32.mrf.mxu2 }
 0xc3e   :  { %v3969_v60 = vadd.f32 %v3963_v21, %v3886_v5  ;;  %v5818_v21 = vld [vmem:[%s10144_s8 + $0x410] sm:$0xff] }
 0xc3f   :  { %v4046_v43 = vpop.f32.mrf.mxu0 }
 0xc40   :  { %v4052_v48 = vadd.f32 %v4046_v43, %v3969_v60  ;;  %v5932_v60 = vld [vmem:[%s10144_s8 + $0x7a0] sm:$0xff] }
 0xc41   :  { %4468 = vmatpush.msrb.mxu0 %v5932_v60  ;;  %v5922_v60 = vld [vmem:[%s10144_s8 + $0x750] sm:$0xff] }
 0xc45   :  { %v3966_v40 = vpop.f32.mrf.mxu2 }
 0xc46   :  { %v3970_v51 = vadd.f32 %v3966_v40, %v3887_v38  ;;  %v5917_v38 = vld [vmem:[%s10144_s8 + $0x728] sm:$0xff] }
 0xc47   :  { %v4049_v56 = vpop.f32.mrf.mxu0  ;;  %4492 = vmatpush.msra.mxu3 %v5917_v38  ;;  %v5906_v38 = vld [vmem:[%s10144_s8 + $0x6d0] sm:$0xff] }
 0xc48   :  { %v4053_v4 = vadd.f32 %v4049_v56, %v3970_v51  ;;  %v5919_v51 = vld [vmem:[%s10144_s8 + $0x738] sm:$0xff]  ;;  %v5901_v56 = vld [vmem:[%s10144_s8 + $0x6a8] sm:$0xff] }
 0xc49   :  { %4493 = vmatpush.msra.mxu3 %v5901_v56  ;;  %v5889_v56 = vld [vmem:[%s10144_s8 + $0x648] sm:$0xff] }
 0xc4d   :  { %v4129_v36 = vpop.f32.mrf.mxu2 }
 0xc4e   :  { %v4135_v47 = vadd.f32 %v4129_v36, %v4052_v48  ;;  %v5934_v48 = vld [vmem:[%s10144_s8 + $0x7b0] sm:$0xff]  ;;  %v5916_v36 = vld [vmem:[%s10144_s8 + $0x720] sm:$0xff] }
 0xc4f   :  { %4469 = vmatpush.msrb.mxu0 %v5916_v36  ;;  %v5905_v36 = vld [vmem:[%s10144_s8 + $0x6c8] sm:$0xff] }
 0xc50   :  { %v4138_v39 = vadd.f32 %v4137_v49, %v4135_v47  ;;  %v5918_v47 = vld [vmem:[%s10144_s8 + $0x730] sm:$0xff] }
 0xc52   :  { %v8696_v32 = vadd.f32 %v4138_v39, %v8388_v13  ;;  %v5900_v39 = vld [vmem:[%s10144_s8 + $0x6a0] sm:$0xff] }
 0xc53   :  { %4470 = vmatpush.msrb.mxu0 %v5900_v39  ;;  %v5888_v39 = vld [vmem:[%s10144_s8 + $0x640] sm:$0xff] }
 0xc54   :  { %v4142_v57 = vsel %vm123_vm1, %v8696_v32, 0.0  ;;  %v4150_v26 = vmul.f32 %v8696_v32, %v8696_v32 }
 0xc55   :  { %4143 = vadd.xlane.f32.xlu2 %v4142_v57  ;;  %v4132_v27 = vpop.f32.mrf.mxu2 }
 0xc56   :  { %v4136_v58 = vadd.f32 %v4132_v27, %v4053_v4  ;;  %v4152_v59 = vsel %vm123_vm1, %v4150_v26, 0.0  ;;  %v5902_v4 = vld [vmem:[%s10144_s8 + $0x6b0] sm:$0xff]  ;;  %v5903_v26 = vld [vmem:[%s10144_s8 + $0x6b8] sm:$0xff]  ;;  %v5884_v27 = vld [vmem:[%s10144_s8 + $0x620] sm:$0xff] }
 0xc57   :  { %4153 = vadd.xlane.f32.xlu0 %v4152_v59  ;;  %v5886_v59 = vld [vmem:[%s10144_s8 + $0x630] sm:$0xff]  ;;  %4471 = vmatpush.msrb.mxu0 %v5884_v27  ;;  %v5891_v27 = vld [vmem:[%s10144_s8 + $0x658] sm:$0xff] }
 0xc58   :  { %v4139_v62 = vadd.f32 %v4137_v49, %v4136_v58  ;;  %v5935_v49 = vld [vmem:[%s10144_s8 + $0x7b8] sm:$0xff]  ;;  %v5885_v58 = vld [vmem:[%s10144_s8 + $0x628] sm:$0xff] }
 0xc59   :  { %4537 = vmatpush.msra.mxu2 %v5935_v49  ;;  %4494 = vmatpush.msra.mxu3 %v5885_v58  ;;  %v5904_v49 = vld [vmem:[%s10144_s8 + $0x6c0] sm:$0xff] }
 0xc5a   :  { %v8704_v37 = vadd.f32 %v4139_v62, %v8394_v17  ;;  %v5930_v17 = vld [vmem:[%s10144_s8 + $0x790] sm:$0xff]  ;;  %v5887_v62 = vld [vmem:[%s10144_s8 + $0x638] sm:$0xff]  ;;  %4472 = vmatpush.msrb.mxu0 %v5868_v8 }
 0xc5b   :  { %4422 = vmatpush.msrb.mxu1 %v5930_v17  ;;  %4538 = vmatpush.msra.mxu2 %v5919_v51  ;;  %v5870_v17 = vld [vmem:[%s10144_s8 + $0x5b0] sm:$0xff] }
 0xc5c   :  { %v4145_v13 = vsel %vm123_vm1, %v8704_v37, 0.0  ;;  %v4151_v30 = vmul.f32 %v8704_v37, %v8704_v37  ;;  %4495 = vmatpush.msra.mxu3 %v5869_v44  ;;  %v5858_v44 = vld [vmem:[%s10144_s8 + $0x550] sm:$0xff] }
 0xc5d   :  { %4146 = vadd.xlane.f32.xlu2 %v4145_v13  ;;  %4423 = vmatpush.msrb.mxu1 %v5914_v31  ;;  %v5852_v31 = vld [vmem:[%s10144_s8 + $0x520] sm:$0xff] }
 0xc5e   :  { %v4155_v10 = vsel %vm123_vm1, %v4151_v30, 0.0  ;;  %4539 = vmatpush.msra.mxu2 %v5903_v26  ;;  %4473 = vmatpush.msrb.mxu0 %v5852_v31  ;;  %v5890_v26 = vld [vmem:[%s10144_s8 + $0x650] sm:$0xff]  ;;  %v5843_v31 = vld [vmem:[%s10144_s8 + $0x4d8] sm:$0xff] }
 0xc5f   :  { %4424 = vmatpush.msrb.mxu1 %v5898_v52  ;;  %v5855_v52 = vld [vmem:[%s10144_s8 + $0x538] sm:$0xff]  ;;  %4496 = vmatpush.msra.mxu3 %v5853_v12  ;;  %v5825_v12 = vld [vmem:[%s10144_s8 + $0x448] sm:$0xff] }
 0xc60   :  { %4540 = vmatpush.msra.mxu2 %v5887_v62  ;;  %4474 = vmatpush.msrb.mxu0 %v5836_v20  ;;  %v5874_v62 = vld [vmem:[%s10144_s8 + $0x5d0] sm:$0xff]  ;;  %v5941_v20 = vld [vmem:[%s10144_s8 + $0x7e8] sm:$0xff] }
 0xc61   :  { %4425 = vmatpush.msrb.mxu1 %v5882_v46  ;;  %v5838_v46 = vld [vmem:[%s10144_s8 + $0x4b0] sm:$0xff]  ;;  %4497 = vmatpush.msra.mxu3 %v5837_v2 }
 0xc62   :  { %4541 = vmatpush.msra.mxu2 %v5871_v1  ;;  %4475 = vmatpush.msrb.mxu0 %v5820_v55  ;;  %v5841_v1 = vld [vmem:[%s10144_s8 + $0x4c8] sm:$0xff]  ;;  %v5942_v2 = vld [vmem:[%s10144_s8 + $0x7f0] sm:$0xff] }
 0xc63   :  { %4426 = vmatpush.msrb.mxu1 %v5866_v42  ;;  %v5821_v42 = vld [vmem:[%s10144_s8 + $0x428] sm:$0xff]  ;;  %v5926_v55 = vld [vmem:[%s10144_s8 + $0x770] sm:$0xff] }
 0xc64   :  { %4542 = vmatpush.msra.mxu2 %v5855_v52  ;;  %4498 = vmatpush.msra.mxu3 %v5821_v42  ;;  %v5827_v52 = vld [vmem:[%s10144_s8 + $0x458] sm:$0xff] }
 0xc65   :  { %4156 = vadd.xlane.f32.xlu2 %v4155_v10  ;;  %4427 = vmatpush.msrb.mxu1 %v5850_v54  ;;  %v5927_v42 = vld [vmem:[%s10144_s8 + $0x778] sm:$0xff] }
 0xc66   :  { %4543 = vmatpush.msra.mxu2 %v5839_v19  ;;  %v5925_v19 = vld [vmem:[%s10144_s8 + $0x768] sm:$0xff] }
 0xc67   :  { %4428 = vmatpush.msrb.mxu1 %v5834_v33 }
 0xc68   :  { %4544 = vmatpush.msra.mxu2 %v5823_v61  ;;  %v5910_v61 = vld [vmem:[%s10144_s8 + $0x6f0] sm:$0xff] }
 0xc69   :  { %4429 = vmatpush.msrb.mxu1 %v5818_v21 }
 0xc6b   :  { %4514 = vmatpush.msra.mxu1 %v5934_v48 }
 0xc6d   :  { %4515 = vmatpush.msra.mxu1 %v5918_v47  ;;  %v5907_v47 = vld [vmem:[%s10144_s8 + $0x6d8] sm:$0xff] }
 0xc6f   :  { %4516 = vmatpush.msra.mxu1 %v5902_v4 }
 0xc71   :  { %4517 = vmatpush.msra.mxu1 %v5886_v59  ;;  %v5872_v59 = vld [vmem:[%s10144_s8 + $0x5c0] sm:$0xff] }
 0xc73   :  { %4518 = vmatpush.msra.mxu1 %v5870_v17  ;;  %v5859_v17 = vld [vmem:[%s10144_s8 + $0x558] sm:$0xff] }
 0xc75   :  { %4519 = vmatpush.msra.mxu1 %v5854_v15  ;;  %v5826_v15 = vld [vmem:[%s10144_s8 + $0x450] sm:$0xff] }
 0xc77   :  { %4520 = vmatpush.msra.mxu1 %v5838_v46  ;;  %v5943_v46 = vld [vmem:[%s10144_s8 + $0x7f8] sm:$0xff] }
 0xc79   :  { %4521 = vmatpush.msra.mxu1 %v5822_v3  ;;  %v5909_v3 = vld [vmem:[%s10144_s8 + $0x6e8] sm:$0xff] }
 0xcc8   :  { %v4144_v34 = vpop.xlane.xlu2 %4143 }
 0xcc9   :  { %v8805_v35 = vmul.f32 %v4144_v34, %v7066_v45 }
 0xcca   :  { %v4154_v7 = vpop.xlane.xlu0 %4153 }
 0xccb   :  { %v4160_v40 = vmul.f32 %v8805_v35, %v8805_v35  ;;  %v4158_v41 = vmul.f32 %v4154_v7, %v7066_v45  ;;  %v4164_v50 = vsub.f32 %v8696_v32, %v8805_v35  ;;  %v5937_v32 = vld [vmem:[%s10144_s8 + $0x7c8] sm:$0xff]  ;;  %v5938_v35 = vld [vmem:[%s10144_s8 + $0x7d0] sm:$0xff] }
 0xccd   :  { %v4162_v5 = vsub.f32 %v4158_v41, %v4160_v40  ;;  %v5936_v40 = vld [vmem:[%s10144_s8 + $0x7c0] sm:$0xff]  ;;  %v5939_v41 = vld [vmem:[%s10144_s8 + $0x7d8] sm:$0xff] }
 0xccf   :  { %v8813_v43 = vadd.f32 1e-05, %v4162_v5 }
 0xcd0   :  { %v4147_v18 = vpop.xlane.xlu2 %4146 }
 0xcd1   :  { %6447 = vrsqrt.f32 %v8813_v43  ;;  %v8850_v57 = vmul.f32 %v4147_v18, %v7066_v45  ;;  %vm4174_vm3 = vweird.f32 %v8813_v43  ;;  %v5921_v18 = vld [vmem:[%s10144_s8 + $0x748] sm:$0xff] }
 0xcd3   :  { %v4161_v29 = vmul.f32 %v8850_v57, %v8850_v57  ;;  %v4165_v4 = vsub.f32 %v8704_v37, %v8850_v57  ;;  %v5873_v37 = vld [vmem:[%s10144_s8 + $0x5c8] sm:$0xff] }
 0xcd7   :  { %v6448_v13 = vpop.eup %6447 }
 0xcd8   :  { %v4169_v30 = vmul.f32 %v6448_v13, %v8813_v43  ;;  %v4157_v10 = vpop.xlane.xlu2 %4156  ;;  %vm4175_vm2 = vweird.f32 %v6448_v13  ;;  %v5920_v43 = vld [vmem:[%s10144_s8 + $0x740] sm:$0xff] }
 0xcd9   :  { %v4159_v9 = vmul.f32 %v4157_v10, %v7066_v45  ;;  %vm4176_vm4 = vmor %vm4174_vm3, %vm4175_vm2  ;;  %v5857_v10 = vld [vmem:[%s10144_s8 + $0x548] sm:$0xff] }
 0xcda   :  { %v4170_v0 = vmul.f32 %v6448_v13, %v4169_v30  ;;  %v5856_v30 = vld [vmem:[%s10144_s8 + $0x540] sm:$0xff] }
 0xcdb   :  { %v4163_v11 = vsub.f32 %v4159_v9, %v4161_v29  ;;  %v5840_v9 = vld [vmem:[%s10144_s8 + $0x4c0] sm:$0xff] }
 0xcdc   :  { %v4171_v24 = vmul.f32 0.5, %v4170_v0  ;;  %v5824_v0 = vld [vmem:[%s10144_s8 + $0x440] sm:$0xff] }
 0xcdd   :  { %v4167_v23 = vadd.f32 1e-05, %v4163_v11  ;;  %v5940_v11 = vld [vmem:[%s10144_s8 + $0x7e0] sm:$0xff] }
 0xcde   :  { %v4172_v54 = vsub.f32 1.5, %v4171_v24  ;;  %v5924_v24 = vld [vmem:[%s10144_s8 + $0x760] sm:$0xff] }
 0xcdf   :  { %6449 = vrsqrt.f32 %v4167_v23  ;;  %vm4184_vm6 = vweird.f32 %v4167_v23 }
 0xce0   :  { %v4173_v28 = vmul.f32 %v6448_v13, %v4172_v54  ;;  %v5911_v54 = vld [vmem:[%s10144_s8 + $0x6f8] sm:$0xff] }
 0xce2   :  { %v4177_v33 = vsel %vm4176_vm4, %v6448_v13, %v4173_v28  ;;  %v5875_v13 = vld [vmem:[%s10144_s8 + $0x5d8] sm:$0xff]  ;;  %v5892_v28 = vld [vmem:[%s10144_s8 + $0x660] sm:$0xff] }
 0xce3   :  { %v4188_v34 = vmul.f32 %v4177_v33, %v4164_v50  ;;  %v5893_v50 = vld [vmem:[%s10144_s8 + $0x668] sm:$0xff]  ;;  %v5895_v33 = vld [vmem:[%s10144_s8 + $0x678] sm:$0xff] }
 0xce5   :  { %v6450_v25 = vpop.eup %6449  ;;  %v4191_v6 = vmul.f32 %v4190_v14, %v4188_v34  ;;  %v5877_v34 = vld [vmem:[%s10144_s8 + $0x5e8] sm:$0xff] }
 0xce6   :  { %v4179_v21 = vmul.f32 %v6450_v25, %v4167_v23  ;;  %vm4185_vm5 = vweird.f32 %v6450_v25  ;;  %v5908_v23 = vld [vmem:[%s10144_s8 + $0x6e0] sm:$0xff] }
 0xce7   :  { %v8926_v16 = vadd.f32 %v4193_v53, %v4191_v6  ;;  %vm4186_vm7 = vmor %vm4184_vm6, %vm4185_vm5  ;;  %v5879_v6 = vld [vmem:[%s10144_s8 + $0x5f8] sm:$0xff]  ;;  %vm5602_vm6 = vcmask 58368  }
 0xce8   :  { %v4180_v7 = vmul.f32 %v6450_v25, %v4179_v21  ;;  %v5860_v21 = vld [vmem:[%s10144_s8 + $0x560] sm:$0xff] }
 0xce9   :  { %5946 = vmatmul.msk.f32.vlgmr.msra.gmra.mxu0 %vm123_vm1, %v8926_v16  ;;  %5948 = vmatmul.msk.f32.vlgmr.msrb.gmra.mxu3 %vm123_vm1, %v8926_v16 }
 0xcea   :  { %v4181_v5 = vmul.f32 0.5, %v4180_v7  ;;  %5950 = vmatmul.msk.f32.vlgmr.msrb.gmra.mxu1 %vm123_vm1, %v8926_v16  ;;  %5952 = vmatmul.msk.f32.vlgmr.msrb.gmra.mxu2 %vm123_vm1, %v8926_v16  ;;  %v5861_v7 = vld [vmem:[%s10144_s8 + $0x568] sm:$0xff] }
 0xceb   :  { %4560 = vmatpush.msra.mxu0 %v5936_v40  ;;  %4583 = vmatpush.msrb.mxu3 %v5937_v32  ;;  %v5862_v40 = vld [vmem:[%s10144_s8 + $0x570] sm:$0xff]  ;;  %v5863_v32 = vld [vmem:[%s10144_s8 + $0x578] sm:$0xff] }
 0xcec   :  { %v4182_v48 = vsub.f32 1.5, %v4181_v5  ;;  %4606 = vmatpush.msrb.mxu1 %v5938_v35  ;;  %4629 = vmatpush.msrb.mxu2 %v5939_v41  ;;  %v5844_v35 = vld [vmem:[%s10144_s8 + $0x4e0] sm:$0xff]  ;;  %v5845_v41 = vld [vmem:[%s10144_s8 + $0x4e8] sm:$0xff]  ;;  %v5846_v5 = vld [vmem:[%s10144_s8 + $0x4f0] sm:$0xff] }
 0xced   :  { %4561 = vmatpush.msra.mxu0 %v5920_v43  ;;  %4584 = vmatpush.msrb.mxu3 %v5921_v18  ;;  %v5847_v43 = vld [vmem:[%s10144_s8 + $0x4f8] sm:$0xff]  ;;  %v5828_v18 = vld [vmem:[%s10144_s8 + $0x460] sm:$0xff] }
 0xcee   :  { %v4183_v51 = vmul.f32 %v6450_v25, %v4182_v48  ;;  %4607 = vmatpush.msrb.mxu1 %v5922_v60  ;;  %4630 = vmatpush.msrb.mxu2 %v5923_v22  ;;  %v5829_v60 = vld [vmem:[%s10144_s8 + $0x468] sm:$0xff]  ;;  %v5830_v22 = vld [vmem:[%s10144_s8 + $0x470] sm:$0xff]  ;;  %v5831_v48 = vld [vmem:[%s10144_s8 + $0x478] sm:$0xff] }
 0xcef   :  { %4562 = vmatpush.msra.mxu0 %v5904_v49  ;;  %4585 = vmatpush.msrb.mxu3 %v5905_v36  ;;  %v5993_v49 = vld [vmem:[%s10146_s10 + $0x878] sm:$0xff] }
 0xcf0   :  { %v4187_v58 = vsel %vm4186_vm7, %v6450_v25, %v4183_v51  ;;  %4608 = vmatpush.msrb.mxu1 %v5906_v38  ;;  %4631 = vmatpush.msrb.mxu2 %v5907_v47  ;;  %v5878_v25 = vld [vmem:[%s10144_s8 + $0x5f0] sm:$0xff]  ;;  %v6025_v36 = vld [vmem:[%s10146_s10 + $0x978] sm:$0xff] }
 0xcf1   :  { %v4189_v57 = vmul.f32 %v4187_v58, %v4165_v4  ;;  %4563 = vmatpush.msra.mxu0 %v5888_v39  ;;  %4586 = vmatpush.msrb.mxu3 %v5889_v56  ;;  %v6009_v38 = vld [vmem:[%s10146_s10 + $0x8f8] sm:$0xff]  ;;  %v5992_v51 = vld [vmem:[%s10146_s10 + $0x870] sm:$0xff]  ;;  %v6007_v58 = vld [vmem:[%s10146_s10 + $0x8e8] sm:$0xff] }
 0xcf2   :  { %4609 = vmatpush.msrb.mxu1 %v5890_v26  ;;  %4632 = vmatpush.msrb.mxu2 %v5891_v27  ;;  %v6041_v47 = vld [vmem:[%s10146_s10 + $0x9f8] sm:$0xff]  ;;  %v6024_v39 = vld [vmem:[%s10146_s10 + $0x970] sm:$0xff]  ;;  %v5991_v26 = vld [vmem:[%s10146_s10 + $0x868] sm:$0xff] }
 0xcf3   :  { %v4192_v8 = vmul.f32 %v4190_v14, %v4189_v57  ;;  %4564 = vmatpush.msra.mxu0 %v5872_v59  ;;  %4587 = vmatpush.msrb.mxu3 %v5873_v37  ;;  %v5894_v14 = vld [vmem:[%s10144_s8 + $0x670] sm:$0xff]  ;;  %v6023_v27 = vld [vmem:[%s10146_s10 + $0x968] sm:$0xff]  ;;  %v5990_v37 = vld [vmem:[%s10146_s10 + $0x860] sm:$0xff] }
 0xcf4   :  { %4610 = vmatpush.msrb.mxu1 %v5874_v62  ;;  %4633 = vmatpush.msrb.mxu2 %v5875_v13  ;;  %v6008_v56 = vld [vmem:[%s10146_s10 + $0x8f0] sm:$0xff]  ;;  %v6039_v59 = vld [vmem:[%s10146_s10 + $0x9e8] sm:$0xff]  ;;  %v6022_v57 = vld [vmem:[%s10146_s10 + $0x960] sm:$0xff] }
 0xcf5   :  { %v9013_v29 = vadd.f32 %v4193_v53, %v4192_v8  ;;  %4565 = vmatpush.msra.mxu0 %v5856_v30  ;;  %4588 = vmatpush.msrb.mxu3 %v5857_v10  ;;  %v5876_v53 = vld [vmem:[%s10144_s8 + $0x5e0] sm:$0xff]  ;;  %v6040_v4 = vld [vmem:[%s10146_s10 + $0x9f0] sm:$0xff]  ;;  %v5989_v30 = vld [vmem:[%s10146_s10 + $0x858] sm:$0xff] }
 0xcf6   :  { %4611 = vmatpush.msrb.mxu1 %v5858_v44  ;;  %4634 = vmatpush.msrb.mxu2 %v5859_v17  ;;  %v6006_v62 = vld [vmem:[%s10146_s10 + $0x8e0] sm:$0xff]  ;;  %v6021_v10 = vld [vmem:[%s10146_s10 + $0x958] sm:$0xff]  ;;  %v5988_v17 = vld [vmem:[%s10146_s10 + $0x850] sm:$0xff] }
 0xcf7   :  { %5947 = vmatmul.msk.f32.gmra.mxu0 %vm123_vm1, %v9013_v29  ;;  %5949 = vmatmul.msk.f32.gmra.mxu3 %vm123_vm1, %v9013_v29  ;;  %v6038_v13 = vld [vmem:[%s10146_s10 + $0x9e0] sm:$0xff]  ;;  %v6005_v8 = vld [vmem:[%s10146_s10 + $0x8d8] sm:$0xff] }
 0xcf8   :  { %5951 = vmatmul.msk.f32.gmra.mxu1 %vm123_vm1, %v9013_v29  ;;  %5953 = vmatmul.msk.f32.gmra.mxu2 %vm123_vm1, %v9013_v29  ;;  %v6037_v44 = vld [vmem:[%s10146_s10 + $0x9d8] sm:$0xff] }
 0xcf9   :  { %4566 = vmatpush.msra.mxu0 %v5840_v9  ;;  %4589 = vmatpush.msrb.mxu3 %v5841_v1  ;;  %v6020_v9 = vld [vmem:[%s10146_s10 + $0x950] sm:$0xff] }
 0xcfa   :  { %4612 = vmatpush.msrb.mxu1 %v5842_v63  ;;  %4635 = vmatpush.msrb.mxu2 %v5843_v31  ;;  %v6004_v1 = vld [vmem:[%s10146_s10 + $0x8d0] sm:$0xff]  ;;  %v5987_v31 = vld [vmem:[%s10146_s10 + $0x848] sm:$0xff] }
 0xcfb   :  { %4567 = vmatpush.msra.mxu0 %v5824_v0  ;;  %4590 = vmatpush.msrb.mxu3 %v5825_v12  ;;  %v6036_v63 = vld [vmem:[%s10146_s10 + $0x9d0] sm:$0xff]  ;;  %v6019_v0 = vld [vmem:[%s10146_s10 + $0x948] sm:$0xff] }
 0xcfc   :  { %4613 = vmatpush.msrb.mxu1 %v5826_v15  ;;  %4636 = vmatpush.msrb.mxu2 %v5827_v52  ;;  %v6003_v12 = vld [vmem:[%s10146_s10 + $0x8c8] sm:$0xff]  ;;  %v5986_v52 = vld [vmem:[%s10146_s10 + $0x840] sm:$0xff] }
 0xcfd   :  { %v6035_v15 = vld [vmem:[%s10146_s10 + $0x9c8] sm:$0xff] }
 0xcff   :  { %5954 = vmatmul.msk.f32.vlgmr.msrb.gmra.mxu0 %vm123_vm1, %v8926_v16  ;;  %5956 = vmatmul.msk.f32.vlgmr.msra.gmra.mxu3 %vm123_vm1, %v8926_v16 }
 0xd00   :  { %5958 = vmatmul.msk.f32.vlgmr.msra.gmra.mxu1 %vm123_vm1, %v8926_v16  ;;  %5960 = vmatmul.msk.f32.vlgmr.msra.gmra.mxu2 %vm123_vm1, %v8926_v16 }
 0xd01   :  { %4652 = vmatpush.msrb.mxu0 %v5940_v11  ;;  %4675 = vmatpush.msra.mxu3 %v5941_v20  ;;  %v6018_v11 = vld [vmem:[%s10146_s10 + $0x940] sm:$0xff] }
 0xd02   :  { %4698 = vmatpush.msra.mxu1 %v5942_v2  ;;  %4721 = vmatpush.msra.mxu2 %v5943_v46  ;;  %v6002_v20 = vld [vmem:[%s10146_s10 + $0x8c0] sm:$0xff]  ;;  %v5985_v46 = vld [vmem:[%s10146_s10 + $0x838] sm:$0xff] }
 0xd03   :  { %4653 = vmatpush.msrb.mxu0 %v5924_v24  ;;  %4676 = vmatpush.msra.mxu3 %v5925_v19  ;;  %v6034_v2 = vld [vmem:[%s10146_s10 + $0x9c0] sm:$0xff]  ;;  %v6017_v24 = vld [vmem:[%s10146_s10 + $0x938] sm:$0xff] }
 0xd04   :  { %4699 = vmatpush.msra.mxu1 %v5926_v55  ;;  %4722 = vmatpush.msra.mxu2 %v5927_v42  ;;  %v6001_v19 = vld [vmem:[%s10146_s10 + $0x8b8] sm:$0xff]  ;;  %v5984_v42 = vld [vmem:[%s10146_s10 + $0x830] sm:$0xff] }
 0xd05   :  { %4654 = vmatpush.msrb.mxu0 %v5908_v23  ;;  %4677 = vmatpush.msra.mxu3 %v5909_v3  ;;  %v6033_v55 = vld [vmem:[%s10146_s10 + $0x9b8] sm:$0xff]  ;;  %v6016_v23 = vld [vmem:[%s10146_s10 + $0x930] sm:$0xff] }
 0xd06   :  { %4700 = vmatpush.msra.mxu1 %v5910_v61  ;;  %4723 = vmatpush.msra.mxu2 %v5911_v54  ;;  %v6000_v3 = vld [vmem:[%s10146_s10 + $0x8b0] sm:$0xff]  ;;  %v5983_v54 = vld [vmem:[%s10146_s10 + $0x828] sm:$0xff] }
 0xd07   :  { %5955 = vmatmul.msk.f32.gmra.mxu0 %vm123_vm1, %v9013_v29  ;;  %5957 = vmatmul.msk.f32.gmra.mxu3 %vm123_vm1, %v9013_v29  ;;  %v6032_v61 = vld [vmem:[%s10146_s10 + $0x9b0] sm:$0xff] }
 0xd08   :  { %5959 = vmatmul.msk.f32.gmra.mxu1 %vm123_vm1, %v9013_v29  ;;  %5961 = vmatmul.msk.f32.gmra.mxu2 %vm123_vm1, %v9013_v29 }
 0xd09   :  { %4655 = vmatpush.msrb.mxu0 %v5892_v28  ;;  %4678 = vmatpush.msra.mxu3 %v5893_v50  ;;  %v6015_v28 = vld [vmem:[%s10146_s10 + $0x928] sm:$0xff] }
 0xd0a   :  { %4701 = vmatpush.msra.mxu1 %v5894_v14  ;;  %4724 = vmatpush.msra.mxu2 %v5895_v33  ;;  %v5999_v50 = vld [vmem:[%s10146_s10 + $0x8a8] sm:$0xff]  ;;  %v5982_v33 = vld [vmem:[%s10146_s10 + $0x820] sm:$0xff] }
 0xd0b   :  { %4656 = vmatpush.msrb.mxu0 %v5876_v53  ;;  %4679 = vmatpush.msra.mxu3 %v5877_v34  ;;  %v6031_v14 = vld [vmem:[%s10146_s10 + $0x9a8] sm:$0xff]  ;;  %v6014_v53 = vld [vmem:[%s10146_s10 + $0x920] sm:$0xff] }
 0xd0c   :  { %4702 = vmatpush.msra.mxu1 %v5878_v25  ;;  %4725 = vmatpush.msra.mxu2 %v5879_v6  ;;  %v5998_v34 = vld [vmem:[%s10146_s10 + $0x8a0] sm:$0xff]  ;;  %v5981_v6 = vld [vmem:[%s10146_s10 + $0x818] sm:$0xff] }
 0xd0d   :  { %4657 = vmatpush.msrb.mxu0 %v5860_v21  ;;  %4680 = vmatpush.msra.mxu3 %v5861_v7  ;;  %v6030_v25 = vld [vmem:[%s10146_s10 + $0x9a0] sm:$0xff]  ;;  %v6013_v21 = vld [vmem:[%s10146_s10 + $0x918] sm:$0xff] }
 0xd0e   :  { %4703 = vmatpush.msra.mxu1 %v5862_v40  ;;  %4726 = vmatpush.msra.mxu2 %v5863_v32  ;;  %v5997_v7 = vld [vmem:[%s10146_s10 + $0x898] sm:$0xff]  ;;  %v5980_v32 = vld [vmem:[%s10146_s10 + $0x810] sm:$0xff] }
 0xd0f   :  { %5962 = vmatmul.msk.f32.vlgmr.msra.gmra.mxu0 %vm123_vm1, %v8926_v16  ;;  %5964 = vmatmul.msk.f32.vlgmr.msrb.gmra.mxu3 %vm123_vm1, %v8926_v16  ;;  %v6029_v40 = vld [vmem:[%s10146_s10 + $0x998] sm:$0xff] }
 0xd10   :  { %5966 = vmatmul.msk.f32.vlgmr.msrb.gmra.mxu1 %vm123_vm1, %v8926_v16  ;;  %5968 = vmatmul.msk.f32.vlgmr.msrb.gmra.mxu2 %vm123_vm1, %v8926_v16 }
 0xd11   :  { %4658 = vmatpush.msrb.mxu0 %v5844_v35  ;;  %4681 = vmatpush.msra.mxu3 %v5845_v41  ;;  %v6012_v35 = vld [vmem:[%s10146_s10 + $0x910] sm:$0xff] }
 0xd12   :  { %4704 = vmatpush.msra.mxu1 %v5846_v5  ;;  %4727 = vmatpush.msra.mxu2 %v5847_v43  ;;  %v5996_v41 = vld [vmem:[%s10146_s10 + $0x890] sm:$0xff]  ;;  %v5979_v43 = vld [vmem:[%s10146_s10 + $0x808] sm:$0xff] }
 0xd13   :  { %4659 = vmatpush.msrb.mxu0 %v5828_v18  ;;  %4682 = vmatpush.msra.mxu3 %v5829_v60  ;;  %v6028_v5 = vld [vmem:[%s10146_s10 + $0x990] sm:$0xff]  ;;  %v6011_v18 = vld [vmem:[%s10146_s10 + $0x908] sm:$0xff] }
 0xd14   :  { %4705 = vmatpush.msra.mxu1 %v5830_v22  ;;  %4728 = vmatpush.msra.mxu2 %v5831_v48  ;;  %v5995_v60 = vld [vmem:[%s10146_s10 + $0x888] sm:$0xff]  ;;  %v5978_v48 = vld [vmem:[%s10146_s10 + $0x800] sm:$0xff] }
 0xd15   :  { %5026 = vmatpush.msra.mxu0 %v5993_v49  ;;  %5049 = vmatpush.msrb.mxu3 %v6009_v38  ;;  %v6027_v22 = vld [vmem:[%s10146_s10 + $0x988] sm:$0xff]  ;;  %v6010_v49 = vld [vmem:[%s10146_s10 + $0x900] sm:$0xff]  ;;  %v6089_v38 = vld [vmem:[%s10146_s10 + $0xb78] sm:$0xff] }
 0xd16   :  { %5072 = vmatpush.msrb.mxu1 %v6025_v36  ;;  %5095 = vmatpush.msrb.mxu2 %v6041_v47  ;;  %v6057_v36 = vld [vmem:[%s10146_s10 + $0xa78] sm:$0xff]  ;;  %v5994_v47 = vld [vmem:[%s10146_s10 + $0x880] sm:$0xff] }
 0xd17   :  { %5963 = vmatmul.msk.f32.gmra.mxu0 %vm123_vm1, %v9013_v29  ;;  %5965 = vmatmul.msk.f32.gmra.mxu3 %vm123_vm1, %v9013_v29 }
 0xd18   :  { %5967 = vmatmul.msk.f32.gmra.mxu1 %vm123_vm1, %v9013_v29  ;;  %5969 = vmatmul.msk.f32.gmra.mxu2 %vm123_vm1, %v9013_v29 }
 0xd19   :  { %5027 = vmatpush.msra.mxu0 %v5992_v51  ;;  %5073 = vmatpush.msrb.mxu1 %v6024_v39  ;;  %v6026_v51 = vld [vmem:[%s10146_s10 + $0x980] sm:$0xff]  ;;  %v6056_v39 = vld [vmem:[%s10146_s10 + $0xa70] sm:$0xff] }
 0xd1a   :  { %5050 = vmatpush.msrb.mxu3 %v6008_v56  ;;  %5096 = vmatpush.msrb.mxu2 %v6040_v4  ;;  %v6088_v56 = vld [vmem:[%s10146_s10 + $0xb70] sm:$0xff]  ;;  %v6073_v4 = vld [vmem:[%s10146_s10 + $0xaf8] sm:$0xff] }
 0xd1b   :  { %5028 = vmatpush.msra.mxu0 %v5991_v26  ;;  %5074 = vmatpush.msrb.mxu1 %v6023_v27  ;;  %v6105_v26 = vld [vmem:[%s10146_s10 + $0xbf8] sm:$0xff]  ;;  %v6055_v27 = vld [vmem:[%s10146_s10 + $0xa68] sm:$0xff] }
 0xd1c   :  { %5051 = vmatpush.msrb.mxu3 %v6007_v58  ;;  %5097 = vmatpush.msrb.mxu2 %v6039_v59  ;;  %v6087_v58 = vld [vmem:[%s10146_s10 + $0xb68] sm:$0xff]  ;;  %v6072_v59 = vld [vmem:[%s10146_s10 + $0xaf0] sm:$0xff] }
 0xd1d   :  { %5029 = vmatpush.msra.mxu0 %v5990_v37  ;;  %5075 = vmatpush.msrb.mxu1 %v6022_v57  ;;  %v6104_v37 = vld [vmem:[%s10146_s10 + $0xbf0] sm:$0xff]  ;;  %v6054_v57 = vld [vmem:[%s10146_s10 + $0xa60] sm:$0xff] }
 0xd1e   :  { %5052 = vmatpush.msrb.mxu3 %v6006_v62  ;;  %5098 = vmatpush.msrb.mxu2 %v6038_v13  ;;  %v6086_v62 = vld [vmem:[%s10146_s10 + $0xb60] sm:$0xff]  ;;  %v6071_v13 = vld [vmem:[%s10146_s10 + $0xae8] sm:$0xff] }
 0xd1f   :  { %5970 = vmatmul.msk.f32.vlgmr.msrb.gmra.mxu0 %vm123_vm1, %v8926_v16  ;;  %5972 = vmatmul.msk.f32.vlgmr.msra.gmra.mxu3 %vm123_vm1, %v8926_v16 }
 0xd20   :  { %5974 = vmatmul.msk.f32.vlgmr.msra.gmra.mxu1 %vm123_vm1, %v8926_v16  ;;  %5976 = vmatmul.msk.f32.vlgmr.msra.gmra.mxu2 %vm123_vm1, %v8926_v16 }
 0xd21   :  { %5030 = vmatpush.msra.mxu0 %v5989_v30  ;;  %5076 = vmatpush.msrb.mxu1 %v6021_v10  ;;  %v6103_v30 = vld [vmem:[%s10146_s10 + $0xbe8] sm:$0xff]  ;;  %v6053_v10 = vld [vmem:[%s10146_s10 + $0xa58] sm:$0xff] }
 0xd22   :  { %5053 = vmatpush.msrb.mxu3 %v6005_v8  ;;  %5099 = vmatpush.msrb.mxu2 %v6037_v44  ;;  %v6085_v8 = vld [vmem:[%s10146_s10 + $0xb58] sm:$0xff]  ;;  %v6070_v44 = vld [vmem:[%s10146_s10 + $0xae0] sm:$0xff] }
 0xd23   :  { %5031 = vmatpush.msra.mxu0 %v5988_v17  ;;  %5077 = vmatpush.msrb.mxu1 %v6020_v9  ;;  %v6102_v17 = vld [vmem:[%s10146_s10 + $0xbe0] sm:$0xff]  ;;  %v6052_v9 = vld [vmem:[%s10146_s10 + $0xa50] sm:$0xff] }
 0xd24   :  { %5054 = vmatpush.msrb.mxu3 %v6004_v1  ;;  %5100 = vmatpush.msrb.mxu2 %v6036_v63  ;;  %v6084_v1 = vld [vmem:[%s10146_s10 + $0xb50] sm:$0xff]  ;;  %v6069_v63 = vld [vmem:[%s10146_s10 + $0xad8] sm:$0xff] }
 0xd25   :  { %5032 = vmatpush.msra.mxu0 %v5987_v31  ;;  %5078 = vmatpush.msrb.mxu1 %v6019_v0  ;;  %v6101_v31 = vld [vmem:[%s10146_s10 + $0xbd8] sm:$0xff]  ;;  %v6051_v0 = vld [vmem:[%s10146_s10 + $0xa48] sm:$0xff] }
 0xd26   :  { %5055 = vmatpush.msrb.mxu3 %v6003_v12  ;;  %5101 = vmatpush.msrb.mxu2 %v6035_v15  ;;  %v6083_v12 = vld [vmem:[%s10146_s10 + $0xb48] sm:$0xff]  ;;  %v6068_v15 = vld [vmem:[%s10146_s10 + $0xad0] sm:$0xff] }
 0xd27   :  { %5971 = vmatmul.msk.f32.gmra.mxu0 %vm123_vm1, %v9013_v29  ;;  %5973 = vmatmul.msk.f32.gmra.mxu3 %vm123_vm1, %v9013_v29 }
 0xd28   :  { %5975 = vmatmul.msk.f32.gmra.mxu1 %vm123_vm1, %v9013_v29  ;;  %5977 = vmatmul.msk.f32.gmra.mxu2 %vm123_vm1, %v9013_v29 }
 0xd29   :  { %5033 = vmatpush.msra.mxu0 %v5986_v52  ;;  %5079 = vmatpush.msrb.mxu1 %v6018_v11  ;;  %v6100_v52 = vld [vmem:[%s10146_s10 + $0xbd0] sm:$0xff]  ;;  %v6050_v11 = vld [vmem:[%s10146_s10 + $0xa40] sm:$0xff] }
 0xd2a   :  { %5056 = vmatpush.msrb.mxu3 %v6002_v20  ;;  %5102 = vmatpush.msrb.mxu2 %v6034_v2  ;;  %v6082_v20 = vld [vmem:[%s10146_s10 + $0xb40] sm:$0xff]  ;;  %v6067_v2 = vld [vmem:[%s10146_s10 + $0xac8] sm:$0xff] }
 0xd2b   :  { %5034 = vmatpush.msra.mxu0 %v5985_v46  ;;  %5080 = vmatpush.msrb.mxu1 %v6017_v24  ;;  %v6099_v46 = vld [vmem:[%s10146_s10 + $0xbc8] sm:$0xff]  ;;  %v6049_v24 = vld [vmem:[%s10146_s10 + $0xa38] sm:$0xff] }
 0xd2c   :  { %5057 = vmatpush.msrb.mxu3 %v6001_v19  ;;  %5103 = vmatpush.msrb.mxu2 %v6033_v55  ;;  %v6081_v19 = vld [vmem:[%s10146_s10 + $0xb38] sm:$0xff]  ;;  %v6066_v55 = vld [vmem:[%s10146_s10 + $0xac0] sm:$0xff] }
 0xd2d   :  { %5035 = vmatpush.msra.mxu0 %v5984_v42  ;;  %5081 = vmatpush.msrb.mxu1 %v6016_v23  ;;  %v6098_v42 = vld [vmem:[%s10146_s10 + $0xbc0] sm:$0xff]  ;;  %v6048_v23 = vld [vmem:[%s10146_s10 + $0xa30] sm:$0xff] }
 0xd2e   :  { %5058 = vmatpush.msrb.mxu3 %v6000_v3  ;;  %5104 = vmatpush.msrb.mxu2 %v6032_v61  ;;  %v6080_v3 = vld [vmem:[%s10146_s10 + $0xb30] sm:$0xff]  ;;  %v6065_v61 = vld [vmem:[%s10146_s10 + $0xab8] sm:$0xff] }
 0xd2f   :  { %5036 = vmatpush.msra.mxu0 %v5983_v54  ;;  %5082 = vmatpush.msrb.mxu1 %v6015_v28  ;;  %v6097_v54 = vld [vmem:[%s10146_s10 + $0xbb8] sm:$0xff]  ;;  %v6047_v28 = vld [vmem:[%s10146_s10 + $0xa28] sm:$0xff] }
 0xd30   :  { %5059 = vmatpush.msrb.mxu3 %v5999_v50  ;;  %5105 = vmatpush.msrb.mxu2 %v6031_v14  ;;  %v6079_v50 = vld [vmem:[%s10146_s10 + $0xb28] sm:$0xff]  ;;  %v6064_v14 = vld [vmem:[%s10146_s10 + $0xab0] sm:$0xff] }
 0xd31   :  { %5037 = vmatpush.msra.mxu0 %v5982_v33  ;;  %5083 = vmatpush.msrb.mxu1 %v6014_v53  ;;  %v6096_v33 = vld [vmem:[%s10146_s10 + $0xbb0] sm:$0xff]  ;;  %v6046_v53 = vld [vmem:[%s10146_s10 + $0xa20] sm:$0xff] }
 0xd32   :  { %5060 = vmatpush.msrb.mxu3 %v5998_v34  ;;  %5106 = vmatpush.msrb.mxu2 %v6030_v25  ;;  %v6078_v34 = vld [vmem:[%s10146_s10 + $0xb20] sm:$0xff]  ;;  %v6063_v25 = vld [vmem:[%s10146_s10 + $0xaa8] sm:$0xff] }
 0xd33   :  { %5038 = vmatpush.msra.mxu0 %v5981_v6  ;;  %5084 = vmatpush.msrb.mxu1 %v6013_v21  ;;  %v6095_v6 = vld [vmem:[%s10146_s10 + $0xba8] sm:$0xff]  ;;  %v6045_v21 = vld [vmem:[%s10146_s10 + $0xa18] sm:$0xff] }
 0xd34   :  { %5061 = vmatpush.msrb.mxu3 %v5997_v7  ;;  %5107 = vmatpush.msrb.mxu2 %v6029_v40  ;;  %v6077_v7 = vld [vmem:[%s10146_s10 + $0xb18] sm:$0xff]  ;;  %v6062_v40 = vld [vmem:[%s10146_s10 + $0xaa0] sm:$0xff] }
 0xd35   :  { %5039 = vmatpush.msra.mxu0 %v5980_v32  ;;  %5085 = vmatpush.msrb.mxu1 %v6012_v35  ;;  %v6094_v32 = vld [vmem:[%s10146_s10 + $0xba0] sm:$0xff]  ;;  %v6044_v35 = vld [vmem:[%s10146_s10 + $0xa10] sm:$0xff] }
 0xd36   :  { %5062 = vmatpush.msrb.mxu3 %v5996_v41  ;;  %5108 = vmatpush.msrb.mxu2 %v6028_v5  ;;  %v6076_v41 = vld [vmem:[%s10146_s10 + $0xb10] sm:$0xff]  ;;  %v6061_v5 = vld [vmem:[%s10146_s10 + $0xa98] sm:$0xff] }
 0xd37   :  { %5040 = vmatpush.msra.mxu0 %v5979_v43  ;;  %5086 = vmatpush.msrb.mxu1 %v6011_v18  ;;  %v6093_v43 = vld [vmem:[%s10146_s10 + $0xb98] sm:$0xff]  ;;  %v6043_v18 = vld [vmem:[%s10146_s10 + $0xa08] sm:$0xff] }
 0xd38   :  { %5063 = vmatpush.msrb.mxu3 %v5995_v60  ;;  %5109 = vmatpush.msrb.mxu2 %v6027_v22  ;;  %v6075_v60 = vld [vmem:[%s10146_s10 + $0xb08] sm:$0xff]  ;;  %v6060_v22 = vld [vmem:[%s10146_s10 + $0xa90] sm:$0xff] }
 0xd39   :  { %5041 = vmatpush.msra.mxu0 %v5978_v48  ;;  %5087 = vmatpush.msrb.mxu1 %v6010_v49  ;;  %v6092_v48 = vld [vmem:[%s10146_s10 + $0xb90] sm:$0xff]  ;;  %v6042_v49 = vld [vmem:[%s10146_s10 + $0xa00] sm:$0xff] }
 0xd3a   :  { %5064 = vmatpush.msrb.mxu3 %v5994_v47  ;;  %5110 = vmatpush.msrb.mxu2 %v6026_v51  ;;  %v6091_v47 = vld [vmem:[%s10146_s10 + $0xb88] sm:$0xff]  ;;  %v6058_v51 = vld [vmem:[%s10146_s10 + $0xa80] sm:$0xff] }
 0xd3b   :  { %5118 = vmatpush.msrb.mxu0 %v6057_v36  ;;  %5164 = vmatpush.msra.mxu1 %v6089_v38  ;;  %v6074_v36 = vld [vmem:[%s10146_s10 + $0xb00] sm:$0xff]  ;;  %v6059_v38 = vld [vmem:[%s10146_s10 + $0xa88] sm:$0xff] }
 0xd3c   :  { %5141 = vmatpush.msra.mxu3 %v6073_v4  ;;  %5187 = vmatpush.msra.mxu2 %v6105_v26 }
 0xd3d   :  { %5119 = vmatpush.msrb.mxu0 %v6056_v39  ;;  %5165 = vmatpush.msra.mxu1 %v6088_v56  ;;  %v6090_v39 = vld [vmem:[%s10146_s10 + $0xb80] sm:$0xff]  ;;  %v9578_v56 = vld [vmem:[%s10145_s9 + $0x10] sm:$0xff] }
 0xd3e   :  { %5142 = vmatpush.msra.mxu3 %v6072_v59  ;;  %5188 = vmatpush.msra.mxu2 %v6104_v37  ;;  %v4330_v4 = vperm.slane %v9578_v56, 0  ;;  %v4332_v26 = vperm.slane %v9578_v56, 2 }
 0xd3f   :  { %5120 = vmatpush.msrb.mxu0 %v6055_v27  ;;  %5166 = vmatpush.msra.mxu1 %v6087_v58 }
 0xd40   :  { %5143 = vmatpush.msra.mxu3 %v6071_v13  ;;  %5189 = vmatpush.msra.mxu2 %v6103_v30  ;;  %v4331_v13 = vperm.slane %v9578_v56, 1 }
 0xd41   :  { %5121 = vmatpush.msrb.mxu0 %v6054_v57  ;;  %5167 = vmatpush.msra.mxu1 %v6086_v62  ;;  %v6121_v62 = vld [vmem:[%s10146_s10 + $0xc78] sm:$0xff] }
 0xd42   :  { %5144 = vmatpush.msra.mxu3 %v6070_v44  ;;  %5190 = vmatpush.msra.mxu2 %v6102_v17  ;;  %v6120_v44 = vld [vmem:[%s10146_s10 + $0xc70] sm:$0xff] }
 0xd43   :  { %5122 = vmatpush.msrb.mxu0 %v6053_v10  ;;  %5168 = vmatpush.msra.mxu1 %v6085_v8  ;;  %v6153_v10 = vld [vmem:[%s10146_s10 + $0xd78] sm:$0xff]  ;;  %v4333_v8 = vperm.slane %v9578_v56, 3 }
 0xd44   :  { %5145 = vmatpush.msra.mxu3 %v6069_v63  ;;  %5191 = vmatpush.msra.mxu2 %v6101_v31  ;;  %v6119_v31 = vld [vmem:[%s10146_s10 + $0xc68] sm:$0xff] }
 0xd45   :  { %5123 = vmatpush.msrb.mxu0 %v6052_v9  ;;  %5169 = vmatpush.msra.mxu1 %v6084_v1  ;;  %v6152_v9 = vld [vmem:[%s10146_s10 + $0xd70] sm:$0xff] }
 0xd46   :  { %5146 = vmatpush.msra.mxu3 %v6068_v15  ;;  %5192 = vmatpush.msra.mxu2 %v6100_v52  ;;  %v6118_v52 = vld [vmem:[%s10146_s10 + $0xc60] sm:$0xff] }
 0xd47   :  { %5124 = vmatpush.msrb.mxu0 %v6051_v0  ;;  %5170 = vmatpush.msra.mxu1 %v6083_v12  ;;  %v6151_v12 = vld [vmem:[%s10146_s10 + $0xd68] sm:$0xff] }
 0xd48   :  { %5147 = vmatpush.msra.mxu3 %v6067_v2  ;;  %5193 = vmatpush.msra.mxu2 %v6099_v46  ;;  %v6150_v2 = vld [vmem:[%s10146_s10 + $0xd60] sm:$0xff]  ;;  %v6169_v46 = vld [vmem:[%s10146_s10 + $0xdf8] sm:$0xff] }
 0xd49   :  { %5125 = vmatpush.msrb.mxu0 %v6050_v11  ;;  %5171 = vmatpush.msra.mxu1 %v6082_v20  ;;  %v6137_v20 = vld [vmem:[%s10146_s10 + $0xcf8] sm:$0xff] }
 0xd4a   :  { %5148 = vmatpush.msra.mxu3 %v6066_v55  ;;  %5194 = vmatpush.msra.mxu2 %v6098_v42  ;;  %v6149_v55 = vld [vmem:[%s10146_s10 + $0xd58] sm:$0xff]  ;;  %v6168_v42 = vld [vmem:[%s10146_s10 + $0xdf0] sm:$0xff] }
 0xd4b   :  { %5126 = vmatpush.msrb.mxu0 %v6049_v24  ;;  %5172 = vmatpush.msra.mxu1 %v6081_v19  ;;  %v6117_v24 = vld [vmem:[%s10146_s10 + $0xc58] sm:$0xff]  ;;  %v6136_v19 = vld [vmem:[%s10146_s10 + $0xcf0] sm:$0xff] }
 0xd4c   :  { %5149 = vmatpush.msra.mxu3 %v6065_v61  ;;  %5195 = vmatpush.msra.mxu2 %v6097_v54  ;;  %v6135_v61 = vld [vmem:[%s10146_s10 + $0xce8] sm:$0xff]  ;;  %v6148_v54 = vld [vmem:[%s10146_s10 + $0xd50] sm:$0xff] }
 0xd4d   :  { %5127 = vmatpush.msrb.mxu0 %v6048_v23  ;;  %5173 = vmatpush.msra.mxu1 %v6080_v3  ;;  %v6116_v23 = vld [vmem:[%s10146_s10 + $0xc50] sm:$0xff] }
 0xd4e   :  { %5150 = vmatpush.msra.mxu3 %v6064_v14  ;;  %5196 = vmatpush.msra.mxu2 %v6096_v33  ;;  %v6167_v14 = vld [vmem:[%s10146_s10 + $0xde8] sm:$0xff] }
 0xd4f   :  { %5128 = vmatpush.msrb.mxu0 %v6047_v28  ;;  %5174 = vmatpush.msra.mxu1 %v6079_v50  ;;  %v6115_v33 = vld [vmem:[%s10146_s10 + $0xc48] sm:$0xff] }
 0xd50   :  { %5151 = vmatpush.msra.mxu3 %v6063_v25  ;;  %5197 = vmatpush.msra.mxu2 %v6095_v6  ;;  %v6147_v25 = vld [vmem:[%s10146_s10 + $0xd48] sm:$0xff] }
 0xd51   :  { %5129 = vmatpush.msrb.mxu0 %v6046_v53  ;;  %5175 = vmatpush.msra.mxu1 %v6078_v34  ;;  %v6134_v34 = vld [vmem:[%s10146_s10 + $0xce0] sm:$0xff] }
 0xd52   :  { %5152 = vmatpush.msra.mxu3 %v6062_v40  ;;  %5198 = vmatpush.msra.mxu2 %v6094_v32  ;;  %v6114_v40 = vld [vmem:[%s10146_s10 + $0xc40] sm:$0xff]  ;;  %v6133_v32 = vld [vmem:[%s10146_s10 + $0xcd8] sm:$0xff] }
 0xd53   :  { %5130 = vmatpush.msrb.mxu0 %v6045_v21  ;;  %5176 = vmatpush.msra.mxu1 %v6077_v7  ;;  %v6166_v21 = vld [vmem:[%s10146_s10 + $0xde0] sm:$0xff] }
 0xd54   :  { %5153 = vmatpush.msra.mxu3 %v6061_v5  ;;  %5199 = vmatpush.msra.mxu2 %v6093_v43  ;;  %v6165_v5 = vld [vmem:[%s10146_s10 + $0xdd8] sm:$0xff] }
 0xd55   :  { %5131 = vmatpush.msrb.mxu0 %v6044_v35  ;;  %5177 = vmatpush.msra.mxu1 %v6076_v41  ;;  %v6146_v35 = vld [vmem:[%s10146_s10 + $0xd40] sm:$0xff]  ;;  %v4334_v41 = vperm.slane %v9578_v56, 4 }
 0xd56   :  { %5154 = vmatpush.msra.mxu3 %v6060_v22  ;;  %5200 = vmatpush.msra.mxu2 %v6092_v48 }
 0xd57   :  { %5132 = vmatpush.msrb.mxu0 %v6043_v18  ;;  %5178 = vmatpush.msra.mxu1 %v6075_v60  ;;  %v6113_v18 = vld [vmem:[%s10146_s10 + $0xc38] sm:$0xff]  ;;  %v4336_v60 = vperm.slane %v9578_v56, 6 }
 0xd58   :  { %5155 = vmatpush.msra.mxu3 %v6059_v38  ;;  %5201 = vmatpush.msra.mxu2 %v6091_v47  ;;  %v6164_v47 = vld [vmem:[%s10146_s10 + $0xdd0] sm:$0xff] }
 0xd59   :  { %5133 = vmatpush.msrb.mxu0 %v6042_v49  ;;  %5179 = vmatpush.msra.mxu1 %v6074_v36  ;;  %v6132_v49 = vld [vmem:[%s10146_s10 + $0xcd0] sm:$0xff]  ;;  %v6145_v36 = vld [vmem:[%s10146_s10 + $0xd38] sm:$0xff] }
 0xd5a   :  { %5156 = vmatpush.msra.mxu3 %v6058_v51  ;;  %5202 = vmatpush.msra.mxu2 %v6090_v39  ;;  %v6112_v39 = vld [vmem:[%s10146_s10 + $0xc30] sm:$0xff] }
 0xd66   :  { %v4385_v27 = vpop.f32.mrf.mxu0 }
 0xd67   :  { %v4386_v58 = vadd.f32 %v4385_v27, %v4330_v4  ;;  %v4431_v59 = vpop.f32.mrf.mxu1 }
 0xd68   :  { %v4432_v37 = vadd.f32 %v4431_v59, %v4332_v26  ;;  %v6144_v59 = vld [vmem:[%s10146_s10 + $0xd30] sm:$0xff] }
 0xd69   :  { %v4736_v57 = vmax.f32 %v4386_v58, 0.0  ;;  %v6131_v58 = vld [vmem:[%s10146_s10 + $0xcc8] sm:$0xff] }
 0xd6a   :  { %v4738_v30 = vmax.f32 %v4432_v37, 0.0 }
 0xd6b   :  { %5042 = vmatmul.f32.vlgmr.msra.gmra.mxu0 %v4736_v57 }
 0xd6c   :  { %5088 = vmatmul.f32.vlgmr.msrb.gmra.mxu1 %v4738_v30  ;;  %5210 = vmatpush.msra.mxu0 %v6121_v62  ;;  %v4408_v17 = vpop.f32.mrf.mxu3  ;;  %v6163_v62 = vld [vmem:[%s10146_s10 + $0xdc8] sm:$0xff]  ;;  %v4335_v30 = vperm.slane %v9578_v56, 5 }
 0xd6d   :  { %5256 = vmatpush.msrb.mxu1 %v6153_v10  ;;  %v4409_v1 = vadd.f32 %v4408_v17, %v4331_v13  ;;  %v4454_v63 = vpop.f32.mrf.mxu2  ;;  %v4337_v17 = vperm.slane %v9578_v56, 7  ;;  %v6184_v56 = vld [vmem:[%s10146_s10 + $0xe70] sm:$0xff] }
 0xd6e   :  { %v4455_v0 = vadd.f32 %v4454_v63, %v4333_v8  ;;  %5211 = vmatpush.msra.mxu0 %v6120_v44  ;;  %v6143_v44 = vld [vmem:[%s10146_s10 + $0xd28] sm:$0xff]  ;;  %v6110_v63 = vld [vmem:[%s10146_s10 + $0xc20] sm:$0xff] }
 0xd6f   :  { %v4737_v15 = vmax.f32 %v4409_v1, 0.0  ;;  %5257 = vmatpush.msrb.mxu1 %v6152_v9  ;;  %v6162_v1 = vld [vmem:[%s10146_s10 + $0xdc0] sm:$0xff] }
 0xd70   :  { %v4739_v11 = vmax.f32 %v4455_v0, 0.0  ;;  %5212 = vmatpush.msra.mxu0 %v6119_v31  ;;  %v6129_v0 = vld [vmem:[%s10146_s10 + $0xcb8] sm:$0xff] }
 0xd71   :  { %5258 = vmatpush.msrb.mxu1 %v6151_v12  ;;  %5065 = vmatmul.f32.vlgmr.msrb.gmra.mxu3 %v4737_v15  ;;  %v6142_v12 = vld [vmem:[%s10146_s10 + $0xd20] sm:$0xff] }
 0xd72   :  { %5111 = vmatmul.f32.vlgmr.msrb.gmra.mxu2 %v4739_v11  ;;  %5213 = vmatpush.msra.mxu0 %v6118_v52  ;;  %v6161_v11 = vld [vmem:[%s10146_s10 + $0xdb8] sm:$0xff] }
 0xd73   :  { %5233 = vmatpush.msrb.mxu3 %v6137_v20  ;;  %5259 = vmatpush.msrb.mxu1 %v6150_v2  ;;  %v6109_v2 = vld [vmem:[%s10146_s10 + $0xc18] sm:$0xff] }
 0xd74   :  { %5279 = vmatpush.msrb.mxu2 %v6169_v46  ;;  %5214 = vmatpush.msra.mxu0 %v6117_v24  ;;  %v4388_v3 = vpop.f32.mrf.mxu0  ;;  %v6128_v24 = vld [vmem:[%s10146_s10 + $0xcb0] sm:$0xff] }
 0xd75   :  { %5234 = vmatpush.msrb.mxu3 %v6136_v19  ;;  %5260 = vmatpush.msrb.mxu1 %v6149_v55  ;;  %v4389_v28 = vadd.f32 %v4388_v3, %v4330_v4  ;;  %v4434_v50 = vpop.f32.mrf.mxu1  ;;  %v6141_v19 = vld [vmem:[%s10146_s10 + $0xd18] sm:$0xff]  ;;  %v6108_v3 = vld [vmem:[%s10146_s10 + $0xc10] sm:$0xff] }
 0xd76   :  { %5280 = vmatpush.msrb.mxu2 %v6168_v42  ;;  %v4435_v53 = vadd.f32 %v4434_v50, %v4332_v26  ;;  %5215 = vmatpush.msra.mxu0 %v6116_v23  ;;  %v6160_v42 = vld [vmem:[%s10146_s10 + $0xdb0] sm:$0xff] }
 0xd77   :  { %v4752_v6 = vmax.f32 %v4389_v28, 0.0  ;;  %5235 = vmatpush.msrb.mxu3 %v6135_v61  ;;  %5261 = vmatpush.msrb.mxu1 %v6148_v54  ;;  %v6127_v28 = vld [vmem:[%s10146_s10 + $0xca8] sm:$0xff]  ;;  %v6140_v50 = vld [vmem:[%s10146_s10 + $0xd10] sm:$0xff] }
 0xd78   :  { %v4754_v7 = vmax.f32 %v4435_v53, 0.0  ;;  %5281 = vmatpush.msrb.mxu2 %v6167_v14  ;;  %5216 = vmatpush.msra.mxu0 %v6115_v33  ;;  %v6159_v33 = vld [vmem:[%s10146_s10 + $0xda8] sm:$0xff] }
 0xd79   :  { %5236 = vmatpush.msrb.mxu3 %v6134_v34  ;;  %5262 = vmatpush.msrb.mxu1 %v6147_v25  ;;  %v6107_v53 = vld [vmem:[%s10146_s10 + $0xc08] sm:$0xff]  ;;  %v6126_v25 = vld [vmem:[%s10146_s10 + $0xca0] sm:$0xff] }
 0xd7a   :  { %5282 = vmatpush.msrb.mxu2 %v6166_v21  ;;  %5045 = vmatmul.f32.gmra.mxu0 %v4752_v6  ;;  %v4411_v43 = vpop.f32.mrf.mxu3  ;;  %v6139_v6 = vld [vmem:[%s10146_s10 + $0xd08] sm:$0xff] }
 0xd7b   :  { %5091 = vmatmul.f32.gmra.mxu1 %v4754_v7  ;;  %5217 = vmatpush.msra.mxu0 %v6114_v40  ;;  %v4412_v22 = vadd.f32 %v4411_v43, %v4331_v13  ;;  %v4457_v48 = vpop.f32.mrf.mxu2  ;;  %v6111_v13 = vld [vmem:[%s10146_s10 + $0xc28] sm:$0xff]  ;;  %v6158_v7 = vld [vmem:[%s10146_s10 + $0xda0] sm:$0xff] }
 0xd7c   :  { %5237 = vmatpush.msrb.mxu3 %v6133_v32  ;;  %5263 = vmatpush.msrb.mxu1 %v6146_v35  ;;  %v4458_v38 = vadd.f32 %v4457_v48, %v4333_v8  ;;  %v4477_v51 = vpop.f32.mrf.mxu0  ;;  %v6130_v8 = vld [vmem:[%s10146_s10 + $0xcc0] sm:$0xff]  ;;  %v9773_v32 = vld [vmem:[%s10145_s9 + $0x18] sm:$0xff] }
 0xd7d   :  { %5283 = vmatpush.msrb.mxu2 %v6165_v5  ;;  %v4753_v4 = vmax.f32 %v4412_v22, 0.0  ;;  %5218 = vmatpush.msra.mxu0 %v6113_v18  ;;  %v4478_v26 = vadd.f32 %v4477_v51, %v4334_v41  ;;  %v4523_v27 = vpop.f32.mrf.mxu1  ;;  %v6106_v35 = vld [vmem:[%s10146_s10 + $0xc00] sm:$0xff]  ;;  %v6125_v5 = vld [vmem:[%s10146_s10 + $0xc98] sm:$0xff]  ;;  %v4338_v48 = vperm.slane %v9773_v32, 0  ;;  %v4340_v51 = vperm.slane %v9773_v32, 2 }
 0xd7e   :  { %v4755_v37 = vmax.f32 %v4458_v38, 0.0  ;;  %5238 = vmatpush.msrb.mxu3 %v6132_v49  ;;  %5264 = vmatpush.msrb.mxu1 %v6145_v36  ;;  %v4524_v57 = vadd.f32 %v4523_v27, %v4336_v60  ;;  %v6138_v43 = vld [vmem:[%s10146_s10 + $0xd00] sm:$0xff]  ;;  %v6157_v18 = vld [vmem:[%s10146_s10 + $0xd98] sm:$0xff]  ;;  %v6124_v38 = vld [vmem:[%s10146_s10 + $0xc90] sm:$0xff] }
 0xd7f   :  { %5284 = vmatpush.msrb.mxu2 %v6164_v47  ;;  %5219 = vmatpush.msra.mxu0 %v6112_v39  ;;  %v4740_v10 = vmax.f32 %v4478_v26, 0.0  ;;  %v6185_v22 = vld [vmem:[%s10146_s10 + $0xe78] sm:$0xff]  ;;  %v6156_v39 = vld [vmem:[%s10146_s10 + $0xd90] sm:$0xff]  ;;  %v6123_v27 = vld [vmem:[%s10146_s10 + $0xc88] sm:$0xff] }
 0xd80   :  { %5239 = vmatpush.msrb.mxu3 %v6131_v58  ;;  %5265 = vmatpush.msrb.mxu1 %v6144_v59  ;;  %v4742_v9 = vmax.f32 %v4524_v57, 0.0  ;;  %v6217_v36 = vld [vmem:[%s10146_s10 + $0xf78] sm:$0xff]  ;;  %v6216_v26 = vld [vmem:[%s10146_s10 + $0xf70] sm:$0xff]  ;;  %v6183_v57 = vld [vmem:[%s10146_s10 + $0xe68] sm:$0xff] }
 0xd81   :  { %5285 = vmatpush.msrb.mxu2 %v6163_v62  ;;  %5068 = vmatmul.f32.gmra.mxu3 %v4753_v4 }
 0xd82   :  { %5114 = vmatmul.f32.gmra.mxu2 %v4755_v37  ;;  %5220 = vmatpush.msra.mxu0 %v6111_v13  ;;  %v4500_v31 = vpop.f32.mrf.mxu3  ;;  %v6155_v37 = vld [vmem:[%s10146_s10 + $0xd88] sm:$0xff] }
 0xd83   :  { %5240 = vmatpush.msrb.mxu3 %v6130_v8  ;;  %5266 = vmatpush.msrb.mxu1 %v6143_v44  ;;  %v4501_v15 = vadd.f32 %v4500_v31, %v4335_v30  ;;  %v4546_v52 = vpop.f32.mrf.mxu2  ;;  %v6154_v8 = vld [vmem:[%s10146_s10 + $0xd80] sm:$0xff] }
 0xd84   :  { %5286 = vmatpush.msrb.mxu2 %v6162_v1  ;;  %5134 = vmatmul.f32.vlgmr.msrb.gmra.mxu0 %v4740_v10  ;;  %v4547_v20 = vadd.f32 %v4546_v52, %v4337_v17  ;;  %v4480_v46 = vpop.f32.mrf.mxu0  ;;  %v6122_v10 = vld [vmem:[%s10146_s10 + $0xc80] sm:$0xff]  ;;  %v6201_v1 = vld [vmem:[%s10146_s10 + $0xef8] sm:$0xff] }
 0xd85   :  { %5180 = vmatmul.f32.vlgmr.msra.gmra.mxu1 %v4742_v9  ;;  %5221 = vmatpush.msra.mxu0 %v6110_v63  ;;  %v4526_v55 = vpop.f32.mrf.mxu1  ;;  %v4481_v23 = vadd.f32 %v4480_v46, %v4334_v41  ;;  %v4741_v61 = vmax.f32 %v4501_v15, 0.0  ;;  %v6182_v44 = vld [vmem:[%s10146_s10 + $0xe60] sm:$0xff]  ;;  %v6233_v15 = vld [vmem:[%s10146_s10 + $0xff8] sm:$0xff] }
 0xd86   :  { %5241 = vmatpush.msrb.mxu3 %v6129_v0  ;;  %5267 = vmatpush.msrb.mxu1 %v6142_v12  ;;  %v4527_v54 = vadd.f32 %v4526_v55, %v4336_v60  ;;  %v4743_v14 = vmax.f32 %v4547_v20, 0.0  ;;  %v6214_v63 = vld [vmem:[%s10146_s10 + $0xf60] sm:$0xff]  ;;  %v4341_v0 = vperm.slane %v9773_v32, 3  ;;  %v6213_v46 = vld [vmem:[%s10146_s10 + $0xf58] sm:$0xff]  ;;  %v6232_v55 = vld [vmem:[%s10146_s10 + $0xff0] sm:$0xff] }
 0xd87   :  { %5287 = vmatpush.msrb.mxu2 %v6161_v11  ;;  %5222 = vmatpush.msra.mxu0 %v6109_v2  ;;  %v4756_v34 = vmax.f32 %v4481_v23, 0.0  ;;  %v6181_v11 = vld [vmem:[%s10146_s10 + $0xe58] sm:$0xff]  ;;  %v6200_v2 = vld [vmem:[%s10146_s10 + $0xef0] sm:$0xff] }
 0xd88   :  { %5242 = vmatpush.msrb.mxu3 %v6128_v24  ;;  %5268 = vmatpush.msrb.mxu1 %v6141_v19  ;;  %v4758_v21 = vmax.f32 %v4527_v54, 0.0  ;;  %v6180_v23 = vld [vmem:[%s10146_s10 + $0xe50] sm:$0xff] }
 0xd89   :  { %5288 = vmatpush.msrb.mxu2 %v6160_v42  ;;  %5223 = vmatpush.msra.mxu0 %v6108_v3  ;;  %v6199_v3 = vld [vmem:[%s10146_s10 + $0xee8] sm:$0xff] }
 0xd8a   :  { %5243 = vmatpush.msrb.mxu3 %v6127_v28  ;;  %5269 = vmatpush.msrb.mxu1 %v6140_v50  ;;  %v4503_v40 = vpop.f32.mrf.mxu3  ;;  %v6231_v28 = vld [vmem:[%s10146_s10 + $0xfe8] sm:$0xff] }
 0xd8b   :  { %5289 = vmatpush.msrb.mxu2 %v6159_v33  ;;  %5157 = vmatmul.f32.vlgmr.msra.gmra.mxu3 %v4741_v61  ;;  %v4549_v41 = vpop.f32.mrf.mxu2  ;;  %v4504_v60 = vadd.f32 %v4503_v40, %v4335_v30  ;;  %v6215_v30 = vld [vmem:[%s10146_s10 + $0xf68] sm:$0xff]  ;;  %v6212_v61 = vld [vmem:[%s10146_s10 + $0xf50] sm:$0xff]  ;;  %v6197_v40 = vld [vmem:[%s10146_s10 + $0xed8] sm:$0xff] }
 0xd8c   :  { %5203 = vmatmul.f32.vlgmr.msra.gmra.mxu2 %v4743_v14  ;;  %5224 = vmatpush.msra.mxu0 %v6107_v53  ;;  %v4550_v49 = vadd.f32 %v4549_v41, %v4337_v17  ;;  %v4569_v47 = vpop.f32.mrf.mxu0  ;;  %v4339_v17 = vperm.slane %v9773_v32, 1  ;;  %v6179_v50 = vld [vmem:[%s10146_s10 + $0xe48] sm:$0xff]  ;;  %v6198_v53 = vld [vmem:[%s10146_s10 + $0xee0] sm:$0xff] }
 0xd8d   :  { %5244 = vmatpush.msrb.mxu3 %v6126_v25  ;;  %5270 = vmatpush.msrb.mxu1 %v6139_v6  ;;  %v4615_v4 = vpop.f32.mrf.mxu1  ;;  %v4757_v58 = vmax.f32 %v4504_v60, 0.0  ;;  %v4570_v59 = vadd.f32 %v4569_v47, %v4338_v48  ;;  %v6230_v6 = vld [vmem:[%s10146_s10 + $0xfe0] sm:$0xff]  ;;  %v6177_v60 = vld [vmem:[%s10146_s10 + $0xe38] sm:$0xff]  ;;  %v6176_v47 = vld [vmem:[%s10146_s10 + $0xe30] sm:$0xff] }
 0xd8e   :  { %5290 = vmatpush.msrb.mxu2 %v6158_v7  ;;  %5137 = vmatmul.f32.gmra.mxu0 %v4756_v34  ;;  %v4759_v62 = vmax.f32 %v4550_v49, 0.0  ;;  %v4616_v13 = vadd.f32 %v4615_v4, %v4340_v51  ;;  %v6211_v34 = vld [vmem:[%s10146_s10 + $0xf48] sm:$0xff]  ;;  %v6209_v49 = vld [vmem:[%s10146_s10 + $0xf38] sm:$0xff] }
 0xd8f   :  { %5183 = vmatmul.f32.gmra.mxu1 %v4758_v21  ;;  %5225 = vmatpush.msra.mxu0 %v6106_v35  ;;  %v4744_v9 = vmax.f32 %v4570_v59, 0.0  ;;  %v6178_v21 = vld [vmem:[%s10146_s10 + $0xe40] sm:$0xff]  ;;  %v6227_v4 = vld [vmem:[%s10146_s10 + $0xfc8] sm:$0xff] }
 0xd90   :  { %5245 = vmatpush.msrb.mxu3 %v6125_v5  ;;  %5271 = vmatpush.msrb.mxu1 %v6138_v43  ;;  %v4746_v12 = vmax.f32 %v4616_v13, 0.0  ;;  %v6210_v35 = vld [vmem:[%s10146_s10 + $0xf40] sm:$0xff]  ;;  %v6229_v43 = vld [vmem:[%s10146_s10 + $0xfd8] sm:$0xff] }
 0xd91   :  { %5291 = vmatpush.msrb.mxu2 %v6157_v18  ;;  %5302 = vmatpush.msrb.mxu0 %v6185_v22  ;;  %v6206_v13 = vld [vmem:[%s10146_s10 + $0xf20] sm:$0xff] }
 0xd92   :  { %5348 = vmatpush.msra.mxu1 %v6217_v36  ;;  %5246 = vmatpush.msrb.mxu3 %v6124_v38  ;;  %v4592_v31 = vpop.f32.mrf.mxu3  ;;  %v6228_v38 = vld [vmem:[%s10146_s10 + $0xfd0] sm:$0xff] }
 0xd93   :  { %5292 = vmatpush.msrb.mxu2 %v6156_v39  ;;  %5303 = vmatpush.msrb.mxu0 %v6184_v56  ;;  %v4638_v52 = vpop.f32.mrf.mxu2  ;;  %v4593_v20 = vadd.f32 %v4592_v31, %v4339_v17  ;;  %v6208_v39 = vld [vmem:[%s10146_s10 + $0xf30] sm:$0xff]  ;;  %v6175_v56 = vld [vmem:[%s10146_s10 + $0xe28] sm:$0xff] }
 0xd94   :  { %5349 = vmatpush.msra.mxu1 %v6216_v26  ;;  %5247 = vmatpush.msrb.mxu3 %v6123_v27  ;;  %v4572_v24 = vpop.f32.mrf.mxu0  ;;  %v4639_v19 = vadd.f32 %v4638_v52, %v4341_v0  ;;  %v6194_v27 = vld [vmem:[%s10146_s10 + $0xec0] sm:$0xff]  ;;  %v6224_v31 = vld [vmem:[%s10146_s10 + $0xfb0] sm:$0xff]  ;;  %v6223_v52 = vld [vmem:[%s10146_s10 + $0xfa8] sm:$0xff] }
 0xd95   :  { %5293 = vmatpush.msrb.mxu2 %v6155_v37  ;;  %5304 = vmatpush.msrb.mxu0 %v6183_v57  ;;  %v4618_v42 = vpop.f32.mrf.mxu1  ;;  %v4573_v54 = vadd.f32 %v4572_v24, %v4338_v48  ;;  %v4745_v14 = vmax.f32 %v4593_v20, 0.0  ;;  %v6196_v48 = vld [vmem:[%s10146_s10 + $0xed0] sm:$0xff]  ;;  %v6226_v37 = vld [vmem:[%s10146_s10 + $0xfc0] sm:$0xff] }
 0xd96   :  { %5350 = vmatpush.msra.mxu1 %v6215_v30  ;;  %5160 = vmatmul.f32.gmra.mxu3 %v4757_v58  ;;  %v4619_v33 = vadd.f32 %v4618_v42, %v4340_v51  ;;  %v4747_v25 = vmax.f32 %v4639_v19, 0.0  ;;  %v6195_v51 = vld [vmem:[%s10146_s10 + $0xec8] sm:$0xff]  ;;  %v6174_v57 = vld [vmem:[%s10146_s10 + $0xe20] sm:$0xff] }
 0xd97   :  { %5206 = vmatmul.f32.gmra.mxu2 %v4759_v62  ;;  %5248 = vmatpush.msrb.mxu3 %v6122_v10  ;;  %v4760_v7 = vmax.f32 %v4573_v54, 0.0  ;;  %v6207_v58 = vld [vmem:[%s10146_s10 + $0xf28] sm:$0xff]  ;;  %v6193_v62 = vld [vmem:[%s10146_s10 + $0xeb8] sm:$0xff]  ;;  %v6170_v42 = vld [vmem:[%s10146_s10 + $0xe00] sm:$0xff] }
 0xd98   :  { %5294 = vmatpush.msrb.mxu2 %v6154_v8  ;;  %5305 = vmatpush.msrb.mxu0 %v6182_v44  ;;  %v4762_v5 = vmax.f32 %v4619_v33, 0.0  ;;  %v6225_v10 = vld [vmem:[%s10146_s10 + $0xfb8] sm:$0xff]  ;;  %v4342_v44 = vperm.slane %v9773_v32, 4  ;;  %v6202_v54 = vld [vmem:[%s10146_s10 + $0xf00] sm:$0xff]  ;;  %v6188_v33 = vld [vmem:[%s10146_s10 + $0xe90] sm:$0xff] }
 0xd99   :  { %5325 = vmatpush.msra.mxu3 %v6201_v1  ;;  %5351 = vmatpush.msra.mxu1 %v6214_v63  ;;  %v6173_v8 = vld [vmem:[%s10146_s10 + $0xe18] sm:$0xff]  ;;  %v4344_v63 = vperm.slane %v9773_v32, 6 }
 0xd9a   :  { %5371 = vmatpush.msra.mxu2 %v6233_v15  ;;  %5226 = vmatmul.f32.vlgmr.msra.gmra.mxu0 %v4744_v9  ;;  %v4595_v41 = vpop.f32.mrf.mxu3  ;;  %v6192_v9 = vld [vmem:[%s10146_s10 + $0xeb0] sm:$0xff]  ;;  %v6205_v1 = vld [vmem:[%s10146_s10 + $0xf18] sm:$0xff] }
 0xd9b   :  { %5272 = vmatmul.f32.vlgmr.msrb.gmra.mxu1 %v4746_v12  ;;  %5306 = vmatpush.msrb.mxu0 %v6181_v11  ;;  %v4641_v18 = vpop.f32.mrf.mxu2  ;;  %v4596_v22 = vadd.f32 %v4595_v41, %v4339_v17  ;;  %v6191_v12 = vld [vmem:[%s10146_s10 + $0xea8] sm:$0xff]  ;;  %v6204_v15 = vld [vmem:[%s10146_s10 + $0xf10] sm:$0xff]  ;;  %v6186_v41 = vld [vmem:[%s10146_s10 + $0xe80] sm:$0xff] }
 0xd9c   :  { %5326 = vmatpush.msra.mxu3 %v6200_v2  ;;  %5352 = vmatpush.msra.mxu1 %v6213_v46  ;;  %v4642_v36 = vadd.f32 %v4641_v18, %v4341_v0  ;;  %v4661_v30 = vpop.f32.mrf.mxu0  ;;  %v6172_v0 = vld [vmem:[%s10146_s10 + $0xe10] sm:$0xff]  ;;  %v6171_v11 = vld [vmem:[%s10146_s10 + $0xe08] sm:$0xff]  ;;  %v6190_v2 = vld [vmem:[%s10146_s10 + $0xea0] sm:$0xff] }
 0xd9d   :  { %5372 = vmatpush.msra.mxu2 %v6232_v55  ;;  %5307 = vmatpush.msrb.mxu0 %v6180_v23  ;;  %v4761_v26 = vmax.f32 %v4596_v22, 0.0  ;;  %v4707_v17 = vpop.f32.mrf.mxu1  ;;  %v4662_v20 = vadd.f32 %v4661_v30, %v4342_v44  ;;  %v6203_v46 = vld [vmem:[%s10146_s10 + $0xf08] sm:$0xff]  ;;  %v6222_v55 = vld [vmem:[%s10146_s10 + $0xfa0] sm:$0xff]  ;;  %v4343_v23 = vperm.slane %v9773_v32, 5 }
 0xd9e   :  { %5327 = vmatpush.msra.mxu3 %v6199_v3  ;;  %5353 = vmatpush.msra.mxu1 %v6212_v61  ;;  %v4763_v59 = vmax.f32 %v4642_v36, 0.0  ;;  %v4708_v24 = vadd.f32 %v4707_v17, %v4344_v63  ;;  %v6189_v61 = vld [vmem:[%s10146_s10 + $0xe98] sm:$0xff] }
 0xd9f   :  { %5373 = vmatpush.msra.mxu2 %v6231_v28  ;;  %5308 = vmatpush.msrb.mxu0 %v6179_v50  ;;  %v4345_v28 = vperm.slane %v9773_v32, 7  ;;  %v6221_v50 = vld [vmem:[%s10146_s10 + $0xf98] sm:$0xff]  ;;  %v6220_v32 = vld [vmem:[%s10146_s10 + $0xf90] sm:$0xff] }
 0xda0   :  { %5328 = vmatpush.msra.mxu3 %v6198_v53  ;;  %5354 = vmatpush.msra.mxu1 %v6211_v34  ;;  %v4750_v53 = vmax.f32 %v4708_v24, 0.0 }
 0xda1   :  { %5374 = vmatpush.msra.mxu2 %v6230_v6  ;;  %5249 = vmatmul.f32.vlgmr.msrb.gmra.mxu3 %v4745_v14  ;;  %v4748_v14 = vmax.f32 %v4662_v20, 0.0 }
 0xda2   :  { %5295 = vmatmul.f32.vlgmr.msrb.gmra.mxu2 %v4747_v25  ;;  %5309 = vmatpush.msrb.mxu0 %v6178_v21  ;;  %v4684_v19 = vpop.f32.mrf.mxu3  ;;  %v6187_v21 = vld [vmem:[%s10146_s10 + $0xe88] sm:$0xff] }
 0xda3   :  { %5329 = vmatpush.msra.mxu3 %v6197_v40  ;;  %5355 = vmatpush.msra.mxu1 %v6210_v35  ;;  %v4730_v3 = vpop.f32.mrf.mxu2  ;;  %v4685_v25 = vadd.f32 %v4684_v19, %v4343_v23  ;;  %v6219_v40 = vld [vmem:[%s10146_s10 + $0xf88] sm:$0xff] }
 0xda4   :  { %5375 = vmatpush.msra.mxu2 %v6229_v43  ;;  %5229 = vmatmul.f32.gmra.mxu0 %v4760_v7  ;;  %v4664_v34 = vpop.f32.mrf.mxu0  ;;  %v4731_v7 = vadd.f32 %v4730_v3, %v4345_v28  ;;  %v6218_v43 = vld [vmem:[%s10146_s10 + $0xf80] sm:$0xff] }
 0xda5   :  { %5275 = vmatmul.f32.gmra.mxu1 %v4762_v5  ;;  %5310 = vmatpush.msrb.mxu0 %v6177_v60  ;;  %v4710_v6 = vpop.f32.mrf.mxu1  ;;  %v4665_v35 = vadd.f32 %v4664_v34, %v4342_v44  ;;  %v4749_v18 = vmax.f32 %v4685_v25, 0.0 }
 0xda6   :  { %5330 = vmatpush.msra.mxu3 %v6196_v48  ;;  %5356 = vmatpush.msra.mxu1 %v6209_v49  ;;  %v4711_v5 = vadd.f32 %v4710_v6, %v4344_v63  ;;  %v4751_v60 = vmax.f32 %v4731_v7, 0.0 }
 0xda7   :  { %5376 = vmatpush.msra.mxu2 %v6228_v38  ;;  %5311 = vmatpush.msrb.mxu0 %v6176_v47  ;;  %v4764_v48 = vmax.f32 %v4665_v35, 0.0 }
 0xda8   :  { %5331 = vmatpush.msra.mxu3 %v6195_v51  ;;  %5357 = vmatpush.msra.mxu1 %v6208_v39  ;;  %v4766_v36 = vmax.f32 %v4711_v5, 0.0 }
 0xda9   :  { %5377 = vmatpush.msra.mxu2 %v6227_v4  ;;  %5312 = vmatpush.msrb.mxu0 %v6175_v56 }
 0xdaa   :  { %5332 = vmatpush.msra.mxu3 %v6194_v27  ;;  %5358 = vmatpush.msra.mxu1 %v6207_v58  ;;  %v4687_v22 = vpop.f32.mrf.mxu3 }
 0xdab   :  { %5378 = vmatpush.msra.mxu2 %v6226_v37  ;;  %5252 = vmatmul.f32.gmra.mxu3 %v4761_v26  ;;  %v4733_v49 = vpop.f32.mrf.mxu2  ;;  %v4688_v38 = vadd.f32 %v4687_v22, %v4343_v23 }
 0xdac   :  { %5298 = vmatmul.f32.gmra.mxu2 %v4763_v59  ;;  %5313 = vmatpush.msrb.mxu0 %v6174_v57  ;;  %v4734_v47 = vadd.f32 %v4733_v49, %v4345_v28 }
 0xdad   :  { %5333 = vmatpush.msra.mxu3 %v6193_v62  ;;  %5359 = vmatpush.msra.mxu1 %v6206_v13  ;;  %v4765_v51 = vmax.f32 %v4688_v38, 0.0  ;;  %v10028_v13 = vld [vmem:[%s10143_s7 + $0x8] sm:$0xff] }
 0xdae   :  { %5379 = vmatpush.msra.mxu2 %v6225_v10  ;;  %5314 = vmatpush.msrb.mxu0 %v6173_v8  ;;  %v4767_v39 = vmax.f32 %v4734_v47, 0.0  ;;  %v5025_v30 = vperm.slane %v10028_v13, 1 }
 0xdaf   :  { %5334 = vmatpush.msra.mxu3 %v6192_v9  ;;  %5360 = vmatpush.msra.mxu1 %v6205_v1 }
 0xdb0   :  { %5380 = vmatpush.msra.mxu2 %v6224_v31  ;;  %5315 = vmatpush.msrb.mxu0 %v6172_v0 }
 0xdb1   :  { %5335 = vmatpush.msra.mxu3 %v6191_v12  ;;  %5361 = vmatpush.msra.mxu1 %v6204_v15 }
 0xdb2   :  { %5381 = vmatpush.msra.mxu2 %v6223_v52  ;;  %5316 = vmatpush.msrb.mxu0 %v6171_v11 }
 0xdb3   :  { %5336 = vmatpush.msra.mxu3 %v6190_v2  ;;  %5362 = vmatpush.msra.mxu1 %v6203_v46 }
 0xdb4   :  { %5382 = vmatpush.msra.mxu2 %v6222_v55  ;;  %5317 = vmatpush.msrb.mxu0 %v6170_v42 }
 0xdb5   :  { %5337 = vmatpush.msra.mxu3 %v6189_v61  ;;  %5363 = vmatpush.msra.mxu1 %v6202_v54 }
 0xdb6   :  { %5383 = vmatpush.msra.mxu2 %v6221_v50  ;;  %5318 = vmatmul.f32.vlgmr.msrb.gmra.mxu0 %v4748_v14 }
 0xdb7   :  { %5364 = vmatmul.f32.vlgmr.msra.gmra.mxu1 %v4750_v53  ;;  %5338 = vmatpush.msra.mxu3 %v6188_v33 }
 0xdb8   :  { %5384 = vmatpush.msra.mxu2 %v6220_v32 }
 0xdb9   :  { %5339 = vmatpush.msra.mxu3 %v6187_v21 }
 0xdba   :  { %5385 = vmatpush.msra.mxu2 %v6219_v40 }
 0xdbb   :  { %5340 = vmatpush.msra.mxu3 %v6186_v41 }
 0xdbc   :  { %5386 = vmatpush.msra.mxu2 %v6218_v43  ;;  %5341 = vmatmul.f32.vlgmr.msra.gmra.mxu3 %v4749_v18 }
 0xdbd   :  { %5387 = vmatmul.f32.vlgmr.msra.gmra.mxu2 %v4751_v60 }
 0xdbe   :  { %5321 = vmatmul.f32.gmra.mxu0 %v4764_v48 }
 0xdbf   :  { %5367 = vmatmul.f32.gmra.mxu1 %v4766_v36 }
 0xdc4   :  { %5344 = vmatmul.f32.gmra.mxu3 %v4765_v51 }
 0xdc5   :  { %5390 = vmatmul.f32.gmra.mxu2 %v4767_v39 }
 0xde8   :  { %v5043_v4 = vpop.f32.mrf.mxu0 }
 0xde9   :  { %v5089_v56 = vpop.f32.mrf.mxu1  ;;  %v5044_v10 = vadd.f32 %v5043_v4, %v5025_v30 }
 0xdf4   :  { %v5066_v26 = vpop.f32.mrf.mxu3 }
 0xdf5   :  { %v5112_v27 = vpop.f32.mrf.mxu2  ;;  %v5067_v17 = vadd.f32 %v5066_v26, %v5044_v10 }
 0xdf7   :  { %v5046_v58 = vpop.f32.mrf.mxu0  ;;  %v5090_v63 = vadd.f32 %v5089_v56, %v5067_v17 }
 0xdf8   :  { %v5092_v59 = vpop.f32.mrf.mxu1  ;;  %v5047_v31 = vadd.f32 %v5046_v58, %v5025_v30 }
 0xdf9   :  { %v5113_v12 = vadd.f32 %v5112_v27, %v5090_v63 }
 0xe01   :  { %v5135_v62 = vpop.f32.mrf.mxu0 }
 0xe02   :  { %v5181_v8 = vpop.f32.mrf.mxu1  ;;  %v5136_v11 = vadd.f32 %v5135_v62, %v5113_v12 }
 0xe04   :  { %v5069_v37 = vpop.f32.mrf.mxu3 }
 0xe05   :  { %v5115_v57 = vpop.f32.mrf.mxu2  ;;  %v5070_v0 = vadd.f32 %v5069_v37, %v5047_v31 }
 0xe07   :  { %v5093_v20 = vadd.f32 %v5092_v59, %v5070_v0 }
 0xe09   :  { %v5116_v19 = vadd.f32 %v5115_v57, %v5093_v20 }
 0xe0b   :  { %v5138_v1 = vpop.f32.mrf.mxu0 }
 0xe0c   :  { %v5184_v15 = vpop.f32.mrf.mxu1  ;;  %v5139_v42 = vadd.f32 %v5138_v1, %v5116_v19 }
 0xe0e   :  { %v5158_v44 = vpop.f32.mrf.mxu3 }
 0xe0f   :  { %v5204_v9 = vpop.f32.mrf.mxu2  ;;  %v5159_v46 = vadd.f32 %v5158_v44, %v5136_v11 }
 0xe11   :  { %v5182_v55 = vadd.f32 %v5181_v8, %v5159_v46 }
 0xe13   :  { %v5205_v61 = vadd.f32 %v5204_v9, %v5182_v55  ;;  %v5479_v55 = vld [vmem:[%s10147_s11 + $0x30] sm:$0xff] }
 0xe17   :  { %v5227_v24 = vpop.f32.mrf.mxu0 }
 0xe18   :  { %v5273_v23 = vpop.f32.mrf.mxu1  ;;  %v5228_v14 = vadd.f32 %v5227_v24, %v5205_v61 }
 0xe19   :  { %v5161_v52 = vpop.f32.mrf.mxu3 }
 0xe1a   :  { %v5207_v2 = vpop.f32.mrf.mxu2  ;;  %v5162_v54 = vadd.f32 %v5161_v52, %v5139_v42  ;;  %v5478_v42 = vld [vmem:[%s10147_s11 + $0x28] sm:$0xff] }
 0xe1c   :  { %v5185_v33 = vadd.f32 %v5184_v15, %v5162_v54  ;;  %v5482_v54 = vld [vmem:[%s10148_s12] sm:$0xff] }
 0xe1e   :  { %v5208_v34 = vadd.f32 %v5207_v2, %v5185_v33  ;;  %v5480_v2 = vld [vmem:[%s10147_s11 + $0x38] sm:$0xff] }
 0xe1f   :  { %5521 = vmatpush.msrb.mxu3 %v5480_v2 }
 0xe21   :  { %v5230_v50 = vpop.f32.mrf.mxu0  ;;  %5522 = vmatpush.msrb.mxu3 %v5479_v55  ;;  %v5542_v55 = vld [vmem:[%s10150_s14 + $0x18] sm:$0xff] }
 0xe22   :  { %v5276_v32 = vpop.f32.mrf.mxu1  ;;  %v5231_v40 = vadd.f32 %v5230_v50, %v5208_v34 }
 0xe23   :  { %5523 = vmatpush.msrb.mxu3 %v5478_v42  ;;  %v5541_v42 = vld [vmem:[%s10150_s14 + $0x10] sm:$0xff] }
 0xe24   :  { %v5250_v3 = vpop.f32.mrf.mxu3 }
 0xe25   :  { %v5296_v28 = vpop.f32.mrf.mxu2  ;;  %v5251_v53 = vadd.f32 %v5250_v3, %v5228_v14  ;;  %v5476_v14 = vld [vmem:[%s10147_s11 + $0x18] sm:$0xff] }
 0xe27   :  { %v5274_v6 = vadd.f32 %v5273_v23, %v5251_v53  ;;  %v5483_v23 = vld [vmem:[%s10148_s12 + $0x8] sm:$0xff]  ;;  %v5444_v53 = vperm.slane %v10028_v13, 4 }
 0xe28   :  { %5501 = vmatpush.msra.mxu0 %v5483_v23  ;;  %v5540_v23 = vld [vmem:[%s10150_s14 + $0x8] sm:$0xff] }
 0xe29   :  { %v5297_v35 = vadd.f32 %v5296_v28, %v5274_v6 }
 0xe2a   :  { %5502 = vmatpush.msra.mxu0 %v5482_v54 }
 0xe2e   :  { %v5253_v25 = vpop.f32.mrf.mxu3 }
 0xe2f   :  { %v5299_v21 = vpop.f32.mrf.mxu2  ;;  %v5254_v41 = vadd.f32 %v5253_v25, %v5231_v40  ;;  %v5447_v25 = vperm.slane %v10028_v13, 5  ;;  %v5473_v40 = vld [vmem:[%s10147_s11] sm:$0xff] }
 0xe30   :  { %v5481_v13 = vld [vmem:[%s10137_s1] sm:$0x3] }
 0xe31   :  { %v5277_v60 = vadd.f32 %v5276_v32, %v5254_v41  ;;  %v5475_v32 = vld [vmem:[%s10147_s11 + $0x10] sm:$0xff]  ;;  %6234 = vmatmul.msk.f32.vlgmr.msra.gmra.mxu0 %vm62_vm0, %v5481_v13 }
 0xe33   :  { %v5319_v7 = vpop.f32.mrf.mxu0  ;;  %v5300_v38 = vadd.f32 %v5299_v21, %v5277_v60  ;;  %v5474_v21 = vld [vmem:[%s10147_s11 + $0x8] sm:$0xff]  ;;  %v6505_v60 = vmov 8.0  }
 0xe34   :  { %v5320_v5 = vadd.f32 %v5319_v7, %v5297_v35  ;;  %v5365_v43 = vpop.f32.mrf.mxu1 }
 0xe3b   :  { %v5322_v36 = vpop.f32.mrf.mxu0 }
 0xe3c   :  { %v5323_v51 = vadd.f32 %v5322_v36, %v5300_v38  ;;  %v5368_v58 = vpop.f32.mrf.mxu1  ;;  %v5547_v38 = vld [vmem:[%s10150_s14 + $0x40] sm:$0xff] }
 0xe3f   :  { %v5342_v18 = vpop.f32.mrf.mxu3 }
 0xe40   :  { %v5343_v22 = vadd.f32 %v5342_v18, %v5320_v5  ;;  %v5388_v48 = vpop.f32.mrf.mxu2 }
 0xe42   :  { %v5366_v49 = vadd.f32 %v5365_v43, %v5343_v22  ;;  %v5550_v43 = vld [vmem:[%s10150_s14 + $0x58] sm:$0xff]  ;;  %v5549_v22 = vld [vmem:[%s10150_s14 + $0x50] sm:$0xff] }
 0xe43   :  { %5563 = vmatpush.msrb.mxu1 %v5550_v43 }
 0xe44   :  { %v5389_v47 = vadd.f32 %v5388_v48, %v5366_v49  ;;  %v5548_v49 = vld [vmem:[%s10150_s14 + $0x48] sm:$0xff] }
 0xe45   :  { %5564 = vmatpush.msrb.mxu1 %v5549_v22 }
 0xe46   :  { %v5394_v39 = vadd.f32 %v5389_v47, %v8926_v16 }
 0xe47   :  { %v5345_v4 = vpop.f32.mrf.mxu3  ;;  %5565 = vmatpush.msrb.mxu1 %v5548_v49 }
 0xe48   :  { %v5346_v56 = vadd.f32 %v5345_v4, %v5323_v51  ;;  %v5396_v26 = vsel %vm123_vm1, %v5394_v39, 0.0  ;;  %v5404_v27 = vmul.f32 %v5394_v39, %v5394_v39  ;;  %v5391_v57 = vpop.f32.mrf.mxu2 }
 0xe49   :  { %5397 = vadd.xlane.f32.xlu1 %v5396_v26  ;;  %5566 = vmatpush.msrb.mxu1 %v5547_v38 }
 0xe4a   :  { %v5369_v59 = vadd.f32 %v5368_v58, %v5346_v56  ;;  %v5406_v37 = vsel %vm123_vm1, %v5404_v27, 0.0  ;;  %v5545_v27 = vld [vmem:[%s10150_s14 + $0x30] sm:$0xff] }
 0xe4b   :  { %5407 = vadd.xlane.f32.xlu2 %v5406_v37 }
 0xe4c   :  { %v5392_v62 = vadd.f32 %v5391_v57, %v5369_v59 }
 0xe4e   :  { %v10035_v30 = vadd.f32 %v5392_v62, %v9013_v29  ;;  %v5544_v62 = vld [vmem:[%s10150_s14 + $0x28] sm:$0xff] }
 0xe50   :  { %v5399_v10 = vsel %vm123_vm1, %v10035_v30, 0.0  ;;  %v5405_v16 = vmul.f32 %v10035_v30, %v10035_v30 }
 0xe52   :  { %v5409_v8 = vsel %vm123_vm1, %v5405_v16, 0.0 }
 0xe53   :  { %5400 = vadd.xlane.f32.xlu2 %v5399_v10 }
 0xe5b   :  { %5410 = vadd.xlane.f32.xlu2 %v5409_v8 }
 0xebc   :  { %v5398_v44 = vpop.xlane.xlu1 %5397 }
 0xebd   :  { %v5402_v17 = vmul.f32 %v5398_v44, %v7066_v45 }
 0xebe   :  { %v5408_v9 = vpop.xlane.xlu2 %5407 }
 0xebf   :  { %v5414_v1 = vmul.f32 %v5402_v17, %v5402_v17  ;;  %v5412_v63 = vmul.f32 %v5408_v9, %v7066_v45  ;;  %v5418_v33 = vsub.f32 %v5394_v39, %v5402_v17  ;;  %v5546_v39 = vld [vmem:[%s10150_s14 + $0x38] sm:$0xff] }
 0xec0   :  { %5567 = vmatpush.msrb.mxu1 %v5546_v39 }
 0xec1   :  { %v5416_v31 = vsub.f32 %v5412_v63, %v5414_v1 }
 0xec2   :  { %5568 = vmatpush.msrb.mxu1 %v5545_v27 }
 0xec3   :  { %v5420_v29 = vadd.f32 1e-05, %v5416_v31 }
 0xec4   :  { %5569 = vmatpush.msrb.mxu1 %v5544_v62 }
 0xec5   :  { %6451 = vrsqrt.f32 %v5420_v29  ;;  %vm5428_vm9 = vweird.f32 %v5420_v29 }
 0xec6   :  { %v5401_v0 = vpop.xlane.xlu2 %5400 }
 0xec7   :  { %v10045_v15 = vmul.f32 %v5401_v0, %v7066_v45 }
 0xec9   :  { %v5415_v46 = vmul.f32 %v10045_v15, %v10045_v15  ;;  %v5419_v26 = vsub.f32 %v10035_v30, %v10045_v15  ;;  %v5543_v30 = vld [vmem:[%s10150_s14 + $0x20] sm:$0xff] }
 0xeca   :  { %5570 = vmatpush.msrb.mxu1 %v5543_v30 }
 0xecb   :  { %v6452_v12 = vpop.eup %6451 }
 0xecc   :  { %v5423_v52 = vmul.f32 %v6452_v12, %v5420_v29  ;;  %vm5429_vm8 = vweird.f32 %v6452_v12  ;;  %5571 = vmatpush.msrb.mxu1 %v5542_v55 }
 0xecd   :  { %vm5430_vm10 = vmor %vm5428_vm9, %vm5429_vm8 }
 0xece   :  { %v5424_v11 = vmul.f32 %v6452_v12, %v5423_v52  ;;  %v5411_v20 = vpop.xlane.xlu2 %5410  ;;  %5572 = vmatpush.msrb.mxu1 %v5541_v42 }
 0xecf   :  { %v5413_v24 = vmul.f32 %v5411_v20, %v7066_v45  ;;  %v5477_v45 = vld [vmem:[%s10147_s11 + $0x20] sm:$0xff]  ;;  %s5611_s11 = sshll.u32 %s10152_s16, 4  ;;  %s5612_s11 = int_to_ptr.hbm [resolvable:$true] %s5611_s11 }
 0xed0   :  { %v5425_v19 = vmul.f32 0.5, %v5424_v11  ;;  %5524 = vmatpush.msrb.mxu3 %v5477_v45  ;;  %5573 = vmatpush.msrb.mxu1 %v5540_v23  ;;  %v6307_v45 = vld [vmem:[%s10149_s13] ss:$0 sm:$0xff]  ;;  %s6506_s13 = smov [#allocation2]  }
 0xed1   :  { %v5417_v3 = vsub.f32 %v5413_v24, %v5415_v46 }
 0xed2   :  { %v5426_v61 = vsub.f32 1.5, %v5425_v19  ;;  %5525 = vmatpush.msrb.mxu3 %v5476_v14 }
 0xed3   :  { %v5421_v28 = vadd.f32 1e-05, %v5417_v3  ;;  %v5539_v3 = vld [vmem:[%s10150_s14] sm:$0xff]  ;;  %s5609_s14 = sshll.u32 %s6506_s13, 4  ;;  %s5610_s14 = int_to_ptr.vmem [resolvable:$true] %s5609_s14 }
 0xed4   :  { %v5427_v50 = vmul.f32 %v6452_v12, %v5426_v61  ;;  %5526 = vmatpush.msrb.mxu3 %v5475_v32  ;;  %5574 = vmatpush.msrb.mxu1 %v5539_v3  ;;  %v5504_v61 = vpop.f32.mrf.mxu0 }
 0xed5   :  { %6453 = vrsqrt.f32 %v5421_v28  ;;  %vm5438_vm11 = vweird.f32 %v5421_v28 }
 0xed6   :  { %v5431_v34 = vsel %vm5430_vm10, %v6452_v12, %v5427_v50  ;;  %5527 = vmatpush.msrb.mxu3 %v5474_v21  ;;  %6455 = vrcp.f32 %v6505_v60 }
 0xed7   :  { %v5442_v6 = vmul.f32 %v5431_v34, %v5418_v33  ;;  %v6308_v33 = vld [vmem:[%s10151_s15] ss:$0 sm:$0xff] }
 0xed8   :  { %5528 = vmatpush.msrb.mxu3 %v5473_v40 }
 0xed9   :  { %v5445_v7 = vmul.f32 %v5444_v53, %v5442_v6 }
 0xedb   :  { %v6454_v35 = vpop.eup %6453  ;;  %v5448_v41 = vadd.f32 %v5447_v25, %v5445_v7  ;;  %v5579_v7 = vlaneseq }
 0xedc   :  { %v5433_v5 = vmul.f32 %v6454_v35, %v5421_v28  ;;  %vm5439_vm0 = vweird.f32 %v6454_v35  ;;  %v6456_v4 = vpop.eup %6455 }
 0xedd   :  { %v5450_v48 = vsel %vm123_vm1, %v5448_v41, 0.0  ;;  %vm5440_vm12 = vmor %vm5438_vm11, %vm5439_vm0  ;;  %v5465_v57 = vmul.f32 8.0, %v6456_v4  ;;  %vm5469_vm13 = vweird.f32 %v6456_v4  ;;  %v5580_v41 = vand.u32 127, %v5579_v7 }
 0xede   :  { %v5434_v18 = vmul.f32 %v6454_v35, %v5433_v5  ;;  %v5451_v47 = vrot.slane %v5450_v48, 4 }
 0xedf   :  { %v5466_v44 = vsub.f32 1.0, %v5465_v57  ;;  %vm5581_vm3 = vcmp.eq.s32.totalorder %v5580_v41, 4 }
 0xee0   :  { %v5435_v36 = vmul.f32 0.5, %v5434_v18  ;;  %v5452_v58 = vadd.f32 %v5451_v47, %v5450_v48 }
 0xee1   :  { %v5467_v63 = vmul.f32 %v6456_v4, %v5466_v44 }
 0xee2   :  { %v5436_v51 = vsub.f32 1.5, %v5435_v36  ;;  %v5453_v16 = vrot.slane %v5452_v58, 2 }
 0xee3   :  { %v5468_v12 = vadd.f32 %v6456_v4, %v5467_v63 }
 0xee4   :  { %v5437_v56 = vmul.f32 %v6454_v35, %v5436_v51  ;;  %v5454_v1 = vadd.f32 %v5453_v16, %v5452_v58 }
 0xee5   :  { %v5470_v20 = vsel %vm5469_vm13, %v6456_v4, %v5468_v12 }
 0xee6   :  { %v5441_v59 = vsel %vm5440_vm12, %v6454_v35, %v5437_v56  ;;  %v5455_v29 = vrot.slane %v5454_v1, 1 }
 0xee7   :  { %v5443_v37 = vmul.f32 %v5441_v59, %v5419_v26 }
 0xee8   :  { %v5456_v52 = vadd.f32 %v5455_v29, %v5454_v1 }
 0xee9   :  { %v5446_v10 = vmul.f32 %v5444_v53, %v5443_v37 }
 0xeea   :  { %v5471_v46 = vmul.f32 %v5470_v20, %v5456_v52 }
 0xeeb   :  { %v5449_v8 = vadd.f32 %v5447_v25, %v5446_v10 }
 0xeed   :  { %v5457_v17 = vsel %vm123_vm1, %v5449_v8, 0.0 }
 0xeee   :  { %v5458_v9 = vrot.slane %v5457_v17, 4 }
 0xef0   :  { %v5459_v31 = vadd.f32 %v5458_v9, %v5457_v17 }
 0xef2   :  { %v5460_v0 = vrot.slane %v5459_v31, 2 }
 0xef4   :  { %v5461_v15 = vadd.f32 %v5460_v0, %v5459_v31 }
 0xef6   :  { %v5462_v11 = vrot.slane %v5461_v15, 1 }
 0xef8   :  { %v5463_v2 = vadd.f32 %v5462_v11, %v5461_v15 }
 0xefa   :  { %v5472_v24 = vmul.f32 %v5470_v20, %v5463_v2 }
 0xefc   :  { %v5510_v19 = vsel %vm5509_vm14, %v5472_v24, %v5471_v46 }
 0xefd   :  { %6235 = vmatmul.msk.f32.vlgmr.msrb.gmra.mxu3 %vm123_vm1, %v5510_v19  ;;  %vm5555_vm1 = vcmask 785408  }
 0xf80   :  { %v5530_v54 = vpop.f32.mrf.mxu3 }
 0xf81   :  { %v5531_v28 = vadd.f32 %v5530_v54, %v5504_v61 }
 0xf83   :  { %v5537_v50 = vadd.f32 %v6307_v45, %v5531_v28 }
 0xf85   :  { %v5538_v14 = vmax.f32 %v5537_v50, 0.0 }
 0xf87   :  { %6236 = vmatmul.msk.f32.vlgmr.msrb.gmra.mxu1 %vm5555_vm1, %v5538_v14 }
0x1004   :  { %v5576_v53 = vpop.f32.mrf.mxu1 }
0x1005   :  { %v5577_v34 = vadd.f32 %v6308_v33, %v5576_v53 }
0x1007   :  { %v6237_v32 = vmul.f32 -1.442695, %v5577_v34 }
0x1009   :  { %6457 = vpow2.f32 %v6237_v32 }
0x100f   :  { %v6458_v25 = vpop.eup %6457 }
0x1010   :  { %v5585_v6 = vadd.f32 1.0, %v6458_v25 }
0x1012   :  { %6459 = vrcp.f32 %v5585_v6  ;;  %v5597_v5 = vand.u32 2147483648, %v5585_v6  ;;  %v5595_v43 = vand.u32 2147483647, %v5585_v6  ;;  %vm5591_vm2 = vweird.f32 %v5585_v6 }
0x1014   :  { %v5598_v60 = vor.u32 1.1754944e-38, %v5597_v5  ;;  %vm5596_vm5 = vcmp.eq.f32.partialorder %v5595_v43, 8.507059e+37 }
0x1018   :  { %v6460_v21 = vpop.eup %6459 }
0x1019   :  { %v5587_v40 = vmul.f32 %v6460_v21, %v5585_v6  ;;  %vm5592_vm15 = vweird.f32 %v6460_v21 }
0x101a   :  { %vm5593_vm4 = vmor %vm5591_vm2, %vm5592_vm15 }
0x101b   :  { %v5588_v35 = vsub.f32 1.0, %v5587_v40 }
0x101d   :  { %v5589_v13 = vmul.f32 %v6460_v21, %v5588_v35 }
0x101f   :  { %v5590_v18 = vadd.f32 %v6460_v21, %v5589_v13 }
0x1021   :  { %v5594_v22 = vsel %vm5593_vm4, %v6460_v21, %v5590_v18 }
0x1022   :  { %v5599_v48 = vsel %vm5596_vm5, %v5598_v60, %v5594_v22 }
0x1023   :  { %v5601_v49 = vsel %vm5581_vm3, %v5599_v48, %v5577_v34 }
0x1024   :  { %5603 = vst.msk [vmem:[#allocation2] sm:$0x3] %vm5602_vm6, %v5601_v49 }
0x1025   :  { %5614 = dma.vmem_to_hbm [thread:$0]  %s5610_s14, 32, %s5612_s11, [#allocation3]  }
0x1026   :  { %6487 = dma.done.wait [#allocation3], 32  }
0x1027   :  { %6488 = vsyncadd [#allocation3], 4294967264 }
0x1028   :  { %5619 = vsyncpa [#allocation3], 1 }

</bundles_post_ra>
